<compile_context>
chip_gen: v5e
topology: v5e:2x2
jax: 0.10.0
libtpu: 0.0.40
codegen_flags: <defaults>
</compile_context>

<pallas_src>
import functools

import jax
import jax.numpy as jnp
from jax import lax
from jax.experimental import pallas as pl
from jax.experimental.pallas import tpu as pltpu

LANE = 128


def _round_up(v, m):
    return (v + m - 1) // m * m


def _pick_row_tile(h, max_rows=64):
    # Largest divisor of H not exceeding max_rows (any value works; Wp, not TH,
    # carries the sublane alignment).
    for th in range(min(h, max_rows), 0, -1):
        if h % th == 0:
            return th
    return h


# ---------------------------------------------------------------------------
# Fused residual-block kernel: one (batch n, row-tile t) step per grid point.
# Flat activation layout: (frame_row * Wp + frame_col, Cp), Wp % 8 == 0.
# ---------------------------------------------------------------------------
def _residual_block_kernel(x_hbm, cmask_ref, w1_ref, s1_ref, b1_ref,
                           w2_ref, s2_ref, b2_ref, o_ref,
                           xbuf, xmx, zraw, zmx, sem, *,
                           TH, T, FR, Wp, Cp, CHUNK, mxu_dtype,
                           M_x, M_xs, M_z, M_zs, M_o):
    n = pl.program_id(0)
    t = pl.program_id(1)
    slot = lax.rem(t, 2)

    def dma(tt, sl):
        start = pl.multiple_of((n * FR + tt * TH) * Wp, 8)
        return pltpu.make_async_copy(x_hbm.at[pl.ds(start, M_x)],
                                     xbuf.at[sl], sem.at[sl])

    # Prime the pipeline on the first row tile of this image.
    @pl.when(t == 0)
    def _():
        dma(0, 0).start()

    # Wait for the current tile's slab (started just above if t==0, otherwise
    # prefetched by the previous grid step).
    dma(t, slot).wait()

    # Prefetch the next row tile's slab while we compute on this one.
    @pl.when(t + 1 < T)
    def _():
        dma(t + 1, 1 - slot).start()

    xcur = xbuf.at[slot]

    # One-shot cast (+ kw pre-shift) of the input slab into MXU staging planes:
    # xmx plane kw satisfies xmx[kw*M_xs + u] == xcur[u + kw], so every tap
    # slice below starts at an 8-aligned row offset (kh*Wp, Wp % 8 == 0).
    for kw in range(3):
        xmx[pl.ds(kw * M_xs, M_xs), :] = (
            xcur[pl.ds(kw, M_xs), :].astype(mxu_dtype))

    def conv9(src_ref, src_plane, w_ref, n_rows, epilogue):
        # 3x3 conv as 9 accumulated MXU matmuls, accumulated in vregs per
        # row-chunk; a single fused-epilogue store per chunk.
        s = 0
        while s < n_rows:
            size = min(CHUNK, n_rows - s)
            acc = None
            for kh in range(3):
                for kw in range(3):
                    lhs = src_ref[pl.ds(kw * src_plane + s + kh * Wp, size), :]
                    wt = w_ref[pl.ds((kh * 3 + kw) * Cp, Cp), :]
                    part = jnp.dot(lhs, wt, preferred_element_type=jnp.float32)
                    acc = part if acc is None else acc + part
            epilogue(s, size, acc)
            s += size

    # ---- conv1 (3x3, pad 1, bias=False) + folded BN + ReLU + column mask ----
    def epi1(s, size, acc):
        z = jnp.maximum(acc * s1_ref[...] + b1_ref[...], 0.0)
        zraw[pl.ds(s, size), :] = z * cmask_ref[pl.ds(s, size), :]

    conv9(xmx, M_xs, w1_ref, M_z, epi1)

    # conv2's zero padding at the true image border (top / bottom row tiles).
    @pl.when(t == 0)
    def _():
        zraw[pl.ds(0, Wp), :] = jnp.zeros((Wp, Cp), jnp.float32)

    @pl.when(t == T - 1)
    def _():
        tail = M_z - (TH + 1) * Wp
        zraw[pl.ds((TH + 1) * Wp, tail), :] = jnp.zeros((tail, Cp), jnp.float32)

    # One-shot cast (+ kw pre-shift) of the conv1 activation.
    for kw in range(3):
        zmx[pl.ds(kw * M_zs, M_zs), :] = (
            zraw[pl.ds(kw, M_zs), :].astype(mxu_dtype))

    # ---- conv2 (3x3, pad 1, bias=False) + folded BN + residual add + ReLU ----
    def epi2(s, size, acc):
        resid = xcur[pl.ds(s + 2 * Wp + 2, size), :]     # exact f32 input tile
        y = acc * s2_ref[...] + b2_ref[...] + resid
        o_ref[0, pl.ds(s, size), :] = jnp.maximum(y, 0.0).astype(o_ref.dtype)

    conv9(zmx, M_zs, w2_ref, M_o, epi2)


# ---------------------------------------------------------------------------
# Wrapper: NCHW in / NCHW out (PyTorch convention).
# ---------------------------------------------------------------------------
def residual_block_forward(x_nchw, params, *, row_tile=None,
                           mxu_dtype=jnp.bfloat16, chunk_rows=None,
                           vmem_limit_bytes=None):
    N, C, H, W = x_nchw.shape
    Cp = _round_up(C, LANE)                 # lane-dense channels / full MXU N
    Wp = _round_up(W + 4, 8)                # frame row stride, sublane aligned

    TH = _pick_row_tile(H) if row_tile is None else min(row_tile, H)
    assert H % TH == 0, "row_tile must divide H"
    T = H // TH

    M_o = TH * Wp                           # conv2 output rows per tile
    M_zs = M_o + 2 * Wp                     # conv1-activation staging plane rows
    M_z = M_zs + 8                          # conv1 activation rows (f32)
    M_xs = M_z + 2 * Wp                     # input staging plane rows
    M_x = M_xs + 8                          # DMA'd input rows (incl. both halos)
    FR = H + 4 + -(-16 // Wp)               # frame rows per image (2 top pad incl.)

    if chunk_rows is None:                  # keep the per-chunk accumulator in vregs
        chunk_rows = max(8, min(256, (16384 // Cp) // 8 * 8))
    CHUNK = chunk_rows

    # NCHW -> NHWC, spatial pad into the Wp-wide frame, channel pad to Cp, then
    # flatten to the (frame_row*Wp + frame_col, Cp) slab the kernel slices.
    x_nhwc = jnp.transpose(x_nchw, (0, 2, 3, 1)).astype(jnp.float32)
    xp = jnp.pad(x_nhwc, ((0, 0), (2, FR - H - 2), (2, Wp - W - 2), (0, Cp - C)))
    x_flat = xp.reshape(N * FR * Wp, Cp)

    # conv2's zero padding in the column direction (grid-step invariant).
    j = jnp.arange(M_z, dtype=jnp.int32) % Wp
    cmask = ((j >= 1) & (j <= W)).astype(jnp.float32).reshape(M_z, 1)

    def prep_w(w):                          # (3,3,C,C) HWIO -> (9*Cp, Cp)
        wp = jnp.pad(w, ((0, 0), (0, 0), (0, Cp - C), (0, Cp - C)))
        return wp.reshape(9 * Cp, Cp).astype(mxu_dtype)

    def prep_v(v):                          # (C,) -> (1, Cp)
        return jnp.pad(v, (0, Cp - C)).reshape(1, Cp).astype(jnp.float32)

    w1 = prep_w(params["w1"])
    w2 = prep_w(params["w2"])
    s1 = prep_v(params["s1"])
    b1 = prep_v(params["b1"])
    s2 = prep_v(params["s2"])
    b2 = prep_v(params["b2"])

    # Generation-aware VMEM budget: size the limit from the actual buffers.
    mxu_b = jnp.finfo(mxu_dtype).bits // 8
    out_b = jnp.finfo(x_nchw.dtype).bits // 8
    need = (2 * M_x * Cp * 4                 # DMA double buffer (f32)
            + 3 * M_xs * Cp * mxu_b          # input staging planes
            + M_z * Cp * 4                   # conv1 activation (f32)
            + 3 * M_zs * Cp * mxu_b          # activation staging planes
            + 2 * 2 * 9 * Cp * Cp * mxu_b    # w1/w2 (Pallas double-buffers them)
            + 2 * M_o * Cp * out_b           # output block double buffer
            + 2 * (M_z * 4 + 4 * Cp * 4))    # mask + scale/bias vectors
    if vmem_limit_bytes is None:
        try:
            cap = int(pltpu.get_tpu_info().vmem_capacity_bytes)
        except Exception:
            cap = 64 * 1024 * 1024           # v7x-safe fallback
        vmem_limit_bytes = min(int(cap * 0.9),
                               max(32 * 1024 * 1024, need + (8 << 20)))

    kernel = functools.partial(
        _residual_block_kernel, TH=TH, T=T, FR=FR, Wp=Wp, Cp=Cp, CHUNK=CHUNK,
        mxu_dtype=mxu_dtype, M_x=M_x, M_xs=M_xs, M_z=M_z, M_zs=M_zs, M_o=M_o)

    def cspec(shape):
        return pl.BlockSpec(shape, lambda n, t: (0,) * len(shape))

    out_flat = pl.pallas_call(
        kernel,
        out_shape=jax.ShapeDtypeStruct((N, T * M_o, Cp), x_nchw.dtype),
        grid=(N, T),
        in_specs=[
            pl.BlockSpec(memory_space=pl.ANY),        # padded frame stays in HBM
            cspec((M_z, 1)),                          # conv2 padding column mask
            cspec((9 * Cp, Cp)),                      # w1 (resident)
            cspec((1, Cp)),                           # s1
            cspec((1, Cp)),                           # b1
            cspec((9 * Cp, Cp)),                      # w2 (resident)
            cspec((1, Cp)),                           # s2
            cspec((1, Cp)),                           # b2
        ],
        out_specs=pl.BlockSpec((1, M_o, Cp), lambda n, t: (n, t, 0)),
        scratch_shapes=[
            pltpu.VMEM((2, M_x, Cp), jnp.float32),    # halo DMA double buffer
            pltpu.VMEM((3 * M_xs, Cp), mxu_dtype),    # input: cast + kw-preshifted
            pltpu.VMEM((M_z, Cp), jnp.float32),       # conv1 activation (masked)
            pltpu.VMEM((3 * M_zs, Cp), mxu_dtype),    # activation: cast + preshifted
            pltpu.SemaphoreType.DMA((2,)),
        ],
        compiler_params=pltpu.CompilerParams(
            dimension_semantics=("parallel", "arbitrary"),
            vmem_limit_bytes=int(vmem_limit_bytes)),
    )(x_flat, cmask, w1, s1, b1, w2, s2, b2)

    out = out_flat.reshape(N, H, Wp, Cp)[:, :, :W, :C]
    return jnp.transpose(out, (0, 3, 1, 2))


# ---------------------------------------------------------------------------
# Deterministic parameter init (Conv2d bias=False + folded inference-mode BN).
# ---------------------------------------------------------------------------
def init_params(key, channels, eps=1e-5):
    def branch(k):
        k1, k2, k3, k4, k5 = jax.random.split(k, 5)
        bound = 1.0 / jnp.sqrt(channels * 9.0)
        w = jax.random.uniform(k1, (3, 3, channels, channels), jnp.float32,
                               -bound, bound)                       # HWIO
        gamma = 1.0 + 0.1 * jax.random.normal(k2, (channels,), jnp.float32)
        beta = 0.1 * jax.random.normal(k3, (channels,), jnp.float32)
        mean = 0.1 * jax.random.normal(k4, (channels,), jnp.float32)
        var = 1.0 + 0.1 * jnp.abs(jax.random.normal(k5, (channels,), jnp.float32))
        s = gamma / jnp.sqrt(var + eps)
        b = beta - mean * s
        return w, s, b

    ka, kb = jax.random.split(key)
    w1, s1, b1 = branch(ka)
    w2, s2, b2 = branch(kb)
    return {"w1": w1, "s1": s1, "b1": b1, "w2": w2, "s2": s2, "b2": b2}


# ---------------------------------------------------------------------------
# Pure-JAX reference (same folded-BN semantics) for the in-script check.
# ---------------------------------------------------------------------------
def _ref_forward(x_nchw, params, mxu_dtype=jnp.float32):
    x = jnp.transpose(x_nchw, (0, 2, 3, 1)).astype(jnp.float32)

    def conv(h, w):
        return lax.conv_general_dilated(
            h.astype(mxu_dtype), w.astype(mxu_dtype), (1, 1), "SAME",
            dimension_numbers=("NHWC", "HWIO", "NHWC"),
            preferred_element_type=jnp.float32,
            precision=lax.Precision.HIGHEST)

    z = jnp.maximum(conv(x, params["w1"]) * params["s1"] + params["b1"], 0.0)
    y = conv(z, params["w2"]) * params["s2"] + params["b2"] + x
    out = jnp.maximum(y, 0.0)
    return jnp.transpose(out, (0, 3, 1, 2))


if __name__ == "__main__":
    key = jax.random.PRNGKey(0)
    kx, kp = jax.random.split(key)
    N, C, H, W = 2, 4, 16, 16          # in_channels == n_filters (residual add)

    x = jax.random.normal(kx, (N, C, H, W), jnp.float32)
    params = init_params(kp, C)
    ref32 = _ref_forward(x, params, jnp.float32)

    # f32 MXU operands (accuracy mode), single row tile.
    out = residual_block_forward(x, params, mxu_dtype=jnp.float32)
    jax.block_until_ready(out)
    assert out.shape == (N, C, H, W), out.shape
    assert jnp.allclose(out, ref32, rtol=2e-3, atol=2e-3), \
        float(jnp.max(jnp.abs(out - ref32)))

    # f32, multi-row-tile path: exercises the halo recompute + double-buffered
    # cross-step DMA prefetch.
    out_t = residual_block_forward(x, params, row_tile=8, mxu_dtype=jnp.float32)
    jax.block_until_ready(out_t)
    assert jnp.allclose(out_t, ref32, rtol=2e-3, atol=2e-3), \
        float(jnp.max(jnp.abs(out_t - ref32)))

    # bf16 MXU operands (default fast path on v5e/v6e/v7x), f32 accumulation,
    # checked against a bf16-operand reference.
    out_bf16 = residual_block_forward(x, params)
    jax.block_until_ready(out_bf16)
    ref_bf16 = _ref_forward(x, params, jnp.bfloat16)
    assert jnp.allclose(out_bf16, ref_bf16, rtol=2e-2, atol=2e-2), \
        float(jnp.max(jnp.abs(out_bf16 - ref_bf16)))

    print("KERNEL_OK")
</pallas_src>

<mosaic_0001>
module attributes {stable_mosaic.version = 11 : i64} {
  func.func @_residual_block_kernel(%arg0: i32, %arg1: i32, %arg2: memref<1008x128xf32, #tpu.memory_space<any>>, %arg3: memref<440x1xf32, #tpu.memory_space<vmem>>, %arg4: memref<1152x128xf32, #tpu.memory_space<vmem>>, %arg5: memref<1x128xf32, #tpu.memory_space<vmem>>, %arg6: memref<1x128xf32, #tpu.memory_space<vmem>>, %arg7: memref<1152x128xf32, #tpu.memory_space<vmem>>, %arg8: memref<1x128xf32, #tpu.memory_space<vmem>>, %arg9: memref<1x128xf32, #tpu.memory_space<vmem>>, %arg10: memref<1x384x128xf32, #tpu.memory_space<vmem>>, %arg11: memref<2x496x128xf32, #tpu.memory_space<vmem>>, %arg12: memref<1464x128xf32, #tpu.memory_space<vmem>>, %arg13: memref<440x128xf32, #tpu.memory_space<vmem>>, %arg14: memref<1296x128xf32, #tpu.memory_space<vmem>>, %arg15: memref<2x!tpu.dma_semaphore, #tpu.memory_space<semaphore_mem>>) attributes {dimension_semantics = [#tpu.dimension_semantics<parallel>, #tpu.dimension_semantics<arbitrary>], iteration_bounds = array<i64: 2, 1>, scalar_prefetch = 0 : i64, scratch_operands = 5 : i64, tpu.core_type = #tpu.core_type<tc>, window_params = [{}, {pipeline_mode = #tpu.pipeline_mode<synchronous>, transform_indices = @transform_1, window_bounds = array<i64: 440, 1>}, {pipeline_mode = #tpu.pipeline_mode<synchronous>, transform_indices = @transform_2, window_bounds = array<i64: 1152, 128>}, {pipeline_mode = #tpu.pipeline_mode<synchronous>, transform_indices = @transform_3, window_bounds = array<i64: 1, 128>}, {pipeline_mode = #tpu.pipeline_mode<synchronous>, transform_indices = @transform_4, window_bounds = array<i64: 1, 128>}, {pipeline_mode = #tpu.pipeline_mode<synchronous>, transform_indices = @transform_5, window_bounds = array<i64: 1152, 128>}, {pipeline_mode = #tpu.pipeline_mode<synchronous>, transform_indices = @transform_6, window_bounds = array<i64: 1, 128>}, {pipeline_mode = #tpu.pipeline_mode<synchronous>, transform_indices = @transform_7, window_bounds = array<i64: 1, 128>}, {transform_indices = @transform_8, window_bounds = array<i64: 1, 384, 128>}]} {
    %c2_i32 = arith.constant 2 : i32
    %0 = arith.remsi %arg1, %c2_i32 : i32
    %c0_i32 = arith.constant 0 : i32
    %1 = arith.cmpi eq, %arg1, %c0_i32 : i32
    %2 = arith.extui %1 : i1 to i32
    %c0_i32_0 = arith.constant 0 : i32
    %3 = arith.cmpi ne, %2, %c0_i32_0 : i32
    scf.if %3 {
      %c21_i32_368 = arith.constant 21 : i32
      %380 = arith.muli %arg0, %c21_i32_368 : i32
      %c0_i32_369 = arith.constant 0 : i32
      %381 = arith.addi %380, %c0_i32_369 : i32
      %c24_i32_370 = arith.constant 24 : i32
      %382 = arith.muli %381, %c24_i32_370 : i32
      %383 = tpu.assume_multiple %382, 8 : i32
      %c0_i32_371 = arith.constant 0 : i32
      %c0_i32_372 = arith.constant 0 : i32
      %c0_i32_373 = arith.constant 0 : i32
      %384 = tpu.memref_slice %arg2[%383, %c0_i32_373] : memref<1008x128xf32, #tpu.memory_space<any>> -> memref<496x128xf32, #tpu.memory_space<any>>
      %c0_i32_374 = arith.constant 0 : i32
      %c0_i32_375 = arith.constant 0 : i32
      %385 = tpu.memref_slice %arg11[%c0_i32_371, %c0_i32_374, %c0_i32_375] : memref<2x496x128xf32, #tpu.memory_space<vmem>> -> memref<1x496x128xf32, #tpu.memory_space<vmem>>
      %386 = tpu.memref_squeeze %385 : memref<1x496x128xf32, #tpu.memory_space<vmem>> -> memref<496x128xf32, #tpu.memory_space<vmem>>
      %387 = tpu.memref_slice %arg15[%c0_i32_372] : memref<2x!tpu.dma_semaphore, #tpu.memory_space<semaphore_mem>> -> memref<1x!tpu.dma_semaphore, #tpu.memory_space<semaphore_mem>>
      %388 = tpu.memref_squeeze %387 : memref<1x!tpu.dma_semaphore, #tpu.memory_space<semaphore_mem>> -> memref<!tpu.dma_semaphore, #tpu.memory_space<semaphore_mem>>
      tpu.enqueue_dma source(%384 : memref<496x128xf32, #tpu.memory_space<any>>) target(%386 : memref<496x128xf32, #tpu.memory_space<vmem>>) target_semaphore(%388 : memref<!tpu.dma_semaphore, #tpu.memory_space<semaphore_mem>>)
    } else {
    }
    %c21_i32 = arith.constant 21 : i32
    %4 = arith.muli %arg0, %c21_i32 : i32
    %c16_i32 = arith.constant 16 : i32
    %5 = arith.muli %arg1, %c16_i32 : i32
    %6 = arith.addi %4, %5 : i32
    %c24_i32 = arith.constant 24 : i32
    %7 = arith.muli %6, %c24_i32 : i32
    %8 = tpu.assume_multiple %7, 8 : i32
    %c0_i32_1 = arith.constant 0 : i32
    %9 = tpu.memref_slice %arg2[%8, %c0_i32_1] : memref<1008x128xf32, #tpu.memory_space<any>> -> memref<496x128xf32, #tpu.memory_space<any>>
    %c0_i32_2 = arith.constant 0 : i32
    %c0_i32_3 = arith.constant 0 : i32
    %10 = tpu.memref_slice %arg11[%0, %c0_i32_2, %c0_i32_3] : memref<2x496x128xf32, #tpu.memory_space<vmem>> -> memref<1x496x128xf32, #tpu.memory_space<vmem>>
    %11 = tpu.memref_squeeze %10 : memref<1x496x128xf32, #tpu.memory_space<vmem>> -> memref<496x128xf32, #tpu.memory_space<vmem>>
    %12 = tpu.memref_slice %arg15[%0] : memref<2x!tpu.dma_semaphore, #tpu.memory_space<semaphore_mem>> -> memref<1x!tpu.dma_semaphore, #tpu.memory_space<semaphore_mem>>
    %13 = tpu.memref_squeeze %12 : memref<1x!tpu.dma_semaphore, #tpu.memory_space<semaphore_mem>> -> memref<!tpu.dma_semaphore, #tpu.memory_space<semaphore_mem>>
    tpu.wait_dma2 semaphore(%13 : memref<!tpu.dma_semaphore, #tpu.memory_space<semaphore_mem>>) src(%9 : memref<496x128xf32, #tpu.memory_space<any>>) dst(%11 : memref<496x128xf32, #tpu.memory_space<vmem>>)
    %c1_i32 = arith.constant 1 : i32
    %14 = arith.addi %arg1, %c1_i32 : i32
    %c1_i32_4 = arith.constant 1 : i32
    %15 = arith.cmpi slt, %14, %c1_i32_4 : i32
    %16 = arith.extui %15 : i1 to i32
    %c0_i32_5 = arith.constant 0 : i32
    %17 = arith.cmpi ne, %16, %c0_i32_5 : i32
    scf.if %17 {
      %c1_i32_368 = arith.constant 1 : i32
      %380 = arith.addi %arg1, %c1_i32_368 : i32
      %c1_i32_369 = arith.constant 1 : i32
      %381 = arith.subi %c1_i32_369, %0 : i32
      %c21_i32_370 = arith.constant 21 : i32
      %382 = arith.muli %arg0, %c21_i32_370 : i32
      %c16_i32_371 = arith.constant 16 : i32
      %383 = arith.muli %380, %c16_i32_371 : i32
      %384 = arith.addi %382, %383 : i32
      %c24_i32_372 = arith.constant 24 : i32
      %385 = arith.muli %384, %c24_i32_372 : i32
      %386 = tpu.assume_multiple %385, 8 : i32
      %c0_i32_373 = arith.constant 0 : i32
      %387 = tpu.memref_slice %arg2[%386, %c0_i32_373] : memref<1008x128xf32, #tpu.memory_space<any>> -> memref<496x128xf32, #tpu.memory_space<any>>
      %c0_i32_374 = arith.constant 0 : i32
      %c0_i32_375 = arith.constant 0 : i32
      %388 = tpu.memref_slice %arg11[%381, %c0_i32_374, %c0_i32_375] : memref<2x496x128xf32, #tpu.memory_space<vmem>> -> memref<1x496x128xf32, #tpu.memory_space<vmem>>
      %389 = tpu.memref_squeeze %388 : memref<1x496x128xf32, #tpu.memory_space<vmem>> -> memref<496x128xf32, #tpu.memory_space<vmem>>
      %390 = tpu.memref_slice %arg15[%381] : memref<2x!tpu.dma_semaphore, #tpu.memory_space<semaphore_mem>> -> memref<1x!tpu.dma_semaphore, #tpu.memory_space<semaphore_mem>>
      %391 = tpu.memref_squeeze %390 : memref<1x!tpu.dma_semaphore, #tpu.memory_space<semaphore_mem>> -> memref<!tpu.dma_semaphore, #tpu.memory_space<semaphore_mem>>
      tpu.enqueue_dma source(%387 : memref<496x128xf32, #tpu.memory_space<any>>) target(%389 : memref<496x128xf32, #tpu.memory_space<vmem>>) target_semaphore(%391 : memref<!tpu.dma_semaphore, #tpu.memory_space<semaphore_mem>>)
    } else {
    }
    %c0_i32_6 = arith.constant 0 : i32
    %c0_i32_7 = arith.constant 0 : i32
    %18 = tpu.memref_slice %arg11[%0, %c0_i32_6, %c0_i32_7] : memref<2x496x128xf32, #tpu.memory_space<vmem>> -> memref<1x496x128xf32, #tpu.memory_space<vmem>>
    %19 = tpu.memref_squeeze %18 : memref<1x496x128xf32, #tpu.memory_space<vmem>> -> memref<496x128xf32, #tpu.memory_space<vmem>>
    %c0 = arith.constant 0 : index
    %c0_8 = arith.constant 0 : index
    %20 = vector.load %19[%c0, %c0_8] : memref<496x128xf32, #tpu.memory_space<vmem>>, vector<488x128xf32>
    %c0_9 = arith.constant 0 : index
    %c0_10 = arith.constant 0 : index
    %21 = vector.load %arg12[%c0_9, %c0_10] : memref<1464x128xf32, #tpu.memory_space<vmem>>, vector<488x128xf32>
    tpu.vector_store %arg12[%c0_9, %c0_10], %20 {strides = array<i32>} : memref<1464x128xf32, #tpu.memory_space<vmem>>, vector<488x128xf32>,
    %c0_i32_11 = arith.constant 0 : i32
    %c0_i32_12 = arith.constant 0 : i32
    %22 = tpu.memref_slice %arg11[%0, %c0_i32_11, %c0_i32_12] : memref<2x496x128xf32, #tpu.memory_space<vmem>> -> memref<1x496x128xf32, #tpu.memory_space<vmem>>
    %23 = tpu.memref_squeeze %22 : memref<1x496x128xf32, #tpu.memory_space<vmem>> -> memref<496x128xf32, #tpu.memory_space<vmem>>
    %c1 = arith.constant 1 : index
    %c0_13 = arith.constant 0 : index
    %24 = vector.load %23[%c1, %c0_13] : memref<496x128xf32, #tpu.memory_space<vmem>>, vector<488x128xf32>
    %c488 = arith.constant 488 : index
    %c0_14 = arith.constant 0 : index
    %25 = vector.load %arg12[%c488, %c0_14] : memref<1464x128xf32, #tpu.memory_space<vmem>>, vector<488x128xf32>
    tpu.vector_store %arg12[%c488, %c0_14], %24 {strides = array<i32>} : memref<1464x128xf32, #tpu.memory_space<vmem>>, vector<488x128xf32>,
    %c0_i32_15 = arith.constant 0 : i32
    %c0_i32_16 = arith.constant 0 : i32
    %26 = tpu.memref_slice %arg11[%0, %c0_i32_15, %c0_i32_16] : memref<2x496x128xf32, #tpu.memory_space<vmem>> -> memref<1x496x128xf32, #tpu.memory_space<vmem>>
    %27 = tpu.memref_squeeze %26 : memref<1x496x128xf32, #tpu.memory_space<vmem>> -> memref<496x128xf32, #tpu.memory_space<vmem>>
    %c2 = arith.constant 2 : index
    %c0_17 = arith.constant 0 : index
    %28 = vector.load %27[%c2, %c0_17] : memref<496x128xf32, #tpu.memory_space<vmem>>, vector<488x128xf32>
    %c976 = arith.constant 976 : index
    %c0_18 = arith.constant 0 : index
    %29 = vector.load %arg12[%c976, %c0_18] : memref<1464x128xf32, #tpu.memory_space<vmem>>, vector<488x128xf32>
    tpu.vector_store %arg12[%c976, %c0_18], %28 {strides = array<i32>} : memref<1464x128xf32, #tpu.memory_space<vmem>>, vector<488x128xf32>,
    %c0_19 = arith.constant 0 : index
    %c0_20 = arith.constant 0 : index
    %30 = vector.load %arg12[%c0_19, %c0_20] : memref<1464x128xf32, #tpu.memory_space<vmem>>, vector<128x128xf32>
    %c0_21 = arith.constant 0 : index
    %c0_22 = arith.constant 0 : index
    %31 = vector.load %arg4[%c0_21, %c0_22] : memref<1152x128xf32, #tpu.memory_space<vmem>>, vector<128x128xf32>
    %cst = arith.constant dense<0.000000e+00> : vector<128x128xf32>
    %32 = tpu.matmul %30, %31, %cst {dimension_numbers = #tpu.dot_dimension_numbers<[1], [0], [0], [1], [0, 0, 1, 1], [], []>} : vector<128x128xf32>, vector<128x128xf32>, vector<128x128xf32> -> vector<128x128xf32>
    %c488_23 = arith.constant 488 : index
    %c0_24 = arith.constant 0 : index
    %33 = vector.load %arg12[%c488_23, %c0_24] : memref<1464x128xf32, #tpu.memory_space<vmem>>, vector<128x128xf32>
    %c128 = arith.constant 128 : index
    %c0_25 = arith.constant 0 : index
    %34 = vector.load %arg4[%c128, %c0_25] : memref<1152x128xf32, #tpu.memory_space<vmem>>, vector<128x128xf32>
    %cst_26 = arith.constant dense<0.000000e+00> : vector<128x128xf32>
    %35 = tpu.matmul %33, %34, %cst_26 {dimension_numbers = #tpu.dot_dimension_numbers<[1], [0], [0], [1], [0, 0, 1, 1], [], []>} : vector<128x128xf32>, vector<128x128xf32>, vector<128x128xf32> -> vector<128x128xf32>
    %36 = arith.addf %32, %35 : vector<128x128xf32>
    %c976_27 = arith.constant 976 : index
    %c0_28 = arith.constant 0 : index
    %37 = vector.load %arg12[%c976_27, %c0_28] : memref<1464x128xf32, #tpu.memory_space<vmem>>, vector<128x128xf32>
    %c256 = arith.constant 256 : index
    %c0_29 = arith.constant 0 : index
    %38 = vector.load %arg4[%c256, %c0_29] : memref<1152x128xf32, #tpu.memory_space<vmem>>, vector<128x128xf32>
    %cst_30 = arith.constant dense<0.000000e+00> : vector<128x128xf32>
    %39 = tpu.matmul %37, %38, %cst_30 {dimension_numbers = #tpu.dot_dimension_numbers<[1], [0], [0], [1], [0, 0, 1, 1], [], []>} : vector<128x128xf32>, vector<128x128xf32>, vector<128x128xf32> -> vector<128x128xf32>
    %40 = arith.addf %36, %39 : vector<128x128xf32>
    %c24 = arith.constant 24 : index
    %c0_31 = arith.constant 0 : index
    %41 = vector.load %arg12[%c24, %c0_31] : memref<1464x128xf32, #tpu.memory_space<vmem>>, vector<128x128xf32>
    %c384 = arith.constant 384 : index
    %c0_32 = arith.constant 0 : index
    %42 = vector.load %arg4[%c384, %c0_32] : memref<1152x128xf32, #tpu.memory_space<vmem>>, vector<128x128xf32>
    %cst_33 = arith.constant dense<0.000000e+00> : vector<128x128xf32>
    %43 = tpu.matmul %41, %42, %cst_33 {dimension_numbers = #tpu.dot_dimension_numbers<[1], [0], [0], [1], [0, 0, 1, 1], [], []>} : vector<128x128xf32>, vector<128x128xf32>, vector<128x128xf32> -> vector<128x128xf32>
    %44 = arith.addf %40, %43 : vector<128x128xf32>
    %c512 = arith.constant 512 : index
    %c0_34 = arith.constant 0 : index
    %45 = vector.load %arg12[%c512, %c0_34] : memref<1464x128xf32, #tpu.memory_space<vmem>>, vector<128x128xf32>
    %c512_35 = arith.constant 512 : index
    %c0_36 = arith.constant 0 : index
    %46 = vector.load %arg4[%c512_35, %c0_36] : memref<1152x128xf32, #tpu.memory_space<vmem>>, vector<128x128xf32>
    %cst_37 = arith.constant dense<0.000000e+00> : vector<128x128xf32>
    %47 = tpu.matmul %45, %46, %cst_37 {dimension_numbers = #tpu.dot_dimension_numbers<[1], [0], [0], [1], [0, 0, 1, 1], [], []>} : vector<128x128xf32>, vector<128x128xf32>, vector<128x128xf32> -> vector<128x128xf32>
    %48 = arith.addf %44, %47 : vector<128x128xf32>
    %c1000 = arith.constant 1000 : index
    %c0_38 = arith.constant 0 : index
    %49 = vector.load %arg12[%c1000, %c0_38] : memref<1464x128xf32, #tpu.memory_space<vmem>>, vector<128x128xf32>
    %c640 = arith.constant 640 : index
    %c0_39 = arith.constant 0 : index
    %50 = vector.load %arg4[%c640, %c0_39] : memref<1152x128xf32, #tpu.memory_space<vmem>>, vector<128x128xf32>
    %cst_40 = arith.constant dense<0.000000e+00> : vector<128x128xf32>
    %51 = tpu.matmul %49, %50, %cst_40 {dimension_numbers = #tpu.dot_dimension_numbers<[1], [0], [0], [1], [0, 0, 1, 1], [], []>} : vector<128x128xf32>, vector<128x128xf32>, vector<128x128xf32> -> vector<128x128xf32>
    %52 = arith.addf %48, %51 : vector<128x128xf32>
    %c48 = arith.constant 48 : index
    %c0_41 = arith.constant 0 : index
    %53 = vector.load %arg12[%c48, %c0_41] : memref<1464x128xf32, #tpu.memory_space<vmem>>, vector<128x128xf32>
    %c768 = arith.constant 768 : index
    %c0_42 = arith.constant 0 : index
    %54 = vector.load %arg4[%c768, %c0_42] : memref<1152x128xf32, #tpu.memory_space<vmem>>, vector<128x128xf32>
    %cst_43 = arith.constant dense<0.000000e+00> : vector<128x128xf32>
    %55 = tpu.matmul %53, %54, %cst_43 {dimension_numbers = #tpu.dot_dimension_numbers<[1], [0], [0], [1], [0, 0, 1, 1], [], []>} : vector<128x128xf32>, vector<128x128xf32>, vector<128x128xf32> -> vector<128x128xf32>
    %56 = arith.addf %52, %55 : vector<128x128xf32>
    %c536 = arith.constant 536 : index
    %c0_44 = arith.constant 0 : index
    %57 = vector.load %arg12[%c536, %c0_44] : memref<1464x128xf32, #tpu.memory_space<vmem>>, vector<128x128xf32>
    %c896 = arith.constant 896 : index
    %c0_45 = arith.constant 0 : index
    %58 = vector.load %arg4[%c896, %c0_45] : memref<1152x128xf32, #tpu.memory_space<vmem>>, vector<128x128xf32>
    %cst_46 = arith.constant dense<0.000000e+00> : vector<128x128xf32>
    %59 = tpu.matmul %57, %58, %cst_46 {dimension_numbers = #tpu.dot_dimension_numbers<[1], [0], [0], [1], [0, 0, 1, 1], [], []>} : vector<128x128xf32>, vector<128x128xf32>, vector<128x128xf32> -> vector<128x128xf32>
    %60 = arith.addf %56, %59 : vector<128x128xf32>
    %c1024 = arith.constant 1024 : index
    %c0_47 = arith.constant 0 : index
    %61 = vector.load %arg12[%c1024, %c0_47] : memref<1464x128xf32, #tpu.memory_space<vmem>>, vector<128x128xf32>
    %c1024_48 = arith.constant 1024 : index
    %c0_49 = arith.constant 0 : index
    %62 = vector.load %arg4[%c1024_48, %c0_49] : memref<1152x128xf32, #tpu.memory_space<vmem>>, vector<128x128xf32>
    %cst_50 = arith.constant dense<0.000000e+00> : vector<128x128xf32>
    %63 = tpu.matmul %61, %62, %cst_50 {dimension_numbers = #tpu.dot_dimension_numbers<[1], [0], [0], [1], [0, 0, 1, 1], [], []>} : vector<128x128xf32>, vector<128x128xf32>, vector<128x128xf32> -> vector<128x128xf32>
    %64 = arith.addf %60, %63 : vector<128x128xf32>
    %c0_51 = arith.constant 0 : index
    %c0_52 = arith.constant 0 : index
    %65 = vector.load %arg5[%c0_51, %c0_52] : memref<1x128xf32, #tpu.memory_space<vmem>>, vector<1x128xf32>
    %66 = vector.broadcast %65 : vector<1x128xf32> to vector<128x128xf32>
    %67 = arith.mulf %64, %66 : vector<128x128xf32>
    %c0_53 = arith.constant 0 : index
    %c0_54 = arith.constant 0 : index
    %68 = vector.load %arg6[%c0_53, %c0_54] : memref<1x128xf32, #tpu.memory_space<vmem>>, vector<1x128xf32>
    %69 = vector.broadcast %68 : vector<1x128xf32> to vector<128x128xf32>
    %70 = arith.addf %67, %69 : vector<128x128xf32>
    %cst_55 = arith.constant 0.000000e+00 : f32
    %71 = vector.broadcast %cst_55 : f32 to vector<128x128xf32>
    %72 = arith.maximumf %70, %71 : vector<128x128xf32>
    %c0_56 = arith.constant 0 : index
    %c0_57 = arith.constant 0 : index
    %73 = vector.load %arg3[%c0_56, %c0_57] : memref<440x1xf32, #tpu.memory_space<vmem>>, vector<128x1xf32>
    %74 = vector.broadcast %73 : vector<128x1xf32> to vector<128x128xf32>
    %75 = arith.mulf %72, %74 : vector<128x128xf32>
    %c0_58 = arith.constant 0 : index
    %c0_59 = arith.constant 0 : index
    %76 = vector.load %arg13[%c0_58, %c0_59] : memref<440x128xf32, #tpu.memory_space<vmem>>, vector<128x128xf32>
    tpu.vector_store %arg13[%c0_58, %c0_59], %75 {strides = array<i32>} : memref<440x128xf32, #tpu.memory_space<vmem>>, vector<128x128xf32>,
    %c128_60 = arith.constant 128 : index
    %c0_61 = arith.constant 0 : index
    %77 = vector.load %arg12[%c128_60, %c0_61] : memref<1464x128xf32, #tpu.memory_space<vmem>>, vector<128x128xf32>
    %c0_62 = arith.constant 0 : index
    %c0_63 = arith.constant 0 : index
    %78 = vector.load %arg4[%c0_62, %c0_63] : memref<1152x128xf32, #tpu.memory_space<vmem>>, vector<128x128xf32>
    %cst_64 = arith.constant dense<0.000000e+00> : vector<128x128xf32>
    %79 = tpu.matmul %77, %78, %cst_64 {dimension_numbers = #tpu.dot_dimension_numbers<[1], [0], [0], [1], [0, 0, 1, 1], [], []>} : vector<128x128xf32>, vector<128x128xf32>, vector<128x128xf32> -> vector<128x128xf32>
    %c616 = arith.constant 616 : index
    %c0_65 = arith.constant 0 : index
    %80 = vector.load %arg12[%c616, %c0_65] : memref<1464x128xf32, #tpu.memory_space<vmem>>, vector<128x128xf32>
    %c128_66 = arith.constant 128 : index
    %c0_67 = arith.constant 0 : index
    %81 = vector.load %arg4[%c128_66, %c0_67] : memref<1152x128xf32, #tpu.memory_space<vmem>>, vector<128x128xf32>
    %cst_68 = arith.constant dense<0.000000e+00> : vector<128x128xf32>
    %82 = tpu.matmul %80, %81, %cst_68 {dimension_numbers = #tpu.dot_dimension_numbers<[1], [0], [0], [1], [0, 0, 1, 1], [], []>} : vector<128x128xf32>, vector<128x128xf32>, vector<128x128xf32> -> vector<128x128xf32>
    %83 = arith.addf %79, %82 : vector<128x128xf32>
    %c1104 = arith.constant 1104 : index
    %c0_69 = arith.constant 0 : index
    %84 = vector.load %arg12[%c1104, %c0_69] : memref<1464x128xf32, #tpu.memory_space<vmem>>, vector<128x128xf32>
    %c256_70 = arith.constant 256 : index
    %c0_71 = arith.constant 0 : index
    %85 = vector.load %arg4[%c256_70, %c0_71] : memref<1152x128xf32, #tpu.memory_space<vmem>>, vector<128x128xf32>
    %cst_72 = arith.constant dense<0.000000e+00> : vector<128x128xf32>
    %86 = tpu.matmul %84, %85, %cst_72 {dimension_numbers = #tpu.dot_dimension_numbers<[1], [0], [0], [1], [0, 0, 1, 1], [], []>} : vector<128x128xf32>, vector<128x128xf32>, vector<128x128xf32> -> vector<128x128xf32>
    %87 = arith.addf %83, %86 : vector<128x128xf32>
    %c152 = arith.constant 152 : index
    %c0_73 = arith.constant 0 : index
    %88 = vector.load %arg12[%c152, %c0_73] : memref<1464x128xf32, #tpu.memory_space<vmem>>, vector<128x128xf32>
    %c384_74 = arith.constant 384 : index
    %c0_75 = arith.constant 0 : index
    %89 = vector.load %arg4[%c384_74, %c0_75] : memref<1152x128xf32, #tpu.memory_space<vmem>>, vector<128x128xf32>
    %cst_76 = arith.constant dense<0.000000e+00> : vector<128x128xf32>
    %90 = tpu.matmul %88, %89, %cst_76 {dimension_numbers = #tpu.dot_dimension_numbers<[1], [0], [0], [1], [0, 0, 1, 1], [], []>} : vector<128x128xf32>, vector<128x128xf32>, vector<128x128xf32> -> vector<128x128xf32>
    %91 = arith.addf %87, %90 : vector<128x128xf32>
    %c640_77 = arith.constant 640 : index
    %c0_78 = arith.constant 0 : index
    %92 = vector.load %arg12[%c640_77, %c0_78] : memref<1464x128xf32, #tpu.memory_space<vmem>>, vector<128x128xf32>
    %c512_79 = arith.constant 512 : index
    %c0_80 = arith.constant 0 : index
    %93 = vector.load %arg4[%c512_79, %c0_80] : memref<1152x128xf32, #tpu.memory_space<vmem>>, vector<128x128xf32>
    %cst_81 = arith.constant dense<0.000000e+00> : vector<128x128xf32>
    %94 = tpu.matmul %92, %93, %cst_81 {dimension_numbers = #tpu.dot_dimension_numbers<[1], [0], [0], [1], [0, 0, 1, 1], [], []>} : vector<128x128xf32>, vector<128x128xf32>, vector<128x128xf32> -> vector<128x128xf32>
    %95 = arith.addf %91, %94 : vector<128x128xf32>
    %c1128 = arith.constant 1128 : index
    %c0_82 = arith.constant 0 : index
    %96 = vector.load %arg12[%c1128, %c0_82] : memref<1464x128xf32, #tpu.memory_space<vmem>>, vector<128x128xf32>
    %c640_83 = arith.constant 640 : index
    %c0_84 = arith.constant 0 : index
    %97 = vector.load %arg4[%c640_83, %c0_84] : memref<1152x128xf32, #tpu.memory_space<vmem>>, vector<128x128xf32>
    %cst_85 = arith.constant dense<0.000000e+00> : vector<128x128xf32>
    %98 = tpu.matmul %96, %97, %cst_85 {dimension_numbers = #tpu.dot_dimension_numbers<[1], [0], [0], [1], [0, 0, 1, 1], [], []>} : vector<128x128xf32>, vector<128x128xf32>, vector<128x128xf32> -> vector<128x128xf32>
    %99 = arith.addf %95, %98 : vector<128x128xf32>
    %c176 = arith.constant 176 : index
    %c0_86 = arith.constant 0 : index
    %100 = vector.load %arg12[%c176, %c0_86] : memref<1464x128xf32, #tpu.memory_space<vmem>>, vector<128x128xf32>
    %c768_87 = arith.constant 768 : index
    %c0_88 = arith.constant 0 : index
    %101 = vector.load %arg4[%c768_87, %c0_88] : memref<1152x128xf32, #tpu.memory_space<vmem>>, vector<128x128xf32>
    %cst_89 = arith.constant dense<0.000000e+00> : vector<128x128xf32>
    %102 = tpu.matmul %100, %101, %cst_89 {dimension_numbers = #tpu.dot_dimension_numbers<[1], [0], [0], [1], [0, 0, 1, 1], [], []>} : vector<128x128xf32>, vector<128x128xf32>, vector<128x128xf32> -> vector<128x128xf32>
    %103 = arith.addf %99, %102 : vector<128x128xf32>
    %c664 = arith.constant 664 : index
    %c0_90 = arith.constant 0 : index
    %104 = vector.load %arg12[%c664, %c0_90] : memref<1464x128xf32, #tpu.memory_space<vmem>>, vector<128x128xf32>
    %c896_91 = arith.constant 896 : index
    %c0_92 = arith.constant 0 : index
    %105 = vector.load %arg4[%c896_91, %c0_92] : memref<1152x128xf32, #tpu.memory_space<vmem>>, vector<128x128xf32>
    %cst_93 = arith.constant dense<0.000000e+00> : vector<128x128xf32>
    %106 = tpu.matmul %104, %105, %cst_93 {dimension_numbers = #tpu.dot_dimension_numbers<[1], [0], [0], [1], [0, 0, 1, 1], [], []>} : vector<128x128xf32>, vector<128x128xf32>, vector<128x128xf32> -> vector<128x128xf32>
    %107 = arith.addf %103, %106 : vector<128x128xf32>
    %c1152 = arith.constant 1152 : index
    %c0_94 = arith.constant 0 : index
    %108 = vector.load %arg12[%c1152, %c0_94] : memref<1464x128xf32, #tpu.memory_space<vmem>>, vector<128x128xf32>
    %c1024_95 = arith.constant 1024 : index
    %c0_96 = arith.constant 0 : index
    %109 = vector.load %arg4[%c1024_95, %c0_96] : memref<1152x128xf32, #tpu.memory_space<vmem>>, vector<128x128xf32>
    %cst_97 = arith.constant dense<0.000000e+00> : vector<128x128xf32>
    %110 = tpu.matmul %108, %109, %cst_97 {dimension_numbers = #tpu.dot_dimension_numbers<[1], [0], [0], [1], [0, 0, 1, 1], [], []>} : vector<128x128xf32>, vector<128x128xf32>, vector<128x128xf32> -> vector<128x128xf32>
    %111 = arith.addf %107, %110 : vector<128x128xf32>
    %c0_98 = arith.constant 0 : index
    %c0_99 = arith.constant 0 : index
    %112 = vector.load %arg5[%c0_98, %c0_99] : memref<1x128xf32, #tpu.memory_space<vmem>>, vector<1x128xf32>
    %113 = vector.broadcast %112 : vector<1x128xf32> to vector<128x128xf32>
    %114 = arith.mulf %111, %113 : vector<128x128xf32>
    %c0_100 = arith.constant 0 : index
    %c0_101 = arith.constant 0 : index
    %115 = vector.load %arg6[%c0_100, %c0_101] : memref<1x128xf32, #tpu.memory_space<vmem>>, vector<1x128xf32>
    %116 = vector.broadcast %115 : vector<1x128xf32> to vector<128x128xf32>
    %117 = arith.addf %114, %116 : vector<128x128xf32>
    %cst_102 = arith.constant 0.000000e+00 : f32
    %118 = vector.broadcast %cst_102 : f32 to vector<128x128xf32>
    %119 = arith.maximumf %117, %118 : vector<128x128xf32>
    %c128_103 = arith.constant 128 : index
    %c0_104 = arith.constant 0 : index
    %120 = vector.load %arg3[%c128_103, %c0_104] : memref<440x1xf32, #tpu.memory_space<vmem>>, vector<128x1xf32>
    %121 = vector.broadcast %120 : vector<128x1xf32> to vector<128x128xf32>
    %122 = arith.mulf %119, %121 : vector<128x128xf32>
    %c128_105 = arith.constant 128 : index
    %c0_106 = arith.constant 0 : index
    %123 = vector.load %arg13[%c128_105, %c0_106] : memref<440x128xf32, #tpu.memory_space<vmem>>, vector<128x128xf32>
    tpu.vector_store %arg13[%c128_105, %c0_106], %122 {strides = array<i32>} : memref<440x128xf32, #tpu.memory_space<vmem>>, vector<128x128xf32>,
    %c256_107 = arith.constant 256 : index
    %c0_108 = arith.constant 0 : index
    %124 = vector.load %arg12[%c256_107, %c0_108] : memref<1464x128xf32, #tpu.memory_space<vmem>>, vector<128x128xf32>
    %c0_109 = arith.constant 0 : index
    %c0_110 = arith.constant 0 : index
    %125 = vector.load %arg4[%c0_109, %c0_110] : memref<1152x128xf32, #tpu.memory_space<vmem>>, vector<128x128xf32>
    %cst_111 = arith.constant dense<0.000000e+00> : vector<128x128xf32>
    %126 = tpu.matmul %124, %125, %cst_111 {dimension_numbers = #tpu.dot_dimension_numbers<[1], [0], [0], [1], [0, 0, 1, 1], [], []>} : vector<128x128xf32>, vector<128x128xf32>, vector<128x128xf32> -> vector<128x128xf32>
    %c744 = arith.constant 744 : index
    %c0_112 = arith.constant 0 : index
    %127 = vector.load %arg12[%c744, %c0_112] : memref<1464x128xf32, #tpu.memory_space<vmem>>, vector<128x128xf32>
    %c128_113 = arith.constant 128 : index
    %c0_114 = arith.constant 0 : index
    %128 = vector.load %arg4[%c128_113, %c0_114] : memref<1152x128xf32, #tpu.memory_space<vmem>>, vector<128x128xf32>
    %cst_115 = arith.constant dense<0.000000e+00> : vector<128x128xf32>
    %129 = tpu.matmul %127, %128, %cst_115 {dimension_numbers = #tpu.dot_dimension_numbers<[1], [0], [0], [1], [0, 0, 1, 1], [], []>} : vector<128x128xf32>, vector<128x128xf32>, vector<128x128xf32> -> vector<128x128xf32>
    %130 = arith.addf %126, %129 : vector<128x128xf32>
    %c1232 = arith.constant 1232 : index
    %c0_116 = arith.constant 0 : index
    %131 = vector.load %arg12[%c1232, %c0_116] : memref<1464x128xf32, #tpu.memory_space<vmem>>, vector<128x128xf32>
    %c256_117 = arith.constant 256 : index
    %c0_118 = arith.constant 0 : index
    %132 = vector.load %arg4[%c256_117, %c0_118] : memref<1152x128xf32, #tpu.memory_space<vmem>>, vector<128x128xf32>
    %cst_119 = arith.constant dense<0.000000e+00> : vector<128x128xf32>
    %133 = tpu.matmul %131, %132, %cst_119 {dimension_numbers = #tpu.dot_dimension_numbers<[1], [0], [0], [1], [0, 0, 1, 1], [], []>} : vector<128x128xf32>, vector<128x128xf32>, vector<128x128xf32> -> vector<128x128xf32>
    %134 = arith.addf %130, %133 : vector<128x128xf32>
    %c280 = arith.constant 280 : index
    %c0_120 = arith.constant 0 : index
    %135 = vector.load %arg12[%c280, %c0_120] : memref<1464x128xf32, #tpu.memory_space<vmem>>, vector<128x128xf32>
    %c384_121 = arith.constant 384 : index
    %c0_122 = arith.constant 0 : index
    %136 = vector.load %arg4[%c384_121, %c0_122] : memref<1152x128xf32, #tpu.memory_space<vmem>>, vector<128x128xf32>
    %cst_123 = arith.constant dense<0.000000e+00> : vector<128x128xf32>
    %137 = tpu.matmul %135, %136, %cst_123 {dimension_numbers = #tpu.dot_dimension_numbers<[1], [0], [0], [1], [0, 0, 1, 1], [], []>} : vector<128x128xf32>, vector<128x128xf32>, vector<128x128xf32> -> vector<128x128xf32>
    %138 = arith.addf %134, %137 : vector<128x128xf32>
    %c768_124 = arith.constant 768 : index
    %c0_125 = arith.constant 0 : index
    %139 = vector.load %arg12[%c768_124, %c0_125] : memref<1464x128xf32, #tpu.memory_space<vmem>>, vector<128x128xf32>
    %c512_126 = arith.constant 512 : index
    %c0_127 = arith.constant 0 : index
    %140 = vector.load %arg4[%c512_126, %c0_127] : memref<1152x128xf32, #tpu.memory_space<vmem>>, vector<128x128xf32>
    %cst_128 = arith.constant dense<0.000000e+00> : vector<128x128xf32>
    %141 = tpu.matmul %139, %140, %cst_128 {dimension_numbers = #tpu.dot_dimension_numbers<[1], [0], [0], [1], [0, 0, 1, 1], [], []>} : vector<128x128xf32>, vector<128x128xf32>, vector<128x128xf32> -> vector<128x128xf32>
    %142 = arith.addf %138, %141 : vector<128x128xf32>
    %c1256 = arith.constant 1256 : index
    %c0_129 = arith.constant 0 : index
    %143 = vector.load %arg12[%c1256, %c0_129] : memref<1464x128xf32, #tpu.memory_space<vmem>>, vector<128x128xf32>
    %c640_130 = arith.constant 640 : index
    %c0_131 = arith.constant 0 : index
    %144 = vector.load %arg4[%c640_130, %c0_131] : memref<1152x128xf32, #tpu.memory_space<vmem>>, vector<128x128xf32>
    %cst_132 = arith.constant dense<0.000000e+00> : vector<128x128xf32>
    %145 = tpu.matmul %143, %144, %cst_132 {dimension_numbers = #tpu.dot_dimension_numbers<[1], [0], [0], [1], [0, 0, 1, 1], [], []>} : vector<128x128xf32>, vector<128x128xf32>, vector<128x128xf32> -> vector<128x128xf32>
    %146 = arith.addf %142, %145 : vector<128x128xf32>
    %c304 = arith.constant 304 : index
    %c0_133 = arith.constant 0 : index
    %147 = vector.load %arg12[%c304, %c0_133] : memref<1464x128xf32, #tpu.memory_space<vmem>>, vector<128x128xf32>
    %c768_134 = arith.constant 768 : index
    %c0_135 = arith.constant 0 : index
    %148 = vector.load %arg4[%c768_134, %c0_135] : memref<1152x128xf32, #tpu.memory_space<vmem>>, vector<128x128xf32>
    %cst_136 = arith.constant dense<0.000000e+00> : vector<128x128xf32>
    %149 = tpu.matmul %147, %148, %cst_136 {dimension_numbers = #tpu.dot_dimension_numbers<[1], [0], [0], [1], [0, 0, 1, 1], [], []>} : vector<128x128xf32>, vector<128x128xf32>, vector<128x128xf32> -> vector<128x128xf32>
    %150 = arith.addf %146, %149 : vector<128x128xf32>
    %c792 = arith.constant 792 : index
    %c0_137 = arith.constant 0 : index
    %151 = vector.load %arg12[%c792, %c0_137] : memref<1464x128xf32, #tpu.memory_space<vmem>>, vector<128x128xf32>
    %c896_138 = arith.constant 896 : index
    %c0_139 = arith.constant 0 : index
    %152 = vector.load %arg4[%c896_138, %c0_139] : memref<1152x128xf32, #tpu.memory_space<vmem>>, vector<128x128xf32>
    %cst_140 = arith.constant dense<0.000000e+00> : vector<128x128xf32>
    %153 = tpu.matmul %151, %152, %cst_140 {dimension_numbers = #tpu.dot_dimension_numbers<[1], [0], [0], [1], [0, 0, 1, 1], [], []>} : vector<128x128xf32>, vector<128x128xf32>, vector<128x128xf32> -> vector<128x128xf32>
    %154 = arith.addf %150, %153 : vector<128x128xf32>
    %c1280 = arith.constant 1280 : index
    %c0_141 = arith.constant 0 : index
    %155 = vector.load %arg12[%c1280, %c0_141] : memref<1464x128xf32, #tpu.memory_space<vmem>>, vector<128x128xf32>
    %c1024_142 = arith.constant 1024 : index
    %c0_143 = arith.constant 0 : index
    %156 = vector.load %arg4[%c1024_142, %c0_143] : memref<1152x128xf32, #tpu.memory_space<vmem>>, vector<128x128xf32>
    %cst_144 = arith.constant dense<0.000000e+00> : vector<128x128xf32>
    %157 = tpu.matmul %155, %156, %cst_144 {dimension_numbers = #tpu.dot_dimension_numbers<[1], [0], [0], [1], [0, 0, 1, 1], [], []>} : vector<128x128xf32>, vector<128x128xf32>, vector<128x128xf32> -> vector<128x128xf32>
    %158 = arith.addf %154, %157 : vector<128x128xf32>
    %c0_145 = arith.constant 0 : index
    %c0_146 = arith.constant 0 : index
    %159 = vector.load %arg5[%c0_145, %c0_146] : memref<1x128xf32, #tpu.memory_space<vmem>>, vector<1x128xf32>
    %160 = vector.broadcast %159 : vector<1x128xf32> to vector<128x128xf32>
    %161 = arith.mulf %158, %160 : vector<128x128xf32>
    %c0_147 = arith.constant 0 : index
    %c0_148 = arith.constant 0 : index
    %162 = vector.load %arg6[%c0_147, %c0_148] : memref<1x128xf32, #tpu.memory_space<vmem>>, vector<1x128xf32>
    %163 = vector.broadcast %162 : vector<1x128xf32> to vector<128x128xf32>
    %164 = arith.addf %161, %163 : vector<128x128xf32>
    %cst_149 = arith.constant 0.000000e+00 : f32
    %165 = vector.broadcast %cst_149 : f32 to vector<128x128xf32>
    %166 = arith.maximumf %164, %165 : vector<128x128xf32>
    %c256_150 = arith.constant 256 : index
    %c0_151 = arith.constant 0 : index
    %167 = vector.load %arg3[%c256_150, %c0_151] : memref<440x1xf32, #tpu.memory_space<vmem>>, vector<128x1xf32>
    %168 = vector.broadcast %167 : vector<128x1xf32> to vector<128x128xf32>
    %169 = arith.mulf %166, %168 : vector<128x128xf32>
    %c256_152 = arith.constant 256 : index
    %c0_153 = arith.constant 0 : index
    %170 = vector.load %arg13[%c256_152, %c0_153] : memref<440x128xf32, #tpu.memory_space<vmem>>, vector<128x128xf32>
    tpu.vector_store %arg13[%c256_152, %c0_153], %169 {strides = array<i32>} : memref<440x128xf32, #tpu.memory_space<vmem>>, vector<128x128xf32>,
    %c384_154 = arith.constant 384 : index
    %c0_155 = arith.constant 0 : index
    %171 = vector.load %arg12[%c384_154, %c0_155] : memref<1464x128xf32, #tpu.memory_space<vmem>>, vector<56x128xf32>
    %c0_156 = arith.constant 0 : index
    %c0_157 = arith.constant 0 : index
    %172 = vector.load %arg4[%c0_156, %c0_157] : memref<1152x128xf32, #tpu.memory_space<vmem>>, vector<128x128xf32>
    %cst_158 = arith.constant dense<0.000000e+00> : vector<56x128xf32>
    %173 = tpu.matmul %171, %172, %cst_158 {dimension_numbers = #tpu.dot_dimension_numbers<[1], [0], [0], [1], [0, 0, 1, 1], [], []>} : vector<56x128xf32>, vector<128x128xf32>, vector<56x128xf32> -> vector<56x128xf32>
    %c872 = arith.constant 872 : index
    %c0_159 = arith.constant 0 : index
    %174 = vector.load %arg12[%c872, %c0_159] : memref<1464x128xf32, #tpu.memory_space<vmem>>, vector<56x128xf32>
    %c128_160 = arith.constant 128 : index
    %c0_161 = arith.constant 0 : index
    %175 = vector.load %arg4[%c128_160, %c0_161] : memref<1152x128xf32, #tpu.memory_space<vmem>>, vector<128x128xf32>
    %cst_162 = arith.constant dense<0.000000e+00> : vector<56x128xf32>
    %176 = tpu.matmul %174, %175, %cst_162 {dimension_numbers = #tpu.dot_dimension_numbers<[1], [0], [0], [1], [0, 0, 1, 1], [], []>} : vector<56x128xf32>, vector<128x128xf32>, vector<56x128xf32> -> vector<56x128xf32>
    %177 = arith.addf %173, %176 : vector<56x128xf32>
    %c1360 = arith.constant 1360 : index
    %c0_163 = arith.constant 0 : index
    %178 = vector.load %arg12[%c1360, %c0_163] : memref<1464x128xf32, #tpu.memory_space<vmem>>, vector<56x128xf32>
    %c256_164 = arith.constant 256 : index
    %c0_165 = arith.constant 0 : index
    %179 = vector.load %arg4[%c256_164, %c0_165] : memref<1152x128xf32, #tpu.memory_space<vmem>>, vector<128x128xf32>
    %cst_166 = arith.constant dense<0.000000e+00> : vector<56x128xf32>
    %180 = tpu.matmul %178, %179, %cst_166 {dimension_numbers = #tpu.dot_dimension_numbers<[1], [0], [0], [1], [0, 0, 1, 1], [], []>} : vector<56x128xf32>, vector<128x128xf32>, vector<56x128xf32> -> vector<56x128xf32>
    %181 = arith.addf %177, %180 : vector<56x128xf32>
    %c408 = arith.constant 408 : index
    %c0_167 = arith.constant 0 : index
    %182 = vector.load %arg12[%c408, %c0_167] : memref<1464x128xf32, #tpu.memory_space<vmem>>, vector<56x128xf32>
    %c384_168 = arith.constant 384 : index
    %c0_169 = arith.constant 0 : index
    %183 = vector.load %arg4[%c384_168, %c0_169] : memref<1152x128xf32, #tpu.memory_space<vmem>>, vector<128x128xf32>
    %cst_170 = arith.constant dense<0.000000e+00> : vector<56x128xf32>
    %184 = tpu.matmul %182, %183, %cst_170 {dimension_numbers = #tpu.dot_dimension_numbers<[1], [0], [0], [1], [0, 0, 1, 1], [], []>} : vector<56x128xf32>, vector<128x128xf32>, vector<56x128xf32> -> vector<56x128xf32>
    %185 = arith.addf %181, %184 : vector<56x128xf32>
    %c896_171 = arith.constant 896 : index
    %c0_172 = arith.constant 0 : index
    %186 = vector.load %arg12[%c896_171, %c0_172] : memref<1464x128xf32, #tpu.memory_space<vmem>>, vector<56x128xf32>
    %c512_173 = arith.constant 512 : index
    %c0_174 = arith.constant 0 : index
    %187 = vector.load %arg4[%c512_173, %c0_174] : memref<1152x128xf32, #tpu.memory_space<vmem>>, vector<128x128xf32>
    %cst_175 = arith.constant dense<0.000000e+00> : vector<56x128xf32>
    %188 = tpu.matmul %186, %187, %cst_175 {dimension_numbers = #tpu.dot_dimension_numbers<[1], [0], [0], [1], [0, 0, 1, 1], [], []>} : vector<56x128xf32>, vector<128x128xf32>, vector<56x128xf32> -> vector<56x128xf32>
    %189 = arith.addf %185, %188 : vector<56x128xf32>
    %c1384 = arith.constant 1384 : index
    %c0_176 = arith.constant 0 : index
    %190 = vector.load %arg12[%c1384, %c0_176] : memref<1464x128xf32, #tpu.memory_space<vmem>>, vector<56x128xf32>
    %c640_177 = arith.constant 640 : index
    %c0_178 = arith.constant 0 : index
    %191 = vector.load %arg4[%c640_177, %c0_178] : memref<1152x128xf32, #tpu.memory_space<vmem>>, vector<128x128xf32>
    %cst_179 = arith.constant dense<0.000000e+00> : vector<56x128xf32>
    %192 = tpu.matmul %190, %191, %cst_179 {dimension_numbers = #tpu.dot_dimension_numbers<[1], [0], [0], [1], [0, 0, 1, 1], [], []>} : vector<56x128xf32>, vector<128x128xf32>, vector<56x128xf32> -> vector<56x128xf32>
    %193 = arith.addf %189, %192 : vector<56x128xf32>
    %c432 = arith.constant 432 : index
    %c0_180 = arith.constant 0 : index
    %194 = vector.load %arg12[%c432, %c0_180] : memref<1464x128xf32, #tpu.memory_space<vmem>>, vector<56x128xf32>
    %c768_181 = arith.constant 768 : index
    %c0_182 = arith.constant 0 : index
    %195 = vector.load %arg4[%c768_181, %c0_182] : memref<1152x128xf32, #tpu.memory_space<vmem>>, vector<128x128xf32>
    %cst_183 = arith.constant dense<0.000000e+00> : vector<56x128xf32>
    %196 = tpu.matmul %194, %195, %cst_183 {dimension_numbers = #tpu.dot_dimension_numbers<[1], [0], [0], [1], [0, 0, 1, 1], [], []>} : vector<56x128xf32>, vector<128x128xf32>, vector<56x128xf32> -> vector<56x128xf32>
    %197 = arith.addf %193, %196 : vector<56x128xf32>
    %c920 = arith.constant 920 : index
    %c0_184 = arith.constant 0 : index
    %198 = vector.load %arg12[%c920, %c0_184] : memref<1464x128xf32, #tpu.memory_space<vmem>>, vector<56x128xf32>
    %c896_185 = arith.constant 896 : index
    %c0_186 = arith.constant 0 : index
    %199 = vector.load %arg4[%c896_185, %c0_186] : memref<1152x128xf32, #tpu.memory_space<vmem>>, vector<128x128xf32>
    %cst_187 = arith.constant dense<0.000000e+00> : vector<56x128xf32>
    %200 = tpu.matmul %198, %199, %cst_187 {dimension_numbers = #tpu.dot_dimension_numbers<[1], [0], [0], [1], [0, 0, 1, 1], [], []>} : vector<56x128xf32>, vector<128x128xf32>, vector<56x128xf32> -> vector<56x128xf32>
    %201 = arith.addf %197, %200 : vector<56x128xf32>
    %c1408 = arith.constant 1408 : index
    %c0_188 = arith.constant 0 : index
    %202 = vector.load %arg12[%c1408, %c0_188] : memref<1464x128xf32, #tpu.memory_space<vmem>>, vector<56x128xf32>
    %c1024_189 = arith.constant 1024 : index
    %c0_190 = arith.constant 0 : index
    %203 = vector.load %arg4[%c1024_189, %c0_190] : memref<1152x128xf32, #tpu.memory_space<vmem>>, vector<128x128xf32>
    %cst_191 = arith.constant dense<0.000000e+00> : vector<56x128xf32>
    %204 = tpu.matmul %202, %203, %cst_191 {dimension_numbers = #tpu.dot_dimension_numbers<[1], [0], [0], [1], [0, 0, 1, 1], [], []>} : vector<56x128xf32>, vector<128x128xf32>, vector<56x128xf32> -> vector<56x128xf32>
    %205 = arith.addf %201, %204 : vector<56x128xf32>
    %c0_192 = arith.constant 0 : index
    %c0_193 = arith.constant 0 : index
    %206 = vector.load %arg5[%c0_192, %c0_193] : memref<1x128xf32, #tpu.memory_space<vmem>>, vector<1x128xf32>
    %207 = vector.broadcast %206 : vector<1x128xf32> to vector<56x128xf32>
    %208 = arith.mulf %205, %207 : vector<56x128xf32>
    %c0_194 = arith.constant 0 : index
    %c0_195 = arith.constant 0 : index
    %209 = vector.load %arg6[%c0_194, %c0_195] : memref<1x128xf32, #tpu.memory_space<vmem>>, vector<1x128xf32>
    %210 = vector.broadcast %209 : vector<1x128xf32> to vector<56x128xf32>
    %211 = arith.addf %208, %210 : vector<56x128xf32>
    %cst_196 = arith.constant 0.000000e+00 : f32
    %212 = vector.broadcast %cst_196 : f32 to vector<56x128xf32>
    %213 = arith.maximumf %211, %212 : vector<56x128xf32>
    %c384_197 = arith.constant 384 : index
    %c0_198 = arith.constant 0 : index
    %214 = vector.load %arg3[%c384_197, %c0_198] : memref<440x1xf32, #tpu.memory_space<vmem>>, vector<56x1xf32>
    %215 = vector.broadcast %214 : vector<56x1xf32> to vector<56x128xf32>
    %216 = arith.mulf %213, %215 : vector<56x128xf32>
    %c384_199 = arith.constant 384 : index
    %c0_200 = arith.constant 0 : index
    %217 = vector.load %arg13[%c384_199, %c0_200] : memref<440x128xf32, #tpu.memory_space<vmem>>, vector<56x128xf32>
    tpu.vector_store %arg13[%c384_199, %c0_200], %216 {strides = array<i32>} : memref<440x128xf32, #tpu.memory_space<vmem>>, vector<56x128xf32>,
    %c0_i32_201 = arith.constant 0 : i32
    %218 = arith.cmpi eq, %arg1, %c0_i32_201 : i32
    %219 = arith.extui %218 : i1 to i32
    %c0_i32_202 = arith.constant 0 : i32
    %220 = arith.cmpi ne, %219, %c0_i32_202 : i32
    scf.if %220 {
      %cst_368 = arith.constant 0.000000e+00 : f32
      %380 = vector.broadcast %cst_368 : f32 to vector<24x128xf32>
      %c0_369 = arith.constant 0 : index
      %c0_370 = arith.constant 0 : index
      %381 = vector.load %arg13[%c0_369, %c0_370] : memref<440x128xf32, #tpu.memory_space<vmem>>, vector<24x128xf32>
      tpu.vector_store %arg13[%c0_369, %c0_370], %380 {strides = array<i32>} : memref<440x128xf32, #tpu.memory_space<vmem>>, vector<24x128xf32>,
    } else {
    }
    %c0_i32_203 = arith.constant 0 : i32
    %221 = arith.cmpi eq, %arg1, %c0_i32_203 : i32
    %222 = arith.extui %221 : i1 to i32
    %c0_i32_204 = arith.constant 0 : i32
    %223 = arith.cmpi ne, %222, %c0_i32_204 : i32
    scf.if %223 {
      %cst_368 = arith.constant 0.000000e+00 : f32
      %380 = vector.broadcast %cst_368 : f32 to vector<32x128xf32>
      %c408_369 = arith.constant 408 : index
      %c0_370 = arith.constant 0 : index
      %381 = vector.load %arg13[%c408_369, %c0_370] : memref<440x128xf32, #tpu.memory_space<vmem>>, vector<32x128xf32>
      tpu.vector_store %arg13[%c408_369, %c0_370], %380 {strides = array<i32>} : memref<440x128xf32, #tpu.memory_space<vmem>>, vector<32x128xf32>,
    } else {
    }
    %c0_205 = arith.constant 0 : index
    %c0_206 = arith.constant 0 : index
    %224 = vector.load %arg13[%c0_205, %c0_206] : memref<440x128xf32, #tpu.memory_space<vmem>>, vector<432x128xf32>
    %c0_207 = arith.constant 0 : index
    %c0_208 = arith.constant 0 : index
    %225 = vector.load %arg14[%c0_207, %c0_208] : memref<1296x128xf32, #tpu.memory_space<vmem>>, vector<432x128xf32>
    tpu.vector_store %arg14[%c0_207, %c0_208], %224 {strides = array<i32>} : memref<1296x128xf32, #tpu.memory_space<vmem>>, vector<432x128xf32>,
    %c1_209 = arith.constant 1 : index
    %c0_210 = arith.constant 0 : index
    %226 = vector.load %arg13[%c1_209, %c0_210] : memref<440x128xf32, #tpu.memory_space<vmem>>, vector<432x128xf32>
    %c432_211 = arith.constant 432 : index
    %c0_212 = arith.constant 0 : index
    %227 = vector.load %arg14[%c432_211, %c0_212] : memref<1296x128xf32, #tpu.memory_space<vmem>>, vector<432x128xf32>
    tpu.vector_store %arg14[%c432_211, %c0_212], %226 {strides = array<i32>} : memref<1296x128xf32, #tpu.memory_space<vmem>>, vector<432x128xf32>,
    %c2_213 = arith.constant 2 : index
    %c0_214 = arith.constant 0 : index
    %228 = vector.load %arg13[%c2_213, %c0_214] : memref<440x128xf32, #tpu.memory_space<vmem>>, vector<432x128xf32>
    %c864 = arith.constant 864 : index
    %c0_215 = arith.constant 0 : index
    %229 = vector.load %arg14[%c864, %c0_215] : memref<1296x128xf32, #tpu.memory_space<vmem>>, vector<432x128xf32>
    tpu.vector_store %arg14[%c864, %c0_215], %228 {strides = array<i32>} : memref<1296x128xf32, #tpu.memory_space<vmem>>, vector<432x128xf32>,
    %c0_216 = arith.constant 0 : index
    %c0_217 = arith.constant 0 : index
    %230 = vector.load %arg14[%c0_216, %c0_217] : memref<1296x128xf32, #tpu.memory_space<vmem>>, vector<128x128xf32>
    %c0_218 = arith.constant 0 : index
    %c0_219 = arith.constant 0 : index
    %231 = vector.load %arg7[%c0_218, %c0_219] : memref<1152x128xf32, #tpu.memory_space<vmem>>, vector<128x128xf32>
    %cst_220 = arith.constant dense<0.000000e+00> : vector<128x128xf32>
    %232 = tpu.matmul %230, %231, %cst_220 {dimension_numbers = #tpu.dot_dimension_numbers<[1], [0], [0], [1], [0, 0, 1, 1], [], []>} : vector<128x128xf32>, vector<128x128xf32>, vector<128x128xf32> -> vector<128x128xf32>
    %c432_221 = arith.constant 432 : index
    %c0_222 = arith.constant 0 : index
    %233 = vector.load %arg14[%c432_221, %c0_222] : memref<1296x128xf32, #tpu.memory_space<vmem>>, vector<128x128xf32>
    %c128_223 = arith.constant 128 : index
    %c0_224 = arith.constant 0 : index
    %234 = vector.load %arg7[%c128_223, %c0_224] : memref<1152x128xf32, #tpu.memory_space<vmem>>, vector<128x128xf32>
    %cst_225 = arith.constant dense<0.000000e+00> : vector<128x128xf32>
    %235 = tpu.matmul %233, %234, %cst_225 {dimension_numbers = #tpu.dot_dimension_numbers<[1], [0], [0], [1], [0, 0, 1, 1], [], []>} : vector<128x128xf32>, vector<128x128xf32>, vector<128x128xf32> -> vector<128x128xf32>
    %236 = arith.addf %232, %235 : vector<128x128xf32>
    %c864_226 = arith.constant 864 : index
    %c0_227 = arith.constant 0 : index
    %237 = vector.load %arg14[%c864_226, %c0_227] : memref<1296x128xf32, #tpu.memory_space<vmem>>, vector<128x128xf32>
    %c256_228 = arith.constant 256 : index
    %c0_229 = arith.constant 0 : index
    %238 = vector.load %arg7[%c256_228, %c0_229] : memref<1152x128xf32, #tpu.memory_space<vmem>>, vector<128x128xf32>
    %cst_230 = arith.constant dense<0.000000e+00> : vector<128x128xf32>
    %239 = tpu.matmul %237, %238, %cst_230 {dimension_numbers = #tpu.dot_dimension_numbers<[1], [0], [0], [1], [0, 0, 1, 1], [], []>} : vector<128x128xf32>, vector<128x128xf32>, vector<128x128xf32> -> vector<128x128xf32>
    %240 = arith.addf %236, %239 : vector<128x128xf32>
    %c24_231 = arith.constant 24 : index
    %c0_232 = arith.constant 0 : index
    %241 = vector.load %arg14[%c24_231, %c0_232] : memref<1296x128xf32, #tpu.memory_space<vmem>>, vector<128x128xf32>
    %c384_233 = arith.constant 384 : index
    %c0_234 = arith.constant 0 : index
    %242 = vector.load %arg7[%c384_233, %c0_234] : memref<1152x128xf32, #tpu.memory_space<vmem>>, vector<128x128xf32>
    %cst_235 = arith.constant dense<0.000000e+00> : vector<128x128xf32>
    %243 = tpu.matmul %241, %242, %cst_235 {dimension_numbers = #tpu.dot_dimension_numbers<[1], [0], [0], [1], [0, 0, 1, 1], [], []>} : vector<128x128xf32>, vector<128x128xf32>, vector<128x128xf32> -> vector<128x128xf32>
    %244 = arith.addf %240, %243 : vector<128x128xf32>
    %c456 = arith.constant 456 : index
    %c0_236 = arith.constant 0 : index
    %245 = vector.load %arg14[%c456, %c0_236] : memref<1296x128xf32, #tpu.memory_space<vmem>>, vector<128x128xf32>
    %c512_237 = arith.constant 512 : index
    %c0_238 = arith.constant 0 : index
    %246 = vector.load %arg7[%c512_237, %c0_238] : memref<1152x128xf32, #tpu.memory_space<vmem>>, vector<128x128xf32>
    %cst_239 = arith.constant dense<0.000000e+00> : vector<128x128xf32>
    %247 = tpu.matmul %245, %246, %cst_239 {dimension_numbers = #tpu.dot_dimension_numbers<[1], [0], [0], [1], [0, 0, 1, 1], [], []>} : vector<128x128xf32>, vector<128x128xf32>, vector<128x128xf32> -> vector<128x128xf32>
    %248 = arith.addf %244, %247 : vector<128x128xf32>
    %c888 = arith.constant 888 : index
    %c0_240 = arith.constant 0 : index
    %249 = vector.load %arg14[%c888, %c0_240] : memref<1296x128xf32, #tpu.memory_space<vmem>>, vector<128x128xf32>
    %c640_241 = arith.constant 640 : index
    %c0_242 = arith.constant 0 : index
    %250 = vector.load %arg7[%c640_241, %c0_242] : memref<1152x128xf32, #tpu.memory_space<vmem>>, vector<128x128xf32>
    %cst_243 = arith.constant dense<0.000000e+00> : vector<128x128xf32>
    %251 = tpu.matmul %249, %250, %cst_243 {dimension_numbers = #tpu.dot_dimension_numbers<[1], [0], [0], [1], [0, 0, 1, 1], [], []>} : vector<128x128xf32>, vector<128x128xf32>, vector<128x128xf32> -> vector<128x128xf32>
    %252 = arith.addf %248, %251 : vector<128x128xf32>
    %c48_244 = arith.constant 48 : index
    %c0_245 = arith.constant 0 : index
    %253 = vector.load %arg14[%c48_244, %c0_245] : memref<1296x128xf32, #tpu.memory_space<vmem>>, vector<128x128xf32>
    %c768_246 = arith.constant 768 : index
    %c0_247 = arith.constant 0 : index
    %254 = vector.load %arg7[%c768_246, %c0_247] : memref<1152x128xf32, #tpu.memory_space<vmem>>, vector<128x128xf32>
    %cst_248 = arith.constant dense<0.000000e+00> : vector<128x128xf32>
    %255 = tpu.matmul %253, %254, %cst_248 {dimension_numbers = #tpu.dot_dimension_numbers<[1], [0], [0], [1], [0, 0, 1, 1], [], []>} : vector<128x128xf32>, vector<128x128xf32>, vector<128x128xf32> -> vector<128x128xf32>
    %256 = arith.addf %252, %255 : vector<128x128xf32>
    %c480 = arith.constant 480 : index
    %c0_249 = arith.constant 0 : index
    %257 = vector.load %arg14[%c480, %c0_249] : memref<1296x128xf32, #tpu.memory_space<vmem>>, vector<128x128xf32>
    %c896_250 = arith.constant 896 : index
    %c0_251 = arith.constant 0 : index
    %258 = vector.load %arg7[%c896_250, %c0_251] : memref<1152x128xf32, #tpu.memory_space<vmem>>, vector<128x128xf32>
    %cst_252 = arith.constant dense<0.000000e+00> : vector<128x128xf32>
    %259 = tpu.matmul %257, %258, %cst_252 {dimension_numbers = #tpu.dot_dimension_numbers<[1], [0], [0], [1], [0, 0, 1, 1], [], []>} : vector<128x128xf32>, vector<128x128xf32>, vector<128x128xf32> -> vector<128x128xf32>
    %260 = arith.addf %256, %259 : vector<128x128xf32>
    %c912 = arith.constant 912 : index
    %c0_253 = arith.constant 0 : index
    %261 = vector.load %arg14[%c912, %c0_253] : memref<1296x128xf32, #tpu.memory_space<vmem>>, vector<128x128xf32>
    %c1024_254 = arith.constant 1024 : index
    %c0_255 = arith.constant 0 : index
    %262 = vector.load %arg7[%c1024_254, %c0_255] : memref<1152x128xf32, #tpu.memory_space<vmem>>, vector<128x128xf32>
    %cst_256 = arith.constant dense<0.000000e+00> : vector<128x128xf32>
    %263 = tpu.matmul %261, %262, %cst_256 {dimension_numbers = #tpu.dot_dimension_numbers<[1], [0], [0], [1], [0, 0, 1, 1], [], []>} : vector<128x128xf32>, vector<128x128xf32>, vector<128x128xf32> -> vector<128x128xf32>
    %264 = arith.addf %260, %263 : vector<128x128xf32>
    %c0_i32_257 = arith.constant 0 : i32
    %c0_i32_258 = arith.constant 0 : i32
    %265 = tpu.memref_slice %arg11[%0, %c0_i32_257, %c0_i32_258] : memref<2x496x128xf32, #tpu.memory_space<vmem>> -> memref<1x496x128xf32, #tpu.memory_space<vmem>>
    %266 = tpu.memref_squeeze %265 : memref<1x496x128xf32, #tpu.memory_space<vmem>> -> memref<496x128xf32, #tpu.memory_space<vmem>>
    %c50 = arith.constant 50 : index
    %c0_259 = arith.constant 0 : index
    %267 = vector.load %266[%c50, %c0_259] : memref<496x128xf32, #tpu.memory_space<vmem>>, vector<128x128xf32>
    %c0_260 = arith.constant 0 : index
    %c0_261 = arith.constant 0 : index
    %268 = vector.load %arg8[%c0_260, %c0_261] : memref<1x128xf32, #tpu.memory_space<vmem>>, vector<1x128xf32>
    %269 = vector.broadcast %268 : vector<1x128xf32> to vector<128x128xf32>
    %270 = arith.mulf %264, %269 : vector<128x128xf32>
    %c0_262 = arith.constant 0 : index
    %c0_263 = arith.constant 0 : index
    %271 = vector.load %arg9[%c0_262, %c0_263] : memref<1x128xf32, #tpu.memory_space<vmem>>, vector<1x128xf32>
    %272 = vector.broadcast %271 : vector<1x128xf32> to vector<128x128xf32>
    %273 = arith.addf %270, %272 : vector<128x128xf32>
    %274 = arith.addf %273, %267 : vector<128x128xf32>
    %cst_264 = arith.constant 0.000000e+00 : f32
    %275 = vector.broadcast %cst_264 : f32 to vector<128x128xf32>
    %276 = arith.maximumf %274, %275 : vector<128x128xf32>
    %c0_265 = arith.constant 0 : index
    %c0_266 = arith.constant 0 : index
    %c0_267 = arith.constant 0 : index
    %277 = vector.load %arg10[%c0_265, %c0_266, %c0_267] : memref<1x384x128xf32, #tpu.memory_space<vmem>>, vector<1x128x128xf32>
    %278 = vector.shape_cast %277 : vector<1x128x128xf32> to vector<128x128xf32>
    %279 = vector.shape_cast %276 : vector<128x128xf32> to vector<1x128x128xf32>
    tpu.vector_store %arg10[%c0_265, %c0_266, %c0_267], %279 {strides = array<i32>} : memref<1x384x128xf32, #tpu.memory_space<vmem>>, vector<1x128x128xf32>,
    %c128_268 = arith.constant 128 : index
    %c0_269 = arith.constant 0 : index
    %280 = vector.load %arg14[%c128_268, %c0_269] : memref<1296x128xf32, #tpu.memory_space<vmem>>, vector<128x128xf32>
    %c0_270 = arith.constant 0 : index
    %c0_271 = arith.constant 0 : index
    %281 = vector.load %arg7[%c0_270, %c0_271] : memref<1152x128xf32, #tpu.memory_space<vmem>>, vector<128x128xf32>
    %cst_272 = arith.constant dense<0.000000e+00> : vector<128x128xf32>
    %282 = tpu.matmul %280, %281, %cst_272 {dimension_numbers = #tpu.dot_dimension_numbers<[1], [0], [0], [1], [0, 0, 1, 1], [], []>} : vector<128x128xf32>, vector<128x128xf32>, vector<128x128xf32> -> vector<128x128xf32>
    %c560 = arith.constant 560 : index
    %c0_273 = arith.constant 0 : index
    %283 = vector.load %arg14[%c560, %c0_273] : memref<1296x128xf32, #tpu.memory_space<vmem>>, vector<128x128xf32>
    %c128_274 = arith.constant 128 : index
    %c0_275 = arith.constant 0 : index
    %284 = vector.load %arg7[%c128_274, %c0_275] : memref<1152x128xf32, #tpu.memory_space<vmem>>, vector<128x128xf32>
    %cst_276 = arith.constant dense<0.000000e+00> : vector<128x128xf32>
    %285 = tpu.matmul %283, %284, %cst_276 {dimension_numbers = #tpu.dot_dimension_numbers<[1], [0], [0], [1], [0, 0, 1, 1], [], []>} : vector<128x128xf32>, vector<128x128xf32>, vector<128x128xf32> -> vector<128x128xf32>
    %286 = arith.addf %282, %285 : vector<128x128xf32>
    %c992 = arith.constant 992 : index
    %c0_277 = arith.constant 0 : index
    %287 = vector.load %arg14[%c992, %c0_277] : memref<1296x128xf32, #tpu.memory_space<vmem>>, vector<128x128xf32>
    %c256_278 = arith.constant 256 : index
    %c0_279 = arith.constant 0 : index
    %288 = vector.load %arg7[%c256_278, %c0_279] : memref<1152x128xf32, #tpu.memory_space<vmem>>, vector<128x128xf32>
    %cst_280 = arith.constant dense<0.000000e+00> : vector<128x128xf32>
    %289 = tpu.matmul %287, %288, %cst_280 {dimension_numbers = #tpu.dot_dimension_numbers<[1], [0], [0], [1], [0, 0, 1, 1], [], []>} : vector<128x128xf32>, vector<128x128xf32>, vector<128x128xf32> -> vector<128x128xf32>
    %290 = arith.addf %286, %289 : vector<128x128xf32>
    %c152_281 = arith.constant 152 : index
    %c0_282 = arith.constant 0 : index
    %291 = vector.load %arg14[%c152_281, %c0_282] : memref<1296x128xf32, #tpu.memory_space<vmem>>, vector<128x128xf32>
    %c384_283 = arith.constant 384 : index
    %c0_284 = arith.constant 0 : index
    %292 = vector.load %arg7[%c384_283, %c0_284] : memref<1152x128xf32, #tpu.memory_space<vmem>>, vector<128x128xf32>
    %cst_285 = arith.constant dense<0.000000e+00> : vector<128x128xf32>
    %293 = tpu.matmul %291, %292, %cst_285 {dimension_numbers = #tpu.dot_dimension_numbers<[1], [0], [0], [1], [0, 0, 1, 1], [], []>} : vector<128x128xf32>, vector<128x128xf32>, vector<128x128xf32> -> vector<128x128xf32>
    %294 = arith.addf %290, %293 : vector<128x128xf32>
    %c584 = arith.constant 584 : index
    %c0_286 = arith.constant 0 : index
    %295 = vector.load %arg14[%c584, %c0_286] : memref<1296x128xf32, #tpu.memory_space<vmem>>, vector<128x128xf32>
    %c512_287 = arith.constant 512 : index
    %c0_288 = arith.constant 0 : index
    %296 = vector.load %arg7[%c512_287, %c0_288] : memref<1152x128xf32, #tpu.memory_space<vmem>>, vector<128x128xf32>
    %cst_289 = arith.constant dense<0.000000e+00> : vector<128x128xf32>
    %297 = tpu.matmul %295, %296, %cst_289 {dimension_numbers = #tpu.dot_dimension_numbers<[1], [0], [0], [1], [0, 0, 1, 1], [], []>} : vector<128x128xf32>, vector<128x128xf32>, vector<128x128xf32> -> vector<128x128xf32>
    %298 = arith.addf %294, %297 : vector<128x128xf32>
    %c1016 = arith.constant 1016 : index
    %c0_290 = arith.constant 0 : index
    %299 = vector.load %arg14[%c1016, %c0_290] : memref<1296x128xf32, #tpu.memory_space<vmem>>, vector<128x128xf32>
    %c640_291 = arith.constant 640 : index
    %c0_292 = arith.constant 0 : index
    %300 = vector.load %arg7[%c640_291, %c0_292] : memref<1152x128xf32, #tpu.memory_space<vmem>>, vector<128x128xf32>
    %cst_293 = arith.constant dense<0.000000e+00> : vector<128x128xf32>
    %301 = tpu.matmul %299, %300, %cst_293 {dimension_numbers = #tpu.dot_dimension_numbers<[1], [0], [0], [1], [0, 0, 1, 1], [], []>} : vector<128x128xf32>, vector<128x128xf32>, vector<128x128xf32> -> vector<128x128xf32>
    %302 = arith.addf %298, %301 : vector<128x128xf32>
    %c176_294 = arith.constant 176 : index
    %c0_295 = arith.constant 0 : index
    %303 = vector.load %arg14[%c176_294, %c0_295] : memref<1296x128xf32, #tpu.memory_space<vmem>>, vector<128x128xf32>
    %c768_296 = arith.constant 768 : index
    %c0_297 = arith.constant 0 : index
    %304 = vector.load %arg7[%c768_296, %c0_297] : memref<1152x128xf32, #tpu.memory_space<vmem>>, vector<128x128xf32>
    %cst_298 = arith.constant dense<0.000000e+00> : vector<128x128xf32>
    %305 = tpu.matmul %303, %304, %cst_298 {dimension_numbers = #tpu.dot_dimension_numbers<[1], [0], [0], [1], [0, 0, 1, 1], [], []>} : vector<128x128xf32>, vector<128x128xf32>, vector<128x128xf32> -> vector<128x128xf32>
    %306 = arith.addf %302, %305 : vector<128x128xf32>
    %c608 = arith.constant 608 : index
    %c0_299 = arith.constant 0 : index
    %307 = vector.load %arg14[%c608, %c0_299] : memref<1296x128xf32, #tpu.memory_space<vmem>>, vector<128x128xf32>
    %c896_300 = arith.constant 896 : index
    %c0_301 = arith.constant 0 : index
    %308 = vector.load %arg7[%c896_300, %c0_301] : memref<1152x128xf32, #tpu.memory_space<vmem>>, vector<128x128xf32>
    %cst_302 = arith.constant dense<0.000000e+00> : vector<128x128xf32>
    %309 = tpu.matmul %307, %308, %cst_302 {dimension_numbers = #tpu.dot_dimension_numbers<[1], [0], [0], [1], [0, 0, 1, 1], [], []>} : vector<128x128xf32>, vector<128x128xf32>, vector<128x128xf32> -> vector<128x128xf32>
    %310 = arith.addf %306, %309 : vector<128x128xf32>
    %c1040 = arith.constant 1040 : index
    %c0_303 = arith.constant 0 : index
    %311 = vector.load %arg14[%c1040, %c0_303] : memref<1296x128xf32, #tpu.memory_space<vmem>>, vector<128x128xf32>
    %c1024_304 = arith.constant 1024 : index
    %c0_305 = arith.constant 0 : index
    %312 = vector.load %arg7[%c1024_304, %c0_305] : memref<1152x128xf32, #tpu.memory_space<vmem>>, vector<128x128xf32>
    %cst_306 = arith.constant dense<0.000000e+00> : vector<128x128xf32>
    %313 = tpu.matmul %311, %312, %cst_306 {dimension_numbers = #tpu.dot_dimension_numbers<[1], [0], [0], [1], [0, 0, 1, 1], [], []>} : vector<128x128xf32>, vector<128x128xf32>, vector<128x128xf32> -> vector<128x128xf32>
    %314 = arith.addf %310, %313 : vector<128x128xf32>
    %c0_i32_307 = arith.constant 0 : i32
    %c0_i32_308 = arith.constant 0 : i32
    %315 = tpu.memref_slice %arg11[%0, %c0_i32_307, %c0_i32_308] : memref<2x496x128xf32, #tpu.memory_space<vmem>> -> memref<1x496x128xf32, #tpu.memory_space<vmem>>
    %316 = tpu.memref_squeeze %315 : memref<1x496x128xf32, #tpu.memory_space<vmem>> -> memref<496x128xf32, #tpu.memory_space<vmem>>
    %c178 = arith.constant 178 : index
    %c0_309 = arith.constant 0 : index
    %317 = vector.load %316[%c178, %c0_309] : memref<496x128xf32, #tpu.memory_space<vmem>>, vector<128x128xf32>
    %c0_310 = arith.constant 0 : index
    %c0_311 = arith.constant 0 : index
    %318 = vector.load %arg8[%c0_310, %c0_311] : memref<1x128xf32, #tpu.memory_space<vmem>>, vector<1x128xf32>
    %319 = vector.broadcast %318 : vector<1x128xf32> to vector<128x128xf32>
    %320 = arith.mulf %314, %319 : vector<128x128xf32>
    %c0_312 = arith.constant 0 : index
    %c0_313 = arith.constant 0 : index
    %321 = vector.load %arg9[%c0_312, %c0_313] : memref<1x128xf32, #tpu.memory_space<vmem>>, vector<1x128xf32>
    %322 = vector.broadcast %321 : vector<1x128xf32> to vector<128x128xf32>
    %323 = arith.addf %320, %322 : vector<128x128xf32>
    %324 = arith.addf %323, %317 : vector<128x128xf32>
    %cst_314 = arith.constant 0.000000e+00 : f32
    %325 = vector.broadcast %cst_314 : f32 to vector<128x128xf32>
    %326 = arith.maximumf %324, %325 : vector<128x128xf32>
    %c0_315 = arith.constant 0 : index
    %c128_316 = arith.constant 128 : index
    %c0_317 = arith.constant 0 : index
    %327 = vector.load %arg10[%c0_315, %c128_316, %c0_317] : memref<1x384x128xf32, #tpu.memory_space<vmem>>, vector<1x128x128xf32>
    %328 = vector.shape_cast %327 : vector<1x128x128xf32> to vector<128x128xf32>
    %329 = vector.shape_cast %326 : vector<128x128xf32> to vector<1x128x128xf32>
    tpu.vector_store %arg10[%c0_315, %c128_316, %c0_317], %329 {strides = array<i32>} : memref<1x384x128xf32, #tpu.memory_space<vmem>>, vector<1x128x128xf32>,
    %c256_318 = arith.constant 256 : index
    %c0_319 = arith.constant 0 : index
    %330 = vector.load %arg14[%c256_318, %c0_319] : memref<1296x128xf32, #tpu.memory_space<vmem>>, vector<128x128xf32>
    %c0_320 = arith.constant 0 : index
    %c0_321 = arith.constant 0 : index
    %331 = vector.load %arg7[%c0_320, %c0_321] : memref<1152x128xf32, #tpu.memory_space<vmem>>, vector<128x128xf32>
    %cst_322 = arith.constant dense<0.000000e+00> : vector<128x128xf32>
    %332 = tpu.matmul %330, %331, %cst_322 {dimension_numbers = #tpu.dot_dimension_numbers<[1], [0], [0], [1], [0, 0, 1, 1], [], []>} : vector<128x128xf32>, vector<128x128xf32>, vector<128x128xf32> -> vector<128x128xf32>
    %c688 = arith.constant 688 : index
    %c0_323 = arith.constant 0 : index
    %333 = vector.load %arg14[%c688, %c0_323] : memref<1296x128xf32, #tpu.memory_space<vmem>>, vector<128x128xf32>
    %c128_324 = arith.constant 128 : index
    %c0_325 = arith.constant 0 : index
    %334 = vector.load %arg7[%c128_324, %c0_325] : memref<1152x128xf32, #tpu.memory_space<vmem>>, vector<128x128xf32>
    %cst_326 = arith.constant dense<0.000000e+00> : vector<128x128xf32>
    %335 = tpu.matmul %333, %334, %cst_326 {dimension_numbers = #tpu.dot_dimension_numbers<[1], [0], [0], [1], [0, 0, 1, 1], [], []>} : vector<128x128xf32>, vector<128x128xf32>, vector<128x128xf32> -> vector<128x128xf32>
    %336 = arith.addf %332, %335 : vector<128x128xf32>
    %c1120 = arith.constant 1120 : index
    %c0_327 = arith.constant 0 : index
    %337 = vector.load %arg14[%c1120, %c0_327] : memref<1296x128xf32, #tpu.memory_space<vmem>>, vector<128x128xf32>
    %c256_328 = arith.constant 256 : index
    %c0_329 = arith.constant 0 : index
    %338 = vector.load %arg7[%c256_328, %c0_329] : memref<1152x128xf32, #tpu.memory_space<vmem>>, vector<128x128xf32>
    %cst_330 = arith.constant dense<0.000000e+00> : vector<128x128xf32>
    %339 = tpu.matmul %337, %338, %cst_330 {dimension_numbers = #tpu.dot_dimension_numbers<[1], [0], [0], [1], [0, 0, 1, 1], [], []>} : vector<128x128xf32>, vector<128x128xf32>, vector<128x128xf32> -> vector<128x128xf32>
    %340 = arith.addf %336, %339 : vector<128x128xf32>
    %c280_331 = arith.constant 280 : index
    %c0_332 = arith.constant 0 : index
    %341 = vector.load %arg14[%c280_331, %c0_332] : memref<1296x128xf32, #tpu.memory_space<vmem>>, vector<128x128xf32>
    %c384_333 = arith.constant 384 : index
    %c0_334 = arith.constant 0 : index
    %342 = vector.load %arg7[%c384_333, %c0_334] : memref<1152x128xf32, #tpu.memory_space<vmem>>, vector<128x128xf32>
    %cst_335 = arith.constant dense<0.000000e+00> : vector<128x128xf32>
    %343 = tpu.matmul %341, %342, %cst_335 {dimension_numbers = #tpu.dot_dimension_numbers<[1], [0], [0], [1], [0, 0, 1, 1], [], []>} : vector<128x128xf32>, vector<128x128xf32>, vector<128x128xf32> -> vector<128x128xf32>
    %344 = arith.addf %340, %343 : vector<128x128xf32>
    %c712 = arith.constant 712 : index
    %c0_336 = arith.constant 0 : index
    %345 = vector.load %arg14[%c712, %c0_336] : memref<1296x128xf32, #tpu.memory_space<vmem>>, vector<128x128xf32>
    %c512_337 = arith.constant 512 : index
    %c0_338 = arith.constant 0 : index
    %346 = vector.load %arg7[%c512_337, %c0_338] : memref<1152x128xf32, #tpu.memory_space<vmem>>, vector<128x128xf32>
    %cst_339 = arith.constant dense<0.000000e+00> : vector<128x128xf32>
    %347 = tpu.matmul %345, %346, %cst_339 {dimension_numbers = #tpu.dot_dimension_numbers<[1], [0], [0], [1], [0, 0, 1, 1], [], []>} : vector<128x128xf32>, vector<128x128xf32>, vector<128x128xf32> -> vector<128x128xf32>
    %348 = arith.addf %344, %347 : vector<128x128xf32>
    %c1144 = arith.constant 1144 : index
    %c0_340 = arith.constant 0 : index
    %349 = vector.load %arg14[%c1144, %c0_340] : memref<1296x128xf32, #tpu.memory_space<vmem>>, vector<128x128xf32>
    %c640_341 = arith.constant 640 : index
    %c0_342 = arith.constant 0 : index
    %350 = vector.load %arg7[%c640_341, %c0_342] : memref<1152x128xf32, #tpu.memory_space<vmem>>, vector<128x128xf32>
    %cst_343 = arith.constant dense<0.000000e+00> : vector<128x128xf32>
    %351 = tpu.matmul %349, %350, %cst_343 {dimension_numbers = #tpu.dot_dimension_numbers<[1], [0], [0], [1], [0, 0, 1, 1], [], []>} : vector<128x128xf32>, vector<128x128xf32>, vector<128x128xf32> -> vector<128x128xf32>
    %352 = arith.addf %348, %351 : vector<128x128xf32>
    %c304_344 = arith.constant 304 : index
    %c0_345 = arith.constant 0 : index
    %353 = vector.load %arg14[%c304_344, %c0_345] : memref<1296x128xf32, #tpu.memory_space<vmem>>, vector<128x128xf32>
    %c768_346 = arith.constant 768 : index
    %c0_347 = arith.constant 0 : index
    %354 = vector.load %arg7[%c768_346, %c0_347] : memref<1152x128xf32, #tpu.memory_space<vmem>>, vector<128x128xf32>
    %cst_348 = arith.constant dense<0.000000e+00> : vector<128x128xf32>
    %355 = tpu.matmul %353, %354, %cst_348 {dimension_numbers = #tpu.dot_dimension_numbers<[1], [0], [0], [1], [0, 0, 1, 1], [], []>} : vector<128x128xf32>, vector<128x128xf32>, vector<128x128xf32> -> vector<128x128xf32>
    %356 = arith.addf %352, %355 : vector<128x128xf32>
    %c736 = arith.constant 736 : index
    %c0_349 = arith.constant 0 : index
    %357 = vector.load %arg14[%c736, %c0_349] : memref<1296x128xf32, #tpu.memory_space<vmem>>, vector<128x128xf32>
    %c896_350 = arith.constant 896 : index
    %c0_351 = arith.constant 0 : index
    %358 = vector.load %arg7[%c896_350, %c0_351] : memref<1152x128xf32, #tpu.memory_space<vmem>>, vector<128x128xf32>
    %cst_352 = arith.constant dense<0.000000e+00> : vector<128x128xf32>
    %359 = tpu.matmul %357, %358, %cst_352 {dimension_numbers = #tpu.dot_dimension_numbers<[1], [0], [0], [1], [0, 0, 1, 1], [], []>} : vector<128x128xf32>, vector<128x128xf32>, vector<128x128xf32> -> vector<128x128xf32>
    %360 = arith.addf %356, %359 : vector<128x128xf32>
    %c1168 = arith.constant 1168 : index
    %c0_353 = arith.constant 0 : index
    %361 = vector.load %arg14[%c1168, %c0_353] : memref<1296x128xf32, #tpu.memory_space<vmem>>, vector<128x128xf32>
    %c1024_354 = arith.constant 1024 : index
    %c0_355 = arith.constant 0 : index
    %362 = vector.load %arg7[%c1024_354, %c0_355] : memref<1152x128xf32, #tpu.memory_space<vmem>>, vector<128x128xf32>
    %cst_356 = arith.constant dense<0.000000e+00> : vector<128x128xf32>
    %363 = tpu.matmul %361, %362, %cst_356 {dimension_numbers = #tpu.dot_dimension_numbers<[1], [0], [0], [1], [0, 0, 1, 1], [], []>} : vector<128x128xf32>, vector<128x128xf32>, vector<128x128xf32> -> vector<128x128xf32>
    %364 = arith.addf %360, %363 : vector<128x128xf32>
    %c0_i32_357 = arith.constant 0 : i32
    %c0_i32_358 = arith.constant 0 : i32
    %365 = tpu.memref_slice %arg11[%0, %c0_i32_357, %c0_i32_358] : memref<2x496x128xf32, #tpu.memory_space<vmem>> -> memref<1x496x128xf32, #tpu.memory_space<vmem>>
    %366 = tpu.memref_squeeze %365 : memref<1x496x128xf32, #tpu.memory_space<vmem>> -> memref<496x128xf32, #tpu.memory_space<vmem>>
    %c306 = arith.constant 306 : index
    %c0_359 = arith.constant 0 : index
    %367 = vector.load %366[%c306, %c0_359] : memref<496x128xf32, #tpu.memory_space<vmem>>, vector<128x128xf32>
    %c0_360 = arith.constant 0 : index
    %c0_361 = arith.constant 0 : index
    %368 = vector.load %arg8[%c0_360, %c0_361] : memref<1x128xf32, #tpu.memory_space<vmem>>, vector<1x128xf32>
    %369 = vector.broadcast %368 : vector<1x128xf32> to vector<128x128xf32>
    %370 = arith.mulf %364, %369 : vector<128x128xf32>
    %c0_362 = arith.constant 0 : index
    %c0_363 = arith.constant 0 : index
    %371 = vector.load %arg9[%c0_362, %c0_363] : memref<1x128xf32, #tpu.memory_space<vmem>>, vector<1x128xf32>
    %372 = vector.broadcast %371 : vector<1x128xf32> to vector<128x128xf32>
    %373 = arith.addf %370, %372 : vector<128x128xf32>
    %374 = arith.addf %373, %367 : vector<128x128xf32>
    %cst_364 = arith.constant 0.000000e+00 : f32
    %375 = vector.broadcast %cst_364 : f32 to vector<128x128xf32>
    %376 = arith.maximumf %374, %375 : vector<128x128xf32>
    %c0_365 = arith.constant 0 : index
    %c256_366 = arith.constant 256 : index
    %c0_367 = arith.constant 0 : index
    %377 = vector.load %arg10[%c0_365, %c256_366, %c0_367] : memref<1x384x128xf32, #tpu.memory_space<vmem>>, vector<1x128x128xf32>
    %378 = vector.shape_cast %377 : vector<1x128x128xf32> to vector<128x128xf32>
    %379 = vector.shape_cast %376 : vector<128x128xf32> to vector<1x128x128xf32>
    tpu.vector_store %arg10[%c0_365, %c256_366, %c0_367], %379 {strides = array<i32>} : memref<1x384x128xf32, #tpu.memory_space<vmem>>, vector<1x128x128xf32>,
    return
  }
  func.func @transform_1(%arg0: i32, %arg1: i32) -> (i32, i32) {
    %c0_i32 = arith.constant 0 : i32
    %c0_i32_0 = arith.constant 0 : i32
    %c0_i32_1 = arith.constant 0 : i32
    return %c0_i32, %c0_i32_0 : i32, i32
  }
  func.func @transform_2(%arg0: i32, %arg1: i32) -> (i32, i32) {
    %c0_i32 = arith.constant 0 : i32
    %c0_i32_0 = arith.constant 0 : i32
    %c0_i32_1 = arith.constant 0 : i32
    return %c0_i32, %c0_i32_0 : i32, i32
  }
  func.func @transform_3(%arg0: i32, %arg1: i32) -> (i32, i32) {
    %c0_i32 = arith.constant 0 : i32
    %c0_i32_0 = arith.constant 0 : i32
    %c0_i32_1 = arith.constant 0 : i32
    return %c0_i32, %c0_i32_0 : i32, i32
  }
  func.func @transform_4(%arg0: i32, %arg1: i32) -> (i32, i32) {
    %c0_i32 = arith.constant 0 : i32
    %c0_i32_0 = arith.constant 0 : i32
    %c0_i32_1 = arith.constant 0 : i32
    return %c0_i32, %c0_i32_0 : i32, i32
  }
  func.func @transform_5(%arg0: i32, %arg1: i32) -> (i32, i32) {
    %c0_i32 = arith.constant 0 : i32
    %c0_i32_0 = arith.constant 0 : i32
    %c0_i32_1 = arith.constant 0 : i32
    return %c0_i32, %c0_i32_0 : i32, i32
  }
  func.func @transform_6(%arg0: i32, %arg1: i32) -> (i32, i32) {
    %c0_i32 = arith.constant 0 : i32
    %c0_i32_0 = arith.constant 0 : i32
    %c0_i32_1 = arith.constant 0 : i32
    return %c0_i32, %c0_i32_0 : i32, i32
  }
  func.func @transform_7(%arg0: i32, %arg1: i32) -> (i32, i32) {
    %c0_i32 = arith.constant 0 : i32
    %c0_i32_0 = arith.constant 0 : i32
    %c0_i32_1 = arith.constant 0 : i32
    return %c0_i32, %c0_i32_0 : i32, i32
  }
  func.func @transform_8(%arg0: i32, %arg1: i32) -> (i32, i32, i32) {
    %c0_i32 = arith.constant 0 : i32
    %c0_i32_0 = arith.constant 0 : i32
    return %arg0, %arg1, %c0_i32 : i32, i32, i32
  }
}

</mosaic_0001>

<bundles_post_ra>
// kernel: tpu_custom_call.1
= control target key start
LH: loop header
LB: loop body
LE: loop exit
PB: predicated region body
PF: predicated region fallthrough
CT: control target
= control target key end

     0   :  { %s12984_s0 = inlined_call_operand.hbm [shape: f32[1008,128], index: 0, kind: input, shape index: {}]   ;;  %s12985_s1 = inlined_call_operand.vmem [shape: f32[440,1], index: 1, kind: input, shape index: {}]   ;;  %s12986_s2 = inlined_call_operand.hbm [shape: f32[1152,128], index: 2, kind: input, shape index: {}]   ;;  %s12987_s3 = inlined_call_operand.vmem [shape: f32[1,128], index: 3, kind: input, shape index: {}]   ;;  %s12988_s4 = inlined_call_operand.vmem [shape: f32[1,128], index: 4, kind: input, shape index: {}]   ;;  %s12989_s5 = inlined_call_operand.hbm [shape: f32[1152,128], index: 5, kind: input, shape index: {}]   ;;  %s12990_s6 = inlined_call_operand.vmem [shape: f32[1,128], index: 6, kind: input, shape index: {}]   ;;  %s12991_s7 = inlined_call_operand.vmem [shape: f32[1,128], index: 7, kind: input, shape index: {}]   ;;  %s12992_s8 = inlined_call_operand.hbm [shape: f32[2,384,128], index: 8, kind: output, shape index: {}]  }
   0x1   :  { %13025 = sst [smem:[#allocation41_spill]] %s12986_s2 }
   0x2   :  { %13026 = sst [smem:[#allocation42_spill]] %s12989_s5 }
   0x3   :  { %13 = vsyncpa [#allocation8], 0 }
   0x4   :  { %14 = vsyncpa [#allocation11], 0 }
   0x5   :  { %15 = vsyncpa [#allocation9], 0 }
   0x6   :  { %17 = vsyncpa [#allocation9 + $0x1], 0  ;;  %s9117_s27 = smov 0   ;;  %s9119_s28 = smov 0  }
   0x7   :  { %s9121_s29 = smov 0   ;;  %s9123_s30 = smov 0  }
   0x8   :  { %s9125_s9 = smov 0   ;;  %s9127_s10 = smov 0  }
   0x9 LB: > { %13027 = sst [smem:[#allocation23_spill]] %s9057_s9  ;;  %s8653_s11 = sadd.s32 4294967295, %s9061_s10   ;;  %s9061_s10 = sphi %s9127_s10, %s23_s10   ;;  %s9057_s9 = sphi %s9125_s9, %s13122_s9   ;;  %s9053_s30 = sphi %s9123_s30, %s13121_s30   ;;  %s9049_s29 = sphi %s9121_s29, %s13125_s29   ;;  %s9045_s28 = sphi %s9119_s28, %s13124_s28   ;;  %s9041_s27 = sphi %s9117_s27, %s13123_s27  }
   0xa   : > { %s8654_s12 = sadd.s32 4294967294, %s9061_s10   ;;  %s35_s13 = sadd.s32 1, %s9057_s9 }
   0xb   : > { %s191_s14 = sadd.s32 1, %s9049_s29  ;;  %p37_p0 = scmp.ge.s32.totalorder %s35_s13, 2 }
   0xc   : > { %p201_p1 = scmp.ne.s32.totalorder %s9049_s29, %s9045_s28  ;;  %p202_p2 = scmp.eq.s32.totalorder %s8653_s11, 1 }
   0xd   : > { %p207_p3 = scmp.ne.s32.totalorder %s9045_s28, %s9041_s27  ;;  %s13127_s13 = smov (%p37_p0, %s35_s13), 0 }
   0xe   : > { %13028 = sst [smem:[#allocation24_spill]] %s13127_s13  ;;  %p9157_p4 = por %p202_p2, %p201_p1 }
   0xf   : > { %p208_p5 = scmp.eq.s32.totalorder %s8654_s12, 1  ;;  %s186_s16 = ssub.s32 %s9057_s9, %s13127_s13 }
  0x10   : > { %p8655_p6 = scmp.ge.s32.totalorder %s9061_s10, 1  ;;  %p189_p7 = scmp.eq.s32.totalorder %s186_s16, 0 }
  0x11   : > { %p9164_p8 = por %p208_p5, %p207_p3  ;;  %p215_p9 = scmp.lt.s32.totalorder %s9061_s10, 3 }
  0x12   : > { %s9170_s18 = scalar_select %p189_p7, %s9049_s29, %s191_s14  }
  0x13   : > { %p9172_p10 = pnand %p8655_p6, %p215_p9  ;;  %p9176_p11 = scmp.eq.s32.totalorder %s8653_s11, 0 }
  0x14   : > { %s13033_s2 = sld [smem:[#allocation41_spill]]  ;;  %s9063_s24 = smov [#allocation7]  }
  0x15   : > { %p8695_p12 = pneg %p9172_p10  ;;  %s231_s25 = sshll.u32 %s9063_s24, 4  ;;  %s232_s25 = int_to_ptr.vmem [resolvable:$true] %s231_s25 }
  0x16   : > { %s13034_s5 = sld [smem:[#allocation42_spill]]  ;;  %s9064_s14 = smov 128  }
  0x17   : > { %p8696_p13 = pnand %p9176_p11, %p8695_p12  ;;  %s9065_s16 = smov 8  }
  0x18   : > { %s9066_s13 = smov [#allocation10]  }
  0x19   : > { %s251_s21 = sshll.u32 %s9066_s13, 4  ;;  %273 = sbr.rel (%p9172_p10) target bundleno = 2086 (0x826), region = 48  ;;  %s252_s21 = int_to_ptr.vmem [resolvable:$true] %s251_s21 }
  0x1a   : > { %s229_s23 = sshll.u32 %s13033_s2, 4  ;;  %s230_s23 = int_to_ptr.hbm [resolvable:$true] %s229_s23 }
  0x1b   : > { %8698 = dma.hbm_to_vmem [thread:$0]  (!%p8696_p13), %s230_s23, 18432, %s232_s25, [#allocation8], %s9064_s14, %s9064_s14, %s9065_s16  }
  0x1c   : > { %s249_s11 = sshll.u32 %s13034_s5, 4  ;;  %s250_s11 = int_to_ptr.hbm [resolvable:$true] %s249_s11 }
  0x1d   : > { %8701 = dma.hbm_to_vmem [thread:$0]  (!%p8696_p13), %s250_s11, 18432, %s252_s21, [#allocation11], %s9064_s14, %s9064_s14, %s9065_s16  }
  0x1e   : > { %9026 = dma.done.wait (%p9176_p11), [#allocation8], 18432  }
  0x1f   : > { %9028 = vsyncadd (%p9176_p11), [#allocation8], 4294948864 }
  0x20   : > { %9030 = dma.done.wait (%p9176_p11), [#allocation11], 18432  }
  0x21   : > { %9032 = vsyncadd (%p9176_p11), [#allocation11], 4294948864  ;;  %s303_s13 = sand.u32 1, %s9045_s28   ;;  %s317_s22 = smul.u32 504, %s9053_s30 }
  0x22   : > { %s8683_s19 = smul.u32 384, %s303_s13  ;;  %s9067_s26 = smov [#allocation2]  }
  0x23   : > { %s318_s25 = scalar_lea.hbm %s12984_s0, %s317_s22  ;;  %s328_s12 = sshll.u32 %s9067_s26, 4  ;;  %s329_s12 = int_to_ptr.vmem [resolvable:$true] %s328_s12 }
  0x24   : > { %s326_s11 = sshll.u32 %s318_s25, 4  ;;  %s8953_s2 = scalar_lea.hbm %s12984_s0, 1008  ;;  %s327_s11 = int_to_ptr.hbm [resolvable:$true] %s326_s11 }
  0x25   : > { %s8949_s14 = sshra.s32 %s327_s11, 4  ;;  %s8950_s14 = int_to_ptr.hbm [resolvable:$true] %s8949_s14 }
  0x26   : > { %s8951_s20 = scalar_lea.hbm %s8950_s14, 496  ;;  %p8954_p1 = scmp.lt.s32.totalorder %s8950_s14, %s12984_s0 }
  0x27   : > { %p8952_p0 = scmp.ne.s32.totalorder %s8950_s14, %s8951_s20  ;;  %p8955_p2 = scmp.lt.s32.totalorder %s8953_s2, %s8951_s20 }
  0x29   : > { %p8956_p3 = por %p8955_p2, %p8954_p1 }
  0x2b   : > { %p8957_p5 = pnand %p8956_p3, %p8952_p0 }
  0x2d   : > { %8960 = shalt.err (!%p8957_p5)  }
  0x2e   : > { %331 = dma.hbm_to_vmem [thread:$0]  %s327_s11, 7936, %s329_s12, [#allocation6] }
  0x2f   : > { %s9213_s22 = scalar_lea.vmem [#allocation12], %s8683_s19 }
  0x30   : > { %9033 = dma.done.wait [#allocation6], 7936 }
  0x31   : > { %9034 = vsyncadd [#allocation6], 4294959360  ;;  %v9215_v0 = vld [vmem:[#allocation7 + $0xf8] sm:$0xff]  ;;  %v9225_v4 = vld [vmem:[#allocation7 + $0xf0] sm:$0xff]  ;;  %s8684_s16 = smul.u32 384, %s9053_s30  ;;  %s8540_s9 = sshll.u32 %s9213_s22, 4  ;;  %s8541_s9 = int_to_ptr.vmem [resolvable:$true] %s8540_s9 }
  0x32   : > { %v9217_v1 = vld [vmem:[#allocation7 + $0x78] sm:$0xff]  ;;  %798 = vmatpush.msra.mxu0 %v9215_v0  ;;  %v9227_v5 = vld [vmem:[#allocation7 + $0x70] sm:$0xff]  ;;  %v9235_v8 = vld [vmem:[#allocation7 + $0xe8] sm:$0xff]  ;;  %s8526_s30 = scalar_lea.sflag [#allocation9], %s303_s13  ;;  %s8993_s12 = scalar_lea.hbm %s12992_s8, 768 }
  0x33   : > { %v9219_v2 = vld [vmem:[#allocation7 + $0x178] sm:$0xff]  ;;  %863 = vmatpush.msra.mxu1 %v9217_v1  ;;  %v9231_v6 = vld [vmem:[#allocation7 + $0x170] sm:$0xff]  ;;  %v9239_v9 = vld [vmem:[#allocation7 + $0x68] sm:$0xff]  ;;  %s8539_s5 = scalar_lea.hbm %s12992_s8, %s8684_s16 }
  0x34   : > { %v9223_v3 = vld [vmem:[#allocation7 + $0x1f8] sm:$0xff]  ;;  %960 = vmatpush.msra.mxu2 %v9219_v2  ;;  %v9233_v7 = vld [vmem:[#allocation7 + $0x1f0] sm:$0xff]  ;;  %799 = vmatpush.msra.mxu0 %v9225_v4  ;;  %v9241_v10 = vld [vmem:[#allocation7 + $0x168] sm:$0xff]  ;;  %s8542_s19 = sshll.u32 %s8539_s5, 4  ;;  %s8543_s19 = int_to_ptr.hbm [resolvable:$true] %s8542_s19 }
  0x35   : > { %8667 = vmatpush.msra.mxu3 %v9223_v3  ;;  %864 = vmatpush.msra.mxu1 %v9227_v5  ;;  %v9243_v11 = vld [vmem:[#allocation7 + $0x1e8] sm:$0xff]  ;;  %v9247_v12 = vld [vmem:[#allocation7 + $0xe0] sm:$0xff]  ;;  %v9259_v16 = vld [vmem:[#allocation7 + $0xd8] sm:$0xff]  ;;  %s8987_s23 = sshra.s32 %s8543_s19, 4  ;;  %s8988_s23 = int_to_ptr.hbm [resolvable:$true] %s8987_s23 }
  0x36   : > { %961 = vmatpush.msra.mxu2 %v9231_v6  ;;  %v9249_v13 = vld [vmem:[#allocation7 + $0x60] sm:$0xff]  ;;  %800 = vmatpush.msra.mxu0 %v9235_v8  ;;  %v9261_v17 = vld [vmem:[#allocation7 + $0x58] sm:$0xff]  ;;  %v792_v20 = vld [vmem:[#allocation7 + $0xd0] sm:$0xff]  ;;  %s8989_s24 = scalar_lea.hbm %s8988_s23, 384  ;;  %p8994_p10 = scmp.lt.s32.totalorder %s8988_s23, %s12992_s8 }
  0x37   : > { %8668 = vmatpush.msra.mxu3 %v9233_v7  ;;  %865 = vmatpush.msra.mxu1 %v9239_v9  ;;  %v9253_v14 = vld [vmem:[#allocation7 + $0x160] sm:$0xff]  ;;  %v9265_v18 = vld [vmem:[#allocation7 + $0x158] sm:$0xff]  ;;  %v9271_v21 = vld [vmem:[#allocation7 + $0x50] sm:$0xff]  ;;  %p8990_p6 = scmp.ne.s32.totalorder %s8988_s23, %s8989_s24  ;;  %p8995_p11 = scmp.lt.s32.totalorder %s8993_s12, %s8989_s24 }
  0x38   : > { %v9255_v15 = vld [vmem:[#allocation7 + $0x1e0] sm:$0xff]  ;;  %962 = vmatpush.msra.mxu2 %v9241_v10  ;;  %801 = vmatpush.msra.mxu0 %v9247_v12  ;;  %v9267_v19 = vld [vmem:[#allocation7 + $0x1d8] sm:$0xff]  ;;  %v9275_v22 = vld [vmem:[#allocation7 + $0x150] sm:$0xff] }
  0x39   : > { %8669 = vmatpush.msra.mxu3 %v9243_v11  ;;  %866 = vmatpush.msra.mxu1 %v9249_v13  ;;  %v9277_v23 = vld [vmem:[#allocation7 + $0x1d0] sm:$0xff]  ;;  %v791_v24 = vld [vmem:[#allocation7 + $0xc8] sm:$0xff]  ;;  %v790_v28 = vld [vmem:[#allocation7 + $0xc0] sm:$0xff]  ;;  %p8991_p7 = pnand %p8990_p6, %p9157_p4  ;;  %p8996_p12 = por %p8995_p11, %p8994_p10 }
  0x3a   : > { %963 = vmatpush.msra.mxu2 %v9253_v14  ;;  %802 = vmatpush.msra.mxu0 %v9259_v16  ;;  %v9281_v25 = vld [vmem:[#allocation7 + $0x48] sm:$0xff]  ;;  %v9290_v29 = vld [vmem:[#allocation7 + $0x40] sm:$0xff]  ;;  %v789_v32 = vld [vmem:[#allocation7 + $0xb8] sm:$0xff] }
  0x3b   : > { %8670 = vmatpush.msra.mxu3 %v9255_v15  ;;  %867 = vmatpush.msra.mxu1 %v9261_v17  ;;  %v9284_v26 = vld [vmem:[#allocation7 + $0x148] sm:$0xff]  ;;  %v9293_v30 = vld [vmem:[#allocation7 + $0x140] sm:$0xff]  ;;  %v9299_v33 = vld [vmem:[#allocation7 + $0x38] sm:$0xff]  ;;  %p8992_p9 = pneg %p8991_p7 }
  0x3c   : > { %964 = vmatpush.msra.mxu2 %v9265_v18  ;;  %803 = vmatpush.msra.mxu0 %v792_v20  ;;  %v9286_v27 = vld [vmem:[#allocation7 + $0x1c8] sm:$0xff]  ;;  %v9295_v31 = vld [vmem:[#allocation7 + $0x1c0] sm:$0xff]  ;;  %v9302_v34 = vld [vmem:[#allocation7 + $0x138] sm:$0xff] }
  0x3d   : > { %8671 = vmatpush.msra.mxu3 %v9267_v19  ;;  %868 = vmatpush.msra.mxu1 %v9271_v21  ;;  %v9304_v35 = vld [vmem:[#allocation7 + $0x1b8] sm:$0xff]  ;;  %v788_v36 = vld [vmem:[#allocation7 + $0xb0] sm:$0xff]  ;;  %v787_v40 = vld [vmem:[#allocation7 + $0xa8] sm:$0xff]  ;;  %p8997_p13 = pnand %p8996_p12, %p8992_p9 }
  0x3e   : > { %965 = vmatpush.msra.mxu2 %v9275_v22  ;;  %804 = vmatpush.msra.mxu0 %v791_v24  ;;  %v9308_v37 = vld [vmem:[#allocation7 + $0x30] sm:$0xff]  ;;  %v755_v41 = vld [vmem:[#allocation7 + $0x28] sm:$0xff]  ;;  %v786_v44 = vld [vmem:[#allocation7 + $0xa0] sm:$0xff] }
  0x3f   : > { %8672 = vmatpush.msra.mxu3 %v9277_v23  ;;  %869 = vmatpush.msra.mxu1 %v9281_v25  ;;  %v9311_v38 = vld [vmem:[#allocation7 + $0x130] sm:$0xff]  ;;  %v9318_v42 = vld [vmem:[#allocation7 + $0x128] sm:$0xff]  ;;  %v754_v45 = vld [vmem:[#allocation7 + $0x20] sm:$0xff] }
  0x40   : > { %966 = vmatpush.msra.mxu2 %v9284_v26  ;;  %805 = vmatpush.msra.mxu0 %v790_v28  ;;  %v9313_v39 = vld [vmem:[#allocation7 + $0x1b0] sm:$0xff]  ;;  %v9320_v43 = vld [vmem:[#allocation7 + $0x1a8] sm:$0xff]  ;;  %v9324_v46 = vld [vmem:[#allocation7 + $0x120] sm:$0xff] }
  0x41   : > { %8673 = vmatpush.msra.mxu3 %v9286_v27  ;;  %870 = vmatpush.msra.mxu1 %v9290_v29  ;;  %v9326_v47 = vld [vmem:[#allocation7 + $0x1a0] sm:$0xff]  ;;  %v785_v48 = vld [vmem:[#allocation7 + $0x98] sm:$0xff]  ;;  %v784_v52 = vld [vmem:[#allocation7 + $0x90] sm:$0xff] }
  0x42   : > { %967 = vmatpush.msra.mxu2 %v9293_v30  ;;  %806 = vmatpush.msra.mxu0 %v789_v32  ;;  %v753_v49 = vld [vmem:[#allocation7 + $0x18] sm:$0xff]  ;;  %v752_v53 = vld [vmem:[#allocation7 + $0x10] sm:$0xff]  ;;  %v783_v56 = vld [vmem:[#allocation7 + $0x88] sm:$0xff] }
  0x43   : > { %8674 = vmatpush.msra.mxu3 %v9295_v31  ;;  %871 = vmatpush.msra.mxu1 %v9299_v33  ;;  %v9330_v50 = vld [vmem:[#allocation7 + $0x118] sm:$0xff]  ;;  %v9336_v54 = vld [vmem:[#allocation7 + $0x110] sm:$0xff]  ;;  %v751_v57 = vld [vmem:[#allocation7 + $0x8] sm:$0xff] }
  0x44   : > { %968 = vmatpush.msra.mxu2 %v9302_v34  ;;  %807 = vmatpush.msra.mxu0 %v788_v36  ;;  %v9332_v51 = vld [vmem:[#allocation7 + $0x198] sm:$0xff]  ;;  %v9338_v55 = vld [vmem:[#allocation7 + $0x190] sm:$0xff]  ;;  %v9342_v58 = vld [vmem:[#allocation7 + $0x108] sm:$0xff] }
  0x45   : > { %8675 = vmatpush.msra.mxu3 %v9304_v35  ;;  %872 = vmatpush.msra.mxu1 %v9308_v37  ;;  %v9344_v59 = vld [vmem:[#allocation7 + $0x188] sm:$0xff]  ;;  %v782_v60 = vld [vmem:[#allocation7 + $0x80] sm:$0xff]  ;;  %v9356_v36 = vld [vmem:[#allocation7 + $0x378] sm:$0xff] }
  0x46   : > { %969 = vmatpush.msra.mxu2 %v9311_v38  ;;  %808 = vmatpush.msra.mxu0 %v787_v40  ;;  %v750_v61 = vld [vmem:[#allocation7] sm:$0xff]  ;;  %v490_v20 = vld [vmem:[#allocation2 + $0x1] sm:$0xff]  ;;  %v1524_v40 = vld [vmem:[#allocation7 + $0x3f8] sm:$0xff] }
  0x47   : > { %8676 = vmatpush.msra.mxu3 %v9313_v39  ;;  %873 = vmatpush.msra.mxu1 %v755_v41  ;;  %v9348_v62 = vld [vmem:[#allocation7 + $0x100] sm:$0xff]  ;;  %v368_v24 = vld [vmem:[#allocation2] sm:$0xff]  ;;  %v9360_v41 = vld [vmem:[#allocation7 + $0x370] sm:$0xff] }
  0x48   : > { %970 = vmatpush.msra.mxu2 %v9318_v42  ;;  %809 = vmatpush.msra.mxu0 %v786_v44  ;;  %v9350_v63 = vld [vmem:[#allocation7 + $0x180] sm:$0xff]  ;;  %v612_v28 = vld [vmem:[#allocation2 + $0x2] sm:$0xff]  ;;  %v1185_v44 = vld [vmem:[#allocation7 + $0x278] sm:$0xff] }
  0x49   : > { %8677 = vmatpush.msra.mxu3 %v9320_v43  ;;  %874 = vmatpush.msra.mxu1 %v754_v45  ;;  %v9354_v32 = vld [vmem:[#allocation2 + $0x38] sm:$0xff]  ;;  %v1523_v45 = vld [vmem:[#allocation7 + $0x3f0] sm:$0xff] }
  0x4a   : > { %971 = vmatpush.msra.mxu2 %v9324_v46  ;;  %810 = vmatpush.msra.mxu0 %v785_v48  ;;  %v9365_v48 = vld [vmem:[#allocation7 + $0x368] sm:$0xff] }
  0x4b   : > { %8678 = vmatpush.msra.mxu3 %v9326_v47  ;;  %875 = vmatpush.msra.mxu1 %v753_v49  ;;  %v1184_v49 = vld [vmem:[#allocation7 + $0x270] sm:$0xff] }
  0x4c   : > { %972 = vmatpush.msra.mxu2 %v9330_v50  ;;  %811 = vmatpush.msra.mxu0 %v784_v52  ;;  %v1522_v52 = vld [vmem:[#allocation7 + $0x3e8] sm:$0xff] }
  0x4d   : > { %8679 = vmatpush.msra.mxu3 %v9332_v51  ;;  %876 = vmatpush.msra.mxu1 %v752_v53  ;;  %v491_v53 = vld [vmem:[#allocation2 + $0x9] sm:$0xff] }
  0x4e   : > { %973 = vmatpush.msra.mxu2 %v9336_v54  ;;  %812 = vmatpush.msra.mxu0 %v783_v56  ;;  %v369_v56 = vld [vmem:[#allocation2 + $0x8] sm:$0xff] }
  0x4f   : > { %8680 = vmatpush.msra.mxu3 %v9338_v55  ;;  %877 = vmatpush.msra.mxu1 %v751_v57  ;;  %v1521_v57 = vld [vmem:[#allocation7 + $0x3e0] sm:$0xff] }
  0x50   : > { %974 = vmatpush.msra.mxu2 %v9342_v58  ;;  %813 = vmatpush.msra.mxu0 %v782_v60  ;;  %v9371_v60 = vld [vmem:[#allocation2 + $0x40] sm:$0xff] }
  0x51   : > { %8681 = vmatpush.msra.mxu3 %v9344_v59  ;;  %878 = vmatpush.msra.mxu1 %v750_v61  ;;  %v9374_v61 = vld [vmem:[#allocation7 + $0x360] sm:$0xff] }
  0x52   : > { %975 = vmatpush.msra.mxu2 %v9348_v62  ;;  %814 = vmatmul.f32.vlgmr.msra.gmra.mxu0 %v490_v20  ;;  %v1183_v20 = vld [vmem:[#allocation7 + $0x268] sm:$0xff] }
  0x53   : > { %8682 = vmatpush.msra.mxu3 %v9350_v63  ;;  %879 = vmatmul.f32.vlgmr.msra.gmra.mxu1 %v368_v24  ;;  %v9378_v24 = vld [vmem:[#allocation7 + $0x358] sm:$0xff] }
  0x54   : > { %976 = vmatmul.f32.vlgmr.msra.gmra.mxu2 %v612_v28  ;;  %1073 = vmatpush.msrb.mxu1 %v9223_v3  ;;  %v613_v3 = vld [vmem:[#allocation2 + $0xa] sm:$0xff]  ;;  %v1182_v28 = vld [vmem:[#allocation7 + $0x260] sm:$0xff] }
  0x55   : > { %1101 = vmatmul.f32.vlgmr.msra.gmra.mxu3 %v9354_v32  ;;  %1412 = vmatpush.msrb.mxu2 %v9356_v36 }
  0x56   : > { %1525 = vmatpush.msrb.mxu3 %v1524_v40  ;;  %1074 = vmatpush.msrb.mxu1 %v9233_v7  ;;  %v1520_v7 = vld [vmem:[#allocation7 + $0x3d8] sm:$0xff] }
  0x57   : > { %1413 = vmatpush.msrb.mxu2 %v9360_v41  ;;  %1186 = vmatpush.msrb.mxu0 %v1185_v44  ;;  %v492_v40 = vld [vmem:[#allocation2 + $0x11] sm:$0xff] }
  0x58   : > { %1526 = vmatpush.msrb.mxu3 %v1523_v45  ;;  %1075 = vmatpush.msrb.mxu1 %v9243_v11  ;;  %v1519_v11 = vld [vmem:[#allocation7 + $0x3d0] sm:$0xff]  ;;  %v370_v44 = vld [vmem:[#allocation2 + $0x10] sm:$0xff] }
  0x59   : > { %1414 = vmatpush.msrb.mxu2 %v9365_v48  ;;  %1187 = vmatpush.msrb.mxu0 %v1184_v49  ;;  %v614_v45 = vld [vmem:[#allocation2 + $0x12] sm:$0xff]  ;;  %v9388_v49 = vld [vmem:[#allocation7 + $0x350] sm:$0xff] }
  0x5a   : > { %1527 = vmatpush.msrb.mxu3 %v1522_v52  ;;  %1076 = vmatpush.msrb.mxu1 %v9255_v15  ;;  %v1518_v15 = vld [vmem:[#allocation7 + $0x3c8] sm:$0xff]  ;;  %v1181_v52 = vld [vmem:[#allocation7 + $0x258] sm:$0xff] }
  0x5b   : > { %817 = vmatmul.f32.gmra.mxu0 %v491_v53  ;;  %882 = vmatmul.f32.gmra.mxu1 %v369_v56  ;;  %v1516_v53 = vld [vmem:[#allocation7 + $0x3b8] sm:$0xff]  ;;  %v9394_v56 = vld [vmem:[#allocation2 + $0x18] sm:$0xff] }
  0x5c   : > { %979 = vmatmul.f32.gmra.mxu2 %v613_v3  ;;  %1528 = vmatpush.msrb.mxu3 %v1521_v57  ;;  %v9396_v3 = vld [vmem:[#allocation2 + $0x1a] sm:$0xff]  ;;  %v1515_v57 = vld [vmem:[#allocation7 + $0x3b0] sm:$0xff] }
  0x5d   : > { %1104 = vmatmul.f32.gmra.mxu3 %v9371_v60  ;;  %1077 = vmatpush.msrb.mxu1 %v9267_v19  ;;  %v9384_v19 = vld [vmem:[#allocation2 + $0x48] sm:$0xff] }
  0x5e   : > { %1529 = vmatpush.msrb.mxu3 %v1520_v7  ;;  %1415 = vmatpush.msrb.mxu2 %v9374_v61  ;;  %v1180_v7 = vld [vmem:[#allocation7 + $0x250] sm:$0xff] }
  0x5f   : > { %1188 = vmatpush.msrb.mxu0 %v1183_v20  ;;  %1078 = vmatpush.msrb.mxu1 %v9277_v23  ;;  %v1517_v23 = vld [vmem:[#allocation7 + $0x3c0] sm:$0xff]  ;;  %v9412_v20 = vld [vmem:[#allocation2 + $0x20] sm:$0xff] }
  0x60   : > { %1530 = vmatpush.msrb.mxu3 %v1519_v11  ;;  %1416 = vmatpush.msrb.mxu2 %v9378_v24  ;;  %v9414_v11 = vld [vmem:[#allocation2 + $0x22] sm:$0xff] }
  0x61   : > { %1189 = vmatpush.msrb.mxu0 %v1182_v28  ;;  %1079 = vmatpush.msrb.mxu1 %v9286_v27  ;;  %v9392_v27 = vld [vmem:[#allocation2 + $0x19] sm:$0xff]  ;;  %13035 = vst [vmem:[#allocation25_spill] sm:$0xff] %v9414_v11 }
  0x62   : > { %1531 = vmatpush.msrb.mxu3 %v1518_v15  ;;  %1417 = vmatpush.msrb.mxu2 %v9388_v49  ;;  %v1404_v28 = vld [vmem:[#allocation7 + $0x340] sm:$0xff]  ;;  %v1179_v15 = vld [vmem:[#allocation7 + $0x248] sm:$0xff] }
  0x63   : > { %820 = vmatmul.f32.gmra.mxu0 %v492_v40  ;;  %885 = vmatmul.f32.gmra.mxu1 %v370_v44  ;;  %v9427_v40 = vld [vmem:[#allocation2 + $0x28] sm:$0xff] }
  0x64   : > { %982 = vmatmul.f32.gmra.mxu2 %v614_v45  ;;  %1080 = vmatpush.msrb.mxu1 %v9295_v31  ;;  %v9399_v31 = vld [vmem:[#allocation2 + $0x50] sm:$0xff]  ;;  %v9432_v45 = vld [vmem:[#allocation2 + $0x60] sm:$0xff] }
  0x65   : > { %1107 = vmatmul.f32.gmra.mxu3 %v9384_v19  ;;  %1190 = vmatpush.msrb.mxu0 %v1181_v52  ;;  %v9429_v44 = vld [vmem:[#allocation2 + $0x2a] sm:$0xff] }
  0x66   : > { %1532 = vmatpush.msrb.mxu3 %v1517_v23  ;;  %1081 = vmatpush.msrb.mxu1 %v9304_v35  ;;  %v9406_v35 = vld [vmem:[#allocation7 + $0x348] sm:$0xff]  ;;  %13036 = vst [vmem:[#allocation26_spill] sm:$0xff] %v9429_v44  ;;  %v1178_v23 = vld [vmem:[#allocation7 + $0x240] sm:$0xff]  ;;  %v1512_v52 = vld [vmem:[#allocation7 + $0x398] sm:$0xff] }
  0x67   : > { %1418 = vmatpush.msrb.mxu2 %v9406_v35  ;;  %1191 = vmatpush.msrb.mxu0 %v1180_v7  ;;  %v9444_v7 = vld [vmem:[#allocation2 + $0x68] sm:$0xff] }
  0x68   : > { %1533 = vmatpush.msrb.mxu3 %v1516_v53  ;;  %1082 = vmatpush.msrb.mxu1 %v9313_v39  ;;  %v9410_v39 = vld [vmem:[#allocation2 + $0x21] sm:$0xff]  ;;  %v9438_v53 = vld [vmem:[#allocation2 + $0x31] sm:$0xff] }
  0x69   : > { %1419 = vmatpush.msrb.mxu2 %v1404_v28  ;;  %1192 = vmatpush.msrb.mxu0 %v1179_v15  ;;  %v1511_v28 = vld [vmem:[#allocation7 + $0x390] sm:$0xff]  ;;  %v1177_v15 = vld [vmem:[#allocation7 + $0x238] sm:$0xff] }
  0x6a   : > { %1083 = vmatpush.msrb.mxu1 %v9320_v43  ;;  %1534 = vmatpush.msrb.mxu3 %v1515_v57  ;;  %v9417_v43 = vld [vmem:[#allocation2 + $0x58] sm:$0xff] }
  0x6b   : > { %823 = vmatmul.f32.gmra.mxu0 %v9392_v27  ;;  %888 = vmatmul.f32.gmra.mxu1 %v9394_v56  ;;  %v9442_v57 = vld [vmem:[#allocation2 + $0x32] sm:$0xff] }
  0x6c   : > { %985 = vmatmul.f32.gmra.mxu2 %v9396_v3  ;;  %1084 = vmatpush.msrb.mxu1 %v9326_v47  ;;  %v1514_v47 = vld [vmem:[#allocation7 + $0x3a8] sm:$0xff]  ;;  %13037 = vst [vmem:[#allocation27_spill] sm:$0xff] %v9442_v57 }
  0x6d   : > { %1110 = vmatmul.f32.gmra.mxu3 %v9399_v31  ;;  %1193 = vmatpush.msrb.mxu0 %v1178_v23  ;;  %v9454_v23 = vld [vmem:[#allocation2 + $0x70] sm:$0xff] }
  0x6e   : > { %1085 = vmatpush.msrb.mxu1 %v9332_v51  ;;  %1535 = vmatpush.msrb.mxu3 %v1514_v47  ;;  %v9425_v51 = vld [vmem:[#allocation2 + $0x29] sm:$0xff] }
  0x6f   : > { %v1402_v47 = vld [vmem:[#allocation7 + $0x330] sm:$0xff]  ;;  %1194 = vmatpush.msrb.mxu0 %v1177_v15 }
  0x70   : > { %1086 = vmatpush.msrb.mxu1 %v9338_v55  ;;  %v1513_v55 = vld [vmem:[#allocation7 + $0x3a0] sm:$0xff]  ;;  %v9462_v15 = vld [vmem:[#allocation2 + $0x42] sm:$0xff] }
  0x71   : > { %1536 = vmatpush.msrb.mxu3 %v1513_v55  ;;  %v9450_v55 = vld [vmem:[#allocation2 + $0x39] sm:$0xff] }
  0x72   : > { %1087 = vmatpush.msrb.mxu1 %v9344_v59  ;;  %v1403_v59 = vld [vmem:[#allocation7 + $0x338] sm:$0xff] }
  0x73   : > { %826 = vmatmul.f32.gmra.mxu0 %v9410_v39  ;;  %891 = vmatmul.f32.gmra.mxu1 %v9412_v20 }
  0x74   : > { %988 = vmatmul.f32.gmra.mxu2 %v9414_v11  ;;  %1088 = vmatpush.msrb.mxu1 %v9350_v63  ;;  %v9440_v63 = vld [vmem:[#allocation2 + $0x30] sm:$0xff]  ;;  %v9465_v11 = vld [vmem:[#allocation2 + $0x78] sm:$0xff] }
  0x75   : > { %1113 = vmatmul.f32.gmra.mxu3 %v9417_v43  ;;  %1420 = vmatpush.msrb.mxu2 %v1403_v59  ;;  %v9452_v59 = vld [vmem:[#allocation2 + $0x3a] sm:$0xff] }
  0x76   : > { %1537 = vmatpush.msrb.mxu3 %v1512_v52  ;;  %v1510_v52 = vld [vmem:[#allocation7 + $0x388] sm:$0xff] }
  0x77   : > { %1421 = vmatpush.msrb.mxu2 %v1402_v47  ;;  %v1509_v47 = vld [vmem:[#allocation7 + $0x380] sm:$0xff] }
  0x78   : > { %1538 = vmatpush.msrb.mxu3 %v1511_v28  ;;  %v9460_v28 = vld [vmem:[#allocation2 + $0x41] sm:$0xff] }
  0x7a   : > { %1539 = vmatpush.msrb.mxu3 %v1510_v52  ;;  %v9473_v52 = vld [vmem:[#allocation2 + $0x49] sm:$0xff] }
  0x7b   : > { %829 = vmatmul.f32.gmra.mxu0 %v9425_v51  ;;  %894 = vmatmul.f32.gmra.mxu1 %v9427_v40 }
  0x7c   : > { %991 = vmatmul.f32.gmra.mxu2 %v9429_v44  ;;  %v1176_v44 = vld [vmem:[#allocation7 + $0x230] sm:$0xff]  ;;  %1540 = vmatpush.msrb.mxu3 %v1509_v47  ;;  %v9478_v47 = vld [vmem:[#allocation2 + $0x80] sm:$0xff] }
  0x7d   : > { %1116 = vmatmul.f32.gmra.mxu3 %v9432_v45  ;;  %1195 = vmatpush.msrb.mxu0 %v1176_v44  ;;  %v1400_v44 = vld [vmem:[#allocation7 + $0x320] sm:$0xff] }
  0x7e   : > { %2129 = vmatpush.msra.mxu3 %v9219_v2  ;;  %v9475_v2 = vld [vmem:[#allocation2 + $0x4a] sm:$0xff] }
  0x80   : > { %2130 = vmatpush.msra.mxu3 %v9231_v6  ;;  %v1399_v6 = vld [vmem:[#allocation7 + $0x318] sm:$0xff] }
  0x82   : > { %2131 = vmatpush.msra.mxu3 %v9241_v10  ;;  %v1174_v10 = vld [vmem:[#allocation7 + $0x220] sm:$0xff] }
  0x83   : > { %832 = vmatmul.f32.gmra.mxu0 %v9438_v53  ;;  %897 = vmatmul.f32.gmra.mxu1 %v9440_v63 }
  0x84   : > { %994 = vmatmul.f32.gmra.mxu2 %v9442_v57  ;;  %v1401_v57 = vld [vmem:[#allocation7 + $0x328] sm:$0xff]  ;;  %2132 = vmatpush.msra.mxu3 %v9253_v14  ;;  %v9488_v14 = vld [vmem:[#allocation2 + $0x52] sm:$0xff] }
  0x85   : > { %1119 = vmatmul.f32.gmra.mxu3 %v9444_v7  ;;  %1422 = vmatpush.msrb.mxu2 %v1401_v57  ;;  %v1175_v57 = vld [vmem:[#allocation7 + $0x228] sm:$0xff]  ;;  %13038 = vst [vmem:[#allocation28_spill] sm:$0xff] %v9488_v14 }
  0x86   : > { %1196 = vmatpush.msrb.mxu0 %v1175_v57  ;;  %2133 = vmatpush.msra.mxu3 %v9265_v18  ;;  %v9491_v57 = vld [vmem:[#allocation2 + $0x88] sm:$0xff] }
  0x87   : > { %1423 = vmatpush.msrb.mxu2 %v1400_v44  ;;  %v9486_v44 = vld [vmem:[#allocation2 + $0x51] sm:$0xff]  ;;  %13039 = vst [vmem:[#allocation29_spill] sm:$0xff] %v9491_v57  ;;  %v1398_v18 = vld [vmem:[#allocation7 + $0x310] sm:$0xff] }
  0x88   : > { %1197 = vmatpush.msrb.mxu0 %v1174_v10  ;;  %2134 = vmatpush.msra.mxu3 %v9275_v22  ;;  %v1173_v22 = vld [vmem:[#allocation7 + $0x218] sm:$0xff] }
  0x89   : > { %1424 = vmatpush.msrb.mxu2 %v1399_v6  ;;  %v9499_v6 = vld [vmem:[#allocation2 + $0x59] sm:$0xff]  ;;  %v9504_v10 = vld [vmem:[#allocation2 + $0x90] sm:$0xff] }
  0x8a   : > { %2135 = vmatpush.msra.mxu3 %v9284_v26  ;;  %1198 = vmatpush.msrb.mxu0 %v1173_v22  ;;  %v9501_v26 = vld [vmem:[#allocation2 + $0x5a] sm:$0xff] }
  0x8b   : > { %835 = vmatmul.f32.gmra.mxu0 %v9450_v55  ;;  %900 = vmatmul.f32.gmra.mxu1 %v9354_v32  ;;  %v1396_v22 = vld [vmem:[#allocation7 + $0x300] sm:$0xff] }
  0x8c   : > { %997 = vmatmul.f32.gmra.mxu2 %v9452_v59  ;;  %2136 = vmatpush.msra.mxu3 %v9293_v30  ;;  %v1172_v30 = vld [vmem:[#allocation7 + $0x210] sm:$0xff] }
  0x8d   : > { %1122 = vmatmul.f32.gmra.mxu3 %v9454_v23  ;;  %1425 = vmatpush.msrb.mxu2 %v1398_v18  ;;  %v9512_v18 = vld [vmem:[#allocation2 + $0x61] sm:$0xff] }
  0x8e   : > { %2137 = vmatpush.msra.mxu3 %v9302_v34  ;;  %v1397_v34 = vld [vmem:[#allocation7 + $0x308] sm:$0xff]  ;;  %1199 = vmatpush.msrb.mxu0 %v1172_v30  ;;  %v9539_v30 = vld [vmem:[#allocation7 + $0x2e0] sm:$0xff] }
  0x8f   : > { %1426 = vmatpush.msrb.mxu2 %v1397_v34  ;;  %v1284_v34 = vld [vmem:[#allocation7 + $0x288] sm:$0xff] }
  0x90   : > { %2138 = vmatpush.msra.mxu3 %v9311_v38  ;;  %v1171_v38 = vld [vmem:[#allocation7 + $0x208] sm:$0xff] }
  0x91   : > { %1200 = vmatpush.msrb.mxu0 %v1171_v38  ;;  %1427 = vmatpush.msrb.mxu2 %v1396_v22  ;;  %v1636_v38 = vld [vmem:[#allocation7 + $0x470] sm:$0xff] }
  0x92   : > { %2139 = vmatpush.msra.mxu3 %v9318_v42  ;;  %v9520_v42 = vld [vmem:[#allocation7 + $0x2f8] sm:$0xff] }
  0x93   : > { %838 = vmatmul.f32.gmra.mxu0 %v9460_v28  ;;  %903 = vmatmul.f32.gmra.mxu1 %v9371_v60 }
  0x94   : > { %1000 = vmatmul.f32.gmra.mxu2 %v9462_v15  ;;  %2140 = vmatpush.msra.mxu3 %v9324_v46  ;;  %v9525_v46 = vld [vmem:[#allocation7 + $0x2f0] sm:$0xff] }
  0x95   : > { %1125 = vmatmul.f32.gmra.mxu3 %v9465_v11  ;;  %2032 = vmatpush.msra.mxu2 %v9217_v1  ;;  %v9530_v1 = vld [vmem:[#allocation2 + $0x69] sm:$0xff] }
  0x96   : > { %2141 = vmatpush.msra.mxu3 %v9330_v50  ;;  %1299 = vmatpush.msra.mxu1 %v9520_v42  ;;  %v9532_v50 = vld [vmem:[#allocation7 + $0x2e8] sm:$0xff] }
  0x97   : > { %2033 = vmatpush.msra.mxu2 %v9227_v5  ;;  %v9545_v5 = vld [vmem:[#allocation7 + $0x2d8] sm:$0xff] }
  0x98   : > { %2142 = vmatpush.msra.mxu3 %v9336_v54  ;;  %1300 = vmatpush.msra.mxu1 %v9525_v46  ;;  %v9559_v54 = vld [vmem:[#allocation7 + $0x2c8] sm:$0xff] }
  0x99   : > { %2034 = vmatpush.msra.mxu2 %v9239_v9  ;;  %v9550_v9 = vld [vmem:[#allocation7 + $0x2d0] sm:$0xff] }
  0x9a   : > { %2143 = vmatpush.msra.mxu3 %v9342_v58  ;;  %1301 = vmatpush.msra.mxu1 %v9532_v50  ;;  %v9562_v58 = vld [vmem:[#allocation2 + $0x72] sm:$0xff] }
  0x9b   : > { %841 = vmatmul.f32.gmra.mxu0 %v9473_v52  ;;  %906 = vmatmul.f32.gmra.mxu1 %v9384_v19 }
  0x9c   : > { %1003 = vmatmul.f32.gmra.mxu2 %v9475_v2  ;;  %2144 = vmatpush.msra.mxu3 %v9348_v62  ;;  %v9564_v62 = vld [vmem:[#allocation7 + $0x2c0] sm:$0xff] }
  0x9d   : > { %1128 = vmatmul.f32.gmra.mxu3 %v9478_v47  ;;  %2035 = vmatpush.msra.mxu2 %v9249_v13  ;;  %v9556_v13 = vld [vmem:[#allocation2 + $0x71] sm:$0xff] }
  0x9e   : > { %1302 = vmatpush.msra.mxu1 %v9539_v30 }
  0x9f   : > { %2036 = vmatpush.msra.mxu2 %v9261_v17  ;;  %v9571_v17 = vld [vmem:[#allocation7 + $0x2b8] sm:$0xff] }
  0xa0   : > { %1303 = vmatpush.msra.mxu1 %v9545_v5 }
  0xa1   : > { %2037 = vmatpush.msra.mxu2 %v9271_v21  ;;  %v9576_v21 = vld [vmem:[#allocation7 + $0x2b0] sm:$0xff] }
  0xa2   : > { %1304 = vmatpush.msra.mxu1 %v9550_v9 }
  0xa3   : > { %844 = vmatmul.f32.gmra.mxu0 %v9486_v44  ;;  %909 = vmatmul.f32.gmra.mxu1 %v9399_v31 }
  0xa4   : > { %1006 = vmatmul.f32.gmra.mxu2 %v9488_v14  ;;  %v1170_v14 = vld [vmem:[#allocation7 + $0x200] sm:$0xff]  ;;  %1305 = vmatpush.msra.mxu1 %v9559_v54 }
  0xa5   : > { %1131 = vmatmul.f32.gmra.mxu3 %v9491_v57  ;;  %v9514_v57 = vld [vmem:[#allocation2 + $0x62] sm:$0xff]  ;;  %1201 = vmatpush.msrb.mxu0 %v1170_v14  ;;  %v9536_v14 = vld [vmem:[#allocation2 + $0x6a] sm:$0xff] }
  0xa6   : > { %2038 = vmatpush.msra.mxu2 %v9281_v25  ;;  %1306 = vmatpush.msra.mxu1 %v9564_v62  ;;  %v9582_v25 = vld [vmem:[#allocation2 + $0x79] sm:$0xff] }
  0xa8   : > { %2039 = vmatpush.msra.mxu2 %v9290_v29  ;;  %1307 = vmatpush.msra.mxu1 %v9571_v17  ;;  %v1637_v29 = vld [vmem:[#allocation7 + $0x478] sm:$0xff] }
  0xa9   : > { %1638 = vmatpush.msra.mxu0 %v1637_v29  ;;  %v1635_v29 = vld [vmem:[#allocation7 + $0x468] sm:$0xff] }
  0xaa   : > { %2040 = vmatpush.msra.mxu2 %v9299_v33  ;;  %1308 = vmatpush.msra.mxu1 %v9576_v21  ;;  %v1286_v33 = vld [vmem:[#allocation7 + $0x298] sm:$0xff] }
  0xab   : > { %847 = vmatmul.f32.gmra.mxu0 %v9499_v6  ;;  %912 = vmatmul.f32.gmra.mxu1 %v9417_v43 }
  0xac   : > { %1009 = vmatmul.f32.gmra.mxu2 %v9501_v26  ;;  %1639 = vmatpush.msra.mxu0 %v1636_v38 }
  0xad   : > { %1134 = vmatmul.f32.gmra.mxu3 %v9504_v10  ;;  %2041 = vmatpush.msra.mxu2 %v9308_v37 }
  0xae   : > { %1640 = vmatpush.msra.mxu0 %v1635_v29 }
  0xb3   : > { %850 = vmatmul.f32.gmra.mxu0 %v9512_v18  ;;  %915 = vmatmul.f32.gmra.mxu1 %v9432_v45 }
  0xb4   : > { %1012 = vmatmul.f32.gmra.mxu2 %v9514_v57 }
  0xb5   : > { %1541 = vmatmul.f32.vlgmr.msrb.gmra.mxu3 %v9438_v53 }
  0xb6   : > { %2581 = vmatpush.msrb.mxu3 %v9356_v36  ;;  %v1288_v36 = vld [vmem:[#allocation7 + $0x2a8] sm:$0xff] }
  0xb7   : > { %1309 = vmatpush.msra.mxu1 %v1288_v36 }
  0xb8   : > { %2582 = vmatpush.msrb.mxu3 %v9360_v41  ;;  %v9586_v41 = vld [vmem:[#allocation2 + $0x7a] sm:$0xff] }
  0xba   : > { %2583 = vmatpush.msrb.mxu3 %v9365_v48  ;;  %v1287_v48 = vld [vmem:[#allocation7 + $0x2a0] sm:$0xff] }
  0xbb   : > { %853 = vmatmul.f32.gmra.mxu0 %v9530_v1  ;;  %918 = vmatmul.f32.gmra.mxu1 %v9444_v7 }
  0xbc   : > { %1015 = vmatmul.f32.gmra.mxu2 %v9536_v14  ;;  %2584 = vmatpush.msrb.mxu3 %v9374_v61  ;;  %v1285_v61 = vld [vmem:[#allocation7 + $0x290] sm:$0xff] }
  0xbd   : > { %1544 = vmatmul.f32.gmra.mxu3 %v9450_v55  ;;  %1310 = vmatpush.msra.mxu1 %v1287_v48 }
  0xbe   : > { %2585 = vmatpush.msrb.mxu3 %v9378_v24 }
  0xbf   : > { %1311 = vmatpush.msra.mxu1 %v1286_v33  ;;  %v1634_v33 = vld [vmem:[#allocation7 + $0x460] sm:$0xff] }
  0xc0   : > { %2586 = vmatpush.msrb.mxu3 %v9388_v49  ;;  %v1283_v49 = vld [vmem:[#allocation7 + $0x280] sm:$0xff]  ;;  %1641 = vmatpush.msra.mxu0 %v1634_v33 }
  0xc1   : > { %1312 = vmatpush.msra.mxu1 %v1285_v61  ;;  %v1632_v61 = vld [vmem:[#allocation7 + $0x450] sm:$0xff] }
  0xc2   : > { %2587 = vmatpush.msrb.mxu3 %v9406_v35 }
  0xc3   : > { %856 = vmatmul.f32.gmra.mxu0 %v9556_v13  ;;  %921 = vmatmul.f32.gmra.mxu1 %v9454_v23 }
  0xc4   : > { %1018 = vmatmul.f32.gmra.mxu2 %v9562_v58  ;;  %1313 = vmatpush.msra.mxu1 %v1284_v34 }
  0xc5   : > { %1547 = vmatmul.f32.gmra.mxu3 %v9460_v28 }
  0xc6   : > { %1314 = vmatpush.msra.mxu1 %v1283_v49  ;;  %v1631_v49 = vld [vmem:[#allocation7 + $0x448] sm:$0xff] }
  0xcb   : > { %859 = vmatmul.f32.gmra.mxu0 %v9582_v25  ;;  %924 = vmatmul.f32.gmra.mxu1 %v9465_v11 }
  0xcc   : > { %1021 = vmatmul.f32.gmra.mxu2 %v9586_v41 }
  0xcd   : > { %1550 = vmatmul.f32.gmra.mxu3 %v9473_v52 }
  0xcf   : > { %v815_v37 = vpop.f32.mrf.mxu0 }
  0xd0   : > { %v880_v24 = vpop.f32.mrf.mxu1 }
  0xd3   : > { %1089 = vmatmul.f32.vlgmr.msrb.gmra.mxu1 %v9394_v56  ;;  %1202 = vmatmul.f32.vlgmr.msrb.gmra.mxu0 %v9392_v27 }
  0xd4   : > { %1428 = vmatmul.f32.vlgmr.msrb.gmra.mxu2 %v9440_v63  ;;  %1967 = vmatpush.msrb.mxu1 %v9215_v0 }
  0xd5   : > { %1553 = vmatmul.f32.gmra.mxu3 %v9486_v44 }
  0xd6   : > { %1968 = vmatpush.msrb.mxu1 %v9225_v4 }
  0xd7   : > { %v977_v35 = vpop.f32.mrf.mxu2 }
  0xd8   : > { %v1102_v22 = vpop.f32.mrf.mxu3  ;;  %v818_v36 = vpop.f32.mrf.mxu0  ;;  %1969 = vmatpush.msrb.mxu1 %v9235_v8 }
  0xd9   : > { %v883_v48 = vpop.f32.mrf.mxu1 }
  0xda   : > { %1970 = vmatpush.msrb.mxu1 %v9247_v12 }
  0xdb   : > { %1092 = vmatmul.f32.gmra.mxu1 %v9412_v20  ;;  %1205 = vmatmul.f32.gmra.mxu0 %v9410_v39 }
  0xdc   : > { %1431 = vmatmul.f32.gmra.mxu2 %v9354_v32  ;;  %1971 = vmatpush.msrb.mxu1 %v9259_v16  ;;  %v1633_v16 = vld [vmem:[#allocation7 + $0x458] sm:$0xff] }
  0xdd   : > { %1556 = vmatmul.f32.gmra.mxu3 %v9499_v6  ;;  %1642 = vmatpush.msra.mxu0 %v1633_v16 }
  0xdf   : > { %v980_v0 = vpop.f32.mrf.mxu2  ;;  %1643 = vmatpush.msra.mxu0 %v1632_v61 }
  0xe0   : > { %v1105_v27 = vpop.f32.mrf.mxu3  ;;  %v821_v4 = vpop.f32.mrf.mxu0 }
  0xe1   : > { %v886_v56 = vpop.f32.mrf.mxu1  ;;  %1644 = vmatpush.msra.mxu0 %v1631_v49  ;;  %v1630_v4 = vld [vmem:[#allocation7 + $0x440] sm:$0xff] }
  0xe2   : > { %v1960_v56 = vld [vmem:[#allocation7 + $0xc8] sm:$0xff] }
  0xe3   : > { %1095 = vmatmul.f32.gmra.mxu1 %v9427_v40  ;;  %1208 = vmatmul.f32.gmra.mxu0 %v9425_v51 }
  0xe4   : > { %1434 = vmatmul.f32.gmra.mxu2 %v9371_v60  ;;  %1645 = vmatpush.msra.mxu0 %v1630_v4 }
  0xe5   : > { %1559 = vmatmul.f32.gmra.mxu3 %v9512_v18 }
  0xe7   : > { %v983_v8 = vpop.f32.mrf.mxu2 }
  0xe8   : > { %v1108_v32 = vpop.f32.mrf.mxu3  ;;  %v9612_v39 = vpop.f32.mrf.mxu0 }
  0xe9   : > { %v9614_v12 = vpop.f32.mrf.mxu1 }
  0xeb   : > { %1098 = vmatmul.f32.gmra.mxu1 %v9440_v63  ;;  %1211 = vmatmul.f32.gmra.mxu0 %v9438_v53 }
  0xec   : > { %1437 = vmatmul.f32.gmra.mxu2 %v9384_v19 }
  0xed   : > { %1562 = vmatmul.f32.gmra.mxu3 %v9530_v1 }
  0xef   : > { %v9620_v60 = vpop.f32.mrf.mxu2 }
  0xf0   : > { %v9622_v20 = vpop.f32.mrf.mxu3  ;;  %v827_v51 = vpop.f32.mrf.mxu0 }
  0xf1   : > { %v892_v40 = vpop.f32.mrf.mxu1 }
  0xf2   : > { %v893_v19 = vadd.f32 %v892_v40, %v827_v51 }
  0xf3   : > { %1214 = vmatmul.f32.gmra.mxu0 %v9450_v55  ;;  %1315 = vmatmul.f32.vlgmr.msra.gmra.mxu1 %v9396_v3  ;;  %v13040_v55 = vld [vmem:[#allocation25_spill] sm:$0xff]  ;;  %v1961_v3 = vld [vmem:[#allocation7 + $0xd0] sm:$0xff] }
  0xf4   : > { %1440 = vmatmul.f32.gmra.mxu2 %v9399_v31  ;;  %1972 = vmatpush.msrb.mxu1 %v1961_v3  ;;  %v1924_v3 = vld [vmem:[#allocation7 + $0x28] sm:$0xff] }
  0xf5   : > { %1565 = vmatmul.f32.gmra.mxu3 %v9556_v13  ;;  %2042 = vmatpush.msra.mxu2 %v1924_v3 }
  0xf6   : > { %1973 = vmatpush.msrb.mxu1 %v1960_v56  ;;  %v1923_v56 = vld [vmem:[#allocation7 + $0x20] sm:$0xff] }
  0xf7   : > { %v989_v53 = vpop.f32.mrf.mxu2  ;;  %2043 = vmatpush.msra.mxu2 %v1923_v56  ;;  %v13044_v56 = vld [vmem:[#allocation29_spill] sm:$0xff] }
  0xf8   : > { %v1029_v63 = vadd.f32 %v989_v53, %v893_v19  ;;  %v9628_v37 = vpop.f32.mrf.mxu3  ;;  %v830_v24 = vpop.f32.mrf.mxu0  ;;  %v1629_v19 = vld [vmem:[#allocation7 + $0x438] sm:$0xff]  ;;  %v1959_v53 = vld [vmem:[#allocation7 + $0xc0] sm:$0xff] }
  0xf9   : > { %v895_v34 = vpop.f32.mrf.mxu1  ;;  %1646 = vmatpush.msra.mxu0 %v1629_v19  ;;  %1974 = vmatpush.msrb.mxu1 %v1959_v53 }
  0xfa   : > { %v9630_v38 = vadd.f32 %v1102_v22, %v1029_v63  ;;  %v896_v31 = vadd.f32 %v895_v34, %v830_v24  ;;  %v9638_v22 = vld [vmem:[#allocation2 + $0x81] sm:$0xff] }
  0xfb   : > { %1217 = vmatmul.f32.gmra.mxu0 %v9460_v28  ;;  %1318 = vmatmul.f32.gmra.mxu1 %v13040_v55 }
  0xfc   : > { %1443 = vmatmul.f32.gmra.mxu2 %v9417_v43  ;;  %v13041_v43 = vld [vmem:[#allocation26_spill] sm:$0xff] }
  0xfd   : > { %1568 = vmatmul.f32.gmra.mxu3 %v9582_v25 }
  0xff   : > { %v992_v35 = vpop.f32.mrf.mxu2 }
 0x100   : > { %v1030_v36 = vadd.f32 %v992_v35, %v896_v31  ;;  %v9636_v48 = vpop.f32.mrf.mxu3  ;;  %v833_v29 = vpop.f32.mrf.mxu0  ;;  %v9658_v31 = vld [vmem:[#allocation2 + $0x91] sm:$0xff] }
 0x101   : > { %v898_v0 = vpop.f32.mrf.mxu1 }
 0x102   : > { %v9640_v28 = vadd.f32 %v1105_v27, %v1030_v36  ;;  %v899_v33 = vadd.f32 %v898_v0, %v833_v29  ;;  %v9648_v27 = vld [vmem:[#allocation2 + $0x89] sm:$0xff] }
 0x103   : > { %1220 = vmatmul.f32.gmra.mxu0 %v9473_v52  ;;  %1321 = vmatmul.f32.gmra.mxu1 %v13041_v43 }
 0x104   : > { %1446 = vmatmul.f32.gmra.mxu2 %v9432_v45  ;;  %v13042_v45 = vld [vmem:[#allocation27_spill] sm:$0xff] }
 0x105   : > { %1571 = vmatmul.f32.gmra.mxu3 %v9638_v22 }
 0x107   : > { %v995_v8 = vpop.f32.mrf.mxu2 }
 0x108   : > { %v1031_v16 = vadd.f32 %v995_v8, %v899_v33  ;;  %v9646_v51 = vpop.f32.mrf.mxu3  ;;  %v836_v40 = vpop.f32.mrf.mxu0  ;;  %v9669_v33 = vld [vmem:[#allocation2 + $0x99] sm:$0xff] }
 0x109   : > { %v901_v61 = vpop.f32.mrf.mxu1 }
 0x10a   : > { %v9650_v52 = vadd.f32 %v1108_v32, %v1031_v16  ;;  %v902_v63 = vadd.f32 %v901_v61, %v836_v40 }
 0x10b   : > { %1223 = vmatmul.f32.gmra.mxu0 %v9486_v44  ;;  %1324 = vmatmul.f32.gmra.mxu1 %v13042_v45  ;;  %v1628_v44 = vld [vmem:[#allocation7 + $0x430] sm:$0xff] }
 0x10c   : > { %1449 = vmatmul.f32.gmra.mxu2 %v9444_v7  ;;  %1647 = vmatpush.msra.mxu0 %v1628_v44  ;;  %v1958_v7 = vld [vmem:[#allocation7 + $0xb8] sm:$0xff] }
 0x10d   : > { %1574 = vmatmul.f32.gmra.mxu3 %v9648_v27  ;;  %1975 = vmatpush.msrb.mxu1 %v1958_v7 }
 0x10f   : > { %v998_v24 = vpop.f32.mrf.mxu2 }
 0x110   : > { %v1032_v34 = vadd.f32 %v998_v24, %v902_v63  ;;  %v9656_v49 = vpop.f32.mrf.mxu3  ;;  %v839_v55 = vpop.f32.mrf.mxu0  ;;  %v1922_v63 = vld [vmem:[#allocation7 + $0x18] sm:$0xff]  ;;  %v9680_v24 = vld [vmem:[#allocation2 + $0xa1] sm:$0xff] }
 0x111   : > { %v904_v32 = vpop.f32.mrf.mxu1  ;;  %2044 = vmatpush.msra.mxu2 %v1922_v63 }
 0x112   : > { %v9661_v35 = vadd.f32 %v9622_v20, %v1032_v34  ;;  %v905_v36 = vadd.f32 %v904_v32, %v839_v55 }
 0x113   : > { %1226 = vmatmul.f32.gmra.mxu0 %v9499_v6  ;;  %1327 = vmatmul.f32.gmra.mxu1 %v9452_v59  ;;  %v1627_v6 = vld [vmem:[#allocation7 + $0x428] sm:$0xff] }
 0x114   : > { %1452 = vmatmul.f32.gmra.mxu2 %v9454_v23  ;;  %1648 = vmatpush.msra.mxu0 %v1627_v6  ;;  %v1957_v23 = vld [vmem:[#allocation7 + $0xb0] sm:$0xff] }
 0x115   : > { %1577 = vmatmul.f32.gmra.mxu3 %v9658_v31  ;;  %1976 = vmatpush.msrb.mxu1 %v1957_v23 }
 0x117   : > { %v1001_v29 = vpop.f32.mrf.mxu2 }
 0x118   : > { %v1033_v0 = vadd.f32 %v1001_v29, %v905_v36  ;;  %v9667_v4 = vpop.f32.mrf.mxu3  ;;  %v842_v43 = vpop.f32.mrf.mxu0  ;;  %v1921_v36 = vld [vmem:[#allocation7 + $0x10] sm:$0xff] }
 0x119   : > { %v907_v20 = vpop.f32.mrf.mxu1  ;;  %2045 = vmatpush.msra.mxu2 %v1921_v36  ;;  %v9691_v29 = vld [vmem:[#allocation2 + $0xa9] sm:$0xff] }
 0x11a   : > { %v9672_v8 = vadd.f32 %v9628_v37, %v1033_v0  ;;  %v908_v16 = vadd.f32 %v907_v20, %v842_v43  ;;  %v13043_v43 = vld [vmem:[#allocation28_spill] sm:$0xff]  ;;  %v1955_v20 = vld [vmem:[#allocation7 + $0xa0] sm:$0xff] }
 0x11b   : > { %1229 = vmatmul.f32.gmra.mxu0 %v9512_v18  ;;  %1330 = vmatmul.f32.gmra.mxu1 %v9462_v15  ;;  %v1626_v18 = vld [vmem:[#allocation7 + $0x420] sm:$0xff] }
 0x11c   : > { %1455 = vmatmul.f32.gmra.mxu2 %v9465_v11  ;;  %1649 = vmatpush.msra.mxu0 %v1626_v18  ;;  %v1956_v11 = vld [vmem:[#allocation7 + $0xa8] sm:$0xff] }
 0x11d   : > { %1580 = vmatmul.f32.gmra.mxu3 %v9669_v33  ;;  %1977 = vmatpush.msrb.mxu1 %v1956_v11  ;;  %v9702_v18 = vld [vmem:[#allocation2 + $0x82] sm:$0xff]  ;;  %v1919_v11 = vld [vmem:[#allocation7] sm:$0xff] }
 0x11f   : > { %v1004_v40 = vpop.f32.mrf.mxu2  ;;  %1978 = vmatpush.msrb.mxu1 %v1955_v20  ;;  %v9715_v20 = vld [vmem:[#allocation2 + $0x8a] sm:$0xff] }
 0x120   : > { %v1034_v61 = vadd.f32 %v1004_v40, %v908_v16  ;;  %v9678_v19 = vpop.f32.mrf.mxu3  ;;  %v845_v53 = vpop.f32.mrf.mxu0  ;;  %v1624_v16 = vld [vmem:[#allocation7 + $0x410] sm:$0xff] }
 0x121   : > { %v910_v37 = vpop.f32.mrf.mxu1 }
 0x122   : > { %v9683_v34 = vadd.f32 %v9636_v48, %v1034_v61  ;;  %v911_v55 = vadd.f32 %v910_v37, %v845_v53  ;;  %v1622_v37 = vld [vmem:[#allocation7 + $0x400] sm:$0xff] }
 0x123   : > { %1232 = vmatmul.f32.gmra.mxu0 %v9530_v1  ;;  %1333 = vmatmul.f32.gmra.mxu1 %v9475_v2  ;;  %v1625_v1 = vld [vmem:[#allocation7 + $0x418] sm:$0xff] }
 0x124   : > { %1458 = vmatmul.f32.gmra.mxu2 %v9478_v47  ;;  %1650 = vmatpush.msra.mxu0 %v1625_v1  ;;  %v9713_v1 = vld [vmem:[#allocation2 + $0x98] sm:$0xff] }
 0x125   : > { %1583 = vmatmul.f32.gmra.mxu3 %v9680_v24 }
 0x126   : > { %1651 = vmatpush.msra.mxu0 %v1624_v16 }
 0x127   : > { %v1007_v3 = vpop.f32.mrf.mxu2 }
 0x128   : > { %v1035_v32 = vadd.f32 %v1007_v3, %v911_v55  ;;  %v9689_v44 = vpop.f32.mrf.mxu3  ;;  %v848_v7 = vpop.f32.mrf.mxu0  ;;  %v1954_v3 = vld [vmem:[#allocation7 + $0x98] sm:$0xff] }
 0x129   : > { %v913_v48 = vpop.f32.mrf.mxu1  ;;  %1979 = vmatpush.msrb.mxu1 %v1954_v3 }
 0x12a   : > { %v9694_v0 = vadd.f32 %v9646_v51, %v1035_v32  ;;  %v914_v6 = vadd.f32 %v913_v48, %v848_v7  ;;  %v1920_v51 = vld [vmem:[#allocation7 + $0x8] sm:$0xff] }
 0x12b   : > { %1235 = vmatmul.f32.gmra.mxu0 %v9556_v13  ;;  %1336 = vmatmul.f32.gmra.mxu1 %v13043_v43  ;;  %v1623_v13 = vld [vmem:[#allocation7 + $0x408] sm:$0xff] }
 0x12c   : > { %1461 = vmatmul.f32.gmra.mxu2 %v13044_v56  ;;  %1652 = vmatpush.msra.mxu0 %v1623_v13  ;;  %v9068_v13 = vmov 0  }
 0x12d   : > { %1586 = vmatmul.f32.gmra.mxu3 %v9691_v29  ;;  %2046 = vmatpush.msra.mxu2 %v1920_v51  ;;  %v9730_v51 = vld [vmem:[#allocation2 + $0x92] sm:$0xff] }
 0x12e   : > { %1653 = vmatpush.msra.mxu0 %v1622_v37  ;;  %8768 = vset.pattern.permute.xlu0 %v9068_v13 }
 0x12f   : > { %v1010_v23 = vpop.f32.mrf.mxu2  ;;  %2047 = vmatpush.msra.mxu2 %v1919_v11  ;;  %8769 = vset.pattern.permute.xlu1 %v9068_v13 }
 0x130   : > { %v1036_v40 = vadd.f32 %v1010_v23, %v914_v6  ;;  %v9700_v61 = vpop.f32.mrf.mxu3  ;;  %v851_v53 = vpop.f32.mrf.mxu0  ;;  %8770 = vset.pattern.permute.xlu2 %v9068_v13 }
 0x131   : > { %v916_v63 = vpop.f32.mrf.mxu1  ;;  %2468 = vmatpush.msrb.mxu2 %v9520_v42  ;;  %v1953_v42 = vld [vmem:[#allocation7 + $0x90] sm:$0xff] }
 0x132   : > { %v9705_v55 = vadd.f32 %v9656_v49, %v1036_v40  ;;  %v917_v32 = vadd.f32 %v916_v63, %v851_v53  ;;  %1980 = vmatpush.msrb.mxu1 %v1953_v42  ;;  %v9727_v53 = vld [vmem:[#allocation2 + $0xa0] sm:$0xff] }
 0x133   : > { %1238 = vmatmul.f32.gmra.mxu0 %v9582_v25  ;;  %1339 = vmatmul.f32.gmra.mxu1 %v9501_v26 }
 0x134   : > { %1464 = vmatmul.f32.gmra.mxu2 %v9504_v10 }
 0x135   : > { %2145 = vmatmul.f32.vlgmr.msra.gmra.mxu3 %v9702_v18  ;;  %2469 = vmatpush.msrb.mxu2 %v9525_v46 }
 0x137   : > { %v1013_v7 = vpop.f32.mrf.mxu2  ;;  %2470 = vmatpush.msrb.mxu2 %v9532_v50 }
 0x138   : > { %v1037_v36 = vadd.f32 %v1013_v7, %v917_v32  ;;  %v1542_v48 = vpop.f32.mrf.mxu3  ;;  %v854_v49 = vpop.f32.mrf.mxu0  ;;  %v9744_v7 = vld [vmem:[#allocation2 + $0xa8] sm:$0xff] }
 0x139   : > { %v919_v25 = vpop.f32.mrf.mxu1  ;;  %2471 = vmatpush.msrb.mxu2 %v9539_v30  ;;  %v1952_v30 = vld [vmem:[#allocation7 + $0x88] sm:$0xff]  ;;  %v1951_v48 = vld [vmem:[#allocation7 + $0x80] sm:$0xff] }
 0x13a   : > { %v9719_v6 = vadd.f32 %v9667_v4, %v1037_v36  ;;  %v920_v46 = vadd.f32 %v919_v25, %v854_v49  ;;  %1981 = vmatpush.msrb.mxu1 %v1952_v30  ;;  %v9747_v36 = vld [vmem:[#allocation2 + $0x9a] sm:$0xff]  ;;  %v1777_v30 = vld [vmem:[%s12985_s1 + $0x10] sm:$0xff] }
 0x13b   : > { %1241 = vmatmul.f32.gmra.mxu0 %v9638_v22  ;;  %1342 = vmatmul.f32.gmra.mxu1 %v9514_v57 }
 0x13c   : > { %1467 = vmatmul.f32.gmra.mxu2 %v9713_v1  ;;  %1982 = vmatpush.msrb.mxu1 %v1951_v48 }
 0x13d   : > { %2148 = vmatmul.f32.gmra.mxu3 %v9715_v20  ;;  %2472 = vmatpush.msrb.mxu2 %v9545_v5  ;;  %v1775_v5 = vld [vmem:[%s12985_s1] sm:$0xff] }
 0x13e   : > { %1793 = vperm.xlu0 %8768, %v1775_v5   ;;  %1803 = vperm.xlu1 %8769, %v1777_v30   ;;  %v9798_v30 = vld [vmem:[#allocation2 + $0xba] sm:$0xff] }
 0x13f   : > { %v1016_v23 = vpop.f32.mrf.mxu2  ;;  %2473 = vmatpush.msrb.mxu2 %v9550_v9 }
 0x140   : > { %v1038_v50 = vadd.f32 %v1016_v23, %v920_v46  ;;  %v1545_v16 = vpop.f32.mrf.mxu3  ;;  %v857_v4 = vpop.f32.mrf.mxu0 }
 0x141   : > { %v922_v40 = vpop.f32.mrf.mxu1  ;;  %2474 = vmatpush.msrb.mxu2 %v9559_v54  ;;  %v2573_v16 = vld [vmem:[#allocation7 + $0x340] sm:$0xff] }
 0x142   : > { %v9733_v63 = vadd.f32 %v9678_v19, %v1038_v50  ;;  %v923_v9 = vadd.f32 %v922_v40, %v857_v4  ;;  %v2240_v50 = vld [vmem:[#allocation7 + $0x1f0] sm:$0xff]  ;;  %2588 = vmatpush.msrb.mxu3 %v2573_v16 }
 0x143   : > { %1244 = vmatmul.f32.gmra.mxu0 %v9648_v27  ;;  %1345 = vmatmul.f32.gmra.mxu1 %v9536_v14  ;;  %v9762_v4 = vld [vmem:[#allocation2 + $0xa2] sm:$0xff] }
 0x144   : > { %1470 = vmatmul.f32.gmra.mxu2 %v9727_v53 }
 0x145   : > { %2151 = vmatmul.f32.gmra.mxu3 %v9730_v51  ;;  %2475 = vmatpush.msrb.mxu2 %v9564_v62  ;;  %v2241_v62 = vld [vmem:[#allocation7 + $0x1f8] sm:$0xff] }
 0x146   : > { %2242 = vmatpush.msrb.mxu0 %v2241_v62 }
 0x147   : > { %v1019_v19 = vpop.f32.mrf.mxu2  ;;  %2476 = vmatpush.msrb.mxu2 %v9571_v17  ;;  %v1776_v17 = vld [vmem:[%s12985_s1 + $0x8] sm:$0xff] }
 0x148   : > { %v1039_v37 = vadd.f32 %v1019_v19, %v923_v9  ;;  %v1548_v11 = vpop.f32.mrf.mxu3  ;;  %v860_v3 = vpop.f32.mrf.mxu0  ;;  %1798 = vperm.xlu0 %8768, %v1776_v17   ;;  %2243 = vmatpush.msrb.mxu0 %v2240_v50  ;;  %v2239_v19 = vld [vmem:[#allocation7 + $0x1e8] sm:$0xff]  ;;  %v2238_v17 = vld [vmem:[#allocation7 + $0x1e0] sm:$0xff] }
 0x149   : > { %v925_v32 = vpop.f32.mrf.mxu1  ;;  %2477 = vmatpush.msrb.mxu2 %v9576_v21  ;;  %v2354_v21 = vld [vmem:[#allocation7 + $0x278] sm:$0xff] }
 0x14a   : > { %v9750_v54 = vadd.f32 %v9689_v44, %v1039_v37  ;;  %v926_v49 = vadd.f32 %v925_v32, %v860_v3  ;;  %2355 = vmatpush.msra.mxu1 %v2354_v21  ;;  %v2572_v37 = vld [vmem:[#allocation7 + $0x338] sm:$0xff]  ;;  %2244 = vmatpush.msrb.mxu0 %v2239_v19  ;;  %v2236_v19 = vld [vmem:[#allocation7 + $0x1d0] sm:$0xff] }
 0x14b   : > { %1247 = vmatmul.f32.gmra.mxu0 %v9658_v31  ;;  %1348 = vmatmul.f32.gmra.mxu1 %v9562_v58  ;;  %v9776_v11 = vld [vmem:[#allocation2 + $0xaa] sm:$0xff] }
 0x14c   : > { %1473 = vmatmul.f32.gmra.mxu2 %v9744_v7  ;;  %2589 = vmatpush.msrb.mxu3 %v2572_v37  ;;  %v2569_v37 = vld [vmem:[#allocation7 + $0x320] sm:$0xff] }
 0x14d   : > { %2154 = vmatmul.f32.gmra.mxu3 %v9747_v36  ;;  %2245 = vmatpush.msrb.mxu0 %v2238_v17  ;;  %v2235_v17 = vld [vmem:[#allocation7 + $0x1c8] sm:$0xff] }
 0x14f   : > { %v1022_v44 = vpop.f32.mrf.mxu2 }
 0x150   : > { %v1040_v25 = vadd.f32 %v1022_v44, %v926_v49  ;;  %v9760_v42 = vpop.f32.mrf.mxu3  ;;  %v1203_v46 = vpop.f32.mrf.mxu0  ;;  %v2571_v49 = vld [vmem:[#allocation7 + $0x330] sm:$0xff]  ;;  %v9787_v44 = vld [vmem:[#allocation2 + $0xb2] sm:$0xff] }
 0x151   : > { %v1090_v23 = vpop.f32.mrf.mxu1  ;;  %2590 = vmatpush.msrb.mxu3 %v2571_v49  ;;  %v2568_v49 = vld [vmem:[#allocation7 + $0x318] sm:$0xff] }
 0x152   : > { %v9765_v40 = vadd.f32 %v9700_v61, %v1040_v25 }
 0x153   : > { %1351 = vmatmul.f32.gmra.mxu1 %v9586_v41  ;;  %1654 = vmatmul.f32.vlgmr.msra.gmra.mxu0 %v13042_v45  ;;  %v1778_v45 = vld [vmem:[%s12985_s1 + $0x18] sm:$0xff] }
 0x154   : > { %2048 = vmatmul.f32.vlgmr.msra.gmra.mxu2 %v9478_v47  ;;  %v2353_v47 = vld [vmem:[#allocation7 + $0x270] sm:$0xff]  ;;  %1808 = vperm.xlu1 %8769, %v1778_v45   ;;  %v1781_v45 = vld [vmem:[%s12985_s1 + $0x30] sm:$0xff] }
 0x155   : > { %2157 = vmatmul.f32.gmra.mxu3 %v9762_v4  ;;  %2356 = vmatpush.msra.mxu1 %v2353_v47  ;;  %v2350_v47 = vld [vmem:[#allocation7 + $0x258] sm:$0xff] }
 0x156   : > { %1823 = vperm.xlu0 %8768, %v1781_v45  }
 0x157   : > { %v1429_v5 = vpop.f32.mrf.mxu2 }
 0x158   : > { %v9774_v9 = vpop.f32.mrf.mxu3  ;;  %v1206_v61 = vpop.f32.mrf.mxu0 }
 0x159   : > { %v1093_v13 = vpop.f32.mrf.mxu1 }
 0x15b   : > { %1354 = vmatmul.f32.gmra.mxu1 %v9702_v18  ;;  %1657 = vmatmul.f32.gmra.mxu0 %v9452_v59  ;;  %v2352_v59 = vld [vmem:[#allocation7 + $0x268] sm:$0xff] }
 0x15c   : > { %2051 = vmatmul.f32.gmra.mxu2 %v13044_v56  ;;  %v890_v56 = vadd.f32 %v9614_v12, %v9612_v39  ;;  %2357 = vmatpush.msra.mxu1 %v2352_v59  ;;  %v2570_v39 = vld [vmem:[#allocation7 + $0x328] sm:$0xff]  ;;  %v2351_v12 = vld [vmem:[#allocation7 + $0x260] sm:$0xff]  ;;  %v2349_v59 = vld [vmem:[#allocation7 + $0x250] sm:$0xff] }
 0x15d   : > { %2160 = vmatmul.f32.gmra.mxu3 %v9776_v11 }
 0x15e   : > { %v1028_v46 = vadd.f32 %v9620_v60, %v890_v56  ;;  %2591 = vmatpush.msrb.mxu3 %v2570_v39  ;;  %2358 = vmatpush.msra.mxu1 %v2351_v12  ;;  %v1779_v56 = vld [vmem:[%s12985_s1 + $0x20] sm:$0xff]  ;;  %v2567_v39 = vld [vmem:[#allocation7 + $0x310] sm:$0xff] }
 0x15f   : > { %v1432_v3 = vpop.f32.mrf.mxu2  ;;  %1813 = vperm.xlu2 %8770, %v1779_v56   ;;  %v2348_v12 = vld [vmem:[#allocation7 + $0x248] sm:$0xff]  ;;  %v2347_v56 = vld [vmem:[#allocation7 + $0x240] sm:$0xff] }
 0x160   : > { %v9785_v32 = vpop.f32.mrf.mxu3  ;;  %v1209_v62 = vpop.f32.mrf.mxu0  ;;  %2592 = vmatpush.msrb.mxu3 %v2569_v37  ;;  %2359 = vmatpush.msra.mxu1 %v2350_v47  ;;  %v9862_v47 = vld [vmem:[#allocation2 + $0xb8] sm:$0xff] }
 0x161   : > { %v1096_v48 = vpop.f32.mrf.mxu1 }
 0x162   : > { %v9827_v48 = vld [vmem:[#allocation2 + $0xca] sm:$0xff]  ;;  %2593 = vmatpush.msrb.mxu3 %v2568_v49  ;;  %2360 = vmatpush.msra.mxu1 %v2349_v59  ;;  %v2566_v59 = vld [vmem:[#allocation7 + $0x308] sm:$0xff] }
 0x163   : > { %1357 = vmatmul.f32.gmra.mxu1 %v9715_v20  ;;  %1660 = vmatmul.f32.gmra.mxu0 %v9462_v15  ;;  %v2233_v49 = vld [vmem:[#allocation7 + $0x1b8] sm:$0xff] }
 0x164   : > { %2054 = vmatmul.f32.gmra.mxu2 %v9504_v10  ;;  %v2237_v10 = vld [vmem:[#allocation7 + $0x1d8] sm:$0xff]  ;;  %2594 = vmatpush.msrb.mxu3 %v2567_v39 }
 0x165   : > { %2163 = vmatmul.f32.gmra.mxu3 %v9787_v44  ;;  %2246 = vmatpush.msrb.mxu0 %v2237_v10  ;;  %v2234_v10 = vld [vmem:[#allocation7 + $0x1c0] sm:$0xff] }
 0x166   : > { %2361 = vmatpush.msra.mxu1 %v2348_v12  ;;  %2595 = vmatpush.msrb.mxu3 %v2566_v59  ;;  %v9886_v12 = vld [vmem:[#allocation2 + $0xc0] sm:$0xff] }
 0x167   : > { %v1435_v25 = vpop.f32.mrf.mxu2  ;;  %2247 = vmatpush.msrb.mxu0 %v2236_v19 }
 0x168   : > { %v9796_v23 = vpop.f32.mrf.mxu3  ;;  %v1212_v50 = vpop.f32.mrf.mxu0  ;;  %2362 = vmatpush.msra.mxu1 %v2347_v56  ;;  %v2456_v56 = vld [vmem:[#allocation7 + $0x2a0] sm:$0xff] }
 0x169   : > { %v1099_v16 = vpop.f32.mrf.mxu1  ;;  %2248 = vmatpush.msrb.mxu0 %v2235_v17 }
 0x16a   : > { %v1141_v21 = vadd.f32 %v1099_v16, %v1028_v46  ;;  %v9845_v16 = vld [vmem:[#allocation2 + $0xb0] sm:$0xff] }
 0x16b   : > { %1360 = vmatmul.f32.gmra.mxu1 %v9730_v51  ;;  %1663 = vmatmul.f32.gmra.mxu0 %v9475_v2  ;;  %v9812_v2 = vld [vmem:[#allocation2 + $0xc2] sm:$0xff] }
 0x16c   : > { %v9802_v15 = vadd.f32 %v1212_v50, %v1141_v21  ;;  %2057 = vmatmul.f32.gmra.mxu2 %v9713_v1  ;;  %v9847_v21 = vld [vmem:[#allocation2 + $0xd2] sm:$0xff]  ;;  %2249 = vmatpush.msrb.mxu0 %v2234_v10  ;;  %v2457_v10 = vld [vmem:[#allocation7 + $0x2a8] sm:$0xff] }
 0x16d   : > { %2166 = vmatmul.f32.gmra.mxu3 %v9798_v30  ;;  %2478 = vmatpush.msrb.mxu2 %v2457_v10 }
 0x16e   : > { %2250 = vmatpush.msrb.mxu0 %v2233_v49 }
 0x16f   : > { %v9806_v60 = vpop.f32.mrf.mxu2  ;;  %2479 = vmatpush.msrb.mxu2 %v2456_v56  ;;  %v9934_v56 = vld [vmem:[#allocation2 + $0xd0] sm:$0xff] }
 0x170   : > { %v9808_v5 = vpop.f32.mrf.mxu3  ;;  %v9810_v61 = vpop.f32.mrf.mxu0 }
 0x171   : > { %v1316_v13 = vpop.f32.mrf.mxu1 }
 0x172   : > { %v1780_v13 = vld [vmem:[%s12985_s1 + $0x28] sm:$0xff] }
 0x173   : > { %1666 = vmatmul.f32.gmra.mxu0 %v13043_v43  ;;  %1983 = vmatmul.f32.vlgmr.msrb.gmra.mxu1 %v9638_v22 }
 0x174   : > { %2060 = vmatmul.f32.gmra.mxu2 %v9727_v53  ;;  %1818 = vperm.xlu2 %8770, %v1780_v13  }
 0x175   : > { %2169 = vmatmul.f32.gmra.mxu3 %v9812_v2 }
 0x177   : > { %v9821_v3 = vpop.f32.mrf.mxu2 }
 0x178   : > { %v9823_v43 = vpop.f32.mrf.mxu3  ;;  %v9825_v22 = vpop.f32.mrf.mxu0 }
 0x179   : > { %v1319_v62 = vpop.f32.mrf.mxu1 }
 0x17a   : > { %v9865_v62 = vld [vmem:[#allocation2 + $0xda] sm:$0xff] }
 0x17b   : > { %1669 = vmatmul.f32.gmra.mxu0 %v9501_v26  ;;  %1986 = vmatmul.f32.gmra.mxu1 %v9648_v27  ;;  %v1782_v26 = vld [vmem:[%s12985_s1 + $0x38] sm:$0xff] }
 0x17c   : > { %2063 = vmatmul.f32.gmra.mxu2 %v9744_v7  ;;  %1828 = vperm.xlu1 %8769, %v1782_v26  }
 0x17d   : > { %2172 = vmatmul.f32.gmra.mxu3 %v9827_v48 }
 0x17f   : > { %v9839_v25 = vpop.f32.mrf.mxu2 }
 0x180   : > { %v9841_v27 = vpop.f32.mrf.mxu3  ;;  %v9843_v46 = vpop.f32.mrf.mxu0 }
 0x181   : > { %v1322_v50 = vpop.f32.mrf.mxu1 }
 0x183   : > { %1672 = vmatmul.f32.gmra.mxu0 %v9514_v57  ;;  %1989 = vmatmul.f32.gmra.mxu1 %v9658_v31 }
 0x184   : > { %2066 = vmatmul.f32.gmra.mxu2 %v9845_v16 }
 0x185   : > { %2175 = vmatmul.f32.gmra.mxu3 %v9847_v21 }
 0x187   : > { %v9856_v19 = vpop.f32.mrf.mxu2 }
 0x188   : > { %v9858_v57 = vpop.f32.mrf.mxu3  ;;  %v9860_v31 = vpop.f32.mrf.mxu0 }
 0x189   : > { %v1325_v37 = vpop.f32.mrf.mxu1 }
 0x18a   : > { %v1367_v45 = vadd.f32 %v1325_v37, %v9802_v15  ;;  %v1784_v15 = vld [vmem:[%s12985_s1 + $0x48] sm:$0xff] }
 0x18b   : > { %1675 = vmatmul.f32.gmra.mxu0 %v9536_v14  ;;  %1992 = vmatmul.f32.gmra.mxu1 %v9669_v33  ;;  %v9888_v37 = vld [vmem:[#allocation2 + $0xe2] sm:$0xff] }
 0x18c   : > { %v1480_v17 = vadd.f32 %v9806_v60, %v1367_v45  ;;  %2069 = vmatmul.f32.gmra.mxu2 %v9862_v47  ;;  %1838 = vperm.xlu0 %8768, %v1784_v15   ;;  %v1255_v60 = vadd.f32 %v9810_v61, %v9630_v38  ;;  %13045 = vst [vmem:[#allocation25_spill] sm:$0xff] %v9888_v37  ;;  %v2232_v38 = vld [vmem:[#allocation7 + $0x1b0] sm:$0xff]  ;;  %v2346_v61 = vld [vmem:[#allocation7 + $0x238] sm:$0xff] }
 0x18d   : > { %2178 = vmatmul.f32.gmra.mxu3 %v9865_v62  ;;  %2251 = vmatpush.msrb.mxu0 %v2232_v38 }
 0x18e   : > { %v9876_v14 = vadd.f32 %v9760_v42, %v1480_v17  ;;  %v2565_v42 = vld [vmem:[#allocation7 + $0x300] sm:$0xff]  ;;  %v1785_v17 = vld [vmem:[%s12985_s1 + $0x50] sm:$0xff]  ;;  %2363 = vmatpush.msra.mxu1 %v2346_v61 }
 0x18f   : > { %v9878_v33 = vpop.f32.mrf.mxu2  ;;  %2596 = vmatpush.msrb.mxu3 %v2565_v42  ;;  %1843 = vperm.xlu1 %8769, %v1785_v17   ;;  %v1783_v42 = vld [vmem:[%s12985_s1 + $0x40] sm:$0xff]  ;;  %v9932_v61 = vld [vmem:[#allocation2 + $0xb1] sm:$0xff] }
 0x190   : > { %v9882_v26 = vpop.f32.mrf.mxu3  ;;  %v9884_v50 = vpop.f32.mrf.mxu0  ;;  %1833 = vperm.xlu2 %8770, %v1783_v42   ;;  %v2455_v17 = vld [vmem:[#allocation7 + $0x298] sm:$0xff] }
 0x191   : > { %v1328_v39 = vpop.f32.mrf.mxu1  ;;  %2480 = vmatpush.msrb.mxu2 %v2455_v17  ;;  %v2454_v17 = vld [vmem:[#allocation7 + $0x290] sm:$0xff] }
 0x192   : > { %v1368_v13 = vadd.f32 %v1328_v39, %v1255_v60  ;;  %v9909_v60 = vld [vmem:[#allocation2 + $0xc8] sm:$0xff] }
 0x193   : > { %1678 = vmatmul.f32.gmra.mxu0 %v9562_v58  ;;  %1995 = vmatmul.f32.gmra.mxu1 %v9680_v24  ;;  %v9911_v39 = vld [vmem:[#allocation2 + $0xea] sm:$0xff] }
 0x194   : > { %v1481_v45 = vadd.f32 %v9821_v3, %v1368_v13  ;;  %2072 = vmatmul.f32.gmra.mxu2 %v9886_v12  ;;  %v1256_v3 = vadd.f32 %v9825_v22, %v9640_v28  ;;  %13046 = vst [vmem:[#allocation26_spill] sm:$0xff] %v9911_v39  ;;  %v2231_v28 = vld [vmem:[#allocation7 + $0x1a8] sm:$0xff]  ;;  %v3103_v22 = vld [vmem:[#allocation7 + $0x78] sm:$0xff]  ;;  %v2345_v13 = vld [vmem:[#allocation7 + $0x230] sm:$0xff] }
 0x195   : > { %2181 = vmatmul.f32.gmra.mxu3 %v9888_v37  ;;  %2252 = vmatpush.msrb.mxu0 %v2231_v28  ;;  %v1787_v28 = vld [vmem:[%s12985_s1 + $0x60] sm:$0xff] }
 0x196   : > { %v9899_v58 = vadd.f32 %v9774_v9, %v1481_v45  ;;  %3201 = vmatpush.msra.mxu3 %v3103_v22  ;;  %2364 = vmatpush.msra.mxu1 %v2345_v13 }
 0x197   : > { %v9901_v24 = vpop.f32.mrf.mxu2  ;;  %1853 = vperm.xlu0 %8768, %v1787_v28   ;;  %2481 = vmatpush.msrb.mxu2 %v2454_v17 }
 0x198   : > { %v9905_v49 = vpop.f32.mrf.mxu3  ;;  %v9907_v59 = vpop.f32.mrf.mxu0 }
 0x199   : > { %v1331_v15 = vpop.f32.mrf.mxu1 }
 0x19a   : > { %v1369_v10 = vadd.f32 %v1331_v15, %v1256_v3 }
 0x19b   : > { %1681 = vmatmul.f32.gmra.mxu0 %v9586_v41  ;;  %1998 = vmatmul.f32.gmra.mxu1 %v9691_v29 }
 0x19c   : > { %v1482_v9 = vadd.f32 %v9839_v25, %v1369_v10  ;;  %2075 = vmatmul.f32.gmra.mxu2 %v9909_v60  ;;  %v1257_v25 = vadd.f32 %v9843_v46, %v9650_v52  ;;  %v2230_v46 = vld [vmem:[#allocation7 + $0x1a0] sm:$0xff]  ;;  %v3102_v10 = vld [vmem:[#allocation7 + $0x70] sm:$0xff] }
 0x19d   : > { %2184 = vmatmul.f32.gmra.mxu3 %v9911_v39  ;;  %2253 = vmatpush.msrb.mxu0 %v2230_v46 }
 0x19e   : > { %v9922_v41 = vadd.f32 %v9785_v32, %v1482_v9  ;;  %v9936_v32 = vld [vmem:[#allocation2 + $0xf2] sm:$0xff]  ;;  %v2344_v9 = vld [vmem:[#allocation7 + $0x228] sm:$0xff]  ;;  %3202 = vmatpush.msra.mxu3 %v3102_v10 }
 0x19f   : > { %v9924_v29 = vpop.f32.mrf.mxu2  ;;  %13047 = vst [vmem:[#allocation27_spill] sm:$0xff] %v9936_v32  ;;  %2365 = vmatpush.msra.mxu1 %v2344_v9  ;;  %v2343_v10 = vld [vmem:[#allocation7 + $0x220] sm:$0xff]  ;;  %v1788_v9 = vld [vmem:[%s12985_s1 + $0x68] sm:$0xff] }
 0x1a0   : > { %v9928_v45 = vpop.f32.mrf.mxu3  ;;  %v9930_v38 = vpop.f32.mrf.mxu0  ;;  %1858 = vperm.xlu1 %8769, %v1788_v9  }
 0x1a1   : > { %v1334_v3 = vpop.f32.mrf.mxu1  ;;  %2366 = vmatpush.msra.mxu1 %v2343_v10  ;;  %v9984_v10 = vld [vmem:[#allocation2 + $0xe0] sm:$0xff] }
 0x1a2   : > { %v1370_v15 = vadd.f32 %v1334_v3, %v1257_v25  ;;  %v9957_v25 = vld [vmem:[#allocation2 + $0xb9] sm:$0xff] }
 0x1a3   : > { %1684 = vmatmul.f32.gmra.mxu0 %v9702_v18  ;;  %2001 = vmatmul.f32.gmra.mxu1 %v9932_v61 }
 0x1a4   : > { %v1483_v52 = vadd.f32 %v9856_v19, %v1370_v15  ;;  %2078 = vmatmul.f32.gmra.mxu2 %v9934_v56  ;;  %v1258_v19 = vadd.f32 %v9860_v31, %v9661_v35  ;;  %v9959_v15 = vld [vmem:[#allocation2 + $0xd8] sm:$0xff]  ;;  %v2229_v31 = vld [vmem:[#allocation7 + $0x198] sm:$0xff] }
 0x1a5   : > { %2187 = vmatmul.f32.gmra.mxu3 %v9936_v32  ;;  %2254 = vmatpush.msrb.mxu0 %v2229_v31  ;;  %v2453_v31 = vld [vmem:[#allocation7 + $0x288] sm:$0xff]  ;;  %v3135_v32 = vld [vmem:[#allocation7 + $0xf8] sm:$0xff] }
 0x1a6   : > { %v9947_v18 = vadd.f32 %v9796_v23, %v1483_v52  ;;  %v9961_v23 = vld [vmem:[#allocation2 + $0xfa] sm:$0xff]  ;;  %2482 = vmatpush.msrb.mxu2 %v2453_v31 }
 0x1a7   : > { %v9949_v22 = vpop.f32.mrf.mxu2  ;;  %13048 = vst [vmem:[#allocation28_spill] sm:$0xff] %v9961_v23  ;;  %v3101_v52 = vld [vmem:[#allocation7 + $0x68] sm:$0xff] }
 0x1a8   : > { %v9953_v13 = vpop.f32.mrf.mxu3  ;;  %v9955_v42 = vpop.f32.mrf.mxu0  ;;  %3203 = vmatpush.msra.mxu3 %v3101_v52 }
 0x1a9   : > { %v1337_v3 = vpop.f32.mrf.mxu1 }
 0x1aa   : > { %v1371_v46 = vadd.f32 %v1337_v3, %v1258_v19  ;;  %v1259_v19 = vadd.f32 %v9884_v50, %v9672_v8  ;;  %v2226_v8 = vld [vmem:[#allocation7 + $0x180] sm:$0xff] }
 0x1ab   : > { %1687 = vmatmul.f32.gmra.mxu0 %v9715_v20  ;;  %2004 = vmatmul.f32.gmra.mxu1 %v9957_v25  ;;  %v2452_v50 = vld [vmem:[#allocation7 + $0x280] sm:$0xff] }
 0x1ac   : > { %v1484_v35 = vadd.f32 %v9878_v33, %v1371_v46  ;;  %2081 = vmatmul.f32.gmra.mxu2 %v9959_v15  ;;  %v2228_v33 = vld [vmem:[#allocation7 + $0x190] sm:$0xff] }
 0x1ad   : > { %2190 = vmatmul.f32.gmra.mxu3 %v9961_v23  ;;  %v9982_v46 = vld [vmem:[#allocation2 + $0xc1] sm:$0xff]  ;;  %2255 = vmatpush.msrb.mxu0 %v2228_v33  ;;  %v3100_v23 = vld [vmem:[#allocation7 + $0x60] sm:$0xff]  ;;  %v2342_v33 = vld [vmem:[#allocation7 + $0x218] sm:$0xff] }
 0x1ae   : > { %v9972_v20 = vadd.f32 %v9808_v5, %v1484_v35  ;;  %v2227_v5 = vld [vmem:[#allocation7 + $0x188] sm:$0xff]  ;;  %2483 = vmatpush.msrb.mxu2 %v2452_v50  ;;  %3204 = vmatpush.msra.mxu3 %v3100_v23  ;;  %v10007_v50 = vld [vmem:[#allocation2 + $0xe8] sm:$0xff] }
 0x1af   : > { %v9974_v28 = vpop.f32.mrf.mxu2  ;;  %2256 = vmatpush.msrb.mxu0 %v2227_v5  ;;  %2367 = vmatpush.msra.mxu1 %v2342_v33  ;;  %v9069_v33 = vmov 0.0  }
 0x1b0   : > { %v9978_v17 = vpop.f32.mrf.mxu3  ;;  %v9980_v3 = vpop.f32.mrf.mxu0  ;;  %4927 = vst [vmem:[#allocation4] sm:$0xff] %v9069_v33  ;;  %3136 = vmatpush.msra.mxu2 %v3135_v32 }
 0x1b1   : > { %v1340_v52 = vpop.f32.mrf.mxu1  ;;  %2257 = vmatpush.msrb.mxu0 %v2226_v8  ;;  %v1794_v23 = vpop.permute.xlu0 %1793  ;;  %4928 = vst [vmem:[#allocation4 + $0x8] sm:$0xff] %v9069_v33 }
 0x1b2   : > { %v1372_v35 = vadd.f32 %v1340_v52, %v1259_v19  ;;  %v1786_v19 = vld [vmem:[%s12985_s1 + $0x58] sm:$0xff]  ;;  %4929 = vst [vmem:[#allocation4 + $0x10] sm:$0xff] %v9069_v33 }
 0x1b3   : > { %1690 = vmatmul.f32.gmra.mxu0 %v9730_v51  ;;  %2007 = vmatmul.f32.gmra.mxu1 %v9982_v46  ;;  %4930 = vst [vmem:[#allocation4 + $0x198] sm:$0xff] %v9069_v33 }
 0x1b4   : > { %v1485_v9 = vadd.f32 %v9901_v24, %v1372_v35  ;;  %2084 = vmatmul.f32.gmra.mxu2 %v9984_v10  ;;  %1848 = vperm.xlu2 %8770, %v1786_v19   ;;  %v1260_v24 = vadd.f32 %v9907_v59, %v9683_v34  ;;  %v10005_v35 = vld [vmem:[#allocation2 + $0xc9] sm:$0xff]  ;;  %v1790_v19 = vld [vmem:[%s12985_s1 + $0x78] sm:$0xff]  ;;  %4931 = vst [vmem:[#allocation4 + $0x1a0] sm:$0xff] %v9069_v33 }
 0x1b5   : > { %2597 = vmatmul.f32.vlgmr.msrb.gmra.mxu3 %v9845_v16  ;;  %13049 = vst [vmem:[#allocation29_spill] sm:$0xff] %v10005_v35  ;;  %v3099_v59 = vld [vmem:[#allocation7 + $0x58] sm:$0xff]  ;;  %1868 = vperm.xlu0 %8768, %v1790_v19  }
 0x1b6   : > { %v9995_v51 = vadd.f32 %v9823_v43, %v1485_v9  ;;  %v2341_v9 = vld [vmem:[#allocation7 + $0x210] sm:$0xff]  ;;  %3205 = vmatpush.msra.mxu3 %v3099_v59  ;;  %4932 = vst [vmem:[#allocation4 + $0x1a8] sm:$0xff] %v9069_v33  ;;  %v10030_v59 = vld [vmem:[#allocation2 + $0xf0] sm:$0xff] }
 0x1b7   : > { %v9997_v31 = vpop.f32.mrf.mxu2  ;;  %2368 = vmatpush.msra.mxu1 %v2341_v9  ;;  %4933 = vst [vmem:[#allocation4 + $0x1b0] sm:$0xff] %v9069_v33  ;;  %v10028_v9 = vld [vmem:[#allocation2 + $0xd1] sm:$0xff] }
 0x1b8   : > { %v10001_v52 = vpop.f32.mrf.mxu3  ;;  %v10003_v5 = vpop.f32.mrf.mxu0  ;;  %13050 = vst [vmem:[#allocation30_spill] sm:$0xff] %v10028_v9 }
 0x1b9   : > { %v1343_v8 = vpop.f32.mrf.mxu1 }
 0x1ba   : > { %v1373_v43 = vadd.f32 %v1343_v8, %v1260_v24  ;;  %v1261_v8 = vadd.f32 %v9930_v38, %v9694_v0  ;;  %v3098_v0 = vld [vmem:[#allocation7 + $0x50] sm:$0xff]  ;;  %v2340_v38 = vld [vmem:[#allocation7 + $0x208] sm:$0xff] }
 0x1bb   : > { %1693 = vmatmul.f32.gmra.mxu0 %v9747_v36  ;;  %2010 = vmatmul.f32.gmra.mxu1 %v10005_v35  ;;  %v10050_v35 = vld [vmem:[#allocation2 + $0xf8] sm:$0xff] }
 0x1bc   : > { %v1486_v34 = vadd.f32 %v9924_v29, %v1373_v43  ;;  %2087 = vmatmul.f32.gmra.mxu2 %v10007_v50  ;;  %2369 = vmatpush.msra.mxu1 %v2340_v38 }
 0x1bd   : > { %2600 = vmatmul.f32.gmra.mxu3 %v9862_v47 }
 0x1be   : > { %v10018_v24 = vadd.f32 %v9841_v27, %v1486_v34  ;;  %v1799_v27 = vpop.permute.xlu0 %1798  ;;  %3206 = vmatpush.msra.mxu3 %v3098_v0  ;;  %v1804_v0 = vpop.permute.xlu1 %1803 }
 0x1bf   : > { %v10020_v29 = vpop.f32.mrf.mxu2 }
 0x1c0   : > { %v10024_v23 = vpop.f32.mrf.mxu3  ;;  %v10026_v43 = vpop.f32.mrf.mxu0 }
 0x1c1   : > { %v1346_v39 = vpop.f32.mrf.mxu1 }
 0x1c2   : > { %v1374_v34 = vadd.f32 %v1346_v39, %v1261_v8  ;;  %v1262_v39 = vadd.f32 %v9955_v42, %v9705_v55  ;;  %v2693_v55 = vld [vmem:[#allocation7 + $0x3f8] sm:$0xff]  ;;  %v3097_v42 = vld [vmem:[#allocation7 + $0x48] sm:$0xff] }
 0x1c3   : > { %1696 = vmatmul.f32.gmra.mxu0 %v9762_v4  ;;  %2013 = vmatmul.f32.gmra.mxu1 %v10028_v9 }
 0x1c4   : > { %v1487_v33 = vadd.f32 %v9949_v22, %v1374_v34  ;;  %2090 = vmatmul.f32.gmra.mxu2 %v10030_v59  ;;  %v10048_v22 = vld [vmem:[#allocation2 + $0xd9] sm:$0xff]  ;;  %v3134_v34 = vld [vmem:[#allocation7 + $0xf0] sm:$0xff]  ;;  %2694 = vmatpush.msra.mxu0 %v2693_v55 }
 0x1c5   : > { %2603 = vmatmul.f32.gmra.mxu3 %v9886_v12  ;;  %13052 = vst [vmem:[#allocation32_spill] sm:$0xff] %v10048_v22  ;;  %3137 = vmatpush.msra.mxu2 %v3134_v34  ;;  %v1789_v34 = vld [vmem:[%s12985_s1 + $0x70] sm:$0xff]  ;;  %v10069_v55 = vld [vmem:[#allocation2 + $0xe1] sm:$0xff] }
 0x1c6   : > { %v10038_v19 = vadd.f32 %v9858_v57, %v1487_v33  ;;  %v2339_v33 = vld [vmem:[#allocation7 + $0x200] sm:$0xff]  ;;  %3207 = vmatpush.msra.mxu3 %v3097_v42  ;;  %1863 = vperm.xlu2 %8770, %v1789_v34  }
 0x1c7   : > { %v10040_v32 = vpop.f32.mrf.mxu2  ;;  %2370 = vmatpush.msra.mxu1 %v2339_v33 }
 0x1c8   : > { %13051 = vst [vmem:[#allocation31_spill] sm:$0xff] %v10038_v19  ;;  %v10044_v8 = vpop.f32.mrf.mxu3  ;;  %v10046_v27 = vpop.f32.mrf.mxu0 }
 0x1c9   : > { %v1349_v9 = vpop.f32.mrf.mxu1 }
 0x1ca   : > { %v1375_v38 = vadd.f32 %v1349_v9, %v1262_v39 }
 0x1cb   : > { %1699 = vmatmul.f32.gmra.mxu0 %v9776_v11  ;;  %2016 = vmatmul.f32.gmra.mxu1 %v10048_v22  ;;  %v3133_v22 = vld [vmem:[#allocation7 + $0xe8] sm:$0xff] }
 0x1cc   : > { %v1488_v57 = vadd.f32 %v9974_v28, %v1375_v38  ;;  %2093 = vmatmul.f32.gmra.mxu2 %v10050_v35  ;;  %v1263_v28 = vadd.f32 %v9980_v3, %v9719_v6  ;;  %v2806_v6 = vld [vmem:[#allocation7 + $0x478] sm:$0xff] }
 0x1cd   : > { %2606 = vmatmul.f32.gmra.mxu3 %v9909_v60  ;;  %3138 = vmatpush.msra.mxu2 %v3133_v22 }
 0x1ce   : > { %v10061_v9 = vadd.f32 %v9882_v26, %v1488_v57  ;;  %v2692_v26 = vld [vmem:[#allocation7 + $0x3f0] sm:$0xff]  ;;  %v3096_v57 = vld [vmem:[#allocation7 + $0x40] sm:$0xff]  ;;  %2807 = vmatpush.msrb.mxu1 %v2806_v6 }
 0x1cf   : > { %v10063_v39 = vpop.f32.mrf.mxu2  ;;  %2695 = vmatpush.msra.mxu0 %v2692_v26  ;;  %3208 = vmatpush.msra.mxu3 %v3096_v57 }
 0x1d0   : > { %v10067_v0 = vpop.f32.mrf.mxu3  ;;  %v1655_v38 = vpop.f32.mrf.mxu0 }
 0x1d1   : > { %v1352_v19 = vpop.f32.mrf.mxu1 }
 0x1d2   : > { %v1376_v37 = vadd.f32 %v1352_v19, %v1263_v28  ;;  %v3095_v28 = vld [vmem:[#allocation7 + $0x38] sm:$0xff] }
 0x1d3   : > { %2019 = vmatmul.f32.gmra.mxu1 %v10069_v55  ;;  %2258 = vmatmul.f32.vlgmr.msrb.gmra.mxu0 %v9713_v1  ;;  %v1264_v1 = vadd.f32 %v10003_v5, %v9733_v63  ;;  %v2805_v63 = vld [vmem:[#allocation7 + $0x470] sm:$0xff] }
 0x1d4   : > { %v1489_v42 = vadd.f32 %v9997_v31, %v1376_v37  ;;  %2484 = vmatmul.f32.vlgmr.msrb.gmra.mxu2 %v9747_v36  ;;  %v10085_v37 = vld [vmem:[#allocation2 + $0xe9] sm:$0xff]  ;;  %v3132_v36 = vld [vmem:[#allocation7 + $0xe0] sm:$0xff]  ;;  %3209 = vmatpush.msra.mxu3 %v3095_v28 }
 0x1d5   : > { %2609 = vmatmul.f32.gmra.mxu3 %v9934_v56  ;;  %3139 = vmatpush.msra.mxu2 %v3132_v36  ;;  %v3130_v28 = vld [vmem:[#allocation7 + $0xd0] sm:$0xff] }
 0x1d6   : > { %v10077_v3 = vadd.f32 %v9905_v49, %v1489_v42  ;;  %v2691_v49 = vld [vmem:[#allocation7 + $0x3e8] sm:$0xff]  ;;  %2808 = vmatpush.msrb.mxu1 %v2805_v63 }
 0x1d7   : > { %v10079_v19 = vpop.f32.mrf.mxu2  ;;  %2696 = vmatpush.msra.mxu0 %v2691_v49  ;;  %v10122_v49 = vld [vmem:[#allocation2 + $0xf9] sm:$0xff] }
 0x1d8   : > { %v10083_v22 = vpop.f32.mrf.mxu3  ;;  %v1658_v33 = vpop.f32.mrf.mxu0 }
 0x1d9   : > { %v1355_v31 = vpop.f32.mrf.mxu1  ;;  %v3094_v33 = vld [vmem:[#allocation7 + $0x30] sm:$0xff] }
 0x1da   : > { %v1377_v34 = vadd.f32 %v1355_v31, %v1264_v1  ;;  %3210 = vmatpush.msra.mxu3 %v3094_v33  ;;  %v10114_v31 = vld [vmem:[%s12987_s3] ss:$0 sm:$0xff] }
 0x1db   : > { %2022 = vmatmul.f32.gmra.mxu1 %v10085_v37  ;;  %2261 = vmatmul.f32.gmra.mxu0 %v9727_v53  ;;  %v1265_v53 = vadd.f32 %v10026_v43, %v9750_v54  ;;  %v2804_v54 = vld [vmem:[#allocation7 + $0x468] sm:$0xff] }
 0x1dc   : > { %v1490_v38 = vadd.f32 %v10020_v29, %v1377_v34  ;;  %2487 = vmatmul.f32.gmra.mxu2 %v9762_v4  ;;  %v10101_v29 = vld [vmem:[#allocation2 + $0xf1] sm:$0xff]  ;;  %2809 = vmatpush.msrb.mxu1 %v2804_v54  ;;  %v3129_v54 = vld [vmem:[#allocation7 + $0xc8] sm:$0xff] }
 0x1dd   : > { %2612 = vmatmul.f32.gmra.mxu3 %v9959_v15  ;;  %v3131_v4 = vld [vmem:[#allocation7 + $0xd8] sm:$0xff] }
 0x1de   : > { %v10093_v5 = vadd.f32 %v9928_v45, %v1490_v38  ;;  %3140 = vmatpush.msra.mxu2 %v3131_v4  ;;  %v2690_v45 = vld [vmem:[#allocation7 + $0x3e0] sm:$0xff] }
 0x1df   : > { %v10095_v26 = vpop.f32.mrf.mxu2  ;;  %2697 = vmatpush.msra.mxu0 %v2690_v45 }
 0x1e0   : > { %v10099_v57 = vpop.f32.mrf.mxu3  ;;  %v1661_v42 = vpop.f32.mrf.mxu0  ;;  %3141 = vmatpush.msra.mxu2 %v3130_v28 }
 0x1e1   : > { %v1358_v6 = vpop.f32.mrf.mxu1 }
 0x1e2   : > { %v1378_v1 = vadd.f32 %v1358_v6, %v1265_v53  ;;  %3142 = vmatpush.msra.mxu2 %v3129_v54  ;;  %v8786_v54 = vld [vmem:[#allocation2 + $0xa1] sm:$0xff] }
 0x1e3   : > { %2025 = vmatmul.f32.gmra.mxu1 %v10101_v29  ;;  %2264 = vmatmul.f32.gmra.mxu0 %v9744_v7 }
 0x1e4   : > { %v1491_v36 = vadd.f32 %v10040_v32, %v1378_v1  ;;  %2490 = vmatmul.f32.gmra.mxu2 %v9776_v11  ;;  %v1266_v32 = vadd.f32 %v10046_v27, %v9765_v40  ;;  %v2689_v40 = vld [vmem:[#allocation7 + $0x3d8] sm:$0xff]  ;;  %v3093_v27 = vld [vmem:[#allocation7 + $0x28] sm:$0xff]  ;;  %v1809_v1 = vpop.permute.xlu1 %1808 }
 0x1e5   : > { %2615 = vmatmul.f32.gmra.mxu3 %v9984_v10  ;;  %2698 = vmatpush.msra.mxu0 %v2689_v40 }
 0x1e6   : > { %v10109_v43 = vadd.f32 %v9953_v13, %v1491_v36  ;;  %v10127_v13 = vld [vmem:[%s12988_s4] ss:$0 sm:$0xff]  ;;  %3211 = vmatpush.msra.mxu3 %v3093_v27 }
 0x1e7   : > { %v10116_v7 = vpop.f32.mrf.mxu2 }
 0x1e8   : > { %v10120_v11 = vpop.f32.mrf.mxu3  ;;  %v1664_v34 = vpop.f32.mrf.mxu0 }
 0x1e9   : > { %v1361_v38 = vpop.f32.mrf.mxu1  ;;  %v1706_v63 = vadd.f32 %v1664_v34, %v9876_v14  ;;  %v2803_v14 = vld [vmem:[#allocation7 + $0x460] sm:$0xff] }
 0x1ea   : > { %v1379_v53 = vadd.f32 %v1361_v38, %v1266_v32  ;;  %2810 = vmatpush.msrb.mxu1 %v2803_v14  ;;  %v3128_v14 = vld [vmem:[#allocation7 + $0xc0] sm:$0xff] }
 0x1eb   : > { %v1726_v42 = vmul.f32 %v10114_v31, %v1706_v63  ;;  %2028 = vmatmul.f32.gmra.mxu1 %v10122_v49  ;;  %2267 = vmatmul.f32.gmra.mxu0 %v9845_v16  ;;  %v2688_v63 = vld [vmem:[#allocation7 + $0x3d0] sm:$0xff] }
 0x1ec   : > { %v1492_v4 = vadd.f32 %v10063_v39, %v1379_v53  ;;  %2493 = vmatmul.f32.gmra.mxu2 %v9787_v44  ;;  %v3092_v53 = vld [vmem:[#allocation7 + $0x20] sm:$0xff]  ;;  %2699 = vmatpush.msra.mxu0 %v2688_v63 }
 0x1ed   : > { %2618 = vmatmul.f32.gmra.mxu3 %v10007_v50  ;;  %v1746_v6 = vadd.f32 %v10127_v13, %v1726_v42  ;;  %v1814_v42 = vpop.permute.xlu2 %1813  ;;  %3143 = vmatpush.msra.mxu2 %v3128_v14  ;;  %v2686_v14 = vld [vmem:[#allocation7 + $0x3c0] sm:$0xff] }
 0x1ee   : > { %v10138_v45 = vadd.f32 %v9978_v17, %v1492_v4  ;;  %v8785_v17 = vld [vmem:[#allocation2 + $0x99] sm:$0xff]  ;;  %3212 = vmatpush.msra.mxu3 %v3092_v53  ;;  %v3127_v53 = vld [vmem:[#allocation7 + $0xb8] sm:$0xff] }
 0x1ef   : > { %v10140_v33 = vpop.f32.mrf.mxu2  ;;  %v1762_v16 = vmax.f32 %v1746_v6, 0.0  ;;  %3144 = vmatpush.msra.mxu2 %v3127_v53  ;;  %v2799_v53 = vld [vmem:[#allocation7 + $0x440] sm:$0xff] }
 0x1f0   : > { %v10142_v36 = vpop.f32.mrf.mxu3  ;;  %v1667_v39 = vpop.f32.mrf.mxu0 }
 0x1f1   : > { %v1874_v44 = vmul.f32 %v1809_v1, %v1762_v16  ;;  %v1707_v32 = vadd.f32 %v1667_v39, %v9899_v58  ;;  %v1984_v34 = vpop.f32.mrf.mxu1 }
 0x1f2   : > { %v2050_v28 = vadd.f32 %v10079_v19, %v1984_v34  ;;  %v2802_v19 = vld [vmem:[#allocation7 + $0x458] sm:$0xff] }
 0x1f3   : > { %1890 = vst [vmem:[#allocation4 + $0x18] sm:$0xff] %v1874_v44  ;;  %v1727_v38 = vmul.f32 %v10114_v31, %v1707_v32  ;;  %2270 = vmatmul.f32.gmra.mxu0 %v9862_v47  ;;  %2371 = vmatmul.f32.vlgmr.msra.gmra.mxu1 %v8785_v17  ;;  %v2687_v44 = vld [vmem:[#allocation7 + $0x3c8] sm:$0xff]  ;;  %v3091_v32 = vld [vmem:[#allocation7 + $0x18] sm:$0xff] }
 0x1f4   : > { %2496 = vmatmul.f32.gmra.mxu2 %v9798_v30  ;;  %v10150_v40 = vadd.f32 %v10001_v52, %v2050_v28  ;;  %2811 = vmatpush.msrb.mxu1 %v2802_v19  ;;  %v10174_v19 = vld [vmem:[#allocation2 + $0x100] sm:$0xff] }
 0x1f5   : > { %2621 = vmatmul.f32.gmra.mxu3 %v10030_v59  ;;  %v1747_v58 = vadd.f32 %v10127_v13, %v1727_v38  ;;  %2700 = vmatpush.msra.mxu0 %v2687_v44  ;;  %v1819_v28 = vpop.permute.xlu2 %1818  ;;  %v3126_v44 = vld [vmem:[#allocation7 + $0xb0] sm:$0xff] }
 0x1f6   : > { %3213 = vmatpush.msra.mxu3 %v3091_v32  ;;  %3145 = vmatpush.msra.mxu2 %v3126_v44 }
 0x1f7   : > { %v10154_v27 = vpop.f32.mrf.mxu2  ;;  %v1763_v47 = vmax.f32 %v1747_v58, 0.0  ;;  %2701 = vmatpush.msra.mxu0 %v2686_v14  ;;  %v10207_v14 = vld [vmem:[#allocation2 + $0x110] sm:$0xff] }
 0x1f8   : > { %v10156_v4 = vpop.f32.mrf.mxu3  ;;  %v1670_v6 = vpop.f32.mrf.mxu0 }
 0x1f9   : > { %v1875_v30 = vmul.f32 %v1814_v42, %v1763_v47  ;;  %v1708_v1 = vadd.f32 %v1670_v6, %v9922_v41  ;;  %v1987_v16 = vpop.f32.mrf.mxu1  ;;  %v8787_v6 = vld [vmem:[#allocation2 + $0xa9] sm:$0xff] }
 0x1fa   : > { %v2053_v52 = vadd.f32 %v10095_v26, %v1987_v16  ;;  %v2801_v26 = vld [vmem:[#allocation7 + $0x450] sm:$0xff]  ;;  %v1824_v16 = vpop.permute.xlu0 %1823 }
 0x1fb   : > { %1891 = vst [vmem:[#allocation4 + $0x20] sm:$0xff] %v1875_v30  ;;  %v1728_v39 = vmul.f32 %v10114_v31, %v1708_v1  ;;  %2273 = vmatmul.f32.gmra.mxu0 %v9886_v12  ;;  %2374 = vmatmul.f32.gmra.mxu1 %v8786_v54  ;;  %v3090_v30 = vld [vmem:[#allocation7 + $0x10] sm:$0xff]  ;;  %v2800_v1 = vld [vmem:[#allocation7 + $0x448] sm:$0xff] }
 0x1fc   : > { %2499 = vmatmul.f32.gmra.mxu2 %v9812_v2  ;;  %v10164_v34 = vadd.f32 %v10024_v23, %v2053_v52  ;;  %2812 = vmatpush.msrb.mxu1 %v2801_v26  ;;  %v10190_v26 = vld [vmem:[#allocation2 + $0x108] sm:$0xff] }
 0x1fd   : > { %2624 = vmatmul.f32.gmra.mxu3 %v10050_v35  ;;  %v1748_v41 = vadd.f32 %v10127_v13, %v1728_v39 }
 0x1fe   : > { %3214 = vmatpush.msra.mxu3 %v3090_v30  ;;  %2813 = vmatpush.msrb.mxu1 %v2800_v1  ;;  %v3088_v1 = vld [vmem:[#allocation7] sm:$0xff] }
 0x1ff   : > { %v10168_v38 = vpop.f32.mrf.mxu2  ;;  %v1764_v12 = vmax.f32 %v1748_v41, 0.0 }
 0x200   : > { %v10170_v17 = vpop.f32.mrf.mxu3  ;;  %v1673_v63 = vpop.f32.mrf.mxu0  ;;  %2814 = vmatpush.msrb.mxu1 %v2799_v53  ;;  %v2797_v53 = vld [vmem:[#allocation7 + $0x430] sm:$0xff] }
 0x201   : > { %v1876_v2 = vmul.f32 %v1819_v28, %v1764_v12  ;;  %v1709_v42 = vadd.f32 %v1673_v63, %v9947_v18  ;;  %v1990_v23 = vpop.f32.mrf.mxu1  ;;  %v2685_v12 = vld [vmem:[#allocation7 + $0x3b8] sm:$0xff]  ;;  %v3089_v63 = vld [vmem:[#allocation7 + $0x8] sm:$0xff] }
 0x202   : > { %v2056_v58 = vadd.f32 %v10116_v7, %v1990_v23  ;;  %2702 = vmatpush.msra.mxu0 %v2685_v12  ;;  %3215 = vmatpush.msra.mxu3 %v3089_v63  ;;  %v2683_v12 = vld [vmem:[#allocation7 + $0x3a8] sm:$0xff]  ;;  %v3636_v63 = vld [vmem:[#allocation7 + $0x2f8] sm:$0xff] }
 0x203   : > { %1892 = vst [vmem:[#allocation4 + $0x28] sm:$0xff] %v1876_v2  ;;  %v1729_v47 = vmul.f32 %v10114_v31, %v1709_v42  ;;  %2276 = vmatmul.f32.gmra.mxu0 %v9909_v60  ;;  %2377 = vmatmul.f32.gmra.mxu1 %v8787_v6  ;;  %v1829_v2 = vpop.permute.xlu1 %1828 }
 0x204   : > { %2502 = vmatmul.f32.gmra.mxu2 %v9827_v48  ;;  %v10180_v18 = vadd.f32 %v10044_v8, %v2056_v58  ;;  %v3125_v58 = vld [vmem:[#allocation7 + $0xa8] sm:$0xff]  ;;  %3216 = vmatpush.msra.mxu3 %v3088_v1  ;;  %v13055_v1 = vld [vmem:[#allocation29_spill] sm:$0xff] }
 0x205   : > { %2627 = vmatmul.f32.gmra.mxu3 %v10174_v19  ;;  %v1749_v7 = vadd.f32 %v10127_v13, %v1729_v47  ;;  %3146 = vmatpush.msra.mxu2 %v3125_v58  ;;  %v3123_v58 = vld [vmem:[#allocation7 + $0x98] sm:$0xff] }
 0x206   : > { %3637 = vmatpush.msrb.mxu3 %v3636_v63 }
 0x207   : > { %v10184_v52 = vpop.f32.mrf.mxu2  ;;  %v1765_v60 = vmax.f32 %v1749_v7, 0.0  ;;  %v2684_v7 = vld [vmem:[#allocation7 + $0x3b0] sm:$0xff] }
 0x208   : > { %v10186_v39 = vpop.f32.mrf.mxu3  ;;  %v1676_v54 = vpop.f32.mrf.mxu0  ;;  %2703 = vmatpush.msra.mxu0 %v2684_v7 }
 0x209   : > { %v1877_v48 = vmul.f32 %v1824_v16, %v1765_v60  ;;  %v1710_v32 = vadd.f32 %v1676_v54, %v9972_v20  ;;  %v1993_v8 = vpop.f32.mrf.mxu1  ;;  %v2798_v16 = vld [vmem:[#allocation7 + $0x438] sm:$0xff]  ;;  %v1834_v60 = vpop.permute.xlu2 %1833 }
 0x20a   : > { %v2059_v41 = vadd.f32 %v10140_v33, %v1993_v8  ;;  %2815 = vmatpush.msrb.mxu1 %v2798_v16  ;;  %2704 = vmatpush.msra.mxu0 %v2683_v12  ;;  %v2682_v16 = vld [vmem:[#allocation7 + $0x3a0] sm:$0xff] }
 0x20b   : > { %1893 = vst [vmem:[#allocation4 + $0x30] sm:$0xff] %v1877_v48  ;;  %v1730_v28 = vmul.f32 %v10114_v31, %v1710_v32  ;;  %2279 = vmatmul.f32.gmra.mxu0 %v9934_v56  ;;  %2380 = vmatmul.f32.gmra.mxu1 %v9932_v61  ;;  %v3124_v48 = vld [vmem:[#allocation7 + $0xa0] sm:$0xff] }
 0x20c   : > { %2505 = vmatmul.f32.gmra.mxu2 %v9847_v21  ;;  %v10197_v20 = vadd.f32 %v10067_v0, %v2059_v41  ;;  %v10224_v41 = vld [vmem:[#allocation2 + $0x118] sm:$0xff]  ;;  %2816 = vmatpush.msrb.mxu1 %v2797_v53 }
 0x20d   : > { %2630 = vmatmul.f32.gmra.mxu3 %v10190_v26  ;;  %v1750_v33 = vadd.f32 %v10127_v13, %v1730_v28  ;;  %3147 = vmatpush.msra.mxu2 %v3124_v48  ;;  %v1844_v48 = vpop.permute.xlu1 %1843 }
 0x20e   : > { %2705 = vmatpush.msra.mxu0 %v2682_v16 }
 0x20f   : > { %v10201_v42 = vpop.f32.mrf.mxu2  ;;  %v1766_v56 = vmax.f32 %v1750_v33, 0.0  ;;  %v13053_v33 = vld [vmem:[#allocation25_spill] sm:$0xff]  ;;  %3148 = vmatpush.msra.mxu2 %v3123_v58 }
 0x210   : > { %v10203_v61 = vpop.f32.mrf.mxu3  ;;  %v1679_v23 = vpop.f32.mrf.mxu0  ;;  %v2795_v58 = vld [vmem:[#allocation7 + $0x420] sm:$0xff] }
 0x211   : > { %v1878_v21 = vmul.f32 %v1829_v2, %v1766_v56  ;;  %v1711_v47 = vadd.f32 %v1679_v23, %v9995_v51  ;;  %v1996_v0 = vpop.f32.mrf.mxu1  ;;  %v1839_v2 = vpop.permute.xlu0 %1838 }
 0x212   : > { %v2062_v6 = vadd.f32 %v10154_v27, %v1996_v0 }
 0x213   : > { %1894 = vst [vmem:[#allocation4 + $0x38] sm:$0xff] %v1878_v21  ;;  %v1731_v30 = vmul.f32 %v10114_v31, %v1711_v47  ;;  %2282 = vmatmul.f32.gmra.mxu0 %v9959_v15  ;;  %2383 = vmatmul.f32.gmra.mxu1 %v9957_v25  ;;  %v13054_v47 = vld [vmem:[#allocation31_spill] sm:$0xff] }
 0x214   : > { %2508 = vmatmul.f32.gmra.mxu2 %v9865_v62  ;;  %v10214_v51 = vadd.f32 %v10083_v22, %v2062_v6 }
 0x215   : > { %2633 = vmatmul.f32.gmra.mxu3 %v10207_v14  ;;  %v1751_v27 = vadd.f32 %v10127_v13, %v1731_v30  ;;  %v10241_v30 = vld [vmem:[#allocation2 + $0x120] sm:$0xff] }
 0x217   : > { %v10218_v54 = vpop.f32.mrf.mxu2  ;;  %v1767_v15 = vmax.f32 %v1751_v27, 0.0  ;;  %v3635_v27 = vld [vmem:[#allocation7 + $0x2f0] sm:$0xff] }
 0x218   : > { %v10220_v25 = vpop.f32.mrf.mxu3  ;;  %v1682_v44 = vpop.f32.mrf.mxu0  ;;  %3638 = vmatpush.msrb.mxu3 %v3635_v27  ;;  %v2679_v27 = vld [vmem:[#allocation7 + $0x388] sm:$0xff] }
 0x219   : > { %v1879_v62 = vmul.f32 %v1834_v60, %v1767_v15  ;;  %v1712_v32 = vadd.f32 %v1682_v44, %v10018_v24  ;;  %v1999_v8 = vpop.f32.mrf.mxu1  ;;  %v13056_v60 = vld [vmem:[#allocation26_spill] sm:$0xff] }
 0x21a   : > { %v2065_v22 = vadd.f32 %v10168_v38, %v1999_v8  ;;  %v2796_v15 = vld [vmem:[#allocation7 + $0x428] sm:$0xff] }
 0x21b   : > { %1895 = vst [vmem:[#allocation4 + $0x40] sm:$0xff] %v1879_v62  ;;  %v1732_v28 = vmul.f32 %v10114_v31, %v1712_v32  ;;  %2285 = vmatmul.f32.gmra.mxu0 %v9984_v10  ;;  %2386 = vmatmul.f32.gmra.mxu1 %v9982_v46 }
 0x21c   : > { %2511 = vmatmul.f32.gmra.mxu2 %v13053_v33  ;;  %v10231_v24 = vadd.f32 %v10099_v57, %v2065_v22  ;;  %2817 = vmatpush.msrb.mxu1 %v2796_v15  ;;  %v3122_v22 = vld [vmem:[#allocation7 + $0x90] sm:$0xff] }
 0x21d   : > { %2636 = vmatmul.f32.gmra.mxu3 %v10224_v41  ;;  %v1752_v38 = vadd.f32 %v10127_v13, %v1732_v28  ;;  %3149 = vmatpush.msra.mxu2 %v3122_v22  ;;  %v10258_v33 = vld [vmem:[#allocation2 + $0x128] sm:$0xff]  ;;  %v13060_v22 = vld [vmem:[#allocation28_spill] sm:$0xff] }
 0x21e   : > { %2818 = vmatpush.msrb.mxu1 %v2795_v58  ;;  %v3632_v58 = vld [vmem:[#allocation7 + $0x2d8] sm:$0xff] }
 0x21f   : > { %v10235_v56 = vpop.f32.mrf.mxu2  ;;  %v1768_v10 = vmax.f32 %v1752_v38, 0.0  ;;  %v13057_v38 = vld [vmem:[#allocation30_spill] sm:$0xff] }
 0x220   : > { %v10237_v46 = vpop.f32.mrf.mxu3  ;;  %v1685_v23 = vpop.f32.mrf.mxu0 }
 0x221   : > { %v1880_v21 = vmul.f32 %v1839_v2, %v1768_v10  ;;  %v1713_v0 = vadd.f32 %v1685_v23, %v13054_v47  ;;  %v2002_v6 = vpop.f32.mrf.mxu1  ;;  %v2681_v2 = vld [vmem:[#allocation7 + $0x398] sm:$0xff]  ;;  %v3634_v10 = vld [vmem:[#allocation7 + $0x2e8] sm:$0xff]  ;;  %v13058_v23 = vld [vmem:[#allocation27_spill] sm:$0xff] }
 0x222   : > { %v2068_v57 = vadd.f32 %v10184_v52, %v2002_v6  ;;  %2706 = vmatpush.msra.mxu0 %v2681_v2  ;;  %3639 = vmatpush.msrb.mxu3 %v3634_v10 }
 0x223   : > { %1896 = vst [vmem:[#allocation4 + $0x48] sm:$0xff] %v1880_v21  ;;  %v1733_v7 = vmul.f32 %v10114_v31, %v1713_v0  ;;  %2288 = vmatmul.f32.gmra.mxu0 %v10007_v50  ;;  %2389 = vmatmul.f32.gmra.mxu1 %v13055_v1  ;;  %v1849_v21 = vpop.permute.xlu2 %1848  ;;  %v2680_v0 = vld [vmem:[#allocation7 + $0x390] sm:$0xff] }
 0x224   : > { %2514 = vmatmul.f32.gmra.mxu2 %v13056_v60  ;;  %v10248_v44 = vadd.f32 %v10120_v11, %v2068_v57  ;;  %2707 = vmatpush.msra.mxu0 %v2680_v0 }
 0x225   : > { %2639 = vmatmul.f32.gmra.mxu3 %v10241_v30  ;;  %v1753_v52 = vadd.f32 %v10127_v13, %v1733_v7  ;;  %v3121_v7 = vld [vmem:[#allocation7 + $0x88] sm:$0xff] }
 0x226   : > { %3150 = vmatpush.msra.mxu2 %v3121_v7  ;;  %2708 = vmatpush.msra.mxu0 %v2679_v27  ;;  %v10306_v27 = vld [vmem:[#allocation2 + $0x10a] sm:$0xff] }
 0x227   : > { %v10252_v62 = vpop.f32.mrf.mxu2  ;;  %v1769_v50 = vmax.f32 %v1753_v52, 0.0  ;;  %v13059_v52 = vld [vmem:[#allocation32_spill] sm:$0xff] }
 0x228   : > { %v10254_v32 = vpop.f32.mrf.mxu3  ;;  %v1688_v8 = vpop.f32.mrf.mxu0 }
 0x229   : > { %v1881_v28 = vmul.f32 %v1844_v48, %v1769_v50  ;;  %v1714_v12 = vadd.f32 %v1688_v8, %v10061_v9  ;;  %v2005_v63 = vpop.f32.mrf.mxu1  ;;  %v3633_v48 = vld [vmem:[#allocation7 + $0x2e0] sm:$0xff] }
 0x22a   : > { %v2071_v11 = vadd.f32 %v10201_v42, %v2005_v63  ;;  %v2678_v50 = vld [vmem:[#allocation7 + $0x380] sm:$0xff]  ;;  %3640 = vmatpush.msrb.mxu3 %v3633_v48 }
 0x22b   : > { %1897 = vst [vmem:[#allocation4 + $0x50] sm:$0xff] %v1881_v28  ;;  %v1734_v53 = vmul.f32 %v10114_v31, %v1714_v12  ;;  %2291 = vmatmul.f32.gmra.mxu0 %v10030_v59  ;;  %2392 = vmatmul.f32.gmra.mxu1 %v13057_v38  ;;  %v3120_v8 = vld [vmem:[#allocation7 + $0x80] sm:$0xff]  ;;  %v1854_v12 = vpop.permute.xlu0 %1853 }
 0x22c   : > { %2517 = vmatmul.f32.gmra.mxu2 %v13058_v23  ;;  %v10265_v9 = vadd.f32 %v10142_v36, %v2071_v11  ;;  %2709 = vmatpush.msra.mxu0 %v2678_v50 }
 0x22d   : > { %2642 = vmatmul.f32.gmra.mxu3 %v10258_v33  ;;  %v1754_v42 = vadd.f32 %v10127_v13, %v1734_v53  ;;  %3151 = vmatpush.msra.mxu2 %v3120_v8 }
 0x22e   : > { %3641 = vmatpush.msrb.mxu3 %v3632_v58 }
 0x22f   : > { %v10269_v47 = vpop.f32.mrf.mxu2  ;;  %v1770_v59 = vmax.f32 %v1754_v42, 0.0 }
 0x230   : > { %v10271_v6 = vpop.f32.mrf.mxu3  ;;  %v1691_v57 = vpop.f32.mrf.mxu0 }
 0x231   : > { %v1882_v1 = vmul.f32 %v1849_v21, %v1770_v59  ;;  %v1715_v36 = vadd.f32 %v1691_v57, %v10077_v3  ;;  %v2008_v16 = vpop.f32.mrf.mxu1  ;;  %v2794_v3 = vld [vmem:[#allocation7 + $0x418] sm:$0xff]  ;;  %v2793_v21 = vld [vmem:[#allocation7 + $0x410] sm:$0xff] }
 0x232   : > { %v2074_v60 = vadd.f32 %v10218_v54, %v2008_v16  ;;  %2819 = vmatpush.msrb.mxu1 %v2794_v3 }
 0x233   : > { %1898 = vst [vmem:[#allocation4 + $0x58] sm:$0xff] %v1882_v1  ;;  %v1735_v15 = vmul.f32 %v10114_v31, %v1715_v36  ;;  %2294 = vmatmul.f32.gmra.mxu0 %v10050_v35  ;;  %2395 = vmatmul.f32.gmra.mxu1 %v13059_v52  ;;  %v2792_v52 = vld [vmem:[#allocation7 + $0x408] sm:$0xff] }
 0x234   : > { %2520 = vmatmul.f32.gmra.mxu2 %v13060_v22  ;;  %v10280_v28 = vadd.f32 %v10156_v4, %v2074_v60  ;;  %v10289_v4 = vld [vmem:[#allocation2 + $0x102] sm:$0xff]  ;;  %2820 = vmatpush.msrb.mxu1 %v2793_v21 }
 0x235   : > { %3217 = vmatmul.f32.vlgmr.msra.gmra.mxu3 %v10174_v19  ;;  %v1755_v54 = vadd.f32 %v10127_v13, %v1735_v15  ;;  %v3631_v60 = vld [vmem:[#allocation7 + $0x2d0] sm:$0xff] }
 0x236   : > { %3642 = vmatpush.msrb.mxu3 %v3631_v60  ;;  %2821 = vmatpush.msrb.mxu1 %v2792_v52  ;;  %v3295_v60 = vld [vmem:[#allocation7 + $0x168] sm:$0xff] }
 0x237   : > { %v10284_v35 = vpop.f32.mrf.mxu2  ;;  %v1771_v63 = vmax.f32 %v1755_v54, 0.0 }
 0x238   : > { %v10286_v11 = vpop.f32.mrf.mxu3  ;;  %v1694_v53 = vpop.f32.mrf.mxu0 }
 0x239   : > { %v1883_v38 = vmul.f32 %v1854_v12, %v1771_v63  ;;  %v1716_v2 = vadd.f32 %v1694_v53, %v10093_v5  ;;  %v2011_v10 = vpop.f32.mrf.mxu1  ;;  %v10323_v63 = vld [vmem:[#allocation2 + $0x112] sm:$0xff] }
 0x23a   : > { %v2077_v23 = vadd.f32 %v10235_v56, %v2011_v10  ;;  %v1859_v56 = vpop.permute.xlu1 %1858  ;;  %v3297_v53 = vld [vmem:[#allocation7 + $0x178] sm:$0xff]  ;;  %v2791_v10 = vld [vmem:[#allocation7 + $0x400] sm:$0xff] }
 0x23b   : > { %1899 = vst [vmem:[#allocation4 + $0x60] sm:$0xff] %v1883_v38  ;;  %v1736_v42 = vmul.f32 %v10114_v31, %v1716_v2  ;;  %2297 = vmatmul.f32.gmra.mxu0 %v10174_v19  ;;  %2398 = vmatmul.f32.gmra.mxu1 %v10069_v55  ;;  %v3523_v55 = vld [vmem:[#allocation7 + $0x278] sm:$0xff]  ;;  %v3630_v2 = vld [vmem:[#allocation7 + $0x2c8] sm:$0xff] }
 0x23c   : > { %2523 = vmatmul.f32.gmra.mxu2 %v10289_v4  ;;  %v10297_v59 = vadd.f32 %v10170_v17, %v2077_v23  ;;  %3298 = vmatpush.msrb.mxu0 %v3297_v53  ;;  %v1869_v23 = vpop.permute.xlu0 %1868 }
 0x23d   : > { %3220 = vmatmul.f32.gmra.mxu3 %v10190_v26  ;;  %v1756_v5 = vadd.f32 %v10127_v13, %v1736_v42  ;;  %3524 = vmatpush.msrb.mxu2 %v3523_v55  ;;  %v3521_v42 = vld [vmem:[#allocation7 + $0x268] sm:$0xff]  ;;  %v3410_v55 = vld [vmem:[#allocation7 + $0x1f8] sm:$0xff] }
 0x23e   : > { %2822 = vmatpush.msrb.mxu1 %v2791_v10  ;;  %3643 = vmatpush.msrb.mxu3 %v3630_v2 }
 0x23f   : > { %v10301_v0 = vpop.f32.mrf.mxu2  ;;  %v1772_v57 = vmax.f32 %v1756_v5, 0.0 }
 0x240   : > { %v10303_v7 = vpop.f32.mrf.mxu3  ;;  %v1697_v19 = vpop.f32.mrf.mxu0  ;;  %3411 = vmatpush.msra.mxu1 %v3410_v55 }
 0x241   : > { %v1884_v1 = vmul.f32 %v1859_v56, %v1772_v57  ;;  %v1717_v36 = vadd.f32 %v1697_v19, %v10109_v43  ;;  %v2014_v16 = vpop.f32.mrf.mxu1  ;;  %v10341_v56 = vld [vmem:[#allocation2 + $0x101] sm:$0xff]  ;;  %v3629_v57 = vld [vmem:[#allocation7 + $0x2c0] sm:$0xff] }
 0x242   : > { %v2080_v17 = vadd.f32 %v10252_v62, %v2014_v16  ;;  %v1864_v62 = vpop.permute.xlu2 %1863  ;;  %3644 = vmatpush.msrb.mxu3 %v3629_v57  ;;  %v3407_v57 = vld [vmem:[#allocation7 + $0x1e0] sm:$0xff] }
 0x243   : > { %1900 = vst [vmem:[#allocation4 + $0x68] sm:$0xff] %v1884_v1  ;;  %v1737_v15 = vmul.f32 %v10114_v31, %v1717_v36  ;;  %2300 = vmatmul.f32.gmra.mxu0 %v10190_v26  ;;  %2401 = vmatmul.f32.gmra.mxu1 %v10085_v37  ;;  %v3522_v37 = vld [vmem:[#allocation7 + $0x270] sm:$0xff]  ;;  %v3520_v36 = vld [vmem:[#allocation7 + $0x260] sm:$0xff] }
 0x244   : > { %2526 = vmatmul.f32.gmra.mxu2 %v10306_v27  ;;  %v10314_v43 = vadd.f32 %v10186_v39, %v2080_v17  ;;  %v10356_v17 = vld [vmem:[#allocation2 + $0x109] sm:$0xff] }
 0x245   : > { %3223 = vmatmul.f32.gmra.mxu3 %v10207_v14  ;;  %v1757_v48 = vadd.f32 %v10127_v13, %v1737_v15  ;;  %3525 = vmatpush.msrb.mxu2 %v3522_v37  ;;  %v3628_v15 = vld [vmem:[#allocation7 + $0x2b8] sm:$0xff] }
 0x246   : > { %3645 = vmatpush.msrb.mxu3 %v3628_v15  ;;  %v408_v15 = vld [vmem:[#allocation2 + $0x140] sm:$0xff] }
 0x247   : > { %v10318_v50 = vpop.f32.mrf.mxu2  ;;  %v1773_v8 = vmax.f32 %v1757_v48, 0.0  ;;  %3526 = vmatpush.msrb.mxu2 %v3521_v42  ;;  %v3409_v48 = vld [vmem:[#allocation7 + $0x1f0] sm:$0xff] }
 0x248   : > { %v10320_v22 = vpop.f32.mrf.mxu3  ;;  %v1700_v26 = vpop.f32.mrf.mxu0  ;;  %3412 = vmatpush.msra.mxu1 %v3409_v48  ;;  %v8792_v48 = vld [vmem:[#allocation2 + $0xd1] sm:$0xff] }
 0x249   : > { %v1885_v3 = vmul.f32 %v1864_v62, %v1773_v8  ;;  %v1718_v54 = vadd.f32 %v1700_v26, %v10138_v45  ;;  %v2017_v12 = vpop.f32.mrf.mxu1  ;;  %3527 = vmatpush.msrb.mxu2 %v3520_v36  ;;  %v3519_v26 = vld [vmem:[#allocation7 + $0x258] sm:$0xff] }
 0x24a   : > { %v2083_v39 = vadd.f32 %v10269_v47, %v2017_v12  ;;  %v3294_v12 = vld [vmem:[#allocation7 + $0x160] sm:$0xff] }
 0x24b   : > { %1901 = vst [vmem:[#allocation4 + $0x70] sm:$0xff] %v1885_v3  ;;  %v1738_v38 = vmul.f32 %v10114_v31, %v1718_v54  ;;  %2303 = vmatmul.f32.gmra.mxu0 %v10207_v14  ;;  %2404 = vmatmul.f32.gmra.mxu1 %v10101_v29  ;;  %v10371_v3 = vld [vmem:[#allocation2 + $0x111] sm:$0xff] }
 0x24c   : > { %2529 = vmatmul.f32.gmra.mxu2 %v10323_v63  ;;  %v10331_v45 = vadd.f32 %v10203_v61, %v2083_v39  ;;  %v10374_v54 = vld [vmem:[#allocation2 + $0x130] sm:$0xff]  ;;  %v3627_v39 = vld [vmem:[#allocation7 + $0x2b0] sm:$0xff] }
 0x24d   : > { %3226 = vmatmul.f32.gmra.mxu3 %v10224_v41  ;;  %v1758_v47 = vadd.f32 %v10127_v13, %v1738_v38  ;;  %v8788_v13 = vld [vmem:[#allocation2 + $0xb1] sm:$0xff]  ;;  %v3296_v41 = vld [vmem:[#allocation7 + $0x170] sm:$0xff]  ;;  %3528 = vmatpush.msrb.mxu2 %v3519_v26  ;;  %v3408_v38 = vld [vmem:[#allocation7 + $0x1e8] sm:$0xff] }
 0x24e   : > { %3299 = vmatpush.msrb.mxu0 %v3296_v41  ;;  %3646 = vmatpush.msrb.mxu3 %v3627_v39  ;;  %v8793_v26 = vld [vmem:[#allocation2 + $0xb2] sm:$0xff] }
 0x24f   : > { %v10335_v31 = vpop.f32.mrf.mxu2  ;;  %v1774_v14 = vmax.f32 %v1758_v47, 0.0  ;;  %3413 = vmatpush.msra.mxu1 %v3408_v38 }
 0x250   : > { %v10337_v58 = vpop.f32.mrf.mxu3  ;;  %v10339_v29 = vpop.f32.mrf.mxu0  ;;  %3300 = vmatpush.msrb.mxu0 %v3295_v60  ;;  %v10410_v60 = vld [vmem:[#allocation2 + $0x121] sm:$0xff] }
 0x251   : > { %v1886_v21 = vmul.f32 %v1869_v23, %v1774_v14  ;;  %v2020_v5 = vpop.f32.mrf.mxu1  ;;  %v3518_v23 = vld [vmem:[#allocation7 + $0x250] sm:$0xff]  ;;  %v10391_v14 = vld [vmem:[#allocation2 + $0x119] sm:$0xff]  ;;  %3414 = vmatpush.msra.mxu1 %v3407_v57  ;;  %v2307_v55 = vadd.f32 %v10339_v29, %v10150_v40 }
 0x252   : > { %v2086_v61 = vadd.f32 %v10284_v35, %v2020_v5  ;;  %3301 = vmatpush.msrb.mxu0 %v3294_v12  ;;  %3529 = vmatpush.msrb.mxu2 %v3518_v23  ;;  %v8791_v5 = vld [vmem:[#allocation2 + $0xc9] sm:$0xff]  ;;  %v3625_v29 = vld [vmem:[#allocation7 + $0x2a0] sm:$0xff] }
 0x253   : > { %1902 = vst [vmem:[#allocation4 + $0x78] sm:$0xff] %v1886_v21  ;;  %2407 = vmatmul.f32.gmra.mxu1 %v10122_v49  ;;  %2710 = vmatmul.f32.vlgmr.msra.gmra.mxu0 %v8788_v13  ;;  %v10394_v21 = vld [vmem:[#allocation2 + $0x138] sm:$0xff]  ;;  %v3626_v13 = vld [vmem:[#allocation7 + $0x2a8] sm:$0xff]  ;;  %v3292_v40 = vld [vmem:[#allocation7 + $0x150] sm:$0xff] }
 0x254   : > { %3152 = vmatmul.f32.vlgmr.msra.gmra.mxu2 %v10341_v56  ;;  %v10347_v19 = vadd.f32 %v10220_v25, %v2086_v61  ;;  %v3293_v61 = vld [vmem:[#allocation7 + $0x158] sm:$0xff]  ;;  %3647 = vmatpush.msrb.mxu3 %v3626_v13  ;;  %v3516_v23 = vld [vmem:[#allocation7 + $0x240] sm:$0xff] }
 0x255   : > { %3229 = vmatmul.f32.gmra.mxu3 %v10241_v30  ;;  %v8789_v30 = vld [vmem:[#allocation2 + $0xb9] sm:$0xff]  ;;  %3302 = vmatpush.msrb.mxu0 %v3293_v61  ;;  %v409_v61 = vld [vmem:[#allocation2 + $0x148] sm:$0xff] }
 0x256   : > { %3648 = vmatpush.msrb.mxu3 %v3625_v29  ;;  %v8794_v13 = vld [vmem:[#allocation2 + $0xd9] sm:$0xff] }
 0x257   : > { %v10350_v1 = vpop.f32.mrf.mxu2  ;;  %3303 = vmatpush.msrb.mxu0 %v3292_v40  ;;  %v10446_v40 = vld [vmem:[#allocation2 + $0x131] sm:$0xff] }
 0x258   : > { %v10352_v35 = vpop.f32.mrf.mxu3  ;;  %v10354_v49 = vpop.f32.mrf.mxu0 }
 0x259   : > { %v2023_v16 = vpop.f32.mrf.mxu1 }
 0x25a   : > { %v2089_v25 = vadd.f32 %v10301_v0, %v2023_v16 }
 0x25b   : > { %2410 = vmatmul.f32.gmra.mxu1 %v10341_v56  ;;  %2713 = vmatmul.f32.gmra.mxu0 %v8789_v30 }
 0x25c   : > { %3155 = vmatmul.f32.gmra.mxu2 %v10356_v17  ;;  %v10362_v52 = vadd.f32 %v10237_v46, %v2089_v25  ;;  %v3517_v25 = vld [vmem:[#allocation7 + $0x248] sm:$0xff] }
 0x25d   : > { %3232 = vmatmul.f32.gmra.mxu3 %v10258_v33  ;;  %v8790_v33 = vld [vmem:[#allocation2 + $0xc1] sm:$0xff]  ;;  %3530 = vmatpush.msrb.mxu2 %v3517_v25  ;;  %v2947_v25 = vld [vmem:[%s12985_s1 + $0x98] sm:$0xff] }
 0x25f   : > { %v10365_v62 = vpop.f32.mrf.mxu2  ;;  %3531 = vmatpush.msrb.mxu2 %v3516_v23  ;;  %v3404_v23 = vld [vmem:[#allocation7 + $0x1c8] sm:$0xff] }
 0x260   : > { %v10367_v0 = vpop.f32.mrf.mxu3  ;;  %v10369_v8 = vpop.f32.mrf.mxu0 }
 0x261   : > { %v2026_v37 = vpop.f32.mrf.mxu1 }
 0x262   : > { %v2092_v46 = vadd.f32 %v10318_v50, %v2026_v37  ;;  %v2944_v50 = vld [vmem:[%s12985_s1 + $0x80] sm:$0xff] }
 0x263   : > { %2413 = vmatmul.f32.gmra.mxu1 %v10356_v17  ;;  %2716 = vmatmul.f32.gmra.mxu0 %v8790_v33  ;;  %v2946_v33 = vld [vmem:[%s12985_s1 + $0x90] sm:$0xff] }
 0x264   : > { %3158 = vmatmul.f32.gmra.mxu2 %v10371_v3  ;;  %v10379_v53 = vadd.f32 %v10254_v32, %v2092_v46  ;;  %2962 = vperm.xlu1 %8769, %v2944_v50   ;;  %v3406_v46 = vld [vmem:[#allocation7 + $0x1d8] sm:$0xff] }
 0x265   : > { %3235 = vmatmul.f32.gmra.mxu3 %v10374_v54  ;;  %3415 = vmatpush.msra.mxu1 %v3406_v46  ;;  %v410_v46 = vld [vmem:[#allocation2 + $0x150] sm:$0xff] }
 0x266   : > { %2972 = vperm.xlu0 %8768, %v2946_v33   ;;  %v8796_v33 = vld [vmem:[#allocation2 + $0xe1] sm:$0xff] }
 0x267   : > { %v10385_v2 = vpop.f32.mrf.mxu2 }
 0x268   : > { %v10387_v10 = vpop.f32.mrf.mxu3  ;;  %v10389_v47 = vpop.f32.mrf.mxu0 }
 0x269   : > { %v2029_v32 = vpop.f32.mrf.mxu1 }
 0x26a   : > { %v2095_v42 = vadd.f32 %v10335_v31, %v2029_v32 }
 0x26b   : > { %2416 = vmatmul.f32.gmra.mxu1 %v10371_v3  ;;  %2719 = vmatmul.f32.gmra.mxu0 %v8791_v5 }
 0x26c   : > { %3161 = vmatmul.f32.gmra.mxu2 %v10391_v14  ;;  %v10399_v41 = vadd.f32 %v10271_v6, %v2095_v42  ;;  %v10428_v42 = vld [vmem:[#allocation2 + $0x129] sm:$0xff]  ;;  %2977 = vperm.xlu1 %8769, %v2947_v25   ;;  %v411_v25 = vld [vmem:[#allocation2 + $0x158] sm:$0xff] }
 0x26d   : > { %3238 = vmatmul.f32.gmra.mxu3 %v10394_v21 }
 0x26f   : > { %v10402_v31 = vpop.f32.mrf.mxu2 }
 0x270   : > { %v10406_v36 = vpop.f32.mrf.mxu3  ;;  %v10408_v16 = vpop.f32.mrf.mxu0 }
 0x271   : > { %v2372_v30 = vpop.f32.mrf.mxu1 }
 0x272   : > { %v2420_v6 = vadd.f32 %v2372_v30, %v2307_v55  ;;  %v3405_v55 = vld [vmem:[#allocation7 + $0x1d0] sm:$0xff] }
 0x273   : > { %2722 = vmatmul.f32.gmra.mxu0 %v8792_v48  ;;  %2823 = vmatmul.f32.vlgmr.msrb.gmra.mxu1 %v8793_v26  ;;  %v3515_v26 = vld [vmem:[#allocation7 + $0x238] sm:$0xff] }
 0x274   : > { %v2533_v37 = vadd.f32 %v10350_v1, %v2420_v6  ;;  %3164 = vmatmul.f32.gmra.mxu2 %v10410_v60  ;;  %v2308_v1 = vadd.f32 %v10354_v49, %v10164_v34  ;;  %v3291_v34 = vld [vmem:[#allocation7 + $0x148] sm:$0xff]  ;;  %v3624_v49 = vld [vmem:[#allocation7 + $0x298] sm:$0xff]  ;;  %3416 = vmatpush.msra.mxu1 %v3405_v55 }
 0x275   : > { %3241 = vmatmul.f32.gmra.mxu3 %v408_v15  ;;  %3304 = vmatpush.msrb.mxu0 %v3291_v34 }
 0x276   : > { %v10418_v12 = vadd.f32 %v10286_v11, %v2533_v37  ;;  %v8795_v11 = vld [vmem:[#allocation2 + $0xba] sm:$0xff]  ;;  %3649 = vmatpush.msrb.mxu3 %v3624_v49  ;;  %3532 = vmatpush.msrb.mxu2 %v3515_v26 }
 0x277   : > { %v10420_v39 = vpop.f32.mrf.mxu2  ;;  %3417 = vmatpush.msra.mxu1 %v3404_v23  ;;  %v10464_v49 = vld [vmem:[#allocation2 + $0x139] sm:$0xff]  ;;  %v10482_v23 = vld [vmem:[#allocation2 + $0x141] sm:$0xff] }
 0x278   : > { %v10424_v38 = vpop.f32.mrf.mxu3  ;;  %v10426_v50 = vpop.f32.mrf.mxu0 }
 0x279   : > { %v2375_v32 = vpop.f32.mrf.mxu1 }
 0x27a   : > { %v2421_v5 = vadd.f32 %v2375_v32, %v2308_v1  ;;  %v2945_v32 = vld [vmem:[%s12985_s1 + $0x88] sm:$0xff] }
 0x27b   : > { %2725 = vmatmul.f32.gmra.mxu0 %v8794_v13  ;;  %2826 = vmatmul.f32.gmra.mxu1 %v8795_v11 }
 0x27c   : > { %v2534_v57 = vadd.f32 %v10365_v62, %v2421_v5  ;;  %3167 = vmatmul.f32.gmra.mxu2 %v10428_v42  ;;  %v2309_v62 = vadd.f32 %v10369_v8, %v10180_v18  ;;  %v3290_v18 = vld [vmem:[#allocation7 + $0x140] sm:$0xff]  ;;  %v3623_v8 = vld [vmem:[#allocation7 + $0x290] sm:$0xff]  ;;  %2967 = vperm.xlu2 %8770, %v2945_v32  }
 0x27d   : > { %3244 = vmatmul.f32.gmra.mxu3 %v409_v61  ;;  %3305 = vmatpush.msrb.mxu0 %v3290_v18  ;;  %v3513_v18 = vld [vmem:[#allocation7 + $0x228] sm:$0xff] }
 0x27e   : > { %v10436_v30 = vadd.f32 %v10303_v7, %v2534_v57  ;;  %v8797_v7 = vld [vmem:[#allocation2 + $0xc2] sm:$0xff]  ;;  %3650 = vmatpush.msrb.mxu3 %v3623_v8 }
 0x27f   : > { %v10438_v6 = vpop.f32.mrf.mxu2  ;;  %v3514_v57 = vld [vmem:[#allocation7 + $0x230] sm:$0xff] }
 0x280   : > { %v10442_v15 = vpop.f32.mrf.mxu3  ;;  %v10444_v48 = vpop.f32.mrf.mxu0  ;;  %3533 = vmatpush.msrb.mxu2 %v3514_v57  ;;  %v8800_v57 = vld [vmem:[#allocation2 + $0xf1] sm:$0xff] }
 0x281   : > { %v2378_v37 = vpop.f32.mrf.mxu1 }
 0x282   : > { %v2422_v29 = vadd.f32 %v2378_v37, %v2309_v62  ;;  %v8798_v62 = vld [vmem:[#allocation2 + $0xe9] sm:$0xff]  ;;  %v3403_v37 = vld [vmem:[#allocation7 + $0x1c0] sm:$0xff]  ;;  %3534 = vmatpush.msrb.mxu2 %v3513_v18 }
 0x283   : > { %2728 = vmatmul.f32.gmra.mxu0 %v8796_v33  ;;  %2829 = vmatmul.f32.gmra.mxu1 %v8797_v7  ;;  %v413_v18 = vld [vmem:[#allocation2 + $0x168] sm:$0xff] }
 0x284   : > { %v2535_v1 = vadd.f32 %v10385_v2, %v2422_v29  ;;  %3170 = vmatmul.f32.gmra.mxu2 %v10446_v40  ;;  %v2310_v2 = vadd.f32 %v10389_v47, %v10197_v20  ;;  %v3289_v20 = vld [vmem:[#allocation7 + $0x138] sm:$0xff]  ;;  %v3622_v47 = vld [vmem:[#allocation7 + $0x288] sm:$0xff]  ;;  %v2949_v29 = vld [vmem:[%s12985_s1 + $0xa8] sm:$0xff]  ;;  %3418 = vmatpush.msra.mxu1 %v3403_v37 }
 0x285   : > { %3247 = vmatmul.f32.gmra.mxu3 %v410_v46  ;;  %3306 = vmatpush.msrb.mxu0 %v3289_v20 }
 0x286   : > { %v10454_v5 = vadd.f32 %v10320_v22, %v2535_v1  ;;  %v8799_v22 = vld [vmem:[#allocation2 + $0xca] sm:$0xff]  ;;  %3651 = vmatpush.msrb.mxu3 %v3622_v47  ;;  %2987 = vperm.xlu0 %8768, %v2949_v29   ;;  %v3512_v47 = vld [vmem:[#allocation7 + $0x220] sm:$0xff] }
 0x287   : > { %v10456_v61 = vpop.f32.mrf.mxu2  ;;  %v10500_v29 = vld [vmem:[#allocation2 + $0x149] sm:$0xff]  ;;  %3535 = vmatpush.msrb.mxu2 %v3512_v47 }
 0x288   : > { %v10460_v13 = vpop.f32.mrf.mxu3  ;;  %v10462_v11 = vpop.f32.mrf.mxu0 }
 0x289   : > { %v2381_v34 = vpop.f32.mrf.mxu1 }
 0x28a   : > { %v2423_v55 = vadd.f32 %v2381_v34, %v2310_v2  ;;  %v412_v2 = vld [vmem:[#allocation2 + $0x160] sm:$0xff]  ;;  %v3621_v34 = vld [vmem:[#allocation7 + $0x280] sm:$0xff] }
 0x28b   : > { %2731 = vmatmul.f32.gmra.mxu0 %v8798_v62  ;;  %2832 = vmatmul.f32.gmra.mxu1 %v8799_v22 }
 0x28c   : > { %v2536_v26 = vadd.f32 %v10402_v31, %v2423_v55  ;;  %3173 = vmatmul.f32.gmra.mxu2 %v10464_v49  ;;  %v2311_v31 = vadd.f32 %v10408_v16, %v10214_v51  ;;  %v3288_v51 = vld [vmem:[#allocation7 + $0x130] sm:$0xff]  ;;  %3652 = vmatpush.msrb.mxu3 %v3621_v34  ;;  %v3402_v16 = vld [vmem:[#allocation7 + $0x1b8] sm:$0xff] }
 0x28d   : > { %3250 = vmatmul.f32.gmra.mxu3 %v411_v25  ;;  %3307 = vmatpush.msrb.mxu0 %v3288_v51  ;;  %v2950_v25 = vld [vmem:[%s12985_s1 + $0xb0] sm:$0xff] }
 0x28e   : > { %v10472_v46 = vadd.f32 %v10337_v58, %v2536_v26  ;;  %v8801_v58 = vld [vmem:[#allocation2 + $0xd2] sm:$0xff]  ;;  %3419 = vmatpush.msra.mxu1 %v3402_v16  ;;  %2992 = vperm.xlu1 %8769, %v2950_v25  }
 0x28f   : > { %v10474_v33 = vpop.f32.mrf.mxu2  ;;  %v3511_v16 = vld [vmem:[#allocation7 + $0x218] sm:$0xff] }
 0x290   : > { %v10478_v7 = vpop.f32.mrf.mxu3  ;;  %v10480_v1 = vpop.f32.mrf.mxu0  ;;  %3536 = vmatpush.msrb.mxu2 %v3511_v16  ;;  %v415_v16 = vld [vmem:[#allocation2 + $0x178] sm:$0xff] }
 0x291   : > { %v2384_v8 = vpop.f32.mrf.mxu1 }
 0x292   : > { %v2424_v32 = vadd.f32 %v2384_v8, %v2311_v31  ;;  %v8802_v8 = vld [vmem:[#allocation2 + $0xf9] sm:$0xff] }
 0x293   : > { %2734 = vmatmul.f32.gmra.mxu0 %v8800_v57  ;;  %2835 = vmatmul.f32.gmra.mxu1 %v8801_v58  ;;  %v2948_v57 = vld [vmem:[%s12985_s1 + $0xa0] sm:$0xff] }
 0x294   : > { %v2537_v55 = vadd.f32 %v10420_v39, %v2424_v32  ;;  %3176 = vmatmul.f32.gmra.mxu2 %v10482_v23  ;;  %v2312_v39 = vadd.f32 %v10426_v50, %v10231_v24  ;;  %v3287_v24 = vld [vmem:[#allocation7 + $0x128] sm:$0xff]  ;;  %v4286_v50 = vld [vmem:[#allocation7 + $0xf8] sm:$0xff]  ;;  %2982 = vperm.xlu2 %8770, %v2948_v57  }
 0x295   : > { %3253 = vmatmul.f32.gmra.mxu3 %v412_v2  ;;  %3308 = vmatpush.msrb.mxu0 %v3287_v24  ;;  %v3401_v2 = vld [vmem:[#allocation7 + $0x1b0] sm:$0xff]  ;;  %v10537_v57 = vld [vmem:[#allocation2 + $0x159] sm:$0xff] }
 0x296   : > { %v10490_v62 = vadd.f32 %v10352_v35, %v2537_v55  ;;  %v8803_v35 = vld [vmem:[#allocation2 + $0xda] sm:$0xff]  ;;  %4287 = vmatpush.msra.mxu3 %v4286_v50  ;;  %3420 = vmatpush.msra.mxu1 %v3401_v2  ;;  %v3510_v50 = vld [vmem:[#allocation7 + $0x210] sm:$0xff] }
 0x297   : > { %v10492_v22 = vpop.f32.mrf.mxu2  ;;  %3537 = vmatpush.msrb.mxu2 %v3510_v50  ;;  %v3283_v50 = vld [vmem:[#allocation7 + $0x108] sm:$0xff] }
 0x298   : > { %v10496_v26 = vpop.f32.mrf.mxu3  ;;  %v10498_v20 = vpop.f32.mrf.mxu0 }
 0x299   : > { %v2387_v37 = vpop.f32.mrf.mxu1 }
 0x29a   : > { %v2425_v31 = vadd.f32 %v2387_v37, %v2312_v39  ;;  %v10518_v39 = vld [vmem:[#allocation2 + $0x151] sm:$0xff] }
 0x29b   : > { %2737 = vmatmul.f32.gmra.mxu0 %v8802_v8  ;;  %2838 = vmatmul.f32.gmra.mxu1 %v8803_v35  ;;  %v414_v37 = vld [vmem:[#allocation2 + $0x170] sm:$0xff]  ;;  %v2952_v8 = vld [vmem:[%s12985_s1 + $0xc0] sm:$0xff] }
 0x29c   : > { %v2538_v32 = vadd.f32 %v10438_v6, %v2425_v31  ;;  %3179 = vmatmul.f32.gmra.mxu2 %v10500_v29  ;;  %v2313_v6 = vadd.f32 %v10444_v48, %v10248_v44  ;;  %v3286_v44 = vld [vmem:[#allocation7 + $0x120] sm:$0xff]  ;;  %v4285_v48 = vld [vmem:[#allocation7 + $0xf0] sm:$0xff]  ;;  %3002 = vperm.xlu0 %8768, %v2952_v8  }
 0x29d   : > { %3256 = vmatmul.f32.gmra.mxu3 %v413_v18  ;;  %3309 = vmatpush.msrb.mxu0 %v3286_v44  ;;  %v3400_v18 = vld [vmem:[#allocation7 + $0x1a8] sm:$0xff] }
 0x29e   : > { %v10508_v58 = vadd.f32 %v10367_v0, %v2538_v32  ;;  %v8804_v0 = vld [vmem:[#allocation2 + $0xe2] sm:$0xff]  ;;  %4288 = vmatpush.msra.mxu3 %v4285_v48  ;;  %3421 = vmatpush.msra.mxu1 %v3400_v18 }
 0x29f   : > { %v10510_v34 = vpop.f32.mrf.mxu2  ;;  %v3509_v18 = vld [vmem:[#allocation7 + $0x208] sm:$0xff] }
 0x2a0   : > { %v10514_v55 = vpop.f32.mrf.mxu3  ;;  %v10516_v51 = vpop.f32.mrf.mxu0  ;;  %3538 = vmatpush.msrb.mxu2 %v3509_v18 }
 0x2a1   : > { %v2390_v25 = vpop.f32.mrf.mxu1 }
 0x2a2   : > { %v2426_v47 = vadd.f32 %v2390_v25, %v2313_v6 }
 0x2a3   : > { %2740 = vmatmul.f32.gmra.mxu0 %v10341_v56  ;;  %2841 = vmatmul.f32.gmra.mxu1 %v8804_v0 }
 0x2a4   : > { %v2539_v31 = vadd.f32 %v10456_v61, %v2426_v47  ;;  %3182 = vmatmul.f32.gmra.mxu2 %v10518_v39  ;;  %v2314_v61 = vadd.f32 %v10462_v11, %v10265_v9  ;;  %v3285_v9 = vld [vmem:[#allocation7 + $0x118] sm:$0xff]  ;;  %v4284_v11 = vld [vmem:[#allocation7 + $0xe8] sm:$0xff]  ;;  %v3399_v47 = vld [vmem:[#allocation7 + $0x1a0] sm:$0xff] }
 0x2a5   : > { %3259 = vmatmul.f32.gmra.mxu3 %v414_v37  ;;  %3310 = vmatpush.msrb.mxu0 %v3285_v9  ;;  %v2953_v37 = vld [vmem:[%s12985_s1 + $0xc8] sm:$0xff]  ;;  %v2951_v9 = vld [vmem:[%s12985_s1 + $0xb8] sm:$0xff] }
 0x2a6   : > { %v10527_v35 = vadd.f32 %v10387_v10, %v2539_v31  ;;  %v8805_v10 = vld [vmem:[#allocation2 + $0xea] sm:$0xff]  ;;  %4289 = vmatpush.msra.mxu3 %v4284_v11  ;;  %3422 = vmatpush.msra.mxu1 %v3399_v47  ;;  %v2315_v31 = vadd.f32 %v10480_v1, %v10280_v28  ;;  %v3282_v28 = vld [vmem:[#allocation7 + $0x100] sm:$0xff] }
 0x2a7   : > { %v10529_v56 = vpop.f32.mrf.mxu2  ;;  %3007 = vperm.xlu1 %8769, %v2953_v37   ;;  %v3508_v1 = vld [vmem:[#allocation7 + $0x200] sm:$0xff]  ;;  %2997 = vperm.xlu2 %8770, %v2951_v9  }
 0x2a8   : > { %v10533_v32 = vpop.f32.mrf.mxu3  ;;  %v10535_v24 = vpop.f32.mrf.mxu0  ;;  %3539 = vmatpush.msrb.mxu2 %v3508_v1  ;;  %v10600_v9 = vld [vmem:[#allocation2 + $0x171] sm:$0xff] }
 0x2a9   : > { %v2393_v2 = vpop.f32.mrf.mxu1 }
 0x2aa   : > { %v2427_v6 = vadd.f32 %v2393_v2, %v2314_v61  ;;  %v10556_v61 = vld [vmem:[#allocation2 + $0x161] sm:$0xff] }
 0x2ab   : > { %2743 = vmatmul.f32.gmra.mxu0 %v10356_v17  ;;  %2844 = vmatmul.f32.gmra.mxu1 %v8805_v10  ;;  %v10558_v2 = vld [vmem:[#allocation2 + $0x11a] sm:$0xff] }
 0x2ac   : > { %v2540_v25 = vadd.f32 %v10474_v33, %v2427_v6  ;;  %3185 = vmatmul.f32.gmra.mxu2 %v10537_v57  ;;  %v3284_v33 = vld [vmem:[#allocation7 + $0x110] sm:$0xff]  ;;  %v8806_v6 = vld [vmem:[#allocation2 + $0xf2] sm:$0xff] }
 0x2ad   : > { %3262 = vmatmul.f32.gmra.mxu3 %v415_v16  ;;  %3311 = vmatpush.msrb.mxu0 %v3284_v33  ;;  %v4283_v10 = vld [vmem:[#allocation7 + $0xe0] sm:$0xff] }
 0x2ae   : > { %v10546_v0 = vadd.f32 %v10406_v36, %v2540_v25  ;;  %v3398_v25 = vld [vmem:[#allocation7 + $0x198] sm:$0xff]  ;;  %4290 = vmatpush.msra.mxu3 %v4283_v10 }
 0x2af   : > { %v10548_v17 = vpop.f32.mrf.mxu2  ;;  %3312 = vmatpush.msrb.mxu0 %v3283_v50  ;;  %3423 = vmatpush.msra.mxu1 %v3398_v25  ;;  %v3975_v10 = vld [vmem:[#allocation7 + $0x478] sm:$0xff] }
 0x2b0   : > { %v10552_v44 = vpop.f32.mrf.mxu3  ;;  %v10554_v48 = vpop.f32.mrf.mxu0  ;;  %3976 = vmatpush.msra.mxu2 %v3975_v10  ;;  %v10623_v10 = vld [vmem:[#allocation2 + $0x179] sm:$0xff] }
 0x2b1   : > { %v2396_v8 = vpop.f32.mrf.mxu1  ;;  %3313 = vmatpush.msrb.mxu0 %v3282_v28 }
 0x2b2   : > { %v2428_v36 = vadd.f32 %v2396_v8, %v2315_v31  ;;  %v10578_v31 = vld [vmem:[#allocation2 + $0x169] sm:$0xff] }
 0x2b3   : > { %2746 = vmatmul.f32.gmra.mxu0 %v10371_v3  ;;  %2847 = vmatmul.f32.gmra.mxu1 %v8806_v6  ;;  %v10580_v8 = vld [vmem:[#allocation2 + $0x122] sm:$0xff] }
 0x2b4   : > { %v2541_v16 = vadd.f32 %v10492_v22, %v2428_v36  ;;  %3188 = vmatmul.f32.gmra.mxu2 %v10556_v61  ;;  %v2316_v22 = vadd.f32 %v10498_v20, %v10297_v59  ;;  %v4282_v36 = vld [vmem:[#allocation7 + $0xd8] sm:$0xff]  ;;  %v3397_v59 = vld [vmem:[#allocation7 + $0x190] sm:$0xff]  ;;  %v2955_v20 = vld [vmem:[%s12985_s1 + $0xd8] sm:$0xff] }
 0x2b5   : > { %3653 = vmatmul.f32.vlgmr.msrb.gmra.mxu3 %v10558_v2  ;;  %3424 = vmatpush.msra.mxu1 %v3397_v59 }
 0x2b6   : > { %v10568_v3 = vadd.f32 %v10424_v38, %v2541_v16  ;;  %v8807_v38 = vld [vmem:[#allocation2 + $0xfa] sm:$0xff]  ;;  %4291 = vmatpush.msra.mxu3 %v4282_v36  ;;  %3017 = vperm.xlu0 %8768, %v2955_v20   ;;  %v3974_v20 = vld [vmem:[#allocation7 + $0x470] sm:$0xff] }
 0x2b7   : > { %v10570_v11 = vpop.f32.mrf.mxu2  ;;  %3977 = vmatpush.msra.mxu2 %v3974_v20 }
 0x2b8   : > { %v10574_v47 = vpop.f32.mrf.mxu3  ;;  %v10576_v37 = vpop.f32.mrf.mxu0 }
 0x2b9   : > { %v2399_v33 = vpop.f32.mrf.mxu1 }
 0x2ba   : > { %v2429_v18 = vadd.f32 %v2399_v33, %v2316_v22  ;;  %v10602_v33 = vld [vmem:[#allocation2 + $0x12a] sm:$0xff] }
 0x2bb   : > { %2749 = vmatmul.f32.gmra.mxu0 %v10391_v14  ;;  %2850 = vmatmul.f32.gmra.mxu1 %v8807_v38 }
 0x2bc   : > { %v2542_v50 = vadd.f32 %v10510_v34, %v2429_v18  ;;  %3191 = vmatmul.f32.gmra.mxu2 %v10578_v31  ;;  %v2317_v34 = vadd.f32 %v10516_v51, %v10314_v43  ;;  %v4281_v43 = vld [vmem:[#allocation7 + $0xd0] sm:$0xff]  ;;  %v3396_v51 = vld [vmem:[#allocation7 + $0x188] sm:$0xff] }
 0x2bd   : > { %3656 = vmatmul.f32.gmra.mxu3 %v10580_v8  ;;  %3425 = vmatpush.msra.mxu1 %v3396_v51  ;;  %v2956_v18 = vld [vmem:[%s12985_s1 + $0xe0] sm:$0xff] }
 0x2be   : > { %v10590_v6 = vadd.f32 %v10442_v15, %v2542_v50  ;;  %4292 = vmatpush.msra.mxu3 %v4281_v43  ;;  %3022 = vperm.xlu1 %8769, %v2956_v18   ;;  %v2954_v43 = vld [vmem:[%s12985_s1 + $0xd0] sm:$0xff] }
 0x2bf   : > { %v10592_v28 = vpop.f32.mrf.mxu2  ;;  %3012 = vperm.xlu2 %8770, %v2954_v43  }
 0x2c0   : > { %v10596_v1 = vpop.f32.mrf.mxu3  ;;  %v10598_v16 = vpop.f32.mrf.mxu0 }
 0x2c1   : > { %v2402_v25 = vpop.f32.mrf.mxu1 }
 0x2c2   : > { %v2430_v22 = vadd.f32 %v2402_v25, %v2317_v34 }
 0x2c3   : > { %2752 = vmatmul.f32.gmra.mxu0 %v10410_v60  ;;  %2853 = vmatmul.f32.gmra.mxu1 %v10289_v4 }
 0x2c4   : > { %v2543_v15 = vadd.f32 %v10529_v56, %v2430_v22  ;;  %3194 = vmatmul.f32.gmra.mxu2 %v10600_v9  ;;  %v2318_v56 = vadd.f32 %v10535_v24, %v10331_v45  ;;  %v10625_v22 = vld [vmem:[#allocation2 + $0x132] sm:$0xff]  ;;  %v4280_v24 = vld [vmem:[#allocation7 + $0xc8] sm:$0xff] }
 0x2c5   : > { %3659 = vmatmul.f32.gmra.mxu3 %v10602_v33  ;;  %v3749_v45 = vld [vmem:[#allocation7 + $0x378] sm:$0xff] }
 0x2c6   : > { %v10613_v38 = vadd.f32 %v10460_v13, %v2543_v15  ;;  %v3395_v15 = vld [vmem:[#allocation7 + $0x180] sm:$0xff]  ;;  %3750 = vmatpush.msra.mxu0 %v3749_v45  ;;  %4293 = vmatpush.msra.mxu3 %v4280_v24  ;;  %v2958_v24 = vld [vmem:[%s12985_s1 + $0xf0] sm:$0xff] }
 0x2c7   : > { %v10615_v50 = vpop.f32.mrf.mxu2  ;;  %3426 = vmatpush.msra.mxu1 %v3395_v15  ;;  %3032 = vperm.xlu0 %8768, %v2958_v24  }
 0x2c8   : > { %13061 = vst [vmem:[#allocation25_spill] sm:$0xff] %v10613_v38  ;;  %v10619_v36 = vpop.f32.mrf.mxu3  ;;  %v10621_v59 = vpop.f32.mrf.mxu0  ;;  %v10646_v38 = vld [vmem:[#allocation2 + $0x13a] sm:$0xff] }
 0x2c9   : > { %v2405_v34 = vpop.f32.mrf.mxu1 }
 0x2ca   : > { %v2431_v25 = vadd.f32 %v2405_v34, %v2318_v56  ;;  %v3973_v34 = vld [vmem:[#allocation7 + $0x468] sm:$0xff] }
 0x2cb   : > { %2755 = vmatmul.f32.gmra.mxu0 %v10428_v42  ;;  %2856 = vmatmul.f32.gmra.mxu1 %v10306_v27 }
 0x2cc   : > { %v2544_v13 = vadd.f32 %v10548_v17, %v2431_v25  ;;  %3197 = vmatmul.f32.gmra.mxu2 %v10623_v10  ;;  %v2319_v17 = vadd.f32 %v10554_v48, %v10347_v19  ;;  %v4279_v19 = vld [vmem:[#allocation7 + $0xc0] sm:$0xff]  ;;  %v10653_v48 = vld [vmem:[#allocation7 + $0x3f8] sm:$0xff] }
 0x2cd   : > { %3662 = vmatmul.f32.gmra.mxu3 %v10625_v22  ;;  %3978 = vmatpush.msra.mxu2 %v3973_v34  ;;  %v3972_v34 = vld [vmem:[#allocation7 + $0x460] sm:$0xff] }
 0x2ce   : > { %v10636_v51 = vadd.f32 %v10478_v7, %v2544_v13  ;;  %v3748_v13 = vld [vmem:[#allocation7 + $0x370] sm:$0xff]  ;;  %4294 = vmatpush.msra.mxu3 %v4279_v19  ;;  %3863 = vmatpush.msrb.mxu1 %v10653_v48 }
 0x2cf   : > { %v10638_v18 = vpop.f32.mrf.mxu2  ;;  %3751 = vmatpush.msra.mxu0 %v3748_v13  ;;  %3979 = vmatpush.msra.mxu2 %v3972_v34  ;;  %v10671_v13 = vld [vmem:[#allocation2 + $0x142] sm:$0xff] }
 0x2d0   : > { %v10642_v56 = vpop.f32.mrf.mxu3  ;;  %v10644_v20 = vpop.f32.mrf.mxu0 }
 0x2d1   : > { %v2408_v25 = vpop.f32.mrf.mxu1 }
 0x2d2   : > { %v2432_v45 = vadd.f32 %v2408_v25, %v2319_v17 }
 0x2d3   : > { %2859 = vmatmul.f32.gmra.mxu1 %v10323_v63  ;;  %3314 = vmatmul.f32.vlgmr.msrb.gmra.mxu0 %v10289_v4 }
 0x2d4   : > { %v2545_v7 = vadd.f32 %v10570_v11, %v2432_v45  ;;  %3540 = vmatmul.f32.vlgmr.msrb.gmra.mxu2 %v10391_v14  ;;  %v2320_v14 = vadd.f32 %v10576_v37, %v10362_v52  ;;  %v3747_v52 = vld [vmem:[#allocation7 + $0x368] sm:$0xff]  ;;  %v10678_v37 = vld [vmem:[#allocation7 + $0x3f0] sm:$0xff] }
 0x2d5   : > { %3665 = vmatmul.f32.gmra.mxu3 %v10646_v38  ;;  %3752 = vmatpush.msra.mxu0 %v3747_v52 }
 0x2d6   : > { %v10660_v4 = vadd.f32 %v10496_v26, %v2545_v7  ;;  %v2959_v7 = vld [vmem:[%s12985_s1 + $0xf8] sm:$0xff]  ;;  %3864 = vmatpush.msrb.mxu1 %v10678_v37 }
 0x2d7   : > { %v3153_v11 = vpop.f32.mrf.mxu2  ;;  %3037 = vperm.xlu1 %8769, %v2959_v7  }
 0x2d8   : > { %v10665_v15 = vadd.f32 %v10574_v47, %v3153_v11  ;;  %v10667_v43 = vpop.f32.mrf.mxu3  ;;  %v10669_v17 = vpop.f32.mrf.mxu0  ;;  %v4278_v47 = vld [vmem:[#allocation7 + $0xb8] sm:$0xff] }
 0x2d9   : > { %v2411_v25 = vpop.f32.mrf.mxu1  ;;  %4295 = vmatpush.msra.mxu3 %v4278_v47 }
 0x2da   : > { %v2433_v45 = vadd.f32 %v2411_v25, %v2320_v14  ;;  %v3971_v14 = vld [vmem:[#allocation7 + $0x458] sm:$0xff] }
 0x2db   : > { %2862 = vmatmul.f32.gmra.mxu1 %v10558_v2  ;;  %3317 = vmatmul.f32.gmra.mxu0 %v10306_v27 }
 0x2dc   : > { %v2546_v26 = vadd.f32 %v10592_v28, %v2433_v45  ;;  %3543 = vmatmul.f32.gmra.mxu2 %v10410_v60  ;;  %v2321_v60 = vadd.f32 %v10598_v16, %v10379_v53  ;;  %v10696_v45 = vld [vmem:[#allocation2 + $0x14a] sm:$0xff]  ;;  %v3746_v53 = vld [vmem:[#allocation7 + $0x360] sm:$0xff]  ;;  %v10703_v16 = vld [vmem:[#allocation7 + $0x3e8] sm:$0xff] }
 0x2dd   : > { %3668 = vmatmul.f32.gmra.mxu3 %v10671_v13  ;;  %3980 = vmatpush.msra.mxu2 %v3971_v14 }
 0x2de   : > { %v10685_v27 = vadd.f32 %v10514_v55, %v2546_v26  ;;  %3753 = vmatpush.msra.mxu0 %v3746_v53  ;;  %v2957_v26 = vld [vmem:[%s12985_s1 + $0xe8] sm:$0xff]  ;;  %3865 = vmatpush.msrb.mxu1 %v10703_v16 }
 0x2df   : > { %v3156_v28 = vpop.f32.mrf.mxu2  ;;  %3027 = vperm.xlu2 %8770, %v2957_v26   ;;  %v3969_v26 = vld [vmem:[#allocation7 + $0x448] sm:$0xff] }
 0x2e0   : > { %v10690_v19 = vadd.f32 %v10596_v1, %v3156_v28  ;;  %v10692_v24 = vpop.f32.mrf.mxu3  ;;  %v10694_v11 = vpop.f32.mrf.mxu0  ;;  %v4277_v1 = vld [vmem:[#allocation7 + $0xb0] sm:$0xff] }
 0x2e1   : > { %v2414_v34 = vpop.f32.mrf.mxu1  ;;  %4296 = vmatpush.msra.mxu3 %v4277_v1  ;;  %v3970_v28 = vld [vmem:[#allocation7 + $0x450] sm:$0xff]  ;;  %v10746_v1 = vld [vmem:[%s12987_s3] ss:$0 sm:$0xff] }
 0x2e2   : > { %v2434_v25 = vadd.f32 %v2414_v34, %v2321_v60  ;;  %3981 = vmatpush.msra.mxu2 %v3970_v28  ;;  %v10721_v34 = vld [vmem:[#allocation2 + $0x152] sm:$0xff]  ;;  %v3744_v28 = vld [vmem:[#allocation7 + $0x350] sm:$0xff] }
 0x2e3   : > { %2865 = vmatmul.f32.gmra.mxu1 %v10580_v8  ;;  %3320 = vmatmul.f32.gmra.mxu0 %v10323_v63 }
 0x2e4   : > { %v2547_v55 = vadd.f32 %v10615_v50, %v2434_v25  ;;  %3546 = vmatmul.f32.gmra.mxu2 %v10428_v42  ;;  %v2322_v42 = vadd.f32 %v10621_v59, %v10399_v41  ;;  %v3745_v41 = vld [vmem:[#allocation7 + $0x358] sm:$0xff]  ;;  %v10728_v59 = vld [vmem:[#allocation7 + $0x3e0] sm:$0xff] }
 0x2e5   : > { %3671 = vmatmul.f32.gmra.mxu3 %v10696_v45  ;;  %3754 = vmatpush.msra.mxu0 %v3745_v41 }
 0x2e6   : > { %v10710_v63 = vadd.f32 %v10533_v32, %v2547_v55  ;;  %3866 = vmatpush.msrb.mxu1 %v10728_v59  ;;  %3982 = vmatpush.msra.mxu2 %v3969_v26 }
 0x2e7   : > { %v3159_v50 = vpop.f32.mrf.mxu2  ;;  %3755 = vmatpush.msra.mxu0 %v3744_v28  ;;  %v10772_v28 = vld [vmem:[#allocation2 + $0x162] sm:$0xff] }
 0x2e8   : > { %v10715_v52 = vadd.f32 %v10619_v36, %v3159_v50  ;;  %v10717_v47 = vpop.f32.mrf.mxu3  ;;  %v10719_v7 = vpop.f32.mrf.mxu0  ;;  %v4276_v36 = vld [vmem:[#allocation7 + $0xa8] sm:$0xff] }
 0x2e9   : > { %v2417_v60 = vpop.f32.mrf.mxu1  ;;  %4297 = vmatpush.msra.mxu3 %v4276_v36  ;;  %v2760_v36 = vadd.f32 %v10669_v17, %v10436_v30  ;;  %v4274_v17 = vld [vmem:[#allocation7 + $0x98] sm:$0xff] }
 0x2ea   : > { %v2435_v14 = vadd.f32 %v2417_v60, %v2322_v42  ;;  %v10748_v42 = vld [vmem:[#allocation2 + $0x15a] sm:$0xff] }
 0x2eb   : > { %2868 = vmatmul.f32.gmra.mxu1 %v10602_v33  ;;  %3323 = vmatmul.f32.gmra.mxu0 %v10558_v2  ;;  %v2759_v2 = vadd.f32 %v10644_v20, %v10418_v12  ;;  %v10753_v12 = vld [vmem:[%s12988_s4] ss:$0 sm:$0xff]  ;;  %v4275_v60 = vld [vmem:[#allocation7 + $0xa0] sm:$0xff] }
 0x2ec   : > { %v2548_v32 = vadd.f32 %v10638_v18, %v2435_v14  ;;  %3549 = vmatmul.f32.gmra.mxu2 %v10446_v40  ;;  %v10759_v14 = vld [vmem:[#allocation7 + $0x3d8] sm:$0xff]  ;;  %4298 = vmatpush.msra.mxu3 %v4275_v60  ;;  %v8809_v60 = vld [vmem:[#allocation2 + $0x120] sm:$0xff] }
 0x2ed   : > { %3674 = vmatmul.f32.gmra.mxu3 %v10721_v34  ;;  %3867 = vmatpush.msrb.mxu1 %v10759_v14 }
 0x2ee   : > { %v10732_v25 = vadd.f32 %v10552_v44, %v2548_v32  ;;  %4299 = vmatpush.msra.mxu3 %v4274_v17  ;;  %v8810_v17 = vld [vmem:[#allocation2 + $0x128] sm:$0xff] }
 0x2ef   : > { %v3162_v55 = vpop.f32.mrf.mxu2 }
 0x2f0   : > { %v10737_v18 = vadd.f32 %v10642_v56, %v3162_v55  ;;  %v10739_v40 = vpop.f32.mrf.mxu3  ;;  %v10741_v53 = vpop.f32.mrf.mxu0  ;;  %v8808_v56 = vld [vmem:[#allocation2 + $0x118] sm:$0xff] }
 0x2f1   : > { %v2824_v50 = vpop.f32.mrf.mxu1 }
 0x2f2   : > { %v2872_v44 = vadd.f32 %v2824_v50, %v2759_v2  ;;  %v3968_v50 = vld [vmem:[#allocation7 + $0x440] sm:$0xff] }
 0x2f3   : > { %3326 = vmatmul.f32.gmra.mxu0 %v10580_v8  ;;  %3427 = vmatmul.f32.vlgmr.msra.gmra.mxu1 %v8808_v56  ;;  %v2963_v8 = vpop.permute.xlu1 %2962 }
 0x2f4   : > { %v2892_v20 = vmul.f32 %v10746_v1, %v2872_v44  ;;  %3552 = vmatmul.f32.gmra.mxu2 %v10464_v49 }
 0x2f5   : > { %3677 = vmatmul.f32.gmra.mxu3 %v10748_v42  ;;  %3983 = vmatpush.msra.mxu2 %v3968_v50 }
 0x2f6   : > { %v2912_v32 = vadd.f32 %v10753_v12, %v2892_v20 }
 0x2f7   : > { %v3165_v41 = vpop.f32.mrf.mxu2 }
 0x2f8   : > { %v10766_v55 = vadd.f32 %v10667_v43, %v3165_v41  ;;  %v10768_v49 = vpop.f32.mrf.mxu3  ;;  %v2928_v2 = vmax.f32 %v2912_v32, 0.0  ;;  %v10770_v26 = vpop.f32.mrf.mxu0  ;;  %v3743_v43 = vld [vmem:[#allocation7 + $0x348] sm:$0xff]  ;;  %v10778_v32 = vld [vmem:[#allocation7 + $0x3d0] sm:$0xff] }
 0x2f9   : > { %v2827_v44 = vpop.f32.mrf.mxu1  ;;  %3756 = vmatpush.msra.mxu0 %v3743_v43  ;;  %3868 = vmatpush.msrb.mxu1 %v10778_v32  ;;  %v10791_v43 = vld [vmem:[#allocation2 + $0x16a] sm:$0xff] }
 0x2fa   : > { %v3040_v56 = vmul.f32 %v2963_v8, %v2928_v2  ;;  %v2873_v20 = vadd.f32 %v2827_v44, %v2760_v36  ;;  %v2968_v8 = vpop.permute.xlu2 %2967  ;;  %v2761_v36 = vadd.f32 %v10694_v11, %v10454_v5  ;;  %v4273_v11 = vld [vmem:[#allocation7 + $0x90] sm:$0xff] }
 0x2fb   : > { %3329 = vmatmul.f32.gmra.mxu0 %v10602_v33  ;;  %3430 = vmatmul.f32.gmra.mxu1 %v8809_v60 }
 0x2fc   : > { %3056 = vst [vmem:[#allocation4 + $0x80] sm:$0xff] %v3040_v56  ;;  %v2893_v30 = vmul.f32 %v10746_v1, %v2873_v20  ;;  %3555 = vmatmul.f32.gmra.mxu2 %v10482_v23  ;;  %v3967_v56 = vld [vmem:[#allocation7 + $0x438] sm:$0xff]  ;;  %4300 = vmatpush.msra.mxu3 %v4273_v11 }
 0x2fd   : > { %3680 = vmatmul.f32.gmra.mxu3 %v10772_v28  ;;  %3984 = vmatpush.msra.mxu2 %v3967_v56  ;;  %v10810_v11 = vld [vmem:[#allocation2 + $0x172] sm:$0xff] }
 0x2fe   : > { %v2913_v41 = vadd.f32 %v10753_v12, %v2893_v30 }
 0x2ff   : > { %v3168_v33 = vpop.f32.mrf.mxu2 }
 0x300   : > { %v10785_v2 = vadd.f32 %v10692_v24, %v3168_v33  ;;  %v10787_v23 = vpop.f32.mrf.mxu3  ;;  %v2929_v50 = vmax.f32 %v2913_v41, 0.0  ;;  %v10789_v44 = vpop.f32.mrf.mxu0  ;;  %v3742_v24 = vld [vmem:[#allocation7 + $0x340] sm:$0xff]  ;;  %v10797_v41 = vld [vmem:[#allocation7 + $0x3c8] sm:$0xff] }
 0x301   : > { %v2830_v20 = vpop.f32.mrf.mxu1  ;;  %3757 = vmatpush.msra.mxu0 %v3742_v24  ;;  %3869 = vmatpush.msrb.mxu1 %v10797_v41 }
 0x302   : > { %v3041_v60 = vmul.f32 %v2968_v8, %v2929_v50  ;;  %v2874_v30 = vadd.f32 %v2830_v20, %v2761_v36  ;;  %v2973_v36 = vpop.permute.xlu0 %2972  ;;  %v2762_v50 = vadd.f32 %v10719_v7, %v10472_v46  ;;  %v4272_v7 = vld [vmem:[#allocation7 + $0x88] sm:$0xff] }
 0x303   : > { %3332 = vmatmul.f32.gmra.mxu0 %v10625_v22  ;;  %3433 = vmatmul.f32.gmra.mxu1 %v8810_v17 }
 0x304   : > { %3057 = vst [vmem:[#allocation4 + $0x88] sm:$0xff] %v3041_v60  ;;  %v2894_v5 = vmul.f32 %v10746_v1, %v2874_v30  ;;  %3558 = vmatmul.f32.gmra.mxu2 %v10500_v29  ;;  %v3966_v30 = vld [vmem:[#allocation7 + $0x430] sm:$0xff]  ;;  %4301 = vmatpush.msra.mxu3 %v4272_v7  ;;  %v10830_v7 = vld [vmem:[#allocation2 + $0x17a] sm:$0xff] }
 0x305   : > { %3683 = vmatmul.f32.gmra.mxu3 %v10791_v43  ;;  %3985 = vmatpush.msra.mxu2 %v3966_v30 }
 0x306   : > { %v2914_v33 = vadd.f32 %v10753_v12, %v2894_v5 }
 0x307   : > { %v3171_v8 = vpop.f32.mrf.mxu2 }
 0x308   : > { %v10804_v56 = vadd.f32 %v10717_v47, %v3171_v8  ;;  %v10806_v29 = vpop.f32.mrf.mxu3  ;;  %v2930_v20 = vmax.f32 %v2914_v33, 0.0  ;;  %v10808_v60 = vpop.f32.mrf.mxu0  ;;  %v3741_v47 = vld [vmem:[#allocation7 + $0x338] sm:$0xff]  ;;  %v10817_v33 = vld [vmem:[#allocation7 + $0x3c0] sm:$0xff] }
 0x309   : > { %v2833_v17 = vpop.f32.mrf.mxu1  ;;  %3758 = vmatpush.msra.mxu0 %v3741_v47  ;;  %3870 = vmatpush.msrb.mxu1 %v10817_v33 }
 0x30a   : > { %13062 = vst [vmem:[#allocation31_spill] sm:$0xff] %v10804_v56  ;;  %v3042_v5 = vmul.f32 %v2973_v36, %v2930_v20  ;;  %v2875_v24 = vadd.f32 %v2833_v17, %v2762_v50  ;;  %v2978_v50 = vpop.permute.xlu1 %2977  ;;  %v10875_v56 = vld [vmem:[#allocation2 + $0x148] sm:$0xff] }
 0x30b   : > { %3335 = vmatmul.f32.gmra.mxu0 %v10646_v38  ;;  %3436 = vmatmul.f32.gmra.mxu1 %v10374_v54  ;;  %v2763_v54 = vadd.f32 %v10741_v53, %v10490_v62  ;;  %v4271_v62 = vld [vmem:[#allocation7 + $0x80] sm:$0xff]  ;;  %v3740_v53 = vld [vmem:[#allocation7 + $0x330] sm:$0xff] }
 0x30c   : > { %3058 = vst [vmem:[#allocation4 + $0x90] sm:$0xff] %v3042_v5  ;;  %v2895_v46 = vmul.f32 %v10746_v1, %v2875_v24  ;;  %3561 = vmatmul.f32.gmra.mxu2 %v10518_v39  ;;  %v3965_v5 = vld [vmem:[#allocation7 + $0x428] sm:$0xff]  ;;  %4302 = vmatpush.msra.mxu3 %v4271_v62 }
 0x30d   : > { %3686 = vmatmul.f32.gmra.mxu3 %v10810_v11  ;;  %3986 = vmatpush.msra.mxu2 %v3965_v5 }
 0x30e   : > { %v2915_v8 = vadd.f32 %v10753_v12, %v2895_v46  ;;  %3759 = vmatpush.msra.mxu0 %v3740_v53  ;;  %v10850_v53 = vld [vmem:[#allocation2 + $0x182] sm:$0xff] }
 0x30f   : > { %v3174_v36 = vpop.f32.mrf.mxu2  ;;  %13065 = vst [vmem:[#allocation30_spill] sm:$0xff] %v10850_v53 }
 0x310   : > { %v10824_v20 = vadd.f32 %v10739_v40, %v3174_v36  ;;  %v10826_v39 = vpop.f32.mrf.mxu3  ;;  %v2931_v30 = vmax.f32 %v2915_v8, 0.0  ;;  %v10828_v17 = vpop.f32.mrf.mxu0  ;;  %v10836_v8 = vld [vmem:[#allocation7 + $0x3b8] sm:$0xff] }
 0x311   : > { %v2836_v24 = vpop.f32.mrf.mxu1  ;;  %3871 = vmatpush.msrb.mxu1 %v10836_v8 }
 0x312   : > { %13063 = vst [vmem:[#allocation29_spill] sm:$0xff] %v10824_v20  ;;  %v3043_v46 = vmul.f32 %v2978_v50, %v2931_v30  ;;  %v2876_v47 = vadd.f32 %v2836_v24, %v2763_v54  ;;  %v2983_v54 = vpop.permute.xlu2 %2982  ;;  %v10853_v20 = vld [vmem:[#allocation2 + $0x140] sm:$0xff] }
 0x313   : > { %3338 = vmatmul.f32.gmra.mxu0 %v10671_v13  ;;  %3439 = vmatmul.f32.gmra.mxu1 %v10394_v21  ;;  %v2764_v21 = vadd.f32 %v10770_v26, %v10508_v58  ;;  %v4263_v26 = vld [vmem:[#allocation7 + $0x78] sm:$0xff] }
 0x314   : > { %3059 = vst [vmem:[#allocation4 + $0x98] sm:$0xff] %v3043_v46  ;;  %v2896_v40 = vmul.f32 %v10746_v1, %v2876_v47  ;;  %3564 = vmatmul.f32.gmra.mxu2 %v10537_v57  ;;  %v3964_v46 = vld [vmem:[#allocation7 + $0x420] sm:$0xff]  ;;  %4325 = vmatpush.msrb.mxu3 %v4263_v26 }
 0x315   : > { %3689 = vmatmul.f32.gmra.mxu3 %v10830_v7  ;;  %3987 = vmatpush.msra.mxu2 %v3964_v46  ;;  %v2765_v46 = vadd.f32 %v10789_v44, %v10527_v35  ;;  %v10880_v44 = vld [vmem:[#allocation7 + $0x320] sm:$0xff] }
 0x316   : > { %v2916_v36 = vadd.f32 %v10753_v12, %v2896_v40  ;;  %13068 = vst [vmem:[#allocation28_spill] sm:$0xff] %v10880_v44 }
 0x317   : > { %v3177_v50 = vpop.f32.mrf.mxu2 }
 0x318   : > { %v10844_v30 = vadd.f32 %v10768_v49, %v3177_v50  ;;  %v10846_v57 = vpop.f32.mrf.mxu3  ;;  %v2932_v5 = vmax.f32 %v2916_v36, 0.0  ;;  %v10848_v24 = vpop.f32.mrf.mxu0  ;;  %v3739_v49 = vld [vmem:[#allocation7 + $0x328] sm:$0xff]  ;;  %v10858_v36 = vld [vmem:[#allocation7 + $0x3b0] sm:$0xff] }
 0x319   : > { %v2839_v47 = vpop.f32.mrf.mxu1  ;;  %3760 = vmatpush.msra.mxu0 %v3739_v49  ;;  %v4262_v50 = vld [vmem:[#allocation7 + $0x70] sm:$0xff]  ;;  %3872 = vmatpush.msrb.mxu1 %v10858_v36  ;;  %v3963_v49 = vld [vmem:[#allocation7 + $0x418] sm:$0xff] }
 0x31a   : > { %13064 = vst [vmem:[#allocation26_spill] sm:$0xff] %v10844_v30  ;;  %v3044_v62 = vmul.f32 %v2983_v54, %v2932_v5  ;;  %v2877_v40 = vadd.f32 %v2839_v47, %v2764_v21  ;;  %v2988_v5 = vpop.permute.xlu0 %2987  ;;  %4326 = vmatpush.msrb.mxu3 %v4262_v50  ;;  %3988 = vmatpush.msra.mxu2 %v3963_v49  ;;  %v10882_v50 = vld [vmem:[#allocation7 + $0x3a8] sm:$0xff] }
 0x31b   : > { %3341 = vmatmul.f32.gmra.mxu0 %v10696_v45  ;;  %3442 = vmatmul.f32.gmra.mxu1 %v10853_v20 }
 0x31c   : > { %3060 = vst [vmem:[#allocation4 + $0xa0] sm:$0xff] %v3044_v62  ;;  %v2897_v58 = vmul.f32 %v10746_v1, %v2877_v40  ;;  %3567 = vmatmul.f32.gmra.mxu2 %v10556_v61  ;;  %3761 = vmatpush.msra.mxu0 %v10880_v44 }
 0x31d   : > { %3692 = vmatmul.f32.gmra.mxu3 %v10850_v53  ;;  %v10872_v53 = vld [vmem:[#allocation2 + $0x18a] sm:$0xff]  ;;  %3873 = vmatpush.msrb.mxu1 %v10882_v50 }
 0x31e   : > { %v2917_v54 = vadd.f32 %v10753_v12, %v2897_v58  ;;  %13067 = vst [vmem:[#allocation32_spill] sm:$0xff] %v10872_v53 }
 0x31f   : > { %v3180_v21 = vpop.f32.mrf.mxu2 }
 0x320   : > { %v10866_v61 = vadd.f32 %v10787_v23, %v3180_v21  ;;  %v10868_v47 = vpop.f32.mrf.mxu3  ;;  %v2933_v62 = vmax.f32 %v2917_v54, 0.0  ;;  %v10870_v40 = vpop.f32.mrf.mxu0  ;;  %v4261_v23 = vld [vmem:[#allocation7 + $0x68] sm:$0xff] }
 0x321   : > { %v2842_v30 = vpop.f32.mrf.mxu1  ;;  %4327 = vmatpush.msrb.mxu3 %v4261_v23 }
 0x322   : > { %13066 = vst [vmem:[#allocation27_spill] sm:$0xff] %v10866_v61  ;;  %v3045_v58 = vmul.f32 %v2988_v5, %v2933_v62  ;;  %v2878_v26 = vadd.f32 %v2842_v30, %v2765_v46  ;;  %v4260_v30 = vld [vmem:[#allocation7 + $0x60] sm:$0xff]  ;;  %v2993_v5 = vpop.permute.xlu1 %2992  ;;  %v4259_v61 = vld [vmem:[#allocation7 + $0x58] sm:$0xff] }
 0x323   : > { %3344 = vmatmul.f32.gmra.mxu0 %v10721_v34  ;;  %3445 = vmatmul.f32.gmra.mxu1 %v10875_v56 }
 0x324   : > { %3061 = vst [vmem:[#allocation4 + $0xa8] sm:$0xff] %v3045_v58  ;;  %v2898_v35 = vmul.f32 %v10746_v1, %v2878_v26  ;;  %3570 = vmatmul.f32.gmra.mxu2 %v10578_v31  ;;  %v2766_v31 = vadd.f32 %v10808_v60, %v10546_v0  ;;  %4328 = vmatpush.msrb.mxu3 %v4260_v30  ;;  %v3962_v26 = vld [vmem:[#allocation7 + $0x410] sm:$0xff]  ;;  %v10900_v0 = vld [vmem:[#allocation2 + $0x150] sm:$0xff]  ;;  %v10907_v30 = vld [vmem:[#allocation7 + $0x3a0] sm:$0xff] }
 0x325   : > { %3695 = vmatmul.f32.gmra.mxu3 %v10872_v53  ;;  %3989 = vmatpush.msra.mxu2 %v3962_v26  ;;  %v10897_v53 = vld [vmem:[#allocation2 + $0x192] sm:$0xff] }
 0x326   : > { %v2918_v54 = vadd.f32 %v10753_v12, %v2898_v35  ;;  %13070 = vst [vmem:[#allocation34_spill] sm:$0xff] %v10897_v53  ;;  %4329 = vmatpush.msrb.mxu3 %v4259_v61  ;;  %v10905_v60 = vld [vmem:[#allocation7 + $0x318] sm:$0xff]  ;;  %v4258_v61 = vld [vmem:[#allocation7 + $0x50] sm:$0xff]  ;;  %3874 = vmatpush.msrb.mxu1 %v10907_v30 }
 0x327   : > { %v3183_v21 = vpop.f32.mrf.mxu2  ;;  %13071 = vst [vmem:[#allocation35_spill] sm:$0xff] %v10905_v60  ;;  %3762 = vmatpush.msra.mxu0 %v10905_v60 }
 0x328   : > { %v10891_v46 = vadd.f32 %v10806_v29, %v3183_v21  ;;  %v10893_v62 = vpop.f32.mrf.mxu3  ;;  %v2934_v49 = vmax.f32 %v2918_v54, 0.0  ;;  %v10895_v58 = vpop.f32.mrf.mxu0  ;;  %4330 = vmatpush.msrb.mxu3 %v4258_v61 }
 0x329   : > { %v2845_v35 = vpop.f32.mrf.mxu1 }
 0x32a   : > { %13069 = vst [vmem:[#allocation33_spill] sm:$0xff] %v10891_v46  ;;  %v3046_v23 = vmul.f32 %v2993_v5, %v2934_v49  ;;  %v2879_v44 = vadd.f32 %v2845_v35, %v2766_v31  ;;  %v2998_v5 = vpop.permute.xlu2 %2997  ;;  %v10913_v31 = vld [vmem:[#allocation7 + $0x310] sm:$0xff]  ;;  %v10925_v46 = vld [vmem:[#allocation7 + $0x308] sm:$0xff] }
 0x32b   : > { %3347 = vmatmul.f32.gmra.mxu0 %v10748_v42  ;;  %3448 = vmatmul.f32.gmra.mxu1 %v10900_v0  ;;  %13073 = vst [vmem:[#allocation37_spill] sm:$0xff] %v10925_v46 }
 0x32c   : > { %3062 = vst [vmem:[#allocation4 + $0xb0] sm:$0xff] %v3046_v23  ;;  %v2899_v29 = vmul.f32 %v10746_v1, %v2879_v44  ;;  %3573 = vmatmul.f32.gmra.mxu2 %v10600_v9  ;;  %v2767_v9 = vadd.f32 %v10828_v17, %v10568_v3  ;;  %3763 = vmatpush.msra.mxu0 %v10913_v31  ;;  %v4257_v23 = vld [vmem:[#allocation7 + $0x48] sm:$0xff]  ;;  %v10934_v17 = vld [vmem:[#allocation7 + $0x300] sm:$0xff] }
 0x32d   : > { %3698 = vmatmul.f32.gmra.mxu3 %v10897_v53  ;;  %v10927_v3 = vld [vmem:[#allocation2 + $0x181] sm:$0xff]  ;;  %13074 = vst [vmem:[#allocation38_spill] sm:$0xff] %v10934_v17 }
 0x32e   : > { %v2919_v54 = vadd.f32 %v10753_v12, %v2899_v29  ;;  %v3961_v29 = vld [vmem:[#allocation7 + $0x408] sm:$0xff]  ;;  %4331 = vmatpush.msrb.mxu3 %v4257_v23  ;;  %3764 = vmatpush.msra.mxu0 %v10925_v46  ;;  %v10955_v46 = vld [vmem:[#allocation2 + $0x189] sm:$0xff] }
 0x32f   : > { %v3186_v21 = vpop.f32.mrf.mxu2  ;;  %3990 = vmatpush.msra.mxu2 %v3961_v29  ;;  %13076 = vst [vmem:[#allocation40_spill] sm:$0xff] %v10955_v46 }
 0x330   : > { %v10918_v44 = vadd.f32 %v10826_v39, %v3186_v21  ;;  %v10920_v49 = vpop.f32.mrf.mxu3  ;;  %v2935_v26 = vmax.f32 %v2919_v54, 0.0  ;;  %v10922_v35 = vpop.f32.mrf.mxu0  ;;  %v10931_v39 = vld [vmem:[#allocation2 + $0x158] sm:$0xff]  ;;  %3765 = vmatpush.msra.mxu0 %v10934_v17 }
 0x331   : > { %v2848_v61 = vpop.f32.mrf.mxu1  ;;  %v3960_v54 = vld [vmem:[#allocation7 + $0x400] sm:$0xff] }
 0x332   : > { %13072 = vst [vmem:[#allocation36_spill] sm:$0xff] %v10918_v44  ;;  %v3047_v60 = vmul.f32 %v2998_v5, %v2935_v26  ;;  %v2880_v53 = vadd.f32 %v2848_v61, %v2767_v9  ;;  %v4256_v5 = vld [vmem:[#allocation7 + $0x40] sm:$0xff]  ;;  %v10939_v9 = vld [vmem:[#allocation7 + $0x398] sm:$0xff]  ;;  %3991 = vmatpush.msra.mxu2 %v3960_v54  ;;  %4726 = vmatpush.msrb.mxu0 %v10653_v48  ;;  %v10958_v48 = vld [vmem:[#allocation2 + $0x160] sm:$0xff] }
 0x333   : > { %3350 = vmatmul.f32.gmra.mxu0 %v10772_v28  ;;  %3451 = vmatmul.f32.gmra.mxu1 %v10931_v39  ;;  %v4255_v26 = vld [vmem:[#allocation7 + $0x38] sm:$0xff] }
 0x334   : > { %3063 = vst [vmem:[#allocation4 + $0xb8] sm:$0xff] %v3047_v60  ;;  %v2900_v21 = vmul.f32 %v10746_v1, %v2880_v53  ;;  %3576 = vmatmul.f32.gmra.mxu2 %v10623_v10  ;;  %4332 = vmatpush.msrb.mxu3 %v4256_v5  ;;  %v3003_v60 = vpop.permute.xlu0 %3002  ;;  %v2768_v10 = vadd.f32 %v10848_v24, %v10590_v6  ;;  %v10968_v24 = vld [vmem:[#allocation7 + $0x390] sm:$0xff] }
 0x335   : > { %4303 = vmatmul.f32.vlgmr.msra.gmra.mxu3 %v10927_v3  ;;  %3875 = vmatpush.msrb.mxu1 %v10939_v9 }
 0x336   : > { %v2920_v23 = vadd.f32 %v10753_v12, %v2900_v21  ;;  %4333 = vmatpush.msrb.mxu3 %v4255_v26  ;;  %4727 = vmatpush.msrb.mxu0 %v10678_v37  ;;  %v4254_v37 = vld [vmem:[#allocation7 + $0x30] sm:$0xff] }
 0x337   : > { %v3189_v29 = vpop.f32.mrf.mxu2  ;;  %3876 = vmatpush.msrb.mxu1 %v10968_v24 }
 0x338   : > { %v10948_v53 = vadd.f32 %v10846_v57, %v3189_v29  ;;  %v10950_v61 = vpop.f32.mrf.mxu3  ;;  %v2936_v44 = vmax.f32 %v2920_v23, 0.0  ;;  %v10952_v54 = vpop.f32.mrf.mxu0  ;;  %v4114_v57 = vld [vmem:[%s12985_s1 + $0x108] sm:$0xff]  ;;  %4728 = vmatpush.msrb.mxu0 %v10703_v16  ;;  %4334 = vmatpush.msrb.mxu3 %v4254_v37  ;;  %v13077_v29 = vld [vmem:[#allocation25_spill] sm:$0xff] }
 0x339   : > { %v2851_v21 = vpop.f32.mrf.mxu1  ;;  %4136 = vperm.xlu0 %8768, %v4114_v57   ;;  %v3008_v23 = vpop.permute.xlu1 %3007 }
 0x33a   : > { %13075 = vst [vmem:[#allocation39_spill] sm:$0xff] %v10948_v53  ;;  %v3048_v5 = vmul.f32 %v3003_v60, %v2936_v44  ;;  %v2881_v17 = vadd.f32 %v2851_v21, %v2768_v10  ;;  %v4253_v44 = vld [vmem:[#allocation7 + $0x28] sm:$0xff]  ;;  %4729 = vmatpush.msrb.mxu0 %v10728_v59  ;;  %v2769_v60 = vadd.f32 %v10870_v40, %v13077_v29  ;;  %v10983_v59 = vld [vmem:[#allocation2 + $0x191] sm:$0xff]  ;;  %v10986_v40 = vld [vmem:[#allocation2 + $0x168] sm:$0xff] }
 0x33b   : > { %3353 = vmatmul.f32.gmra.mxu0 %v10791_v43  ;;  %3454 = vmatmul.f32.gmra.mxu1 %v10958_v48 }
 0x33c   : > { %3064 = vst [vmem:[#allocation4 + $0xc0] sm:$0xff] %v3048_v5  ;;  %v2901_v6 = vmul.f32 %v10746_v1, %v2881_v17  ;;  %3579 = vmatmul.f32.gmra.mxu2 %v10927_v3  ;;  %4335 = vmatpush.msrb.mxu3 %v4253_v44  ;;  %v10994_v44 = vld [vmem:[#allocation7 + $0x388] sm:$0xff] }
 0x33d   : > { %4306 = vmatmul.f32.gmra.mxu3 %v10955_v46  ;;  %4730 = vmatpush.msrb.mxu0 %v10759_v14  ;;  %v4117_v14 = vld [vmem:[%s12985_s1 + $0x120] sm:$0xff] }
 0x33e   : > { %v2921_v26 = vadd.f32 %v10753_v12, %v2901_v6  ;;  %v4589_v6 = vld [vmem:[#allocation7 + $0x2f8] sm:$0xff]  ;;  %3877 = vmatpush.msrb.mxu1 %v10994_v44 }
 0x33f   : > { %v3192_v17 = vpop.f32.mrf.mxu2  ;;  %4590 = vmatpush.msrb.mxu2 %v4589_v6  ;;  %4731 = vmatpush.msrb.mxu0 %v10778_v32 }
 0x340   : > { %v10976_v16 = vadd.f32 %v10868_v47, %v3192_v17  ;;  %v10978_v10 = vpop.f32.mrf.mxu3  ;;  %v2937_v21 = vmax.f32 %v2921_v26, 0.0  ;;  %v10980_v5 = vpop.f32.mrf.mxu0  ;;  %v4252_v47 = vld [vmem:[#allocation7 + $0x20] sm:$0xff]  ;;  %v4251_v17 = vld [vmem:[#allocation7 + $0x18] sm:$0xff] }
 0x341   : > { %v2854_v57 = vpop.f32.mrf.mxu1  ;;  %4336 = vmatpush.msrb.mxu3 %v4252_v47  ;;  %4151 = vperm.xlu0 %8768, %v4117_v14  }
 0x342   : > { %13078 = vst [vmem:[#allocation25_spill] sm:$0xff] %v10976_v16  ;;  %v3049_v37 = vmul.f32 %v3008_v23, %v2937_v21  ;;  %v2882_v53 = vadd.f32 %v2854_v57, %v2769_v60  ;;  %v4250_v60 = vld [vmem:[#allocation7 + $0x10] sm:$0xff]  ;;  %v2770_v21 = vadd.f32 %v10895_v58, %v10636_v51  ;;  %4732 = vmatpush.msrb.mxu0 %v10797_v41  ;;  %v11013_v51 = vld [vmem:[#allocation2 + $0x170] sm:$0xff]  ;;  %v4120_v41 = vld [vmem:[%s12985_s1 + $0x138] sm:$0xff] }
 0x343   : > { %3356 = vmatmul.f32.gmra.mxu0 %v10810_v11  ;;  %3457 = vmatmul.f32.gmra.mxu1 %v10986_v40 }
 0x344   : > { %3065 = vst [vmem:[#allocation4 + $0xc8] sm:$0xff] %v3049_v37  ;;  %v2902_v26 = vmul.f32 %v10746_v1, %v2882_v53  ;;  %3582 = vmatmul.f32.gmra.mxu2 %v10955_v46  ;;  %4337 = vmatpush.msrb.mxu3 %v4251_v17  ;;  %v3013_v53 = vpop.permute.xlu2 %3012  ;;  %v4249_v17 = vld [vmem:[#allocation7 + $0x8] sm:$0xff] }
 0x345   : > { %4309 = vmatmul.f32.gmra.mxu3 %v10983_v59  ;;  %v11010_v46 = vld [vmem:[#allocation2 + $0x199] sm:$0xff]  ;;  %4733 = vmatpush.msrb.mxu0 %v10817_v33 }
 0x346   : > { %v2922_v23 = vadd.f32 %v10753_v12, %v2902_v26  ;;  %4338 = vmatpush.msrb.mxu3 %v4250_v60  ;;  %v4588_v26 = vld [vmem:[#allocation7 + $0x2f0] sm:$0xff]  ;;  %v2771_v60 = vadd.f32 %v10922_v35, %v10660_v4  ;;  %v11040_v4 = vld [vmem:[#allocation2 + $0x178] sm:$0xff]  ;;  %v4115_v35 = vld [vmem:[%s12985_s1 + $0x110] sm:$0xff] }
 0x347   : > { %v3195_v29 = vpop.f32.mrf.mxu2  ;;  %4591 = vmatpush.msrb.mxu2 %v4588_v26  ;;  %4734 = vmatpush.msrb.mxu0 %v10836_v8 }
 0x348   : > { %v11003_v6 = vadd.f32 %v10893_v62, %v3195_v29  ;;  %v11005_v57 = vpop.f32.mrf.mxu3  ;;  %v2938_v37 = vmax.f32 %v2922_v23, 0.0  ;;  %v11007_v47 = vpop.f32.mrf.mxu0  ;;  %4339 = vmatpush.msrb.mxu3 %v4249_v17  ;;  %v4248_v62 = vld [vmem:[#allocation7] sm:$0xff]  ;;  %v4587_v17 = vld [vmem:[#allocation7 + $0x2e8] sm:$0xff]  ;;  %4141 = vperm.xlu1 %8769, %v4115_v35  }
 0x349   : > { %v2857_v14 = vpop.f32.mrf.mxu1  ;;  %v11021_v23 = vld [vmem:[#allocation7 + $0x380] sm:$0xff]  ;;  %4166 = vperm.xlu0 %8768, %v4120_v41   ;;  %4592 = vmatpush.msrb.mxu2 %v4587_v17  ;;  %v4385_v41 = vld [vmem:[#allocation7 + $0x178] sm:$0xff] }
 0x34a   : > { %v3050_v16 = vmul.f32 %v3013_v53, %v2938_v37  ;;  %v2883_v32 = vadd.f32 %v2857_v14, %v2770_v21  ;;  %4340 = vmatpush.msrb.mxu3 %v4248_v62  ;;  %3878 = vmatpush.msrb.mxu1 %v11021_v23  ;;  %v3018_v53 = vpop.permute.xlu0 %3017 }
 0x34b   : > { %3359 = vmatmul.f32.gmra.mxu0 %v10830_v7  ;;  %3460 = vmatmul.f32.gmra.mxu1 %v11013_v51 }
 0x34c   : > { %3066 = vst [vmem:[#allocation4 + $0xd0] sm:$0xff] %v3050_v16  ;;  %v2903_v58 = vmul.f32 %v10746_v1, %v2883_v32  ;;  %3585 = vmatmul.f32.gmra.mxu2 %v10983_v59  ;;  %4735 = vmatpush.msrb.mxu0 %v10858_v36  ;;  %v4123_v36 = vld [vmem:[%s12985_s1 + $0x150] sm:$0xff] }
 0x34d   : > { %4312 = vmatmul.f32.gmra.mxu3 %v11010_v46 }
 0x34e   : > { %v2923_v29 = vadd.f32 %v10753_v12, %v2903_v58  ;;  %v11037_v58 = vld [vmem:[#allocation2 + $0x1a1] sm:$0xff]  ;;  %4386 = vmatpush.msra.mxu3 %v4385_v41  ;;  %4736 = vmatpush.msrb.mxu0 %v10882_v50  ;;  %v11065_v41 = vld [vmem:[#allocation2 + $0x1a9] sm:$0xff] }
 0x34f   : > { %v3198_v16 = vpop.f32.mrf.mxu2  ;;  %v4118_v50 = vld [vmem:[%s12985_s1 + $0x128] sm:$0xff] }
 0x350   : > { %v11030_v21 = vadd.f32 %v10920_v49, %v3198_v16  ;;  %v11032_v37 = vpop.f32.mrf.mxu3  ;;  %v2939_v26 = vmax.f32 %v2923_v29, 0.0  ;;  %v11034_v14 = vpop.f32.mrf.mxu0  ;;  %v8819_v49 = vld [vmem:[#allocation2 + $0x130] sm:$0xff]  ;;  %v4384_v16 = vld [vmem:[#allocation7 + $0x170] sm:$0xff]  ;;  %4737 = vmatpush.msrb.mxu0 %v10907_v30  ;;  %4156 = vperm.xlu1 %8769, %v4118_v50  }
 0x351   : > { %v2860_v32 = vpop.f32.mrf.mxu1  ;;  %4181 = vperm.xlu0 %8768, %v4123_v36   ;;  %v4453_v29 = vld [vmem:[#allocation7 + $0x1f8] sm:$0xff]  ;;  %4387 = vmatpush.msra.mxu3 %v4384_v16  ;;  %v4126_v30 = vld [vmem:[%s12985_s1 + $0x168] sm:$0xff] }
 0x352   : > { %v3051_v62 = vmul.f32 %v3018_v53, %v2939_v26  ;;  %v2884_v33 = vadd.f32 %v2860_v32, %v2771_v60  ;;  %4454 = vmatpush.msra.mxu1 %v4453_v29  ;;  %v3023_v26 = vpop.permute.xlu1 %3022  ;;  %v4383_v29 = vld [vmem:[#allocation7 + $0x168] sm:$0xff]  ;;  %v4452_v16 = vld [vmem:[#allocation7 + $0x1f0] sm:$0xff]  ;;  %4738 = vmatpush.msrb.mxu0 %v10939_v9  ;;  %v4585_v50 = vld [vmem:[#allocation7 + $0x2d8] sm:$0xff] }
 0x353   : > { %3463 = vmatmul.f32.gmra.mxu1 %v11040_v4  ;;  %3766 = vmatmul.f32.vlgmr.msra.gmra.mxu0 %v8819_v49  ;;  %v4586_v49 = vld [vmem:[#allocation7 + $0x2e0] sm:$0xff] }
 0x354   : > { %3067 = vst [vmem:[#allocation4 + $0xd8] sm:$0xff] %v3051_v62  ;;  %v2904_v8 = vmul.f32 %v10746_v1, %v2884_v33  ;;  %3992 = vmatmul.f32.vlgmr.msra.gmra.mxu2 %v10625_v22  ;;  %v2772_v22 = vadd.f32 %v10952_v54, %v10685_v27  ;;  %v11062_v33 = vld [vmem:[#allocation2 + $0x180] sm:$0xff]  ;;  %v8820_v27 = vld [vmem:[#allocation2 + $0x138] sm:$0xff]  ;;  %4388 = vmatpush.msra.mxu3 %v4383_v29 }
 0x355   : > { %4315 = vmatmul.f32.gmra.mxu3 %v11037_v58  ;;  %4593 = vmatpush.msrb.mxu2 %v4586_v49  ;;  %v11090_v9 = vld [vmem:[#allocation2 + $0x1b1] sm:$0xff] }
 0x356   : > { %v2924_v53 = vadd.f32 %v10753_v12, %v2904_v8  ;;  %4455 = vmatpush.msra.mxu1 %v4452_v16  ;;  %4739 = vmatpush.msrb.mxu0 %v10968_v24  ;;  %v4868_v24 = vld [vmem:[%s12985_s1 + $0x180] sm:$0xff]  ;;  %v4380_v16 = vld [vmem:[#allocation7 + $0x150] sm:$0xff] }
 0x357   : > { %v11053_v60 = vpop.f32.mrf.mxu2  ;;  %4594 = vmatpush.msrb.mxu2 %v4585_v50  ;;  %v11113_v50 = vld [vmem:[#allocation2 + $0x190] sm:$0xff] }
 0x358   : > { %v11058_v17 = vpop.f32.mrf.mxu3  ;;  %v2940_v32 = vmax.f32 %v2924_v53, 0.0  ;;  %v11060_v62 = vpop.f32.mrf.mxu0  ;;  %v4382_v53 = vld [vmem:[#allocation7 + $0x160] sm:$0xff]  ;;  %4740 = vmatpush.msrb.mxu0 %v10994_v44 }
 0x359   : > { %v2863_v35 = vpop.f32.mrf.mxu1  ;;  %4196 = vperm.xlu0 %8768, %v4126_v30   ;;  %4389 = vmatpush.msra.mxu3 %v4382_v53  ;;  %v4451_v53 = vld [vmem:[#allocation7 + $0x1e8] sm:$0xff] }
 0x35a   : > { %v3052_v8 = vmul.f32 %v3023_v26, %v2940_v32  ;;  %v2885_v36 = vadd.f32 %v2863_v35, %v2772_v22  ;;  %v3028_v32 = vpop.permute.xlu2 %3027  ;;  %4456 = vmatpush.msra.mxu1 %v4451_v53  ;;  %4741 = vmatpush.msrb.mxu0 %v11021_v23  ;;  %v4450_v23 = vld [vmem:[#allocation7 + $0x1e0] sm:$0xff] }
 0x35b   : > { %3466 = vmatmul.f32.gmra.mxu1 %v11062_v33  ;;  %3769 = vmatmul.f32.gmra.mxu0 %v8820_v27  ;;  %v4381_v27 = vld [vmem:[#allocation7 + $0x158] sm:$0xff] }
 0x35c   : > { %3068 = vst [vmem:[#allocation4 + $0xe0] sm:$0xff] %v3052_v8  ;;  %v2905_v54 = vmul.f32 %v10746_v1, %v2885_v36  ;;  %3995 = vmatmul.f32.gmra.mxu2 %v10646_v38  ;;  %v2773_v38 = vadd.f32 %v10980_v5, %v10710_v63  ;;  %v11087_v36 = vld [vmem:[#allocation2 + $0x188] sm:$0xff]  ;;  %4390 = vmatpush.msra.mxu3 %v4381_v27  ;;  %v4121_v63 = vld [vmem:[%s12985_s1 + $0x140] sm:$0xff] }
 0x35d   : > { %4318 = vmatmul.f32.gmra.mxu3 %v11065_v41  ;;  %4171 = vperm.xlu1 %8769, %v4121_v63  }
 0x35e   : > { %v2925_v26 = vadd.f32 %v10753_v12, %v2905_v54  ;;  %4391 = vmatpush.msra.mxu3 %v4380_v16  ;;  %4457 = vmatpush.msra.mxu1 %v4450_v23 }
 0x35f   : > { %v11078_v22 = vpop.f32.mrf.mxu2 }
 0x360   : > { %v11083_v49 = vpop.f32.mrf.mxu3  ;;  %v2941_v35 = vmax.f32 %v2925_v26, 0.0  ;;  %v11085_v8 = vpop.f32.mrf.mxu0 }
 0x361   : > { %v2866_v54 = vpop.f32.mrf.mxu1  ;;  %4877 = vperm.xlu0 %8768, %v4868_v24   ;;  %v4378_v24 = vld [vmem:[#allocation7 + $0x140] sm:$0xff] }
 0x362   : > { %v3053_v29 = vmul.f32 %v3028_v32, %v2941_v35  ;;  %v2886_v30 = vadd.f32 %v2866_v54, %v2773_v38  ;;  %v3033_v32 = vpop.permute.xlu0 %3032  ;;  %v4379_v54 = vld [vmem:[#allocation7 + $0x148] sm:$0xff] }
 0x363   : > { %3469 = vmatmul.f32.gmra.mxu1 %v11087_v36  ;;  %3772 = vmatmul.f32.gmra.mxu0 %v10853_v20 }
 0x364   : > { %3069 = vst [vmem:[#allocation4 + $0xe8] sm:$0xff] %v3053_v29  ;;  %v2906_v5 = vmul.f32 %v10746_v1, %v2886_v30  ;;  %3998 = vmatmul.f32.gmra.mxu2 %v10671_v13  ;;  %v2774_v13 = vadd.f32 %v11007_v47, %v10732_v25  ;;  %v4584_v29 = vld [vmem:[#allocation7 + $0x2d0] sm:$0xff]  ;;  %4392 = vmatpush.msra.mxu3 %v4379_v54  ;;  %v4124_v25 = vld [vmem:[%s12985_s1 + $0x158] sm:$0xff] }
 0x365   : > { %4321 = vmatmul.f32.gmra.mxu3 %v11090_v9  ;;  %4595 = vmatpush.msrb.mxu2 %v4584_v29  ;;  %v4871_v47 = vld [vmem:[%s12985_s1 + $0x198] sm:$0xff] }
 0x366   : > { %v2926_v20 = vadd.f32 %v10753_v12, %v2906_v5  ;;  %4186 = vperm.xlu1 %8769, %v4124_v25   ;;  %4393 = vmatpush.msra.mxu3 %v4378_v24  ;;  %v4449_v25 = vld [vmem:[#allocation7 + $0x1d8] sm:$0xff] }
 0x367   : > { %v11104_v26 = vpop.f32.mrf.mxu2  ;;  %4458 = vmatpush.msra.mxu1 %v4449_v25  ;;  %v4370_v25 = vld [vmem:[#allocation7 + $0x100] sm:$0xff] }
 0x368   : > { %v11109_v38 = vpop.f32.mrf.mxu3  ;;  %v2942_v35 = vmax.f32 %v2926_v20, 0.0  ;;  %v11111_v27 = vpop.f32.mrf.mxu0 }
 0x369   : > { %v2869_v30 = vpop.f32.mrf.mxu1  ;;  %4892 = vperm.xlu0 %8768, %v4871_v47  }
 0x36a   : > { %v3054_v63 = vmul.f32 %v3033_v32, %v2942_v35  ;;  %v2887_v5 = vadd.f32 %v2869_v30, %v2774_v13  ;;  %v4583_v35 = vld [vmem:[#allocation7 + $0x2c8] sm:$0xff] }
 0x36b   : > { %3472 = vmatmul.f32.gmra.mxu1 %v11113_v50  ;;  %3775 = vmatmul.f32.gmra.mxu0 %v10875_v56  ;;  %v4377_v56 = vld [vmem:[#allocation7 + $0x138] sm:$0xff] }
 0x36c   : > { %3070 = vst [vmem:[#allocation4 + $0xf0] sm:$0xff] %v3054_v63  ;;  %v2907_v44 = vmul.f32 %v10746_v1, %v2887_v5  ;;  %4001 = vmatmul.f32.gmra.mxu2 %v10696_v45  ;;  %v3038_v1 = vpop.permute.xlu1 %3037  ;;  %v3363_v45 = vadd.f32 %v11034_v14, %v10665_v15  ;;  %4394 = vmatpush.msra.mxu3 %v4377_v56  ;;  %v4127_v63 = vld [vmem:[%s12985_s1 + $0x170] sm:$0xff]  ;;  %v4113_v15 = vld [vmem:[%s12985_s1 + $0x100] sm:$0xff]  ;;  %v4376_v5 = vld [vmem:[#allocation7 + $0x130] sm:$0xff] }
 0x36d   : > { %4341 = vmatmul.f32.vlgmr.msrb.gmra.mxu3 %v11062_v33  ;;  %4596 = vmatpush.msrb.mxu2 %v4583_v35  ;;  %v4582_v56 = vld [vmem:[#allocation7 + $0x2c0] sm:$0xff]  ;;  %v4448_v35 = vld [vmem:[#allocation7 + $0x1d0] sm:$0xff] }
 0x36e   : > { %v2927_v16 = vadd.f32 %v10753_v12, %v2907_v44  ;;  %v8821_v12 = vld [vmem:[#allocation2 + $0x131] sm:$0xff]  ;;  %4201 = vperm.xlu1 %8769, %v4127_v63   ;;  %v4375_v44 = vld [vmem:[#allocation7 + $0x128] sm:$0xff]  ;;  %4395 = vmatpush.msra.mxu3 %v4376_v5 }
 0x36f   : > { %v11128_v53 = vpop.f32.mrf.mxu2  ;;  %4131 = vperm.xlu2 %8770, %v4113_v15   ;;  %4597 = vmatpush.msrb.mxu2 %v4582_v56  ;;  %v4581_v63 = vld [vmem:[#allocation7 + $0x2b8] sm:$0xff]  ;;  %v11181_v5 = vld [vmem:[#allocation2 + $0x198] sm:$0xff] }
 0x370   : > { %v11132_v20 = vpop.f32.mrf.mxu3  ;;  %v2943_v32 = vmax.f32 %v2927_v16, 0.0  ;;  %v11134_v13 = vpop.f32.mrf.mxu0  ;;  %4396 = vmatpush.msra.mxu3 %v4375_v44  ;;  %4459 = vmatpush.msra.mxu1 %v4448_v35 }
 0x371   : > { %v3428_v54 = vpop.f32.mrf.mxu1  ;;  %4598 = vmatpush.msrb.mxu2 %v4581_v63 }
 0x372   : > { %v3055_v29 = vmul.f32 %v3038_v1, %v2943_v32  ;;  %v3476_v30 = vadd.f32 %v3428_v54, %v3363_v45  ;;  %v8822_v45 = vld [vmem:[#allocation2 + $0x139] sm:$0xff]  ;;  %v4869_v32 = vld [vmem:[%s12985_s1 + $0x188] sm:$0xff] }
 0x373   : > { %3778 = vmatmul.f32.gmra.mxu0 %v10900_v0  ;;  %3879 = vmatmul.f32.vlgmr.msrb.gmra.mxu1 %v8821_v12  ;;  %v4874_v0 = vld [vmem:[%s12985_s1 + $0x1b0] sm:$0xff] }
 0x374   : > { %3071 = vst [vmem:[#allocation4 + $0xf8] sm:$0xff] %v3055_v29  ;;  %v3589_v14 = vadd.f32 %v11053_v60, %v3476_v30  ;;  %4004 = vmatmul.f32.gmra.mxu2 %v10721_v34  ;;  %4907 = vperm.xlu0 %8768, %v4874_v0   ;;  %v3364_v34 = vadd.f32 %v11060_v62, %v10690_v19  ;;  %v4116_v19 = vld [vmem:[%s12985_s1 + $0x118] sm:$0xff]  ;;  %v4372_v30 = vld [vmem:[#allocation7 + $0x110] sm:$0xff] }
 0x375   : > { %4344 = vmatmul.f32.gmra.mxu3 %v11087_v36 }
 0x376   : > { %v11150_v47 = vadd.f32 %v10950_v61, %v3589_v14  ;;  %v4374_v61 = vld [vmem:[#allocation7 + $0x120] sm:$0xff]  ;;  %4882 = vperm.xlu1 %8769, %v4869_v32   ;;  %v4371_v14 = vld [vmem:[#allocation7 + $0x108] sm:$0xff] }
 0x377   : > { %v11152_v24 = vpop.f32.mrf.mxu2  ;;  %4397 = vmatpush.msra.mxu3 %v4374_v61  ;;  %4146 = vperm.xlu2 %8770, %v4116_v19   ;;  %v11204_v32 = vld [vmem:[#allocation2 + $0x1a0] sm:$0xff]  ;;  %v8824_v19 = vld [vmem:[#allocation2 + $0x149] sm:$0xff] }
 0x378   : > { %v11156_v60 = vpop.f32.mrf.mxu3  ;;  %v11158_v23 = vpop.f32.mrf.mxu0 }
 0x379   : > { %v3431_v16 = vpop.f32.mrf.mxu1 }
 0x37a   : > { %v3477_v1 = vadd.f32 %v3431_v16, %v3364_v34  ;;  %v3366_v16 = vadd.f32 %v11111_v27, %v10737_v18  ;;  %v4657_v27 = vld [vmem:[#allocation7 + $0x378] sm:$0xff] }
 0x37b   : > { %3781 = vmatmul.f32.gmra.mxu0 %v10931_v39  ;;  %3882 = vmatmul.f32.gmra.mxu1 %v8822_v45  ;;  %v4373_v39 = vld [vmem:[#allocation7 + $0x118] sm:$0xff] }
 0x37c   : > { %v3590_v62 = vadd.f32 %v11078_v22, %v3477_v1  ;;  %4007 = vmatmul.f32.gmra.mxu2 %v10748_v42  ;;  %4398 = vmatpush.msra.mxu3 %v4373_v39  ;;  %v3365_v22 = vadd.f32 %v11085_v8, %v10715_v52  ;;  %v4872_v52 = vld [vmem:[%s12985_s1 + $0x1a0] sm:$0xff]  ;;  %v4119_v8 = vld [vmem:[%s12985_s1 + $0x130] sm:$0xff]  ;;  %v4656_v39 = vld [vmem:[#allocation7 + $0x370] sm:$0xff] }
 0x37d   : > { %4347 = vmatmul.f32.gmra.mxu3 %v11113_v50 }
 0x37e   : > { %v11171_v54 = vadd.f32 %v10978_v10, %v3590_v62  ;;  %4399 = vmatpush.msra.mxu3 %v4372_v30  ;;  %v8823_v10 = vld [vmem:[#allocation2 + $0x141] sm:$0xff]  ;;  %4897 = vperm.xlu1 %8769, %v4872_v52   ;;  %v4446_v62 = vld [vmem:[#allocation7 + $0x1c0] sm:$0xff]  ;;  %v3367_v30 = vadd.f32 %v11134_v13, %v10766_v55 }
 0x37f   : > { %v11173_v29 = vpop.f32.mrf.mxu2  ;;  %4161 = vperm.xlu2 %8770, %v4119_v8   ;;  %v4655_v13 = vld [vmem:[#allocation7 + $0x368] sm:$0xff]  ;;  %v4654_v52 = vld [vmem:[#allocation7 + $0x360] sm:$0xff] }
 0x380   : > { %v11177_v12 = vpop.f32.mrf.mxu3  ;;  %v11179_v42 = vpop.f32.mrf.mxu0  ;;  %4400 = vmatpush.msra.mxu3 %v4371_v14  ;;  %v11224_v14 = vld [vmem:[#allocation2 + $0x1a8] sm:$0xff] }
 0x381   : > { %v3434_v15 = vpop.f32.mrf.mxu1 }
 0x382   : > { %v3478_v0 = vadd.f32 %v3434_v15, %v3365_v22  ;;  %4401 = vmatpush.msra.mxu3 %v4370_v25  ;;  %v3368_v25 = vadd.f32 %v11158_v23, %v10785_v2  ;;  %v4128_v2 = vld [vmem:[%s12985_s1 + $0x178] sm:$0xff] }
 0x383   : > { %3784 = vmatmul.f32.gmra.mxu0 %v10958_v48  ;;  %3885 = vmatmul.f32.gmra.mxu1 %v8823_v10  ;;  %v4447_v48 = vld [vmem:[#allocation7 + $0x1c8] sm:$0xff]  ;;  %v4445_v10 = vld [vmem:[#allocation7 + $0x1b8] sm:$0xff] }
 0x384   : > { %v3591_v44 = vadd.f32 %v11104_v26, %v3478_v0  ;;  %4010 = vmatmul.f32.gmra.mxu2 %v10772_v28  ;;  %4460 = vmatpush.msra.mxu1 %v4447_v48  ;;  %v4580_v28 = vld [vmem:[#allocation7 + $0x2b0] sm:$0xff]  ;;  %v4125_v0 = vld [vmem:[%s12985_s1 + $0x160] sm:$0xff]  ;;  %v4653_v48 = vld [vmem:[#allocation7 + $0x358] sm:$0xff] }
 0x385   : > { %4350 = vmatmul.f32.gmra.mxu3 %v11181_v5  ;;  %4599 = vmatpush.msrb.mxu2 %v4580_v28 }
 0x386   : > { %v11194_v34 = vadd.f32 %v11005_v57, %v3591_v44  ;;  %v4122_v57 = vld [vmem:[%s12985_s1 + $0x148] sm:$0xff]  ;;  %4658 = vmatpush.msrb.mxu3 %v4657_v27  ;;  %4461 = vmatpush.msra.mxu1 %v4446_v62 }
 0x387   : > { %v11196_v56 = vpop.f32.mrf.mxu2  ;;  %4176 = vperm.xlu2 %8770, %v4122_v57  }
 0x388   : > { %v11200_v1 = vpop.f32.mrf.mxu3  ;;  %v11202_v26 = vpop.f32.mrf.mxu0  ;;  %4659 = vmatpush.msrb.mxu3 %v4656_v39  ;;  %4462 = vmatpush.msra.mxu1 %v4445_v10  ;;  %v4577_v39 = vld [vmem:[#allocation7 + $0x298] sm:$0xff]  ;;  %v13081_v10 = vld [vmem:[#allocation29_spill] sm:$0xff] }
 0x389   : > { %v3437_v45 = vpop.f32.mrf.mxu1 }
 0x38a   : > { %v3479_v61 = vadd.f32 %v3437_v45, %v3366_v16  ;;  %4660 = vmatpush.msrb.mxu3 %v4655_v13  ;;  %v11244_v45 = vld [vmem:[#allocation2 + $0x1b0] sm:$0xff] }
 0x38b   : > { %3787 = vmatmul.f32.gmra.mxu0 %v10986_v40  ;;  %3888 = vmatmul.f32.gmra.mxu1 %v8824_v19  ;;  %v4652_v19 = vld [vmem:[#allocation7 + $0x350] sm:$0xff] }
 0x38c   : > { %v3592_v18 = vadd.f32 %v11128_v53, %v3479_v61  ;;  %4013 = vmatmul.f32.gmra.mxu2 %v10791_v43  ;;  %v4579_v43 = vld [vmem:[#allocation7 + $0x2a8] sm:$0xff]  ;;  %4661 = vmatpush.msrb.mxu3 %v4654_v52  ;;  %v4444_v61 = vld [vmem:[#allocation7 + $0x1b0] sm:$0xff]  ;;  %v3370_v52 = vadd.f32 %v11202_v26, %v13081_v10  ;;  %v13082_v26 = vld [vmem:[#allocation32_spill] sm:$0xff] }
 0x38d   : > { %4353 = vmatmul.f32.gmra.mxu3 %v11204_v32  ;;  %4600 = vmatpush.msrb.mxu2 %v4579_v43 }
 0x38e   : > { %v11214_v35 = vadd.f32 %v11032_v37, %v3592_v18  ;;  %v8825_v37 = vld [vmem:[#allocation2 + $0x151] sm:$0xff]  ;;  %4662 = vmatpush.msrb.mxu3 %v4653_v48  ;;  %4463 = vmatpush.msra.mxu1 %v4444_v61  ;;  %v13079_v18 = vld [vmem:[#allocation31_spill] sm:$0xff] }
 0x38f   : > { %v11216_v40 = vpop.f32.mrf.mxu2  ;;  %4191 = vperm.xlu2 %8770, %v4125_v0   ;;  %v3369_v27 = vadd.f32 %v11179_v42, %v13079_v18  ;;  %v4443_v0 = vld [vmem:[#allocation7 + $0x1a8] sm:$0xff] }
 0x390   : > { %v11220_v22 = vpop.f32.mrf.mxu3  ;;  %v11222_v53 = vpop.f32.mrf.mxu0  ;;  %4663 = vmatpush.msrb.mxu3 %v4652_v19  ;;  %4464 = vmatpush.msra.mxu1 %v4443_v0  ;;  %v13083_v18 = vld [vmem:[#allocation26_spill] sm:$0xff]  ;;  %v4441_v0 = vld [vmem:[#allocation7 + $0x198] sm:$0xff] }
 0x391   : > { %v3440_v63 = vpop.f32.mrf.mxu1 }
 0x392   : > { %v3480_v15 = vadd.f32 %v3440_v63, %v3367_v30  ;;  %v4870_v63 = vld [vmem:[%s12985_s1 + $0x190] sm:$0xff] }
 0x393   : > { %3790 = vmatmul.f32.gmra.mxu0 %v11013_v51  ;;  %3891 = vmatmul.f32.gmra.mxu1 %v8825_v37  ;;  %v4650_v37 = vld [vmem:[#allocation7 + $0x340] sm:$0xff] }
 0x394   : > { %v3593_v55 = vadd.f32 %v11152_v24, %v3480_v15  ;;  %4016 = vmatmul.f32.gmra.mxu2 %v10810_v11  ;;  %v4578_v11 = vld [vmem:[#allocation7 + $0x2a0] sm:$0xff]  ;;  %v13080_v15 = vld [vmem:[#allocation30_spill] sm:$0xff] }
 0x395   : > { %4356 = vmatmul.f32.gmra.mxu3 %v11224_v14  ;;  %4601 = vmatpush.msrb.mxu2 %v4578_v11  ;;  %v4576_v11 = vld [vmem:[#allocation7 + $0x290] sm:$0xff] }
 0x396   : > { %v11234_v8 = vadd.f32 %v11058_v17, %v3593_v55  ;;  %v8826_v17 = vld [vmem:[#allocation2 + $0x159] sm:$0xff]  ;;  %v4649_v55 = vld [vmem:[#allocation7 + $0x338] sm:$0xff] }
 0x397   : > { %v11236_v51 = vpop.f32.mrf.mxu2  ;;  %4206 = vperm.xlu2 %8770, %v4128_v2   ;;  %4602 = vmatpush.msrb.mxu2 %v4577_v39  ;;  %v4648_v2 = vld [vmem:[#allocation7 + $0x330] sm:$0xff]  ;;  %v8829_v39 = vld [vmem:[#allocation7 + $0x328] sm:$0xff] }
 0x398   : > { %v11240_v44 = vpop.f32.mrf.mxu3  ;;  %v11242_v24 = vpop.f32.mrf.mxu0 }
 0x399   : > { %v3443_v16 = vpop.f32.mrf.mxu1  ;;  %4603 = vmatpush.msrb.mxu2 %v4576_v11 }
 0x39a   : > { %v3481_v28 = vadd.f32 %v3443_v16, %v3368_v25 }
 0x39b   : > { %3793 = vmatmul.f32.gmra.mxu0 %v11040_v4  ;;  %3894 = vmatmul.f32.gmra.mxu1 %v8826_v17 }
 0x39c   : > { %v3594_v23 = vadd.f32 %v11173_v29, %v3481_v28  ;;  %4019 = vmatmul.f32.gmra.mxu2 %v10830_v7  ;;  %v4651_v7 = vld [vmem:[#allocation7 + $0x348] sm:$0xff]  ;;  %v8828_v28 = vld [vmem:[#allocation2 + $0x169] sm:$0xff] }
 0x39d   : > { %4359 = vmatmul.f32.gmra.mxu3 %v11244_v45 }
 0x39e   : > { %v11254_v57 = vadd.f32 %v11083_v49, %v3594_v23  ;;  %4664 = vmatpush.msrb.mxu3 %v4651_v7  ;;  %v8827_v49 = vld [vmem:[#allocation2 + $0x161] sm:$0xff]  ;;  %v4442_v23 = vld [vmem:[#allocation7 + $0x1a0] sm:$0xff] }
 0x39f   : > { %v11256_v4 = vpop.f32.mrf.mxu2  ;;  %4887 = vperm.xlu2 %8770, %v4870_v63   ;;  %4465 = vmatpush.msra.mxu1 %v4442_v23  ;;  %v8830_v63 = vld [vmem:[#allocation2 + $0x171] sm:$0xff] }
 0x3a0   : > { %v11260_v62 = vpop.f32.mrf.mxu3  ;;  %v11262_v29 = vpop.f32.mrf.mxu0  ;;  %4665 = vmatpush.msrb.mxu3 %v4650_v37  ;;  %v13086_v37 = vld [vmem:[#allocation35_spill] sm:$0xff] }
 0x3a1   : > { %v3446_v30 = vpop.f32.mrf.mxu1  ;;  %4466 = vmatpush.msra.mxu1 %v4441_v0 }
 0x3a2   : > { %v3482_v43 = vadd.f32 %v3446_v30, %v3369_v27  ;;  %4666 = vmatpush.msrb.mxu3 %v4649_v55  ;;  %v3371_v27 = vadd.f32 %v11222_v53, %v13083_v18  ;;  %v4575_v30 = vld [vmem:[#allocation7 + $0x288] sm:$0xff] }
 0x3a3   : > { %3796 = vmatmul.f32.gmra.mxu0 %v11062_v33  ;;  %3897 = vmatmul.f32.gmra.mxu1 %v8827_v49  ;;  %v13085_v53 = vld [vmem:[#allocation34_spill] sm:$0xff] }
 0x3a4   : > { %v3595_v42 = vadd.f32 %v11196_v56, %v3482_v43  ;;  %4022 = vmatmul.f32.gmra.mxu2 %v13080_v15  ;;  %4667 = vmatpush.msrb.mxu3 %v4648_v2 }
 0x3a5   : > { %4402 = vmatmul.f32.vlgmr.msra.gmra.mxu3 %v13080_v15  ;;  %4604 = vmatpush.msrb.mxu2 %v4575_v30 }
 0x3a6   : > { %v11272_v13 = vadd.f32 %v11109_v38, %v3595_v42  ;;  %v4873_v38 = vld [vmem:[%s12985_s1 + $0x1a8] sm:$0xff]  ;;  %4668 = vmatpush.msrb.mxu3 %v8829_v39  ;;  %v4574_v42 = vld [vmem:[#allocation7 + $0x280] sm:$0xff] }
 0x3a7   : > { %v11274_v33 = vpop.f32.mrf.mxu2  ;;  %4902 = vperm.xlu2 %8770, %v4873_v38   ;;  %4605 = vmatpush.msrb.mxu2 %v4574_v42  ;;  %v11323_v38 = vld [vmem:[#allocation2 + $0x19a] sm:$0xff]  ;;  %v5289_v42 = vld [vmem:[#allocation10 + $0x78] sm:$0xff] }
 0x3a8   : > { %v11278_v25 = vpop.f32.mrf.mxu3  ;;  %v11280_v56 = vpop.f32.mrf.mxu0 }
 0x3a9   : > { %v3449_v48 = vpop.f32.mrf.mxu1 }
 0x3aa   : > { %v3483_v16 = vadd.f32 %v3449_v48, %v3370_v52  ;;  %v13087_v52 = vld [vmem:[#allocation27_spill] sm:$0xff] }
 0x3ab   : > { %3799 = vmatmul.f32.gmra.mxu0 %v11087_v36  ;;  %3900 = vmatmul.f32.gmra.mxu1 %v8828_v28  ;;  %v11294_v19 = vpop.permute.xlu0 %4136 }
 0x3ac   : > { %v3596_v17 = vadd.f32 %v11216_v40, %v3483_v16  ;;  %4025 = vmatmul.f32.gmra.mxu2 %v13082_v26  ;;  %v13088_v16 = vld [vmem:[#allocation37_spill] sm:$0xff] }
 0x3ad   : > { %4405 = vmatmul.f32.gmra.mxu3 %v13082_v26 }
 0x3ae   : > { %v11290_v61 = vadd.f32 %v11132_v20, %v3596_v17  ;;  %v13084_v20 = vld [vmem:[#allocation28_spill] sm:$0xff]  ;;  %v13089_v17 = vld [vmem:[#allocation38_spill] sm:$0xff] }
 0x3af   : > { %v11292_v36 = vpop.f32.mrf.mxu2  ;;  %4669 = vmatpush.msrb.mxu3 %v13084_v20  ;;  %v11343_v20 = vld [vmem:[#allocation2 + $0x1a2] sm:$0xff] }
 0x3b0   : > { %v11298_v40 = vpop.f32.mrf.mxu3  ;;  %v11300_v7 = vpop.f32.mrf.mxu0 }
 0x3b1   : > { %v3452_v43 = vpop.f32.mrf.mxu1  ;;  %4670 = vmatpush.msrb.mxu3 %v13086_v37 }
 0x3b2   : > { %v3484_v49 = vadd.f32 %v3452_v43, %v3371_v27  ;;  %v13090_v27 = vld [vmem:[#allocation33_spill] sm:$0xff] }
 0x3b3   : > { %3802 = vmatmul.f32.gmra.mxu0 %v11113_v50  ;;  %3903 = vmatmul.f32.gmra.mxu1 %v8830_v63  ;;  %v11314_v10 = vpop.permute.xlu0 %4151  ;;  %v3373_v39 = vadd.f32 %v11262_v29, %v13090_v27  ;;  %v4439_v29 = vld [vmem:[#allocation7 + $0x188] sm:$0xff]  ;;  %v5483_v27 = vld [vmem:[#allocation10 + $0x178] sm:$0xff] }
 0x3b4   : > { %v3597_v15 = vadd.f32 %v11236_v51, %v3484_v49  ;;  %4028 = vmatmul.f32.gmra.mxu2 %v13085_v53  ;;  %4671 = vmatpush.msrb.mxu3 %v10913_v31  ;;  %v3372_v51 = vadd.f32 %v11242_v24, %v13087_v52  ;;  %v4440_v24 = vld [vmem:[#allocation7 + $0x190] sm:$0xff] }
 0x3b5   : > { %4408 = vmatmul.f32.gmra.mxu3 %v13085_v53  ;;  %4467 = vmatpush.msra.mxu1 %v4440_v24  ;;  %v5288_v53 = vld [vmem:[#allocation10 + $0x70] sm:$0xff] }
 0x3b6   : > { %v11310_v55 = vadd.f32 %v11156_v60, %v3597_v15  ;;  %4672 = vmatpush.msrb.mxu3 %v13088_v16  ;;  %v8831_v60 = vld [vmem:[#allocation2 + $0x179] sm:$0xff]  ;;  %v5320_v15 = vld [vmem:[#allocation10 + $0xf0] sm:$0xff]  ;;  %5484 = vmatpush.msra.mxu0 %v5483_v27 }
 0x3b7   : > { %v11312_v50 = vpop.f32.mrf.mxu2  ;;  %4468 = vmatpush.msra.mxu1 %v4439_v29 }
 0x3b8   : > { %v11318_v11 = vpop.f32.mrf.mxu3  ;;  %v11320_v48 = vpop.f32.mrf.mxu0  ;;  %4673 = vmatpush.msrb.mxu3 %v13089_v17  ;;  %v11363_v17 = vld [vmem:[#allocation2 + $0x1aa] sm:$0xff] }
 0x3b9   : > { %v3455_v28 = vpop.f32.mrf.mxu1 }
 0x3ba   : > { %v3485_v31 = vadd.f32 %v3455_v28, %v3372_v51  ;;  %5387 = vmatpush.msra.mxu3 %v5289_v42  ;;  %v11350_v37 = vpop.permute.xlu1 %4141  ;;  %v5319_v28 = vld [vmem:[#allocation10 + $0xe8] sm:$0xff]  ;;  %v5482_v42 = vld [vmem:[#allocation10 + $0x170] sm:$0xff] }
 0x3bb   : > { %3805 = vmatmul.f32.gmra.mxu0 %v11181_v5  ;;  %3906 = vmatmul.f32.gmra.mxu1 %v8831_v60  ;;  %v11335_v18 = vpop.permute.xlu0 %4166 }
 0x3bc   : > { %v3598_v26 = vadd.f32 %v11256_v4, %v3485_v31  ;;  %4031 = vmatmul.f32.gmra.mxu2 %v11323_v38  ;;  %v5321_v4 = vld [vmem:[#allocation10 + $0xf8] sm:$0xff]  ;;  %5388 = vmatpush.msra.mxu3 %v5288_v53 }
 0x3bd   : > { %4411 = vmatmul.f32.gmra.mxu3 %v11323_v38  ;;  %5322 = vmatpush.msra.mxu2 %v5321_v4  ;;  %v4438_v4 = vld [vmem:[#allocation7 + $0x180] sm:$0xff] }
 0x3be   : > { %v11331_v2 = vadd.f32 %v11177_v12, %v3598_v26  ;;  %4469 = vmatpush.msra.mxu1 %v4438_v4  ;;  %5485 = vmatpush.msra.mxu0 %v5482_v42  ;;  %v13095_v42 = vld [vmem:[#allocation25_spill] sm:$0xff] }
 0x3bf   : > { %v11333_v23 = vpop.f32.mrf.mxu2  ;;  %5323 = vmatpush.msra.mxu2 %v5320_v15  ;;  %v13093_v15 = vld [vmem:[#allocation39_spill] sm:$0xff] }
 0x3c0   : > { %v11339_v30 = vpop.f32.mrf.mxu3  ;;  %v11341_v43 = vpop.f32.mrf.mxu0  ;;  %v3375_v53 = vadd.f32 %v11300_v7, %v13093_v15  ;;  %v5480_v7 = vld [vmem:[#allocation10 + $0x160] sm:$0xff] }
 0x3c1   : > { %v3458_v49 = vpop.f32.mrf.mxu1  ;;  %5324 = vmatpush.msra.mxu2 %v5319_v28 }
 0x3c2   : > { %v3486_v63 = vadd.f32 %v3458_v49, %v3373_v39  ;;  %v5318_v39 = vld [vmem:[#allocation10 + $0xe0] sm:$0xff]  ;;  %v11372_v49 = vpop.permute.xlu1 %4156 }
 0x3c3   : > { %3808 = vmatmul.f32.gmra.mxu0 %v11204_v32  ;;  %3909 = vmatmul.f32.gmra.mxu1 %v10927_v3  ;;  %v13091_v3 = vld [vmem:[#allocation36_spill] sm:$0xff]  ;;  %v11365_v26 = vpop.permute.xlu0 %4181 }
 0x3c4   : > { %v3599_v12 = vadd.f32 %v11274_v33, %v3486_v63  ;;  %4034 = vmatmul.f32.gmra.mxu2 %v11343_v20  ;;  %v3374_v33 = vadd.f32 %v11280_v56, %v13091_v3  ;;  %v5287_v56 = vld [vmem:[#allocation10 + $0x68] sm:$0xff]  ;;  %v5286_v63 = vld [vmem:[#allocation10 + $0x60] sm:$0xff] }
 0x3c5   : > { %4414 = vmatmul.f32.gmra.mxu3 %v11343_v20  ;;  %5325 = vmatpush.msra.mxu2 %v5318_v39  ;;  %v5479_v39 = vld [vmem:[#allocation10 + $0x158] sm:$0xff] }
 0x3c6   : > { %v11353_v0 = vadd.f32 %v11200_v1, %v3599_v12  ;;  %v13092_v1 = vld [vmem:[#allocation40_spill] sm:$0xff]  ;;  %5389 = vmatpush.msra.mxu3 %v5287_v56 }
 0x3c7   : > { %v11355_v52 = vpop.f32.mrf.mxu2  ;;  %v5317_v12 = vld [vmem:[#allocation10 + $0xd8] sm:$0xff] }
 0x3c8   : > { %v11359_v51 = vpop.f32.mrf.mxu3  ;;  %v11361_v16 = vpop.f32.mrf.mxu0  ;;  %5390 = vmatpush.msra.mxu3 %v5286_v63  ;;  %5326 = vmatpush.msra.mxu2 %v5317_v12  ;;  %v5478_v12 = vld [vmem:[#allocation10 + $0x150] sm:$0xff] }
 0x3c9   : > { %v3461_v31 = vpop.f32.mrf.mxu1 }
 0x3ca   : > { %v3487_v60 = vadd.f32 %v3461_v31, %v3374_v33  ;;  %v11383_v31 = vpop.permute.xlu2 %4131 }
 0x3cb   : > { %3811 = vmatmul.f32.gmra.mxu0 %v11224_v14  ;;  %3912 = vmatmul.f32.gmra.mxu1 %v13092_v1  ;;  %v5481_v1 = vld [vmem:[#allocation10 + $0x168] sm:$0xff]  ;;  %v11391_v27 = vpop.permute.xlu0 %4196 }
 0x3cc   : > { %v3600_v24 = vadd.f32 %v11292_v36, %v3487_v60  ;;  %4037 = vmatmul.f32.gmra.mxu2 %v11363_v17  ;;  %v5285_v60 = vld [vmem:[#allocation10 + $0x58] sm:$0xff]  ;;  %5486 = vmatpush.msra.mxu0 %v5481_v1  ;;  %13094 = vst [vmem:[#allocation31_spill] sm:$0xff] %v11391_v27 }
 0x3cd   : > { %4417 = vmatmul.f32.gmra.mxu3 %v11363_v17  ;;  %v426_v27 = vld [vmem:[#allocation2 + $0x1d0] sm:$0xff] }
 0x3ce   : > { %v11375_v29 = vadd.f32 %v11220_v22, %v3600_v24  ;;  %v11385_v22 = vld [vmem:[#allocation2 + $0x1b2] sm:$0xff]  ;;  %5391 = vmatpush.msra.mxu3 %v5285_v60  ;;  %5487 = vmatpush.msra.mxu0 %v5480_v7  ;;  %v5315_v60 = vld [vmem:[#allocation10 + $0xc8] sm:$0xff] }
 0x3cf   : > { %v11377_v36 = vpop.f32.mrf.mxu2  ;;  %v11394_v4 = vpop.permute.xlu1 %4171 }
 0x3d0   : > { %v4313_v3 = vpop.f32.mrf.mxu3  ;;  %v11381_v33 = vpop.f32.mrf.mxu0  ;;  %5488 = vmatpush.msra.mxu0 %v5479_v39  ;;  %v5475_v39 = vld [vmem:[#allocation10 + $0x138] sm:$0xff] }
 0x3d1   : > { %v3464_v28 = vpop.f32.mrf.mxu1 }
 0x3d2   : > { %v3488_v56 = vadd.f32 %v3464_v28, %v3375_v53  ;;  %v11405_v53 = vld [vmem:[#allocation2 + $0x1b9] sm:$0xff]  ;;  %5489 = vmatpush.msra.mxu0 %v5478_v12  ;;  %v11407_v28 = vpop.permute.xlu2 %4146  ;;  %v4521_v12 = vld [vmem:[#allocation7 + $0x278] sm:$0xff] }
 0x3d3   : > { %3915 = vmatmul.f32.gmra.mxu1 %v10983_v59  ;;  %4742 = vmatmul.f32.vlgmr.msrb.gmra.mxu0 %v11090_v9  ;;  %v5316_v9 = vld [vmem:[#allocation10 + $0xd0] sm:$0xff] }
 0x3d4   : > { %v3601_v24 = vadd.f32 %v11312_v50, %v3488_v56  ;;  %4606 = vmatmul.f32.vlgmr.msrb.gmra.mxu2 %v11323_v38  ;;  %v3376_v50 = vadd.f32 %v11320_v48, %v13095_v42  ;;  %v5314_v48 = vld [vmem:[#allocation10 + $0xc0] sm:$0xff]  ;;  %v5284_v42 = vld [vmem:[#allocation10 + $0x50] sm:$0xff]  ;;  %4522 = vmatpush.msrb.mxu1 %v4521_v12 }
 0x3d5   : > { %4420 = vmatmul.f32.gmra.mxu3 %v11385_v22  ;;  %5327 = vmatpush.msra.mxu2 %v5316_v9  ;;  %v5476_v56 = vld [vmem:[#allocation10 + $0x140] sm:$0xff]  ;;  %v11414_v9 = vpop.permute.xlu0 %4877 }
 0x3d6   : > { %v11397_v63 = vadd.f32 %v11240_v44, %v3601_v24  ;;  %v5477_v44 = vld [vmem:[#allocation10 + $0x148] sm:$0xff]  ;;  %v5313_v24 = vld [vmem:[#allocation10 + $0xb8] sm:$0xff]  ;;  %13096 = vst [vmem:[#allocation30_spill] sm:$0xff] %v11414_v9  ;;  %5392 = vmatpush.msra.mxu3 %v5284_v42  ;;  %v11431_v42 = vld [vmem:[#allocation2 + $0x1b8] sm:$0xff] }
 0x3d7   : > { %v11399_v59 = vpop.f32.mrf.mxu2  ;;  %5328 = vmatpush.msra.mxu2 %v5315_v60  ;;  %5490 = vmatpush.msra.mxu0 %v5477_v44  ;;  %v5474_v60 = vld [vmem:[#allocation10 + $0x130] sm:$0xff]  ;;  %v3377_v44 = vadd.f32 %v11341_v43, %v11003_v6  ;;  %v5311_v9 = vld [vmem:[#allocation10 + $0xa8] sm:$0xff]  ;;  %v5282_v6 = vld [vmem:[#allocation10 + $0x40] sm:$0xff] }
 0x3d8   : > { %v4316_v38 = vpop.f32.mrf.mxu3  ;;  %v11403_v15 = vpop.f32.mrf.mxu0  ;;  %v5472_v43 = vld [vmem:[#allocation10 + $0x120] sm:$0xff] }
 0x3d9   : > { %v3467_v3 = vpop.f32.mrf.mxu1  ;;  %5491 = vmatpush.msra.mxu0 %v5476_v56  ;;  %5329 = vmatpush.msra.mxu2 %v5314_v48  ;;  %v11427_v56 = vld [vmem:[#allocation2 + $0x1c1] sm:$0xff] }
 0x3da   : > { %v3489_v1 = vadd.f32 %v3467_v3, %v3376_v50  ;;  %v5283_v50 = vld [vmem:[#allocation10 + $0x48] sm:$0xff]  ;;  %v5312_v3 = vld [vmem:[#allocation10 + $0xb0] sm:$0xff] }
 0x3db   : > { %3918 = vmatmul.f32.gmra.mxu1 %v11010_v46  ;;  %4745 = vmatmul.f32.gmra.mxu0 %v11405_v53  ;;  %v11416_v46 = vpop.permute.xlu1 %4186 }
 0x3dc   : > { %v3602_v7 = vadd.f32 %v11333_v23, %v3489_v1  ;;  %4609 = vmatmul.f32.gmra.mxu2 %v11343_v20  ;;  %5492 = vmatpush.msra.mxu0 %v5475_v39  ;;  %v4520_v20 = vld [vmem:[#allocation7 + $0x270] sm:$0xff] }
 0x3dd   : > { %4674 = vmatmul.f32.vlgmr.msrb.gmra.mxu3 %v11244_v45  ;;  %5330 = vmatpush.msra.mxu2 %v5313_v24 }
 0x3de   : > { %v11419_v38 = vadd.f32 %v11260_v62, %v3602_v7  ;;  %5493 = vmatpush.msra.mxu0 %v5474_v60  ;;  %5393 = vmatpush.msra.mxu3 %v5283_v50  ;;  %v11429_v62 = vpop.permute.xlu2 %4161  ;;  %v5473_v7 = vld [vmem:[#allocation10 + $0x128] sm:$0xff]  ;;  %v5310_v50 = vld [vmem:[#allocation10 + $0xa0] sm:$0xff]  ;;  %v5471_v60 = vld [vmem:[#allocation10 + $0x118] sm:$0xff] }
 0x3df   : > { %v11421_v23 = vpop.f32.mrf.mxu2  ;;  %4523 = vmatpush.msrb.mxu1 %v4520_v20  ;;  %5331 = vmatpush.msra.mxu2 %v5312_v3  ;;  %v5281_v20 = vld [vmem:[#allocation10 + $0x38] sm:$0xff]  ;;  %v4519_v3 = vld [vmem:[#allocation7 + $0x268] sm:$0xff] }
 0x3e0   : > { %v4319_v1 = vpop.f32.mrf.mxu3  ;;  %v11425_v48 = vpop.f32.mrf.mxu0  ;;  %5494 = vmatpush.msra.mxu0 %v5473_v7  ;;  %5394 = vmatpush.msra.mxu3 %v5282_v6 }
 0x3e1   : > { %v3470_v39 = vpop.f32.mrf.mxu1  ;;  %5332 = vmatpush.msra.mxu2 %v5311_v9  ;;  %v4518_v1 = vld [vmem:[#allocation7 + $0x260] sm:$0xff]  ;;  %4524 = vmatpush.msrb.mxu1 %v4519_v3  ;;  %v3378_v9 = vadd.f32 %v11361_v16, %v11030_v21  ;;  %v5469_v16 = vld [vmem:[#allocation10 + $0x108] sm:$0xff] }
 0x3e2   : > { %v3490_v12 = vadd.f32 %v3470_v39, %v3377_v44  ;;  %v4893_v44 = vpop.permute.xlu0 %4892  ;;  %5395 = vmatpush.msra.mxu3 %v5281_v20  ;;  %5495 = vmatpush.msra.mxu0 %v5472_v43  ;;  %v5309_v39 = vld [vmem:[#allocation10 + $0x98] sm:$0xff]  ;;  %v5278_v21 = vld [vmem:[#allocation10 + $0x20] sm:$0xff] }
 0x3e3   : > { %3921 = vmatmul.f32.gmra.mxu1 %v11037_v58  ;;  %4748 = vmatmul.f32.gmra.mxu0 %v11427_v56  ;;  %v11438_v58 = vpop.permute.xlu1 %4201  ;;  %v11449_v20 = vld [vmem:[#allocation2 + $0x1c9] sm:$0xff] }
 0x3e4   : > { %v3603_v24 = vadd.f32 %v11355_v52, %v3490_v12  ;;  %4612 = vmatmul.f32.gmra.mxu2 %v11363_v17  ;;  %13097 = vst [vmem:[#allocation29_spill] sm:$0xff] %v11438_v58  ;;  %v5280_v17 = vld [vmem:[#allocation10 + $0x30] sm:$0xff]  ;;  %5496 = vmatpush.msra.mxu0 %v5471_v60  ;;  %v11453_v58 = vld [vmem:[#allocation2 + $0x1c0] sm:$0xff] }
 0x3e5   : > { %4677 = vmatmul.f32.gmra.mxu3 %v11431_v42  ;;  %5333 = vmatpush.msra.mxu2 %v5310_v50  ;;  %v5470_v12 = vld [vmem:[#allocation10 + $0x110] sm:$0xff] }
 0x3e6   : > { %v11441_v7 = vadd.f32 %v11278_v25, %v3603_v24  ;;  %5396 = vmatpush.msra.mxu3 %v5280_v17  ;;  %4525 = vmatpush.msrb.mxu1 %v4518_v1  ;;  %v11451_v25 = vpop.permute.xlu2 %4176  ;;  %v5279_v24 = vld [vmem:[#allocation10 + $0x28] sm:$0xff]  ;;  %v5308_v50 = vld [vmem:[#allocation10 + $0x90] sm:$0xff]  ;;  %v5277_v17 = vld [vmem:[#allocation10 + $0x18] sm:$0xff] }
 0x3e7   : > { %v11443_v52 = vpop.f32.mrf.mxu2  ;;  %5334 = vmatpush.msra.mxu2 %v5309_v39  ;;  %5497 = vmatpush.msra.mxu0 %v5470_v12  ;;  %v5307_v1 = vld [vmem:[#allocation10 + $0x88] sm:$0xff]  ;;  %v5468_v39 = vld [vmem:[#allocation10 + $0x100] sm:$0xff]  ;;  %v4516_v12 = vld [vmem:[#allocation7 + $0x250] sm:$0xff] }
 0x3e8   : > { %v4322_v6 = vpop.f32.mrf.mxu3  ;;  %v11447_v44 = vpop.f32.mrf.mxu0  ;;  %5397 = vmatpush.msra.mxu3 %v5279_v24 }
 0x3e9   : > { %v3473_v43 = vpop.f32.mrf.mxu1  ;;  %5335 = vmatpush.msra.mxu2 %v5308_v50  ;;  %5498 = vmatpush.msra.mxu0 %v5469_v16 }
 0x3ea   : > { %v3491_v3 = vadd.f32 %v3473_v43, %v3378_v9  ;;  %5398 = vmatpush.msra.mxu3 %v5278_v21  ;;  %v4517_v9 = vld [vmem:[#allocation7 + $0x258] sm:$0xff]  ;;  %v4908_v6 = vpop.permute.xlu0 %4907 }
 0x3eb   : > { %3924 = vmatmul.f32.gmra.mxu1 %v11065_v41  ;;  %4751 = vmatmul.f32.gmra.mxu0 %v11449_v20  ;;  %v5306_v41 = vld [vmem:[#allocation10 + $0x80] sm:$0xff] }
 0x3ec   : > { %v3604_v60 = vadd.f32 %v11377_v36, %v3491_v3  ;;  %4615 = vmatmul.f32.gmra.mxu2 %v11385_v22  ;;  %5399 = vmatpush.msra.mxu3 %v5277_v17  ;;  %v11465_v36 = vpop.permute.xlu1 %4882  ;;  %v5276_v22 = vld [vmem:[#allocation10 + $0x10] sm:$0xff]  ;;  %v3815_v3 = vadd.f32 %v11381_v33, %v11150_v47  ;;  %v548_v6 = vld [vmem:[#allocation2 + $0x1d1] sm:$0xff]  ;;  %v5275_v17 = vld [vmem:[#allocation10 + $0x8] sm:$0xff] }
 0x3ed   : > { %4680 = vmatmul.f32.gmra.mxu3 %v11453_v58  ;;  %4526 = vmatpush.msrb.mxu1 %v4517_v9  ;;  %13099 = vst [vmem:[#allocation26_spill] sm:$0xff] %v11465_v36  ;;  %v11481_v47 = vld [vmem:[%s12987_s3] ss:$0 sm:$0xff]  ;;  %v11483_v33 = vld [vmem:[#allocation2 + $0x1c8] sm:$0xff] }
 0x3ee   : > { %v11461_v43 = vadd.f32 %v11298_v40, %v3604_v60  ;;  %5336 = vmatpush.msra.mxu2 %v5307_v1  ;;  %5499 = vmatpush.msra.mxu0 %v5468_v39  ;;  %v11474_v60 = vld [vmem:[#allocation2 + $0x1ba] sm:$0xff]  ;;  %v11476_v1 = vpop.permute.xlu2 %4191 }
 0x3ef   : > { %v11463_v24 = vpop.f32.mrf.mxu2  ;;  %5400 = vmatpush.msra.mxu3 %v5276_v22  ;;  %13100 = vst [vmem:[#allocation28_spill] sm:$0xff] %v11474_v60  ;;  %4527 = vmatpush.msrb.mxu1 %v4516_v12  ;;  %v11490_v12 = vld [vmem:[%s12988_s4] ss:$0 sm:$0xff] }
 0x3f0   : > { %13098 = vst [vmem:[#allocation32_spill] sm:$0xff] %v11461_v43  ;;  %v4342_v50 = vpop.f32.mrf.mxu3  ;;  %v11469_v21 = vpop.f32.mrf.mxu0  ;;  %5337 = vmatpush.msra.mxu2 %v5306_v41  ;;  %v4515_v22 = vld [vmem:[#allocation7 + $0x248] sm:$0xff] }
 0x3f1   : > { %v11472_v16 = vadd.f32 %v4342_v50, %v11318_v11  ;;  %v3880_v40 = vpop.f32.mrf.mxu1  ;;  %5401 = vmatpush.msra.mxu3 %v5275_v17  ;;  %v5274_v11 = vld [vmem:[#allocation10] sm:$0xff]  ;;  %4528 = vmatpush.msrb.mxu1 %v4515_v22 }
 0x3f2   : > { %v3928_v9 = vadd.f32 %v3880_v40, %v3815_v3  ;;  %v4514_v3 = vld [vmem:[#allocation7 + $0x240] sm:$0xff] }
 0x3f3   : > { %4470 = vmatmul.f32.vlgmr.msra.gmra.mxu1 %v11181_v5  ;;  %4754 = vmatmul.f32.gmra.mxu0 %v548_v6 }
 0x3f4   : > { %v4041_v39 = vadd.f32 %v11399_v59, %v3928_v9  ;;  %4618 = vmatmul.f32.gmra.mxu2 %v11474_v60  ;;  %5402 = vmatpush.msra.mxu3 %v5274_v11  ;;  %v4898_v5 = vpop.permute.xlu1 %4897  ;;  %v3816_v59 = vadd.f32 %v11403_v15, %v11171_v54  ;;  %v549_v9 = vld [vmem:[#allocation2 + $0x1d9] sm:$0xff]  ;;  %v4513_v60 = vld [vmem:[#allocation7 + $0x238] sm:$0xff] }
 0x3f5   : > { %4683 = vmatmul.f32.gmra.mxu3 %v11483_v33  ;;  %4529 = vmatpush.msrb.mxu1 %v4514_v3  ;;  %v4511_v3 = vld [vmem:[#allocation7 + $0x228] sm:$0xff] }
 0x3f6   : > { %v4061_v41 = vmul.f32 %v11481_v47, %v4041_v39  ;;  %v11505_v39 = vld [vmem:[#allocation2 + $0x1c2] sm:$0xff]  ;;  %v11507_v43 = vpop.permute.xlu2 %4206 }
 0x3f7   : > { %v11495_v50 = vpop.f32.mrf.mxu2  ;;  %4530 = vmatpush.msrb.mxu1 %v4513_v60  ;;  %v550_v60 = vld [vmem:[#allocation2 + $0x1e1] sm:$0xff] }
 0x3f8   : > { %v4081_v6 = vadd.f32 %v11490_v12, %v4061_v41  ;;  %v4345_v40 = vpop.f32.mrf.mxu3  ;;  %v11500_v17 = vpop.f32.mrf.mxu0  ;;  %v4512_v41 = vld [vmem:[#allocation7 + $0x230] sm:$0xff] }
 0x3f9   : > { %v11503_v11 = vadd.f32 %v4345_v40, %v11339_v30  ;;  %v3883_v36 = vpop.f32.mrf.mxu1  ;;  %v5709_v40 = vld [vmem:[#allocation10 + $0x278] sm:$0xff]  ;;  %4531 = vmatpush.msrb.mxu1 %v4512_v41 }
 0x3fa   : > { %v4097_v22 = vmax.f32 %v4081_v6, 0.0  ;;  %v3929_v5 = vadd.f32 %v3883_v36, %v3816_v59  ;;  %5710 = vmatpush.msrb.mxu2 %v5709_v40  ;;  %v5708_v40 = vld [vmem:[#allocation10 + $0x270] sm:$0xff] }
 0x3fb   : > { %4473 = vmatmul.f32.gmra.mxu1 %v11204_v32  ;;  %4757 = vmatmul.f32.gmra.mxu0 %v549_v9  ;;  %v3817_v32 = vadd.f32 %v11425_v48, %v11194_v34  ;;  %v11524_v9 = vld [vmem:[#allocation2 + $0x1ca] sm:$0xff]  ;;  %v4510_v34 = vld [vmem:[#allocation7 + $0x220] sm:$0xff] }
 0x3fc   : > { %v4209_v54 = vmul.f32 %v11383_v31, %v4097_v22  ;;  %v4042_v15 = vadd.f32 %v11421_v23, %v3929_v5  ;;  %4621 = vmatmul.f32.gmra.mxu2 %v11505_v39  ;;  %4532 = vmatpush.msrb.mxu1 %v4511_v3  ;;  %v5822_v3 = vld [vmem:[#allocation10 + $0x2f8] sm:$0xff] }
 0x3fd   : > { %4686 = vmatmul.f32.gmra.mxu3 %v426_v27  ;;  %5711 = vmatpush.msrb.mxu2 %v5708_v40  ;;  %v5935_v40 = vld [vmem:[#allocation10 + $0x378] sm:$0xff] }
 0x3fe   : > { %4225 = vst [vmem:[#allocation4 + $0x100] sm:$0xff] %v4209_v54  ;;  %v4062_v30 = vmul.f32 %v11481_v47, %v4042_v15  ;;  %v11526_v22 = vpop.permute.xlu2 %4887  ;;  %v427_v15 = vld [vmem:[#allocation2 + $0x1d8] sm:$0xff]  ;;  %4533 = vmatpush.msrb.mxu1 %v4510_v34  ;;  %5823 = vmatpush.msrb.mxu3 %v5822_v3  ;;  %v5821_v3 = vld [vmem:[#allocation10 + $0x2f0] sm:$0xff] }
 0x3ff   : > { %v11514_v6 = vpop.f32.mrf.mxu2  ;;  %13101 = vst [vmem:[#allocation34_spill] sm:$0xff] %v11526_v22  ;;  %5936 = vmatpush.msrb.mxu0 %v5935_v40  ;;  %v6408_v22 = vld [vmem:[#allocation10 + $0xe8] sm:$0xff] }
 0x400   : > { %v4082_v31 = vadd.f32 %v11490_v12, %v4062_v30  ;;  %v4348_v23 = vpop.f32.mrf.mxu3  ;;  %v11519_v36 = vpop.f32.mrf.mxu0  ;;  %5824 = vmatpush.msrb.mxu3 %v5821_v3 }
 0x401   : > { %v11522_v27 = vadd.f32 %v4348_v23, %v11359_v51  ;;  %v3886_v59 = vpop.f32.mrf.mxu1  ;;  %v4509_v51 = vld [vmem:[#allocation7 + $0x218] sm:$0xff] }
 0x402   : > { %v4098_v5 = vmax.f32 %v4082_v31, 0.0  ;;  %v3930_v54 = vadd.f32 %v3886_v59, %v3817_v32  ;;  %4534 = vmatpush.msrb.mxu1 %v4509_v51  ;;  %v4506_v51 = vld [vmem:[#allocation7 + $0x200] sm:$0xff] }
 0x403   : > { %4476 = vmatmul.f32.gmra.mxu1 %v11224_v14  ;;  %4760 = vmatmul.f32.gmra.mxu0 %v550_v60  ;;  %v4508_v14 = vld [vmem:[#allocation7 + $0x210] sm:$0xff] }
 0x404   : > { %v4210_v48 = vmul.f32 %v11294_v19, %v4098_v5  ;;  %v4043_v30 = vadd.f32 %v11443_v52, %v3930_v54  ;;  %4624 = vmatmul.f32.gmra.mxu2 %v11524_v9  ;;  %v3818_v19 = vadd.f32 %v11447_v44, %v11214_v35  ;;  %v5150_v60 = vld [vmem:[#allocation4 + $0x2] sm:$0xff]  ;;  %4535 = vmatpush.msrb.mxu1 %v4508_v14 }
 0x405   : > { %4689 = vmatmul.f32.gmra.mxu3 %v427_v15  ;;  %v5042_v5 = vld [vmem:[#allocation4 + $0x1] sm:$0xff] }
 0x406   : > { %4226 = vst [vmem:[#allocation4 + $0x108] sm:$0xff] %v4210_v48  ;;  %v4063_v41 = vmul.f32 %v11481_v47, %v4043_v30  ;;  %v4903_v54 = vpop.permute.xlu2 %4902  ;;  %v4507_v15 = vld [vmem:[#allocation7 + $0x208] sm:$0xff] }
 0x407   : > { %v11533_v32 = vpop.f32.mrf.mxu2  ;;  %v428_v30 = vld [vmem:[#allocation2 + $0x1e0] sm:$0xff]  ;;  %4536 = vmatpush.msrb.mxu1 %v4507_v15 }
 0x408   : > { %v4083_v52 = vadd.f32 %v11490_v12, %v4063_v41  ;;  %v4351_v31 = vpop.f32.mrf.mxu3  ;;  %v11538_v23 = vpop.f32.mrf.mxu0  ;;  %v5707_v14 = vld [vmem:[#allocation10 + $0x268] sm:$0xff] }
 0x409   : > { %v3889_v59 = vpop.f32.mrf.mxu1  ;;  %4537 = vmatpush.msrb.mxu1 %v4506_v51  ;;  %v5151_v31 = vld [vmem:[#allocation4 + $0xa] sm:$0xff]  ;;  %5712 = vmatpush.msrb.mxu2 %v5707_v14 }
 0x40a   : > { %v4099_v34 = vmax.f32 %v4083_v52, 0.0  ;;  %v3931_v48 = vadd.f32 %v3889_v59, %v3818_v19  ;;  %v5043_v59 = vld [vmem:[#allocation4 + $0x9] sm:$0xff] }
 0x40b   : > { %4479 = vmatmul.f32.gmra.mxu1 %v11244_v45  ;;  %5500 = vmatmul.f32.vlgmr.msra.gmra.mxu0 %v5150_v60  ;;  %v3819_v45 = vadd.f32 %v11469_v21, %v11234_v8  ;;  %v8832_v8 = vld [vmem:[#allocation4] sm:$0xff]  ;;  %v4793_v51 = vld [vmem:[#allocation7 + $0x478] sm:$0xff] }
 0x40c   : > { %v4211_v35 = vmul.f32 %v11350_v37, %v4099_v34  ;;  %v4044_v44 = vadd.f32 %v11463_v24, %v3931_v48  ;;  %5338 = vmatmul.f32.vlgmr.msra.gmra.mxu2 %v5042_v5  ;;  %v5820_v48 = vld [vmem:[#allocation10 + $0x2e8] sm:$0xff]  ;;  %4794 = vmatpush.msra.mxu1 %v4793_v51 }
 0x40d   : > { %4692 = vmatmul.f32.gmra.mxu3 %v428_v30  ;;  %v5934_v30 = vld [vmem:[#allocation10 + $0x370] sm:$0xff] }
 0x40e   : > { %4227 = vst [vmem:[#allocation4 + $0x110] sm:$0xff] %v4211_v35  ;;  %v4064_v41 = vmul.f32 %v11481_v47, %v4044_v44  ;;  %5825 = vmatpush.msrb.mxu3 %v5820_v48  ;;  %5937 = vmatpush.msrb.mxu0 %v5934_v30  ;;  %v4792_v44 = vld [vmem:[#allocation7 + $0x470] sm:$0xff] }
 0x40f   : > { %v11544_v19 = vpop.f32.mrf.mxu2  ;;  %4795 = vmatpush.msra.mxu1 %v4792_v44  ;;  %v11573_v44 = vld [vmem:[#allocation4 + $0x1a] sm:$0xff] }
 0x410   : > { %v4084_v37 = vadd.f32 %v11490_v12, %v4064_v41  ;;  %v4354_v52 = vpop.f32.mrf.mxu3  ;;  %v11549_v24 = vpop.f32.mrf.mxu0 }
 0x411   : > { %v3892_v60 = vpop.f32.mrf.mxu1  ;;  %v5044_v52 = vld [vmem:[#allocation4 + $0x11] sm:$0xff] }
 0x412   : > { %v4100_v5 = vmax.f32 %v4084_v37, 0.0  ;;  %v3932_v54 = vadd.f32 %v3892_v60, %v3819_v45  ;;  %v5152_v37 = vld [vmem:[#allocation4 + $0x12] sm:$0xff] }
 0x413   : > { %4482 = vmatmul.f32.gmra.mxu1 %v11431_v42  ;;  %5503 = vmatmul.f32.gmra.mxu0 %v5151_v31  ;;  %v5706_v42 = vld [vmem:[#allocation10 + $0x260] sm:$0xff] }
 0x414   : > { %v4212_v15 = vmul.f32 %v11407_v28, %v4100_v5  ;;  %v4045_v34 = vadd.f32 %v11495_v50, %v3932_v54  ;;  %5341 = vmatmul.f32.gmra.mxu2 %v5043_v59  ;;  %v3820_v28 = vadd.f32 %v11500_v17, %v11254_v57  ;;  %v5819_v60 = vld [vmem:[#allocation10 + $0x2e0] sm:$0xff]  ;;  %v5933_v59 = vld [vmem:[#allocation10 + $0x368] sm:$0xff] }
 0x415   : > { %5403 = vmatmul.f32.vlgmr.msra.gmra.mxu3 %v8832_v8  ;;  %5713 = vmatpush.msrb.mxu2 %v5706_v42  ;;  %v4791_v5 = vld [vmem:[#allocation7 + $0x468] sm:$0xff] }
 0x416   : > { %4228 = vst [vmem:[#allocation4 + $0x118] sm:$0xff] %v4212_v15  ;;  %v4065_v21 = vmul.f32 %v11481_v47, %v4045_v34  ;;  %5826 = vmatpush.msrb.mxu3 %v5819_v60  ;;  %5938 = vmatpush.msrb.mxu0 %v5933_v59  ;;  %v4790_v15 = vld [vmem:[#allocation7 + $0x460] sm:$0xff]  ;;  %v3821_v34 = vadd.f32 %v11519_v36, %v11272_v13  ;;  %v11593_v60 = vld [vmem:[#allocation4 + $0x22] sm:$0xff] }
 0x417   : > { %v11555_v35 = vpop.f32.mrf.mxu2  ;;  %4796 = vmatpush.msra.mxu1 %v4791_v5  ;;  %v11576_v42 = vld [vmem:[#allocation4 + $0x19] sm:$0xff]  ;;  %v11595_v5 = vld [vmem:[#allocation4 + $0x21] sm:$0xff] }
 0x418   : > { %v4085_v50 = vadd.f32 %v11490_v12, %v4065_v21  ;;  %v4357_v41 = vpop.f32.mrf.mxu3  ;;  %v11560_v3 = vpop.f32.mrf.mxu0  ;;  %v8833_v59 = vld [vmem:[#allocation2 + $0x199] sm:$0xff] }
 0x419   : > { %v3895_v40 = vpop.f32.mrf.mxu1  ;;  %4797 = vmatpush.msra.mxu1 %v4790_v15  ;;  %v5818_v41 = vld [vmem:[#allocation10 + $0x2d8] sm:$0xff] }
 0x41a   : > { %v4101_v14 = vmax.f32 %v4085_v50, 0.0  ;;  %v3933_v45 = vadd.f32 %v3895_v40, %v3820_v28  ;;  %v4789_v50 = vld [vmem:[#allocation7 + $0x458] sm:$0xff]  ;;  %v5932_v40 = vld [vmem:[#allocation10 + $0x360] sm:$0xff]  ;;  %5827 = vmatpush.msrb.mxu3 %v5818_v41 }
 0x41b   : > { %4485 = vmatmul.f32.gmra.mxu1 %v11453_v58  ;;  %5506 = vmatmul.f32.gmra.mxu0 %v5152_v37  ;;  %v5705_v58 = vld [vmem:[#allocation10 + $0x258] sm:$0xff] }
 0x41c   : > { %v4213_v31 = vmul.f32 %v11314_v10, %v4101_v14  ;;  %v4046_v57 = vadd.f32 %v11514_v6, %v3933_v45  ;;  %5344 = vmatmul.f32.gmra.mxu2 %v5044_v52  ;;  %4798 = vmatpush.msra.mxu1 %v4789_v50  ;;  %v5704_v45 = vld [vmem:[#allocation10 + $0x250] sm:$0xff]  ;;  %v4785_v50 = vld [vmem:[#allocation7 + $0x438] sm:$0xff] }
 0x41d   : > { %5406 = vmatmul.f32.gmra.mxu3 %v8832_v8  ;;  %5714 = vmatpush.msrb.mxu2 %v5705_v58  ;;  %v4787_v58 = vld [vmem:[#allocation7 + $0x448] sm:$0xff] }
 0x41e   : > { %4229 = vst [vmem:[#allocation4 + $0x120] sm:$0xff] %v4213_v31  ;;  %v4066_v17 = vmul.f32 %v11481_v47, %v4046_v57  ;;  %5939 = vmatpush.msrb.mxu0 %v5932_v40 }
 0x41f   : > { %v11566_v54 = vpop.f32.mrf.mxu2  ;;  %5715 = vmatpush.msrb.mxu2 %v5704_v45  ;;  %v8834_v45 = vld [vmem:[#allocation2 + $0x1a1] sm:$0xff] }
 0x420   : > { %v4086_v10 = vadd.f32 %v11490_v12, %v4066_v17  ;;  %v4360_v6 = vpop.f32.mrf.mxu3  ;;  %v11571_v21 = vpop.f32.mrf.mxu0 }
 0x421   : > { %v3898_v48 = vpop.f32.mrf.mxu1 }
 0x422   : > { %v4102_v30 = vmax.f32 %v4086_v10, 0.0  ;;  %v3934_v51 = vadd.f32 %v3898_v48, %v3821_v34  ;;  %v5817_v34 = vld [vmem:[#allocation10 + $0x2d0] sm:$0xff]  ;;  %v5931_v10 = vld [vmem:[#allocation10 + $0x358] sm:$0xff]  ;;  %v4786_v48 = vld [vmem:[#allocation7 + $0x440] sm:$0xff] }
 0x423   : > { %4488 = vmatmul.f32.gmra.mxu1 %v11483_v33  ;;  %5509 = vmatmul.f32.gmra.mxu0 %v11573_v44  ;;  %v4788_v33 = vld [vmem:[#allocation7 + $0x450] sm:$0xff] }
 0x424   : > { %v4214_v13 = vmul.f32 %v11372_v49, %v4102_v30  ;;  %v4047_v36 = vadd.f32 %v11533_v32, %v3934_v51  ;;  %5347 = vmatmul.f32.gmra.mxu2 %v11576_v42  ;;  %v3822_v49 = vadd.f32 %v11538_v23, %v11290_v61  ;;  %4799 = vmatpush.msra.mxu1 %v4788_v33  ;;  %v11615_v33 = vld [vmem:[#allocation4 + $0x2a] sm:$0xff] }
 0x425   : > { %5409 = vmatmul.f32.gmra.mxu3 %v8832_v8  ;;  %5940 = vmatpush.msrb.mxu0 %v5931_v10 }
 0x426   : > { %4230 = vst [vmem:[#allocation4 + $0x128] sm:$0xff] %v4214_v13  ;;  %v4067_v28 = vmul.f32 %v11481_v47, %v4047_v36  ;;  %4800 = vmatpush.msra.mxu1 %v4787_v58  ;;  %5828 = vmatpush.msrb.mxu3 %v5817_v34 }
 0x427   : > { %v11583_v14 = vpop.f32.mrf.mxu2 }
 0x428   : > { %v4087_v32 = vadd.f32 %v11490_v12, %v4067_v28  ;;  %v4403_v37 = vpop.f32.mrf.mxu3  ;;  %v11588_v52 = vpop.f32.mrf.mxu0  ;;  %4801 = vmatpush.msra.mxu1 %v4786_v48 }
 0x429   : > { %v11591_v8 = vadd.f32 %v4403_v37, %v11472_v16  ;;  %v3901_v31 = vpop.f32.mrf.mxu1  ;;  %v11601_v16 = vld [vmem:[#allocation4 + $0x18] sm:$0xff]  ;;  %v5816_v37 = vld [vmem:[#allocation10 + $0x2c8] sm:$0xff] }
 0x42a   : > { %v4103_v57 = vmax.f32 %v4087_v32, 0.0  ;;  %v3935_v17 = vadd.f32 %v3901_v31, %v3822_v49  ;;  %4802 = vmatpush.msra.mxu1 %v4785_v50  ;;  %v5930_v31 = vld [vmem:[#allocation10 + $0x350] sm:$0xff]  ;;  %5829 = vmatpush.msrb.mxu3 %v5816_v37 }
 0x42b   : > { %4538 = vmatmul.f32.vlgmr.msrb.gmra.mxu1 %v8833_v59  ;;  %5512 = vmatmul.f32.gmra.mxu0 %v11593_v60  ;;  %v5702_v59 = vld [vmem:[#allocation10 + $0x240] sm:$0xff] }
 0x42c   : > { %v4215_v61 = vmul.f32 %v11429_v62, %v4103_v57  ;;  %v4048_v23 = vadd.f32 %v11544_v19, %v3935_v17  ;;  %5350 = vmatmul.f32.gmra.mxu2 %v11595_v5  ;;  %v5703_v62 = vld [vmem:[#allocation10 + $0x248] sm:$0xff]  ;;  %v3823_v19 = vadd.f32 %v11549_v24, %v11310_v55  ;;  %v11617_v55 = vld [vmem:[#allocation4 + $0x29] sm:$0xff]  ;;  %5941 = vmatpush.msrb.mxu0 %v5930_v31 }
 0x42d   : > { %5412 = vmatmul.f32.gmra.mxu3 %v11601_v16  ;;  %5716 = vmatpush.msrb.mxu2 %v5703_v62  ;;  %v4784_v57 = vld [vmem:[#allocation7 + $0x430] sm:$0xff]  ;;  %v11637_v62 = vld [vmem:[#allocation4 + $0x32] sm:$0xff] }
 0x42e   : > { %4231 = vst [vmem:[#allocation4 + $0x130] sm:$0xff] %v4215_v61  ;;  %v4068_v15 = vmul.f32 %v11481_v47, %v4048_v23  ;;  %4803 = vmatpush.msra.mxu1 %v4784_v57  ;;  %v4779_v57 = vld [vmem:[#allocation7 + $0x408] sm:$0xff] }
 0x42f   : > { %v11605_v6 = vpop.f32.mrf.mxu2  ;;  %5717 = vmatpush.msrb.mxu2 %v5702_v59 }
 0x430   : > { %v4088_v30 = vadd.f32 %v11490_v12, %v4068_v15  ;;  %v4406_v51 = vpop.f32.mrf.mxu3  ;;  %v11610_v13 = vpop.f32.mrf.mxu0 }
 0x431   : > { %v11613_v36 = vadd.f32 %v4406_v51, %v11503_v11  ;;  %v3904_v28 = vpop.f32.mrf.mxu1  ;;  %v11623_v11 = vld [vmem:[#allocation4 + $0x20] sm:$0xff] }
 0x432   : > { %v4104_v41 = vmax.f32 %v4088_v30, 0.0  ;;  %v3936_v40 = vadd.f32 %v3904_v28, %v3823_v19  ;;  %v8835_v19 = vld [vmem:[#allocation2 + $0x1a9] sm:$0xff]  ;;  %v11639_v30 = vld [vmem:[#allocation4 + $0x31] sm:$0xff] }
 0x433   : > { %4541 = vmatmul.f32.gmra.mxu1 %v8834_v45  ;;  %5515 = vmatmul.f32.gmra.mxu0 %v11615_v33  ;;  %v4781_v28 = vld [vmem:[#allocation7 + $0x418] sm:$0xff] }
 0x434   : > { %v4216_v24 = vmul.f32 %v11335_v18, %v4104_v41  ;;  %v4049_v49 = vadd.f32 %v11555_v35, %v3936_v40  ;;  %5353 = vmatmul.f32.gmra.mxu2 %v11617_v55  ;;  %v4783_v18 = vld [vmem:[#allocation7 + $0x428] sm:$0xff]  ;;  %v3824_v35 = vadd.f32 %v11560_v3, %v11331_v2  ;;  %v4782_v2 = vld [vmem:[#allocation7 + $0x420] sm:$0xff]  ;;  %v5701_v45 = vld [vmem:[#allocation10 + $0x238] sm:$0xff] }
 0x435   : > { %5415 = vmatmul.f32.gmra.mxu3 %v11623_v11  ;;  %4804 = vmatpush.msra.mxu1 %v4783_v18  ;;  %v5815_v41 = vld [vmem:[#allocation10 + $0x2c0] sm:$0xff]  ;;  %v5929_v40 = vld [vmem:[#allocation10 + $0x348] sm:$0xff] }
 0x436   : > { %4232 = vst [vmem:[#allocation4 + $0x138] sm:$0xff] %v4216_v24  ;;  %v4069_v32 = vmul.f32 %v11481_v47, %v4049_v49  ;;  %5830 = vmatpush.msrb.mxu3 %v5815_v41  ;;  %5942 = vmatpush.msrb.mxu0 %v5929_v40 }
 0x437   : > { %v11627_v17 = vpop.f32.mrf.mxu2  ;;  %4805 = vmatpush.msra.mxu1 %v4782_v2  ;;  %5718 = vmatpush.msrb.mxu2 %v5701_v45  ;;  %v5928_v2 = vld [vmem:[#allocation10 + $0x340] sm:$0xff] }
 0x438   : > { %v4089_v61 = vadd.f32 %v11490_v12, %v4069_v32  ;;  %v4409_v23 = vpop.f32.mrf.mxu3  ;;  %v11632_v15 = vpop.f32.mrf.mxu0  ;;  %5943 = vmatpush.msrb.mxu0 %v5928_v2  ;;  %v11698_v2 = vld [vmem:[#allocation4 + $0x4a] sm:$0xff] }
 0x439   : > { %v11635_v58 = vadd.f32 %v4409_v23, %v11522_v27  ;;  %v3907_v34 = vpop.f32.mrf.mxu1  ;;  %v11645_v27 = vld [vmem:[#allocation4 + $0x28] sm:$0xff]  ;;  %4806 = vmatpush.msra.mxu1 %v4781_v28  ;;  %v11658_v23 = vld [vmem:[#allocation4 + $0x39] sm:$0xff] }
 0x43a   : > { %v4105_v10 = vmax.f32 %v4089_v61, 0.0  ;;  %v3937_v48 = vadd.f32 %v3907_v34, %v3824_v35  ;;  %v11656_v35 = vld [vmem:[#allocation4 + $0x3a] sm:$0xff]  ;;  %v8836_v61 = vld [vmem:[#allocation2 + $0x1b1] sm:$0xff] }
 0x43b   : > { %4544 = vmatmul.f32.gmra.mxu1 %v8835_v19  ;;  %5518 = vmatmul.f32.gmra.mxu0 %v11637_v62  ;;  %v5814_v19 = vld [vmem:[#allocation10 + $0x2b8] sm:$0xff] }
 0x43c   : > { %v4217_v3 = vmul.f32 %v11394_v4, %v4105_v10  ;;  %v4050_v51 = vadd.f32 %v11566_v54, %v3937_v48  ;;  %5356 = vmatmul.f32.gmra.mxu2 %v11639_v30  ;;  %v4780_v4 = vld [vmem:[#allocation7 + $0x410] sm:$0xff]  ;;  %v3825_v54 = vadd.f32 %v11571_v21, %v11353_v0  ;;  %v4778_v0 = vld [vmem:[#allocation7 + $0x400] sm:$0xff]  ;;  %v11664_v10 = vld [vmem:[#allocation4 + $0x30] sm:$0xff]  ;;  %5831 = vmatpush.msrb.mxu3 %v5814_v19 }
 0x43d   : > { %5418 = vmatmul.f32.gmra.mxu3 %v11645_v27  ;;  %4807 = vmatpush.msra.mxu1 %v4780_v4  ;;  %v11675_v4 = vld [vmem:[#allocation4 + $0x42] sm:$0xff] }
 0x43e   : > { %4233 = vst [vmem:[#allocation4 + $0x140] sm:$0xff] %v4217_v3  ;;  %v4070_v50 = vmul.f32 %v11481_v47, %v4050_v51  ;;  %v5700_v3 = vld [vmem:[#allocation10 + $0x230] sm:$0xff] }
 0x43f   : > { %v11649_v24 = vpop.f32.mrf.mxu2  ;;  %4808 = vmatpush.msra.mxu1 %v4779_v57  ;;  %5719 = vmatpush.msrb.mxu2 %v5700_v3  ;;  %v5927_v57 = vld [vmem:[#allocation10 + $0x338] sm:$0xff] }
 0x440   : > { %v4090_v49 = vadd.f32 %v11490_v12, %v4070_v50  ;;  %v4412_v32 = vpop.f32.mrf.mxu3  ;;  %v11654_v37 = vpop.f32.mrf.mxu0  ;;  %5944 = vmatpush.msrb.mxu0 %v5927_v57  ;;  %v11701_v3 = vld [vmem:[#allocation4 + $0x49] sm:$0xff]  ;;  %v5925_v57 = vld [vmem:[#allocation10 + $0x328] sm:$0xff] }
 0x441   : > { %v3910_v31 = vpop.f32.mrf.mxu1  ;;  %4809 = vmatpush.msra.mxu1 %v4778_v0 }
 0x442   : > { %v4106_v18 = vmax.f32 %v4090_v49, 0.0  ;;  %v3938_v59 = vadd.f32 %v3910_v31, %v3825_v54  ;;  %v11678_v54 = vld [vmem:[#allocation4 + $0x41] sm:$0xff] }
 0x443   : > { %4547 = vmatmul.f32.gmra.mxu1 %v8836_v61  ;;  %5521 = vmatmul.f32.gmra.mxu0 %v11656_v35  ;;  %v5813_v31 = vld [vmem:[#allocation10 + $0x2b0] sm:$0xff] }
 0x444   : > { %v4218_v21 = vmul.f32 %v11451_v25, %v4106_v18  ;;  %v4051_v34 = vadd.f32 %v11583_v14, %v3938_v59  ;;  %5359 = vmatmul.f32.gmra.mxu2 %v11658_v23  ;;  %v3826_v25 = vadd.f32 %v11588_v52, %v11375_v29  ;;  %v11684_v52 = vld [vmem:[#allocation4 + $0x38] sm:$0xff]  ;;  %5832 = vmatpush.msrb.mxu3 %v5813_v31  ;;  %v5699_v59 = vld [vmem:[#allocation10 + $0x228] sm:$0xff] }
 0x445   : > { %5421 = vmatmul.f32.gmra.mxu3 %v11664_v10  ;;  %5720 = vmatpush.msrb.mxu2 %v5699_v59  ;;  %v5811_v31 = vld [vmem:[#allocation10 + $0x2a0] sm:$0xff]  ;;  %v5592_v59 = vld [vmem:[#allocation10 + $0x1d8] sm:$0xff] }
 0x446   : > { %4234 = vst [vmem:[#allocation4 + $0x148] sm:$0xff] %v4218_v21  ;;  %v4071_v48 = vmul.f32 %v11481_v47, %v4051_v34 }
 0x447   : > { %v11668_v51 = vpop.f32.mrf.mxu2 }
 0x448   : > { %v4091_v14 = vadd.f32 %v11490_v12, %v4071_v48  ;;  %v4415_v28 = vpop.f32.mrf.mxu3  ;;  %v11673_v50 = vpop.f32.mrf.mxu0 }
 0x449   : > { %v3913_v41 = vpop.f32.mrf.mxu1  ;;  %v5812_v28 = vld [vmem:[#allocation10 + $0x2a8] sm:$0xff] }
 0x44a   : > { %v4107_v40 = vmax.f32 %v4091_v14, 0.0  ;;  %v3939_v45 = vadd.f32 %v3913_v41, %v3826_v25  ;;  %v11707_v25 = vld [vmem:[#allocation4 + $0x40] sm:$0xff]  ;;  %v5926_v41 = vld [vmem:[#allocation10 + $0x330] sm:$0xff]  ;;  %5833 = vmatpush.msrb.mxu3 %v5812_v28 }
 0x44b   : > { %4550 = vmatmul.f32.gmra.mxu1 %v11405_v53  ;;  %5524 = vmatmul.f32.gmra.mxu0 %v11675_v4  ;;  %v11688_v53 = vld [vmem:[#allocation10 + $0x1f8] sm:$0xff]  ;;  %v5590_v28 = vld [vmem:[#allocation10 + $0x1c8] sm:$0xff] }
 0x44c   : > { %v4219_v49 = vmul.f32 %v11365_v26, %v4107_v40  ;;  %v4052_v29 = vadd.f32 %v11605_v6, %v3939_v45  ;;  %5362 = vmatmul.f32.gmra.mxu2 %v11678_v54  ;;  %13102 = vst [vmem:[#allocation35_spill] sm:$0xff] %v11688_v53  ;;  %v5595_v26 = vld [vmem:[#allocation10 + $0x1f0] sm:$0xff]  ;;  %v3827_v6 = vadd.f32 %v11610_v13, %v11397_v63  ;;  %v5593_v45 = vld [vmem:[#allocation10 + $0x1e0] sm:$0xff] }
 0x44d   : > { %5424 = vmatmul.f32.gmra.mxu3 %v11684_v52  ;;  %5597 = vmatpush.msrb.mxu1 %v11688_v53 }
 0x44e   : > { %4235 = vst [vmem:[#allocation4 + $0x150] sm:$0xff] %v4219_v49  ;;  %v4072_v32 = vmul.f32 %v11481_v47, %v4052_v29  ;;  %5945 = vmatpush.msrb.mxu0 %v5926_v41  ;;  %5834 = vmatpush.msrb.mxu3 %v5811_v31 }
 0x44f   : > { %v11690_v18 = vpop.f32.mrf.mxu2  ;;  %5598 = vmatpush.msrb.mxu1 %v5595_v26 }
 0x450   : > { %v4092_v61 = vadd.f32 %v11490_v12, %v4072_v32  ;;  %v4418_v0 = vpop.f32.mrf.mxu3  ;;  %v11695_v21 = vpop.f32.mrf.mxu0  ;;  %5946 = vmatpush.msrb.mxu0 %v5925_v57 }
 0x451   : > { %v3916_v34 = vpop.f32.mrf.mxu1 }
 0x452   : > { %v4108_v48 = vmax.f32 %v4092_v61, 0.0  ;;  %v3940_v19 = vadd.f32 %v3916_v34, %v3827_v6  ;;  %v5697_v6 = vld [vmem:[#allocation10 + $0x218] sm:$0xff] }
 0x453   : > { %4553 = vmatmul.f32.gmra.mxu1 %v11427_v56  ;;  %5527 = vmatmul.f32.gmra.mxu0 %v11698_v2  ;;  %v5594_v56 = vld [vmem:[#allocation10 + $0x1e8] sm:$0xff]  ;;  %v11718_v34 = vld [vmem:[#allocation4 + $0x52] sm:$0xff] }
 0x454   : > { %v4220_v63 = vmul.f32 %v11416_v46, %v4108_v48  ;;  %v4053_v13 = vadd.f32 %v11627_v17, %v3940_v19  ;;  %5365 = vmatmul.f32.gmra.mxu2 %v11701_v3  ;;  %v5698_v46 = vld [vmem:[#allocation10 + $0x220] sm:$0xff]  ;;  %v3828_v17 = vadd.f32 %v11632_v15, %v11419_v38  ;;  %5599 = vmatpush.msrb.mxu1 %v5594_v56  ;;  %v5591_v48 = vld [vmem:[#allocation10 + $0x1d0] sm:$0xff]  ;;  %v5810_v19 = vld [vmem:[#allocation10 + $0x298] sm:$0xff] }
 0x455   : > { %5427 = vmatmul.f32.gmra.mxu3 %v11707_v25  ;;  %5721 = vmatpush.msrb.mxu2 %v5698_v46  ;;  %v5924_v38 = vld [vmem:[#allocation10 + $0x320] sm:$0xff] }
 0x456   : > { %4236 = vst [vmem:[#allocation4 + $0x158] sm:$0xff] %v4220_v63  ;;  %v4073_v14 = vmul.f32 %v11481_v47, %v4053_v13  ;;  %5600 = vmatpush.msrb.mxu1 %v5593_v45  ;;  %v11721_v15 = vld [vmem:[#allocation4 + $0x51] sm:$0xff]  ;;  %5947 = vmatpush.msrb.mxu0 %v5924_v38 }
 0x457   : > { %v11711_v40 = vpop.f32.mrf.mxu2  ;;  %5722 = vmatpush.msrb.mxu2 %v5697_v6  ;;  %5835 = vmatpush.msrb.mxu3 %v5810_v19  ;;  %v5589_v56 = vld [vmem:[#allocation10 + $0x1c0] sm:$0xff]  ;;  %v5587_v19 = vld [vmem:[#allocation10 + $0x1b0] sm:$0xff] }
 0x458   : > { %v4093_v49 = vadd.f32 %v11490_v12, %v4073_v14  ;;  %v4421_v29 = vpop.f32.mrf.mxu3  ;;  %v11716_v32 = vpop.f32.mrf.mxu0  ;;  %v11727_v14 = vld [vmem:[#allocation4 + $0x48] sm:$0xff]  ;;  %5601 = vmatpush.msrb.mxu1 %v5592_v59  ;;  %v5923_v59 = vld [vmem:[#allocation10 + $0x318] sm:$0xff] }
 0x459   : > { %v3919_v26 = vpop.f32.mrf.mxu1  ;;  %v5588_v29 = vld [vmem:[#allocation10 + $0x1b8] sm:$0xff]  ;;  %5948 = vmatpush.msrb.mxu0 %v5923_v59  ;;  %v5585_v59 = vld [vmem:[#allocation10 + $0x1a0] sm:$0xff] }
 0x45a   : > { %v4109_v61 = vmax.f32 %v4093_v49, 0.0  ;;  %v3941_v0 = vadd.f32 %v3919_v26, %v3828_v17  ;;  %5602 = vmatpush.msrb.mxu1 %v5591_v48  ;;  %v5696_v17 = vld [vmem:[#allocation10 + $0x210] sm:$0xff]  ;;  %v11740_v26 = vld [vmem:[#allocation4 + $0x5a] sm:$0xff]  ;;  %v8837_v6 = vld [vmem:[#allocation2 + $0x1b2] sm:$0xff] }
 0x45b   : > { %4556 = vmatmul.f32.gmra.mxu1 %v11449_v20  ;;  %5530 = vmatmul.f32.gmra.mxu0 %v11718_v34  ;;  %v11748_v48 = vld [vmem:[#allocation4 + $0x50] sm:$0xff] }
 0x45c   : > { %v4221_v63 = vmul.f32 %v11476_v1, %v4109_v61  ;;  %v4054_v13 = vadd.f32 %v11649_v24, %v3941_v0  ;;  %5368 = vmatmul.f32.gmra.mxu2 %v11721_v15  ;;  %v3829_v1 = vadd.f32 %v11654_v37, %v11441_v7  ;;  %5603 = vmatpush.msrb.mxu1 %v5590_v28  ;;  %v11742_v7 = vld [vmem:[#allocation4 + $0x59] sm:$0xff]  ;;  %v5809_v37 = vld [vmem:[#allocation10 + $0x290] sm:$0xff] }
 0x45d   : > { %5430 = vmatmul.f32.gmra.mxu3 %v11727_v14  ;;  %5723 = vmatpush.msrb.mxu2 %v5696_v17  ;;  %v13104_v61 = vld [vmem:[#allocation31_spill] sm:$0xff]  ;;  %v5586_v17 = vld [vmem:[#allocation10 + $0x1a8] sm:$0xff] }
 0x45e   : > { %4237 = vst [vmem:[#allocation4 + $0x160] sm:$0xff] %v4221_v63  ;;  %v4074_v20 = vmul.f32 %v11481_v47, %v4054_v13  ;;  %5604 = vmatpush.msrb.mxu1 %v5589_v56  ;;  %5836 = vmatpush.msrb.mxu3 %v5809_v37  ;;  %v5922_v28 = vld [vmem:[#allocation10 + $0x310] sm:$0xff] }
 0x45f   : > { %v11731_v41 = vpop.f32.mrf.mxu2  ;;  %5949 = vmatpush.msrb.mxu0 %v5922_v28 }
 0x460   : > { %v4094_v24 = vadd.f32 %v11490_v12, %v4074_v20  ;;  %v11736_v45 = vpop.f32.mrf.mxu3  ;;  %v11738_v46 = vpop.f32.mrf.mxu0  ;;  %5605 = vmatpush.msrb.mxu1 %v5588_v29  ;;  %v13105_v20 = vld [vmem:[#allocation32_spill] sm:$0xff] }
 0x461   : > { %13103 = vst [vmem:[#allocation27_spill] sm:$0xff] %v11738_v46  ;;  %v3922_v49 = vpop.f32.mrf.mxu1  ;;  %v6376_v46 = vld [vmem:[#allocation10 + $0x68] sm:$0xff] }
 0x462   : > { %v4110_v31 = vmax.f32 %v4094_v24, 0.0  ;;  %v3942_v57 = vadd.f32 %v3922_v49, %v3829_v1  ;;  %5606 = vmatpush.msrb.mxu1 %v5587_v19  ;;  %v5695_v49 = vld [vmem:[#allocation10 + $0x208] sm:$0xff]  ;;  %v5920_v19 = vld [vmem:[#allocation10 + $0x300] sm:$0xff] }
 0x463   : > { %4810 = vmatmul.f32.vlgmr.msra.gmra.mxu1 %v8837_v6  ;;  %5533 = vmatmul.f32.gmra.mxu0 %v11740_v26 }
 0x464   : > { %v4222_v0 = vmul.f32 %v13104_v61, %v4110_v31  ;;  %v4055_v38 = vadd.f32 %v11668_v51, %v3942_v57  ;;  %5371 = vmatmul.f32.gmra.mxu2 %v11742_v7  ;;  %v3830_v51 = vadd.f32 %v11673_v50, %v13105_v20  ;;  %5607 = vmatpush.msrb.mxu1 %v5586_v17  ;;  %v5921_v31 = vld [vmem:[#allocation10 + $0x308] sm:$0xff]  ;;  %v5694_v50 = vld [vmem:[#allocation10 + $0x200] sm:$0xff] }
 0x465   : > { %5433 = vmatmul.f32.gmra.mxu3 %v11748_v48  ;;  %5724 = vmatpush.msrb.mxu2 %v5695_v49  ;;  %v5808_v57 = vld [vmem:[#allocation10 + $0x288] sm:$0xff] }
 0x466   : > { %4238 = vst [vmem:[#allocation4 + $0x168] sm:$0xff] %v4222_v0  ;;  %v4075_v63 = vmul.f32 %v11481_v47, %v4055_v38  ;;  %v11759_v61 = vld [vmem:[#allocation4 + $0x62] sm:$0xff]  ;;  %5950 = vmatpush.msrb.mxu0 %v5921_v31  ;;  %5837 = vmatpush.msrb.mxu3 %v5808_v57  ;;  %v13106_v0 = vld [vmem:[#allocation28_spill] sm:$0xff] }
 0x467   : > { %v11752_v13 = vpop.f32.mrf.mxu2  ;;  %v11762_v38 = vld [vmem:[#allocation4 + $0x61] sm:$0xff]  ;;  %5608 = vmatpush.msrb.mxu1 %v5585_v59  ;;  %5725 = vmatpush.msrb.mxu2 %v5694_v50 }
 0x468   : > { %v4095_v56 = vadd.f32 %v11490_v12, %v4075_v63  ;;  %v11757_v1 = vpop.f32.mrf.mxu3  ;;  %v4752_v24 = vpop.f32.mrf.mxu0  ;;  %v13107_v63 = vld [vmem:[#allocation29_spill] sm:$0xff]  ;;  %5951 = vmatpush.msrb.mxu0 %v5920_v19  ;;  %v5583_v57 = vld [vmem:[#allocation10 + $0x190] sm:$0xff]  ;;  %v11785_v50 = vld [vmem:[#allocation4 + $0x60] sm:$0xff] }
 0x469   : > { %v3925_v29 = vpop.f32.mrf.mxu1 }
 0x46a   : > { %v4111_v6 = vmax.f32 %v4095_v56, 0.0  ;;  %v3943_v37 = vadd.f32 %v3925_v29, %v3830_v51  ;;  %v11768_v56 = vld [vmem:[#allocation4 + $0x58] sm:$0xff]  ;;  %v5584_v51 = vld [vmem:[#allocation10 + $0x198] sm:$0xff] }
 0x46b   : > { %4813 = vmatmul.f32.gmra.mxu1 %v13106_v0  ;;  %5536 = vmatmul.f32.gmra.mxu0 %v11759_v61  ;;  %v5582_v0 = vld [vmem:[#allocation10 + $0x188] sm:$0xff] }
 0x46c   : > { %v4223_v28 = vmul.f32 %v13107_v63, %v4111_v6  ;;  %v4056_v20 = vadd.f32 %v11690_v18, %v3943_v37  ;;  %5374 = vmatmul.f32.gmra.mxu2 %v11762_v38  ;;  %5609 = vmatpush.msrb.mxu1 %v5584_v51  ;;  %v5807_v6 = vld [vmem:[#allocation10 + $0x280] sm:$0xff]  ;;  %v11777_v37 = vld [vmem:[#allocation4 + $0x6a] sm:$0xff] }
 0x46d   : > { %5436 = vmatmul.f32.gmra.mxu3 %v11768_v56  ;;  %v5581_v51 = vld [vmem:[#allocation10 + $0x180] sm:$0xff] }
 0x46e   : > { %4239 = vst [vmem:[#allocation4 + $0x170] sm:$0xff] %v4223_v28  ;;  %v4076_v24 = vmul.f32 %v11481_v47, %v4056_v20  ;;  %5610 = vmatpush.msrb.mxu1 %v5583_v57  ;;  %5838 = vmatpush.msrb.mxu3 %v5807_v6  ;;  %v11780_v47 = vld [vmem:[#allocation4 + $0x69] sm:$0xff] }
 0x46f   : > { %v4616_v17 = vpop.f32.mrf.mxu2 }
 0x470   : > { %v4096_v49 = vadd.f32 %v11490_v12, %v4076_v24  ;;  %v11773_v29 = vpop.f32.mrf.mxu3  ;;  %v4755_v18 = vpop.f32.mrf.mxu0  ;;  %5611 = vmatpush.msrb.mxu1 %v5582_v0  ;;  %v6410_v24 = vld [vmem:[#allocation10 + $0xf8] sm:$0xff] }
 0x471   : > { %v11775_v31 = vpop.f32.mrf.mxu1  ;;  %v11790_v17 = vld [vmem:[#allocation4 + $0x72] sm:$0xff]  ;;  %6411 = vmatpush.msra.mxu3 %v6410_v24  ;;  %v6047_v24 = vld [vmem:[#allocation10 + $0x3f0] sm:$0xff] }
 0x472   : > { %v4112_v59 = vmax.f32 %v4096_v49, 0.0  ;;  %13108 = vst [vmem:[#allocation37_spill] sm:$0xff] %v11790_v17  ;;  %5612 = vmatpush.msrb.mxu1 %v5581_v51  ;;  %v11797_v49 = vld [vmem:[#allocation4 + $0x68] sm:$0xff]  ;;  %v6048_v18 = vld [vmem:[#allocation10 + $0x3f8] sm:$0xff] }
 0x473   : > { %4816 = vmatmul.f32.gmra.mxu1 %v11505_v39  ;;  %5539 = vmatmul.f32.gmra.mxu0 %v11777_v37  ;;  %v6161_v39 = vld [vmem:[#allocation10 + $0x478] sm:$0xff] }
 0x474   : > { %v4224_v12 = vmul.f32 %v11507_v43, %v4112_v59  ;;  %5377 = vmatmul.f32.gmra.mxu2 %v11780_v47  ;;  %v11793_v43 = vld [vmem:[#allocation4 + $0x71] sm:$0xff]  ;;  %6049 = vmatpush.msra.mxu1 %v6048_v18 }
 0x475   : > { %5439 = vmatmul.f32.gmra.mxu3 %v11785_v50  ;;  %6162 = vmatpush.msra.mxu2 %v6161_v39  ;;  %v11804_v39 = vld [vmem:[#allocation4 + $0x79] sm:$0xff]  ;;  %v11808_v51 = vld [vmem:[#allocation4 + $0x70] sm:$0xff] }
 0x476   : > { %4240 = vst [vmem:[#allocation4 + $0x178] sm:$0xff] %v4224_v12  ;;  %v670_v12 = vld [vmem:[#allocation2 + $0x1d2] sm:$0xff]  ;;  %6050 = vmatpush.msra.mxu1 %v6047_v24  ;;  %v6046_v24 = vld [vmem:[#allocation10 + $0x3e8] sm:$0xff] }
 0x477   : > { %v4619_v19 = vpop.f32.mrf.mxu2 }
 0x478   : > { %v4684_v63 = vpop.f32.mrf.mxu3  ;;  %v4758_v28 = vpop.f32.mrf.mxu0  ;;  %v6409_v19 = vld [vmem:[#allocation10 + $0xf0] sm:$0xff]  ;;  %6051 = vmatpush.msra.mxu1 %v6046_v24 }
 0x479   : > { %v11788_v20 = vpop.f32.mrf.mxu1  ;;  %v6378_v63 = vld [vmem:[#allocation10 + $0x78] sm:$0xff]  ;;  %v11802_v28 = vld [vmem:[#allocation4 + $0x7a] sm:$0xff]  ;;  %6412 = vmatpush.msra.mxu3 %v6409_v19 }
 0x47a   : > { %13109 = vst [vmem:[#allocation38_spill] sm:$0xff] %v11802_v28  ;;  %6476 = vmatpush.msra.mxu0 %v6378_v63  ;;  %v6159_v19 = vld [vmem:[#allocation10 + $0x468] sm:$0xff]  ;;  %v6377_v63 = vld [vmem:[#allocation10 + $0x70] sm:$0xff] }
 0x47b   : > { %4819 = vmatmul.f32.gmra.mxu1 %v11524_v9  ;;  %5542 = vmatmul.f32.gmra.mxu0 %v11790_v17  ;;  %v6160_v9 = vld [vmem:[#allocation10 + $0x470] sm:$0xff]  ;;  %v6157_v17 = vld [vmem:[#allocation10 + $0x458] sm:$0xff] }
 0x47c   : > { %5380 = vmatmul.f32.gmra.mxu2 %v11793_v43  ;;  %6477 = vmatpush.msra.mxu0 %v6377_v63  ;;  %v6045_v63 = vld [vmem:[#allocation10 + $0x3e0] sm:$0xff] }
 0x47d   : > { %5442 = vmatmul.f32.gmra.mxu3 %v11797_v49  ;;  %6163 = vmatpush.msra.mxu2 %v6160_v9 }
 0x47e   : > { %6413 = vmatpush.msra.mxu3 %v6408_v22  ;;  %6478 = vmatpush.msra.mxu0 %v6376_v46  ;;  %v6375_v46 = vld [vmem:[#allocation10 + $0x60] sm:$0xff] }
 0x47f   : > { %v4622_v57 = vpop.f32.mrf.mxu2  ;;  %6164 = vmatpush.msra.mxu2 %v6159_v19  ;;  %6052 = vmatpush.msra.mxu1 %v6045_v63 }
 0x480   : > { %v4687_v6 = vpop.f32.mrf.mxu3  ;;  %v4761_v59 = vpop.f32.mrf.mxu0  ;;  %6479 = vmatpush.msra.mxu0 %v6375_v46 }
 0x481   : > { %v11800_v0 = vpop.f32.mrf.mxu1  ;;  %v671_v59 = vld [vmem:[#allocation2 + $0x1da] sm:$0xff] }
 0x483   : > { %4822 = vmatmul.f32.gmra.mxu1 %v670_v12  ;;  %5545 = vmatmul.f32.gmra.mxu0 %v11802_v28  ;;  %v11812_v12 = vld [vmem:[#allocation4 + $0x78] sm:$0xff]  ;;  %v672_v28 = vld [vmem:[#allocation2 + $0x1e2] sm:$0xff] }
 0x484   : > { %5383 = vmatmul.f32.gmra.mxu2 %v11804_v39 }
 0x485   : > { %5445 = vmatmul.f32.gmra.mxu3 %v11808_v51 }
 0x487   : > { %v4625_v18 = vpop.f32.mrf.mxu2 }
 0x488   : > { %v4690_v57 = vpop.f32.mrf.mxu3  ;;  %v5501_v6 = vpop.f32.mrf.mxu0 }
 0x489   : > { %v4480_v9 = vpop.f32.mrf.mxu1 }
 0x48b   : > { %4825 = vmatmul.f32.gmra.mxu1 %v671_v59  ;;  %5952 = vmatmul.f32.vlgmr.msrb.gmra.mxu0 %v11664_v10  ;;  %v6158_v59 = vld [vmem:[#allocation10 + $0x460] sm:$0xff] }
 0x48c   : > { %5726 = vmatmul.f32.vlgmr.msrb.gmra.mxu2 %v11576_v42  ;;  %v6407_v42 = vld [vmem:[#allocation10 + $0xe0] sm:$0xff] }
 0x48d   : > { %5448 = vmatmul.f32.gmra.mxu3 %v11812_v12  ;;  %6165 = vmatpush.msra.mxu2 %v6158_v59 }
 0x48e   : > { %6414 = vmatpush.msra.mxu3 %v6407_v42 }
 0x48f   : > { %v5339_v18 = vpop.f32.mrf.mxu2  ;;  %6166 = vmatpush.msra.mxu2 %v6157_v17 }
 0x490   : > { %v4693_v57 = vpop.f32.mrf.mxu3  ;;  %v5504_v9 = vpop.f32.mrf.mxu0 }
 0x491   : > { %v4483_v19 = vpop.f32.mrf.mxu1 }
 0x493   : > { %4828 = vmatmul.f32.gmra.mxu1 %v672_v28  ;;  %5955 = vmatmul.f32.gmra.mxu0 %v11684_v52  ;;  %v6044_v28 = vld [vmem:[#allocation10 + $0x3d8] sm:$0xff] }
 0x494   : > { %5729 = vmatmul.f32.gmra.mxu2 %v11595_v5  ;;  %6053 = vmatpush.msra.mxu1 %v6044_v28  ;;  %v6155_v28 = vld [vmem:[#allocation10 + $0x448] sm:$0xff] }
 0x495   : > { %5839 = vmatmul.f32.vlgmr.msrb.gmra.mxu3 %v11573_v44  ;;  %v6406_v44 = vld [vmem:[#allocation10 + $0xd8] sm:$0xff] }
 0x496   : > { %6415 = vmatpush.msra.mxu3 %v6406_v44 }
 0x497   : > { %v5342_v22 = vpop.f32.mrf.mxu2 }
 0x498   : > { %v5404_v24 = vpop.f32.mrf.mxu3  ;;  %v5507_v57 = vpop.f32.mrf.mxu0 }
 0x499   : > { %v5405_v53 = vadd.f32 %v5404_v24, %v5339_v18  ;;  %v4486_v19 = vpop.f32.mrf.mxu1  ;;  %v6405_v24 = vld [vmem:[#allocation10 + $0xd0] sm:$0xff] }
 0x49a   : > { %v6374_v19 = vld [vmem:[#allocation10 + $0x58] sm:$0xff]  ;;  %6416 = vmatpush.msra.mxu3 %v6405_v24  ;;  %v6154_v24 = vld [vmem:[#allocation10 + $0x440] sm:$0xff] }
 0x49b   : > { %5613 = vmatmul.f32.vlgmr.msrb.gmra.mxu1 %v11601_v16  ;;  %5958 = vmatmul.f32.gmra.mxu0 %v11707_v25  ;;  %v11821_v5 = vadd.f32 %v5501_v6, %v5405_v53  ;;  %v6156_v16 = vld [vmem:[#allocation10 + $0x450] sm:$0xff] }
 0x49c   : > { %5732 = vmatmul.f32.gmra.mxu2 %v11617_v55  ;;  %6480 = vmatpush.msra.mxu0 %v6374_v19  ;;  %v6403_v19 = vld [vmem:[#allocation10 + $0xc0] sm:$0xff] }
 0x49d   : > { %5842 = vmatmul.f32.gmra.mxu3 %v11593_v60  ;;  %6167 = vmatpush.msra.mxu2 %v6156_v16  ;;  %v6043_v60 = vld [vmem:[#allocation10 + $0x3d0] sm:$0xff] }
 0x49e   : > { %6054 = vmatpush.msra.mxu1 %v6043_v60 }
 0x49f   : > { %v5345_v18 = vpop.f32.mrf.mxu2  ;;  %6168 = vmatpush.msra.mxu2 %v6155_v28  ;;  %v6153_v28 = vld [vmem:[#allocation10 + $0x438] sm:$0xff] }
 0x4a0   : > { %v5407_v59 = vpop.f32.mrf.mxu3  ;;  %v5510_v42 = vpop.f32.mrf.mxu0 }
 0x4a1   : > { %v5408_v17 = vadd.f32 %v5407_v59, %v5342_v22  ;;  %v4489_v63 = vpop.f32.mrf.mxu1  ;;  %v6404_v59 = vld [vmem:[#allocation10 + $0xc8] sm:$0xff]  ;;  %6169 = vmatpush.msra.mxu2 %v6154_v24 }
 0x4a2   : > { %6417 = vmatpush.msra.mxu3 %v6404_v59  ;;  %v6402_v59 = vld [vmem:[#allocation10 + $0xb8] sm:$0xff] }
 0x4a3   : > { %5616 = vmatmul.f32.gmra.mxu1 %v11623_v11  ;;  %5961 = vmatmul.f32.gmra.mxu0 %v11727_v14  ;;  %v11827_v55 = vadd.f32 %v5504_v9, %v5408_v17  ;;  %v6373_v11 = vld [vmem:[#allocation10 + $0x50] sm:$0xff] }
 0x4a4   : > { %5735 = vmatmul.f32.gmra.mxu2 %v11639_v30  ;;  %6481 = vmatpush.msra.mxu0 %v6373_v11 }
 0x4a5   : > { %5845 = vmatmul.f32.gmra.mxu3 %v11615_v33  ;;  %v6042_v33 = vld [vmem:[#allocation10 + $0x3c8] sm:$0xff]  ;;  %6170 = vmatpush.msra.mxu2 %v6153_v28 }
 0x4a6   : > { %6055 = vmatpush.msra.mxu1 %v6042_v33  ;;  %6418 = vmatpush.msra.mxu3 %v6403_v19  ;;  %v6400_v28 = vld [vmem:[#allocation10 + $0xa8] sm:$0xff] }
 0x4a7   : > { %v5348_v53 = vpop.f32.mrf.mxu2 }
 0x4a8   : > { %v5410_v6 = vpop.f32.mrf.mxu3  ;;  %v5513_v22 = vpop.f32.mrf.mxu0  ;;  %6419 = vmatpush.msra.mxu3 %v6402_v59  ;;  %v6369_v59 = vld [vmem:[#allocation10 + $0x30] sm:$0xff] }
 0x4a9   : > { %v5411_v44 = vadd.f32 %v5410_v6, %v5345_v18  ;;  %v11831_v46 = vpop.f32.mrf.mxu1 }
 0x4ab   : > { %5619 = vmatmul.f32.gmra.mxu1 %v11645_v27  ;;  %5964 = vmatmul.f32.gmra.mxu0 %v11748_v48  ;;  %v11835_v30 = vadd.f32 %v5507_v57, %v5411_v44  ;;  %v6372_v27 = vld [vmem:[#allocation10 + $0x48] sm:$0xff] }
 0x4ac   : > { %5738 = vmatmul.f32.gmra.mxu2 %v11658_v23  ;;  %6482 = vmatpush.msra.mxu0 %v6372_v27 }
 0x4ad   : > { %5848 = vmatmul.f32.gmra.mxu3 %v11637_v62  ;;  %v6041_v62 = vld [vmem:[#allocation10 + $0x3c0] sm:$0xff] }
 0x4ae   : > { %6056 = vmatpush.msra.mxu1 %v6041_v62  ;;  %v6039_v62 = vld [vmem:[#allocation10 + $0x3b0] sm:$0xff] }
 0x4af   : > { %v5351_v9 = vpop.f32.mrf.mxu2 }
 0x4b0   : > { %v5413_v18 = vpop.f32.mrf.mxu3  ;;  %v5516_v17 = vpop.f32.mrf.mxu0 }
 0x4b1   : > { %v5414_v63 = vadd.f32 %v5413_v18, %v5348_v53  ;;  %v11839_v16 = vpop.f32.mrf.mxu1 }
 0x4b3   : > { %5622 = vmatmul.f32.gmra.mxu1 %v11664_v10  ;;  %5967 = vmatmul.f32.gmra.mxu0 %v11768_v56  ;;  %v11843_v23 = vadd.f32 %v5510_v42, %v5414_v63  ;;  %v6371_v10 = vld [vmem:[#allocation10 + $0x40] sm:$0xff]  ;;  %v6152_v63 = vld [vmem:[#allocation10 + $0x430] sm:$0xff] }
 0x4b4   : > { %5741 = vmatmul.f32.gmra.mxu2 %v11678_v54  ;;  %6483 = vmatpush.msra.mxu0 %v6371_v10  ;;  %v6038_v10 = vld [vmem:[#allocation10 + $0x3a8] sm:$0xff] }
 0x4b5   : > { %5851 = vmatmul.f32.gmra.mxu3 %v11656_v35  ;;  %v6040_v35 = vld [vmem:[#allocation10 + $0x3b8] sm:$0xff]  ;;  %6171 = vmatpush.msra.mxu2 %v6152_v63  ;;  %v6368_v63 = vld [vmem:[#allocation10 + $0x28] sm:$0xff] }
 0x4b6   : > { %6057 = vmatpush.msra.mxu1 %v6040_v35  ;;  %v6150_v35 = vld [vmem:[#allocation10 + $0x420] sm:$0xff] }
 0x4b7   : > { %v5354_v57 = vpop.f32.mrf.mxu2 }
 0x4b8   : > { %v5416_v60 = vpop.f32.mrf.mxu3  ;;  %v5519_v53 = vpop.f32.mrf.mxu0  ;;  %6058 = vmatpush.msra.mxu1 %v6039_v62  ;;  %v6397_v62 = vld [vmem:[#allocation10 + $0x90] sm:$0xff] }
 0x4b9   : > { %v5417_v6 = vadd.f32 %v5416_v60, %v5351_v9  ;;  %v11847_v44 = vpop.f32.mrf.mxu1 }
 0x4ba   : > { %6059 = vmatpush.msra.mxu1 %v6038_v10 }
 0x4bb   : > { %5625 = vmatmul.f32.gmra.mxu1 %v11684_v52  ;;  %5970 = vmatmul.f32.gmra.mxu0 %v11785_v50  ;;  %v11851_v54 = vadd.f32 %v5513_v22, %v5417_v6 }
 0x4bc   : > { %5744 = vmatmul.f32.gmra.mxu2 %v11701_v3 }
 0x4bd   : > { %5854 = vmatmul.f32.gmra.mxu3 %v11675_v4 }
 0x4bf   : > { %v5357_v42 = vpop.f32.mrf.mxu2 }
 0x4c0   : > { %v5419_v11 = vpop.f32.mrf.mxu3  ;;  %v5522_v33 = vpop.f32.mrf.mxu0 }
 0x4c1   : > { %v5420_v9 = vadd.f32 %v5419_v11, %v5354_v57  ;;  %v4548_v18 = vpop.f32.mrf.mxu1 }
 0x4c2   : > { %v6399_v18 = vld [vmem:[#allocation10 + $0xa0] sm:$0xff] }
 0x4c3   : > { %5628 = vmatmul.f32.gmra.mxu1 %v11707_v25  ;;  %5973 = vmatmul.f32.gmra.mxu0 %v11797_v49  ;;  %v11857_v52 = vadd.f32 %v5516_v17, %v5420_v9  ;;  %v6401_v25 = vld [vmem:[#allocation10 + $0xb0] sm:$0xff]  ;;  %v6370_v17 = vld [vmem:[#allocation10 + $0x38] sm:$0xff] }
 0x4c4   : > { %5747 = vmatmul.f32.gmra.mxu2 %v11721_v15  ;;  %6484 = vmatpush.msra.mxu0 %v6370_v17  ;;  %v6148_v17 = vld [vmem:[#allocation10 + $0x410] sm:$0xff] }
 0x4c5   : > { %5857 = vmatmul.f32.gmra.mxu3 %v11698_v2  ;;  %v6151_v2 = vld [vmem:[#allocation10 + $0x428] sm:$0xff] }
 0x4c6   : > { %6420 = vmatpush.msra.mxu3 %v6401_v25  ;;  %6172 = vmatpush.msra.mxu2 %v6151_v2  ;;  %v6366_v2 = vld [vmem:[#allocation10 + $0x18] sm:$0xff] }
 0x4c7   : > { %v5360_v4 = vpop.f32.mrf.mxu2  ;;  %6485 = vmatpush.msra.mxu0 %v6369_v59 }
 0x4c8   : > { %v5422_v3 = vpop.f32.mrf.mxu3  ;;  %v5525_v22 = vpop.f32.mrf.mxu0  ;;  %6421 = vmatpush.msra.mxu3 %v6400_v28  ;;  %6173 = vmatpush.msra.mxu2 %v6150_v35  ;;  %v6365_v35 = vld [vmem:[#allocation10 + $0x10] sm:$0xff] }
 0x4c9   : > { %v5423_v24 = vadd.f32 %v5422_v3, %v5357_v42  ;;  %v4551_v19 = vpop.f32.mrf.mxu1  ;;  %6486 = vmatpush.msra.mxu0 %v6368_v63  ;;  %v6367_v3 = vld [vmem:[#allocation10 + $0x20] sm:$0xff] }
 0x4ca   : > { %6422 = vmatpush.msra.mxu3 %v6399_v18  ;;  %v13111_v63 = vld [vmem:[#allocation37_spill] sm:$0xff] }
 0x4cb   : > { %5631 = vmatmul.f32.gmra.mxu1 %v11727_v14  ;;  %5976 = vmatmul.f32.gmra.mxu0 %v11808_v51  ;;  %v11863_v27 = vadd.f32 %v5519_v53, %v5423_v24  ;;  %v4492_v53 = vadd.f32 %v11775_v31, %v11591_v8  ;;  %v11898_v24 = vld [vmem:[%s12987_s3] ss:$0 sm:$0xff] }
 0x4cc   : > { %5750 = vmatmul.f32.gmra.mxu2 %v11742_v7  ;;  %6487 = vmatpush.msra.mxu0 %v6367_v3 }
 0x4cd   : > { %5860 = vmatmul.f32.gmra.mxu3 %v11718_v34  ;;  %v4560_v34 = vadd.f32 %v11831_v46, %v4492_v53  ;;  %v6035_v53 = vld [vmem:[#allocation10 + $0x390] sm:$0xff] }
 0x4ce   : > { %6488 = vmatpush.msra.mxu0 %v6366_v2  ;;  %v6033_v2 = vld [vmem:[#allocation10 + $0x380] sm:$0xff] }
 0x4cf   : > { %v5363_v15 = vpop.f32.mrf.mxu2 }
 0x4d0   : > { %v5425_v57 = vpop.f32.mrf.mxu3  ;;  %v11867_v60 = vpop.f32.mrf.mxu0  ;;  %6489 = vmatpush.msra.mxu0 %v6365_v35  ;;  %v6798_v35 = vld [vmem:[#allocation10 + $0x278] sm:$0xff] }
 0x4d1   : > { %v5426_v14 = vadd.f32 %v5425_v57, %v5360_v4  ;;  %v4554_v6 = vpop.f32.mrf.mxu1  ;;  %v6037_v4 = vld [vmem:[#allocation10 + $0x3a0] sm:$0xff]  ;;  %v11909_v57 = vld [vmem:[#allocation4 + $0x88] sm:$0xff] }
 0x4d2   : > { %6060 = vmatpush.msra.mxu1 %v6037_v4  ;;  %v6034_v4 = vld [vmem:[#allocation10 + $0x388] sm:$0xff] }
 0x4d3   : > { %5634 = vmatmul.f32.gmra.mxu1 %v11748_v48  ;;  %5979 = vmatmul.f32.gmra.mxu0 %v11812_v12  ;;  %v11873_v7 = vadd.f32 %v5522_v33, %v5426_v14  ;;  %v4628_v48 = vadd.f32 %v11711_v40, %v4560_v34  ;;  %v11883_v33 = vld [vmem:[#allocation4 + $0x80] sm:$0xff] }
 0x4d4   : > { %5753 = vmatmul.f32.gmra.mxu2 %v11762_v38  ;;  %v4493_v38 = vadd.f32 %v11788_v20, %v11613_v36  ;;  %v6149_v36 = vld [vmem:[#allocation10 + $0x418] sm:$0xff] }
 0x4d5   : > { %5863 = vmatmul.f32.gmra.mxu3 %v11740_v26  ;;  %v4696_v40 = vadd.f32 %v11736_v45, %v4628_v48  ;;  %v6398_v20 = vld [vmem:[#allocation10 + $0x98] sm:$0xff]  ;;  %6174 = vmatpush.msra.mxu2 %v6149_v36  ;;  %v6364_v48 = vld [vmem:[#allocation10 + $0x8] sm:$0xff] }
 0x4d6   : > { %v4561_v9 = vadd.f32 %v11839_v16, %v4493_v38  ;;  %6423 = vmatpush.msra.mxu3 %v6398_v20  ;;  %v11927_v38 = vld [vmem:[#allocation4 + $0x90] sm:$0xff]  ;;  %6490 = vmatpush.msra.mxu0 %v6364_v48  ;;  %v13112_v20 = vld [vmem:[#allocation35_spill] sm:$0xff] }
 0x4d7   : > { %v5366_v8 = vpop.f32.mrf.mxu2  ;;  %v4764_v45 = vadd.f32 %v11695_v21, %v4696_v40  ;;  %v11907_v21 = vld [vmem:[%s12988_s4] ss:$0 sm:$0xff]  ;;  %6175 = vmatpush.msra.mxu2 %v6148_v17  ;;  %v11942_v17 = vld [vmem:[#allocation4 + $0x98] sm:$0xff]  ;;  %v6684_v48 = vld [vmem:[#allocation10 + $0x1f0] sm:$0xff] }
 0x4d8   : > { %v5428_v31 = vpop.f32.mrf.mxu3  ;;  %v11879_v42 = vpop.f32.mrf.mxu0  ;;  %v4629_v16 = vadd.f32 %v11731_v41, %v4561_v9  ;;  %v4494_v41 = vadd.f32 %v11800_v0, %v11635_v58  ;;  %6424 = vmatpush.msra.mxu3 %v6397_v62  ;;  %v11945_v62 = vld [vmem:[#allocation4 + $0x81] sm:$0xff] }
 0x4d9   : > { %v5429_v11 = vadd.f32 %v5428_v31, %v5363_v15  ;;  %v4557_v46 = vpop.f32.mrf.mxu1  ;;  %v13110_v31 = vld [vmem:[#allocation30_spill] sm:$0xff] }
 0x4da   : > { %v4562_v6 = vadd.f32 %v11847_v44, %v4494_v41  ;;  %v4697_v0 = vadd.f32 %v11757_v1, %v4629_v16  ;;  %v6147_v1 = vld [vmem:[#allocation10 + $0x408] sm:$0xff] }
 0x4db   : > { %5637 = vmatmul.f32.gmra.mxu1 %v11768_v56  ;;  %5982 = vmatmul.f32.gmra.mxu0 %v11883_v33  ;;  %v11887_v26 = vadd.f32 %v5525_v22, %v5429_v11  ;;  %v6036_v56 = vld [vmem:[#allocation10 + $0x398] sm:$0xff] }
 0x4dc   : > { %5756 = vmatmul.f32.gmra.mxu2 %v11780_v47  ;;  %6061 = vmatpush.msra.mxu1 %v6036_v56  ;;  %v4630_v28 = vadd.f32 %v11752_v13, %v4562_v6  ;;  %v4765_v44 = vadd.f32 %v11716_v32, %v4697_v0  ;;  %v6146_v13 = vld [vmem:[#allocation10 + $0x400] sm:$0xff]  ;;  %v13113_v56 = vld [vmem:[#allocation27_spill] sm:$0xff]  ;;  %v13115_v6 = vld [vmem:[#allocation38_spill] sm:$0xff] }
 0x4dd   : > { %5866 = vmatmul.f32.gmra.mxu3 %v11759_v61  ;;  %6176 = vmatpush.msra.mxu2 %v6147_v1  ;;  %v6363_v32 = vld [vmem:[#allocation10] sm:$0xff] }
 0x4de   : > { %6062 = vmatpush.msra.mxu1 %v6035_v53  ;;  %v4698_v18 = vadd.f32 %v11773_v29, %v4630_v28  ;;  %6491 = vmatpush.msra.mxu0 %v6363_v32  ;;  %v6395_v29 = vld [vmem:[#allocation10 + $0x80] sm:$0xff]  ;;  %v6797_v32 = vld [vmem:[#allocation10 + $0x270] sm:$0xff] }
 0x4df   : > { %v5369_v22 = vpop.f32.mrf.mxu2  ;;  %6177 = vmatpush.msra.mxu2 %v6146_v13  ;;  %v11978_v13 = vld [vmem:[#allocation4 + $0x8a] sm:$0xff] }
 0x4e0   : > { %v5431_v47 = vpop.f32.mrf.mxu3  ;;  %v11900_v61 = vpop.f32.mrf.mxu0  ;;  %6063 = vmatpush.msra.mxu1 %v6034_v4 }
 0x4e1   : > { %v5432_v19 = vadd.f32 %v5431_v47, %v5366_v8  ;;  %v4811_v25 = vpop.f32.mrf.mxu1  ;;  %6686 = vmatpush.msrb.mxu2 %v13112_v20 }
 0x4e2   : > { %v4832_v15 = vadd.f32 %v4811_v25, %v4764_v45  ;;  %v13114_v45 = vld [vmem:[#allocation26_spill] sm:$0xff]  ;;  %6064 = vmatpush.msra.mxu1 %v6033_v2 }
 0x4e3   : > { %5640 = vmatmul.f32.gmra.mxu1 %v11785_v50  ;;  %5985 = vmatmul.f32.gmra.mxu0 %v11909_v57  ;;  %v11914_v14 = vadd.f32 %v11867_v60, %v5432_v19 }
 0x4e4   : > { %v4843_v58 = vmul.f32 %v11898_v24, %v4832_v15  ;;  %5759 = vmatmul.f32.gmra.mxu2 %v11793_v43 }
 0x4e5   : > { %5869 = vmatmul.f32.gmra.mxu3 %v11777_v37  ;;  %v6396_v37 = vld [vmem:[#allocation10 + $0x88] sm:$0xff]  ;;  %6687 = vmatpush.msrb.mxu2 %v6684_v48 }
 0x4e6   : > { %v4854_v34 = vadd.f32 %v11907_v21, %v4843_v58  ;;  %6425 = vmatpush.msra.mxu3 %v6396_v37 }
 0x4e7   : > { %v5372_v50 = vpop.f32.mrf.mxu2 }
 0x4e8   : > { %v4861_v60 = vmax.f32 %v4854_v34, 0.0  ;;  %v5434_v59 = vpop.f32.mrf.mxu3  ;;  %v11924_v10 = vpop.f32.mrf.mxu0  ;;  %6426 = vmatpush.msra.mxu3 %v6395_v29 }
 0x4e9   : > { %v5435_v43 = vadd.f32 %v5434_v59, %v5369_v22  ;;  %v4814_v8 = vpop.f32.mrf.mxu1  ;;  %v4766_v22 = vadd.f32 %v13113_v56, %v4698_v18  ;;  %v6571_v18 = vld [vmem:[#allocation10 + $0x170] sm:$0xff]  ;;  %v11985_v56 = vld [vmem:[#allocation4 + $0x92] sm:$0xff] }
 0x4ea   : > { %v4910_v11 = vmul.f32 %v13110_v31, %v4861_v60  ;;  %v4833_v46 = vadd.f32 %v4814_v8, %v4765_v44  ;;  %v13116_v60 = vld [vmem:[#allocation34_spill] sm:$0xff]  ;;  %6799 = vmatpush.msrb.mxu3 %v6798_v35 }
 0x4eb   : > { %5643 = vmatmul.f32.gmra.mxu1 %v11797_v49  ;;  %5988 = vmatmul.f32.gmra.mxu0 %v11927_v38  ;;  %v11932_v9 = vadd.f32 %v11879_v42, %v5435_v43  ;;  %v6572_v43 = vld [vmem:[#allocation10 + $0x178] sm:$0xff] }
 0x4ec   : > { %4917 = vst [vmem:[#allocation4 + $0x180] sm:$0xff] %v4910_v11  ;;  %v4844_v40 = vmul.f32 %v11898_v24, %v4833_v46  ;;  %5762 = vmatmul.f32.gmra.mxu2 %v11804_v39  ;;  %6573 = vmatpush.msrb.mxu1 %v6572_v43  ;;  %v11972_v11 = vld [vmem:[#allocation4 + $0x91] sm:$0xff]  ;;  %v8841_v43 = vld [vmem:[#allocation4 + $0x42] sm:$0xff] }
 0x4ed   : > { %5872 = vmatmul.f32.gmra.mxu3 %v13111_v63 }
 0x4ee   : > { %v4855_v49 = vadd.f32 %v11907_v21, %v4844_v40  ;;  %v6911_v40 = vld [vmem:[#allocation10 + $0x2f8] sm:$0xff]  ;;  %6800 = vmatpush.msrb.mxu3 %v6797_v32  ;;  %6574 = vmatpush.msrb.mxu1 %v6571_v18 }
 0x4ef   : > { %v5375_v36 = vpop.f32.mrf.mxu2  ;;  %6912 = vmatpush.msrb.mxu0 %v6911_v40 }
 0x4f0   : > { %v4862_v42 = vmax.f32 %v4855_v49, 0.0  ;;  %v5437_v3 = vpop.f32.mrf.mxu3  ;;  %v5540_v16 = vpop.f32.mrf.mxu0 }
 0x4f1   : > { %v5438_v39 = vadd.f32 %v5437_v3, %v5372_v50  ;;  %v4817_v47 = vpop.f32.mrf.mxu1 }
 0x4f2   : > { %v4911_v19 = vmul.f32 %v13114_v45, %v4862_v42  ;;  %v4834_v25 = vadd.f32 %v4817_v47, %v4766_v22  ;;  %v8838_v22 = vld [vmem:[#allocation4 + $0x32] sm:$0xff]  ;;  %v6570_v47 = vld [vmem:[#allocation10 + $0x168] sm:$0xff] }
 0x4f3   : > { %5646 = vmatmul.f32.gmra.mxu1 %v11808_v51  ;;  %5991 = vmatmul.f32.gmra.mxu0 %v11942_v17  ;;  %v11949_v41 = vadd.f32 %v11900_v61, %v5438_v39  ;;  %v11956_v61 = vld [vmem:[#allocation4 + $0xa0] sm:$0xff]  ;;  %v6910_v39 = vld [vmem:[#allocation10 + $0x2f0] sm:$0xff] }
 0x4f4   : > { %4918 = vst [vmem:[#allocation4 + $0x188] sm:$0xff] %v4911_v19  ;;  %v4845_v15 = vmul.f32 %v11898_v24, %v4834_v25  ;;  %5765 = vmatmul.f32.gmra.mxu2 %v11945_v62  ;;  %v11959_v24 = vld [vmem:[#allocation4 + $0x89] sm:$0xff]  ;;  %6913 = vmatpush.msrb.mxu0 %v6910_v39  ;;  %v6682_v25 = vld [vmem:[#allocation10 + $0x1e0] sm:$0xff] }
 0x4f5   : > { %5875 = vmatmul.f32.gmra.mxu3 %v13115_v6  ;;  %6575 = vmatpush.msrb.mxu1 %v6570_v47  ;;  %v8839_v6 = vld [vmem:[#allocation4 + $0x3a] sm:$0xff] }
 0x4f6   : > { %v4856_v58 = vadd.f32 %v11907_v21, %v4845_v15  ;;  %v11966_v21 = vld [vmem:[#allocation4 + $0x82] sm:$0xff] }
 0x4f7   : > { %v5378_v0 = vpop.f32.mrf.mxu2 }
 0x4f8   : > { %v4863_v51 = vmax.f32 %v4856_v58, 0.0  ;;  %v5440_v53 = vpop.f32.mrf.mxu3  ;;  %v5543_v34 = vpop.f32.mrf.mxu0  ;;  %v6795_v58 = vld [vmem:[#allocation10 + $0x260] sm:$0xff] }
 0x4f9   : > { %v5441_v50 = vadd.f32 %v5440_v53, %v5375_v36  ;;  %v4820_v28 = vpop.f32.mrf.mxu1  ;;  %v6683_v36 = vld [vmem:[#allocation10 + $0x1e8] sm:$0xff] }
 0x4fa   : > { %v4912_v59 = vmul.f32 %v13116_v60, %v4863_v51  ;;  %6688 = vmatpush.msrb.mxu2 %v6683_v36  ;;  %v6569_v51 = vld [vmem:[#allocation10 + $0x160] sm:$0xff]  ;;  %v6681_v28 = vld [vmem:[#allocation10 + $0x1d8] sm:$0xff] }
 0x4fb   : > { %5649 = vmatmul.f32.gmra.mxu1 %v11812_v12  ;;  %5994 = vmatmul.f32.gmra.mxu0 %v11956_v61  ;;  %v11963_v44 = vadd.f32 %v11924_v10, %v5441_v50  ;;  %v11969_v10 = vld [vmem:[#allocation4 + $0xa8] sm:$0xff] }
 0x4fc   : > { %4919 = vst [vmem:[#allocation4 + $0x190] sm:$0xff] %v4912_v59  ;;  %5768 = vmatmul.f32.gmra.mxu2 %v11959_v24  ;;  %6576 = vmatpush.msrb.mxu1 %v6569_v51  ;;  %v8840_v59 = vld [vmem:[#allocation4 + $0x31] sm:$0xff]  ;;  %v6906_v51 = vld [vmem:[#allocation10 + $0x2d0] sm:$0xff] }
 0x4fd   : > { %5878 = vmatmul.f32.gmra.mxu3 %v11966_v21  ;;  %6689 = vmatpush.msrb.mxu2 %v6682_v25  ;;  %v8843_v36 = vld [vmem:[#allocation4 + $0x4a] sm:$0xff] }
 0x4ff   : > { %v5381_v8 = vpop.f32.mrf.mxu2  ;;  %6690 = vmatpush.msrb.mxu2 %v6681_v28 }
 0x500   : > { %v5443_v12 = vpop.f32.mrf.mxu3  ;;  %v5546_v1 = vpop.f32.mrf.mxu0 }
 0x501   : > { %v5444_v37 = vadd.f32 %v5443_v12, %v5378_v0  ;;  %v4823_v31 = vpop.f32.mrf.mxu1  ;;  %v6909_v0 = vld [vmem:[#allocation10 + $0x2e8] sm:$0xff]  ;;  %v6908_v12 = vld [vmem:[#allocation10 + $0x2e0] sm:$0xff] }
 0x502   : > { %6914 = vmatpush.msrb.mxu0 %v6909_v0  ;;  %v6792_v0 = vld [vmem:[#allocation10 + $0x248] sm:$0xff] }
 0x503   : > { %5652 = vmatmul.f32.gmra.mxu1 %v11883_v33  ;;  %5997 = vmatmul.f32.gmra.mxu0 %v11969_v10  ;;  %v11975_v46 = vadd.f32 %v5540_v16, %v5444_v37  ;;  %v6796_v16 = vld [vmem:[#allocation10 + $0x268] sm:$0xff] }
 0x504   : > { %5771 = vmatmul.f32.gmra.mxu2 %v11972_v11  ;;  %6801 = vmatpush.msrb.mxu3 %v6796_v16 }
 0x505   : > { %5881 = vmatmul.f32.gmra.mxu3 %v11978_v13  ;;  %6915 = vmatpush.msrb.mxu0 %v6908_v12  ;;  %v8847_v12 = vld [vmem:[#allocation4 + $0x5a] sm:$0xff] }
 0x506   : > { %6802 = vmatpush.msrb.mxu3 %v6795_v58  ;;  %v12014_v58 = vld [vmem:[#allocation4 + $0x99] sm:$0xff] }
 0x507   : > { %v5384_v63 = vpop.f32.mrf.mxu2 }
 0x508   : > { %v5446_v4 = vpop.f32.mrf.mxu3  ;;  %v5953_v49 = vpop.f32.mrf.mxu0 }
 0x509   : > { %v5447_v20 = vadd.f32 %v5446_v4, %v5381_v8  ;;  %v4826_v42 = vpop.f32.mrf.mxu1  ;;  %v6794_v8 = vld [vmem:[#allocation10 + $0x258] sm:$0xff] }
 0x50a   : > { %6803 = vmatpush.msrb.mxu3 %v6794_v8  ;;  %v6907_v42 = vld [vmem:[#allocation10 + $0x2d8] sm:$0xff] }
 0x50b   : > { %5655 = vmatmul.f32.gmra.mxu1 %v11909_v57  ;;  %6492 = vmatmul.f32.vlgmr.msra.gmra.mxu0 %v11883_v33  ;;  %v11983_v3 = vadd.f32 %v5543_v34, %v5447_v20  ;;  %v6793_v20 = vld [vmem:[#allocation10 + $0x250] sm:$0xff] }
 0x50c   : > { %6178 = vmatmul.f32.vlgmr.msra.gmra.mxu2 %v8838_v22  ;;  %6916 = vmatpush.msrb.mxu0 %v6907_v42  ;;  %v6567_v22 = vld [vmem:[#allocation10 + $0x150] sm:$0xff]  ;;  %v8848_v42 = vld [vmem:[#allocation4 + $0x51] sm:$0xff] }
 0x50d   : > { %5884 = vmatmul.f32.gmra.mxu3 %v11985_v56 }
 0x50e   : > { %6804 = vmatpush.msrb.mxu3 %v6793_v20  ;;  %6917 = vmatpush.msrb.mxu0 %v6906_v51  ;;  %v12033_v20 = vld [vmem:[#allocation4 + $0xb0] sm:$0xff] }
 0x50f   : > { %v5727_v29 = vpop.f32.mrf.mxu2 }
 0x510   : > { %v5449_v45 = vpop.f32.mrf.mxu3  ;;  %v11988_v19 = vpop.f32.mrf.mxu0  ;;  %6805 = vmatpush.msrb.mxu3 %v6792_v0 }
 0x511   : > { %v5450_v33 = vadd.f32 %v5449_v45, %v5384_v63  ;;  %v4829_v2 = vpop.f32.mrf.mxu1  ;;  %v8842_v63 = vld [vmem:[#allocation4 + $0x39] sm:$0xff] }
 0x513   : > { %5658 = vmatmul.f32.gmra.mxu1 %v11927_v38  ;;  %6495 = vmatmul.f32.gmra.mxu0 %v11909_v57  ;;  %v11992_v15 = vadd.f32 %v5546_v1, %v5450_v33  ;;  %v6568_v1 = vld [vmem:[#allocation10 + $0x158] sm:$0xff]  ;;  %v8844_v33 = vld [vmem:[#allocation4 + $0x41] sm:$0xff] }
 0x514   : > { %6181 = vmatmul.f32.gmra.mxu2 %v8839_v6  ;;  %6577 = vmatpush.msrb.mxu1 %v6568_v1  ;;  %v8845_v6 = vld [vmem:[#allocation4 + $0x52] sm:$0xff]  ;;  %v12024_v1 = vld [vmem:[#allocation4 + $0xa1] sm:$0xff] }
 0x515   : > { %6427 = vmatmul.f32.vlgmr.msra.gmra.mxu3 %v11945_v62 }
 0x516   : > { %6578 = vmatpush.msrb.mxu1 %v6567_v22 }
 0x517   : > { %v5730_v53 = vpop.f32.mrf.mxu2 }
 0x518   : > { %v5840_v34 = vpop.f32.mrf.mxu3  ;;  %v11995_v50 = vpop.f32.mrf.mxu0 }
 0x519   : > { %v5614_v60 = vpop.f32.mrf.mxu1 }
 0x51a   : > { %v5662_v57 = vadd.f32 %v5614_v60, %v11821_v5  ;;  %v6680_v5 = vld [vmem:[#allocation10 + $0x1d0] sm:$0xff]  ;;  %v6678_v60 = vld [vmem:[#allocation10 + $0x1c0] sm:$0xff] }
 0x51b   : > { %6065 = vmatmul.f32.vlgmr.msra.gmra.mxu1 %v8840_v59  ;;  %6498 = vmatmul.f32.gmra.mxu0 %v11927_v38 }
 0x51c   : > { %v5775_v35 = vadd.f32 %v5727_v29, %v5662_v57  ;;  %6184 = vmatmul.f32.gmra.mxu2 %v8841_v43  ;;  %v8846_v43 = vld [vmem:[#allocation4 + $0x49] sm:$0xff] }
 0x51d   : > { %6430 = vmatmul.f32.gmra.mxu3 %v11959_v24  ;;  %6691 = vmatpush.msrb.mxu2 %v6680_v5 }
 0x51e   : > { %v5888_v48 = vadd.f32 %v5840_v34, %v5775_v35 }
 0x51f   : > { %v5733_v37 = vpop.f32.mrf.mxu2 }
 0x520   : > { %v5843_v31 = vpop.f32.mrf.mxu3  ;;  %v12000_v32 = vpop.f32.mrf.mxu0  ;;  %v12002_v40 = vadd.f32 %v5953_v49, %v5888_v48  ;;  %v6791_v48 = vld [vmem:[#allocation10 + $0x240] sm:$0xff] }
 0x521   : > { %v5617_v38 = vpop.f32.mrf.mxu1  ;;  %6806 = vmatpush.msrb.mxu3 %v6791_v48  ;;  %v6675_v48 = vld [vmem:[#allocation10 + $0x1a8] sm:$0xff] }
 0x522   : > { %v5663_v18 = vadd.f32 %v5617_v38, %v11827_v55  ;;  %v6679_v55 = vld [vmem:[#allocation10 + $0x1c8] sm:$0xff] }
 0x523   : > { %6068 = vmatmul.f32.gmra.mxu1 %v8842_v63  ;;  %6501 = vmatmul.f32.gmra.mxu0 %v11942_v17 }
 0x524   : > { %v5776_v4 = vadd.f32 %v5730_v53, %v5663_v18  ;;  %6187 = vmatmul.f32.gmra.mxu2 %v8843_v36  ;;  %v6677_v18 = vld [vmem:[#allocation10 + $0x1b8] sm:$0xff] }
 0x525   : > { %6433 = vmatmul.f32.gmra.mxu3 %v11972_v11  ;;  %6692 = vmatpush.msrb.mxu2 %v6679_v55  ;;  %v6904_v55 = vld [vmem:[#allocation10 + $0x2c0] sm:$0xff] }
 0x526   : > { %v5889_v49 = vadd.f32 %v5843_v31, %v5776_v4 }
 0x527   : > { %v5736_v16 = vpop.f32.mrf.mxu2  ;;  %6693 = vmatpush.msrb.mxu2 %v6678_v60  ;;  %v12048_v60 = vld [vmem:[#allocation4 + $0xb1] sm:$0xff] }
 0x528   : > { %v5846_v39 = vpop.f32.mrf.mxu3  ;;  %v12007_v47 = vpop.f32.mrf.mxu0  ;;  %v12010_v29 = vadd.f32 %v11988_v19, %v5889_v49  ;;  %v6566_v19 = vld [vmem:[#allocation10 + $0x148] sm:$0xff] }
 0x529   : > { %v5620_v45 = vpop.f32.mrf.mxu1  ;;  %6579 = vmatpush.msrb.mxu1 %v6566_v19  ;;  %6694 = vmatpush.msrb.mxu2 %v6677_v18  ;;  %v8849_v49 = vld [vmem:[#allocation4 + $0x62] sm:$0xff]  ;;  %v12045_v19 = vld [vmem:[#allocation4 + $0xb8] sm:$0xff] }
 0x52a   : > { %v5664_v25 = vadd.f32 %v5620_v45, %v11835_v30 }
 0x52b   : > { %6071 = vmatmul.f32.gmra.mxu1 %v8844_v33  ;;  %6504 = vmatmul.f32.gmra.mxu0 %v11956_v61 }
 0x52c   : > { %v5777_v2 = vadd.f32 %v5733_v37, %v5664_v25  ;;  %6190 = vmatmul.f32.gmra.mxu2 %v8845_v6  ;;  %v6905_v37 = vld [vmem:[#allocation10 + $0x2c8] sm:$0xff] }
 0x52d   : > { %6436 = vmatmul.f32.gmra.mxu3 %v12014_v58  ;;  %6918 = vmatpush.msrb.mxu0 %v6905_v37 }
 0x52e   : > { %v5890_v53 = vadd.f32 %v5846_v39, %v5777_v2  ;;  %v6790_v39 = vld [vmem:[#allocation10 + $0x238] sm:$0xff]  ;;  %v6676_v2 = vld [vmem:[#allocation10 + $0x1b0] sm:$0xff] }
 0x52f   : > { %v5739_v34 = vpop.f32.mrf.mxu2  ;;  %6919 = vmatpush.msrb.mxu0 %v6904_v55  ;;  %6807 = vmatpush.msrb.mxu3 %v6790_v39 }
 0x530   : > { %v5849_v30 = vpop.f32.mrf.mxu3  ;;  %v12017_v28 = vpop.f32.mrf.mxu0  ;;  %v12020_v57 = vadd.f32 %v11995_v50, %v5890_v53  ;;  %v6565_v50 = vld [vmem:[#allocation10 + $0x140] sm:$0xff]  ;;  %6695 = vmatpush.msrb.mxu2 %v6676_v2  ;;  %v12069_v2 = vld [vmem:[#allocation4 + $0xc8] sm:$0xff] }
 0x531   : > { %v5623_v59 = vpop.f32.mrf.mxu1  ;;  %6580 = vmatpush.msrb.mxu1 %v6565_v50  ;;  %v8850_v53 = vld [vmem:[#allocation4 + $0x59] sm:$0xff] }
 0x532   : > { %v5665_v35 = vadd.f32 %v5623_v59, %v11843_v23  ;;  %v6789_v59 = vld [vmem:[#allocation10 + $0x230] sm:$0xff]  ;;  %6696 = vmatpush.msrb.mxu2 %v6675_v48 }
 0x533   : > { %6074 = vmatmul.f32.gmra.mxu1 %v8846_v43  ;;  %6507 = vmatmul.f32.gmra.mxu0 %v11969_v10 }
 0x534   : > { %v5778_v8 = vadd.f32 %v5736_v16, %v5665_v35  ;;  %6193 = vmatmul.f32.gmra.mxu2 %v8847_v12  ;;  %v12036_v16 = vld [vmem:[#allocation4 + $0xa9] sm:$0xff]  ;;  %6808 = vmatpush.msrb.mxu3 %v6789_v59  ;;  %v6901_v59 = vld [vmem:[#allocation10 + $0x2a8] sm:$0xff] }
 0x535   : > { %6439 = vmatmul.f32.gmra.mxu3 %v12024_v1  ;;  %v6903_v35 = vld [vmem:[#allocation10 + $0x2b8] sm:$0xff] }
 0x536   : > { %v5891_v31 = vadd.f32 %v5849_v30, %v5778_v8  ;;  %v8851_v30 = vld [vmem:[#allocation4 + $0x6a] sm:$0xff]  ;;  %6920 = vmatpush.msrb.mxu0 %v6903_v35 }
 0x537   : > { %v5742_v5 = vpop.f32.mrf.mxu2 }
 0x538   : > { %v5852_v23 = vpop.f32.mrf.mxu3  ;;  %v12027_v38 = vpop.f32.mrf.mxu0  ;;  %v12030_v63 = vadd.f32 %v12000_v32, %v5891_v31  ;;  %v6564_v32 = vld [vmem:[#allocation10 + $0x138] sm:$0xff] }
 0x539   : > { %v5626_v4 = vpop.f32.mrf.mxu1  ;;  %6581 = vmatpush.msrb.mxu1 %v6564_v32  ;;  %v6674_v32 = vld [vmem:[#allocation10 + $0x1a0] sm:$0xff] }
 0x53a   : > { %v5666_v36 = vadd.f32 %v5626_v4, %v11851_v54  ;;  %v8853_v4 = vld [vmem:[#allocation4 + $0x72] sm:$0xff]  ;;  %6697 = vmatpush.msrb.mxu2 %v6674_v32  ;;  %v6672_v32 = vld [vmem:[#allocation10 + $0x190] sm:$0xff] }
 0x53b   : > { %6077 = vmatmul.f32.gmra.mxu1 %v8848_v42  ;;  %6510 = vmatmul.f32.gmra.mxu0 %v12033_v20  ;;  %v6788_v42 = vld [vmem:[#allocation10 + $0x228] sm:$0xff] }
 0x53c   : > { %v5779_v22 = vadd.f32 %v5739_v34, %v5666_v36  ;;  %6196 = vmatmul.f32.gmra.mxu2 %v8849_v49  ;;  %v12060_v36 = vld [vmem:[#allocation4 + $0xb9] sm:$0xff]  ;;  %6809 = vmatpush.msrb.mxu3 %v6788_v42  ;;  %v6786_v42 = vld [vmem:[#allocation10 + $0x218] sm:$0xff] }
 0x53d   : > { %6442 = vmatmul.f32.gmra.mxu3 %v12036_v16 }
 0x53e   : > { %v5892_v54 = vadd.f32 %v5852_v23, %v5779_v22  ;;  %v8852_v23 = vld [vmem:[#allocation4 + $0x61] sm:$0xff] }
 0x53f   : > { %v5745_v45 = vpop.f32.mrf.mxu2  ;;  %v6902_v22 = vld [vmem:[#allocation10 + $0x2b0] sm:$0xff] }
 0x540   : > { %v5855_v25 = vpop.f32.mrf.mxu3  ;;  %v12039_v33 = vpop.f32.mrf.mxu0  ;;  %v12042_v6 = vadd.f32 %v12007_v47, %v5892_v54  ;;  %v6563_v47 = vld [vmem:[#allocation10 + $0x130] sm:$0xff]  ;;  %6921 = vmatpush.msrb.mxu0 %v6902_v22  ;;  %v6900_v22 = vld [vmem:[#allocation10 + $0x2a0] sm:$0xff] }
 0x541   : > { %v5629_v0 = vpop.f32.mrf.mxu1  ;;  %6582 = vmatpush.msrb.mxu1 %v6563_v47 }
 0x542   : > { %v5667_v51 = vadd.f32 %v5629_v0, %v11857_v52  ;;  %v8854_v0 = vld [vmem:[#allocation4 + $0x69] sm:$0xff]  ;;  %6922 = vmatpush.msrb.mxu0 %v6901_v59 }
 0x543   : > { %6080 = vmatmul.f32.gmra.mxu1 %v8850_v53  ;;  %6513 = vmatmul.f32.gmra.mxu0 %v12045_v19  ;;  %v8855_v53 = vld [vmem:[#allocation4 + $0x7a] sm:$0xff]  ;;  %v6785_v59 = vld [vmem:[#allocation10 + $0x210] sm:$0xff] }
 0x544   : > { %v5780_v34 = vadd.f32 %v5742_v5, %v5667_v51  ;;  %6199 = vmatmul.f32.gmra.mxu2 %v8851_v30  ;;  %v12057_v5 = vld [vmem:[#allocation4 + $0xc0] sm:$0xff]  ;;  %v6787_v30 = vld [vmem:[#allocation10 + $0x220] sm:$0xff]  ;;  %6923 = vmatpush.msrb.mxu0 %v6900_v22 }
 0x545   : > { %6445 = vmatmul.f32.gmra.mxu3 %v12048_v60  ;;  %v6897_v22 = vld [vmem:[#allocation10 + $0x288] sm:$0xff] }
 0x546   : > { %v5893_v52 = vadd.f32 %v5855_v25, %v5780_v34  ;;  %v12072_v34 = vld [vmem:[#allocation4 + $0xc1] sm:$0xff]  ;;  %6810 = vmatpush.msrb.mxu3 %v6787_v30  ;;  %v12098_v30 = vld [vmem:[#allocation4 + $0xd1] sm:$0xff] }
 0x547   : > { %v5748_v43 = vpop.f32.mrf.mxu2 }
 0x548   : > { %v5858_v8 = vpop.f32.mrf.mxu3  ;;  %v12051_v12 = vpop.f32.mrf.mxu0  ;;  %v12054_v37 = vadd.f32 %v12017_v28, %v5893_v52  ;;  %v6562_v28 = vld [vmem:[#allocation10 + $0x128] sm:$0xff]  ;;  %6811 = vmatpush.msrb.mxu3 %v6786_v42 }
 0x549   : > { %v5632_v50 = vpop.f32.mrf.mxu1  ;;  %6583 = vmatpush.msrb.mxu1 %v6562_v28  ;;  %v12107_v42 = vld [vmem:[#allocation4 + $0xe0] sm:$0xff] }
 0x54a   : > { %v5668_v31 = vadd.f32 %v5632_v50, %v11863_v27  ;;  %6812 = vmatpush.msrb.mxu3 %v6785_v59 }
 0x54b   : > { %6083 = vmatmul.f32.gmra.mxu1 %v8852_v23  ;;  %6516 = vmatmul.f32.gmra.mxu0 %v12057_v5  ;;  %v8856_v23 = vld [vmem:[#allocation4 + $0x71] sm:$0xff] }
 0x54c   : > { %v5781_v18 = vadd.f32 %v5745_v45, %v5668_v31  ;;  %6202 = vmatmul.f32.gmra.mxu2 %v8853_v4  ;;  %v12081_v31 = vld [vmem:[#allocation4 + $0xd0] sm:$0xff] }
 0x54d   : > { %6448 = vmatmul.f32.gmra.mxu3 %v12060_v36  ;;  %v12085_v4 = vld [vmem:[#allocation4 + $0xc9] sm:$0xff] }
 0x54e   : > { %v5894_v27 = vadd.f32 %v5858_v8, %v5781_v18  ;;  %v6673_v8 = vld [vmem:[#allocation10 + $0x198] sm:$0xff] }
 0x54f   : > { %v5751_v49 = vpop.f32.mrf.mxu2  ;;  %6698 = vmatpush.msrb.mxu2 %v6673_v8 }
 0x550   : > { %v5861_v39 = vpop.f32.mrf.mxu3  ;;  %v12063_v55 = vpop.f32.mrf.mxu0  ;;  %v12066_v54 = vadd.f32 %v12027_v38, %v5894_v27  ;;  %v6561_v38 = vld [vmem:[#allocation10 + $0x120] sm:$0xff] }
 0x551   : > { %v5635_v45 = vpop.f32.mrf.mxu1  ;;  %6584 = vmatpush.msrb.mxu1 %v6561_v38  ;;  %6699 = vmatpush.msrb.mxu2 %v6672_v32  ;;  %v6899_v38 = vld [vmem:[#allocation10 + $0x298] sm:$0xff]  ;;  %v6896_v32 = vld [vmem:[#allocation10 + $0x280] sm:$0xff] }
 0x552   : > { %v5669_v25 = vadd.f32 %v5635_v45, %v11873_v7  ;;  %6924 = vmatpush.msrb.mxu0 %v6899_v38  ;;  %v12119_v38 = vld [vmem:[#allocation4 + $0xe8] sm:$0xff] }
 0x553   : > { %6086 = vmatmul.f32.gmra.mxu1 %v8854_v0  ;;  %6519 = vmatmul.f32.gmra.mxu0 %v12069_v2  ;;  %v12094_v0 = vld [vmem:[#allocation4 + $0xd8] sm:$0xff] }
 0x554   : > { %v5782_v51 = vadd.f32 %v5748_v43, %v5669_v25  ;;  %6205 = vmatmul.f32.gmra.mxu2 %v8855_v53 }
 0x555   : > { %6451 = vmatmul.f32.gmra.mxu3 %v12072_v34 }
 0x556   : > { %v5895_v7 = vadd.f32 %v5861_v39, %v5782_v51  ;;  %v8857_v51 = vld [vmem:[#allocation4 + $0x79] sm:$0xff] }
 0x557   : > { %v5754_v35 = vpop.f32.mrf.mxu2 }
 0x558   : > { %v5864_v47 = vpop.f32.mrf.mxu3  ;;  %v12075_v52 = vpop.f32.mrf.mxu0  ;;  %v12078_v43 = vadd.f32 %v12039_v33, %v5895_v7  ;;  %v6560_v33 = vld [vmem:[#allocation10 + $0x118] sm:$0xff] }
 0x559   : > { %v5638_v48 = vpop.f32.mrf.mxu1  ;;  %6585 = vmatpush.msrb.mxu1 %v6560_v33  ;;  %v12110_v33 = vld [vmem:[#allocation4 + $0xd9] sm:$0xff] }
 0x55a   : > { %v5670_v50 = vadd.f32 %v5638_v48, %v11887_v26  ;;  %v6898_v48 = vld [vmem:[#allocation10 + $0x290] sm:$0xff] }
 0x55b   : > { %6089 = vmatmul.f32.gmra.mxu1 %v8856_v23  ;;  %6522 = vmatmul.f32.gmra.mxu0 %v12081_v31 }
 0x55c   : > { %v5783_v18 = vadd.f32 %v5751_v49, %v5670_v50  ;;  %6208 = vmatmul.f32.gmra.mxu2 %v11966_v21  ;;  %v6671_v50 = vld [vmem:[#allocation10 + $0x188] sm:$0xff]  ;;  %6925 = vmatpush.msrb.mxu0 %v6898_v48  ;;  %v6783_v48 = vld [vmem:[#allocation10 + $0x200] sm:$0xff] }
 0x55d   : > { %6454 = vmatmul.f32.gmra.mxu3 %v12085_v4  ;;  %6700 = vmatpush.msrb.mxu2 %v6671_v50  ;;  %v6557_v50 = vld [vmem:[#allocation10 + $0x100] sm:$0xff] }
 0x55e   : > { %v5896_v26 = vadd.f32 %v5864_v47, %v5783_v18  ;;  %6926 = vmatpush.msrb.mxu0 %v6897_v22 }
 0x55f   : > { %v5757_v28 = vpop.f32.mrf.mxu2 }
 0x560   : > { %v5867_v27 = vpop.f32.mrf.mxu3  ;;  %v12088_v39 = vpop.f32.mrf.mxu0  ;;  %v12091_v49 = vadd.f32 %v12051_v12, %v5896_v26  ;;  %v6559_v12 = vld [vmem:[#allocation10 + $0x110] sm:$0xff]  ;;  %6927 = vmatpush.msrb.mxu0 %v6896_v32 }
 0x561   : > { %v5641_v45 = vpop.f32.mrf.mxu1  ;;  %6586 = vmatpush.msrb.mxu1 %v6559_v12  ;;  %v12122_v12 = vld [vmem:[#allocation4 + $0x9a] sm:$0xff] }
 0x562   : > { %v5671_v25 = vadd.f32 %v5641_v45, %v11914_v14 }
 0x563   : > { %6092 = vmatmul.f32.gmra.mxu1 %v8857_v51  ;;  %6525 = vmatmul.f32.gmra.mxu0 %v12094_v0 }
 0x564   : > { %v5784_v53 = vadd.f32 %v5754_v35, %v5671_v25  ;;  %6211 = vmatmul.f32.gmra.mxu2 %v11978_v13 }
 0x565   : > { %6457 = vmatmul.f32.gmra.mxu3 %v12098_v30 }
 0x566   : > { %v5897_v14 = vadd.f32 %v5867_v27, %v5784_v53  ;;  %v6670_v27 = vld [vmem:[#allocation10 + $0x180] sm:$0xff] }
 0x567   : > { %v5760_v7 = vpop.f32.mrf.mxu2  ;;  %6701 = vmatpush.msrb.mxu2 %v6670_v27  ;;  %v12136_v27 = vld [vmem:[#allocation4 + $0xa2] sm:$0xff] }
 0x568   : > { %v5870_v47 = vpop.f32.mrf.mxu3  ;;  %v12101_v8 = vpop.f32.mrf.mxu0  ;;  %v12104_v35 = vadd.f32 %v12063_v55, %v5897_v14  ;;  %v6784_v55 = vld [vmem:[#allocation10 + $0x208] sm:$0xff] }
 0x569   : > { %v5644_v23 = vpop.f32.mrf.mxu1  ;;  %6813 = vmatpush.msrb.mxu3 %v6784_v55  ;;  %v12133_v55 = vld [vmem:[#allocation4 + $0xf0] sm:$0xff] }
 0x56a   : > { %v5672_v18 = vadd.f32 %v5644_v23, %v11932_v9  ;;  %v6558_v9 = vld [vmem:[#allocation10 + $0x108] sm:$0xff] }
 0x56b   : > { %6095 = vmatmul.f32.gmra.mxu1 %v11945_v62  ;;  %6528 = vmatmul.f32.gmra.mxu0 %v12107_v42 }
 0x56c   : > { %v5785_v26 = vadd.f32 %v5757_v28, %v5672_v18  ;;  %6214 = vmatmul.f32.gmra.mxu2 %v11985_v56  ;;  %6587 = vmatpush.msrb.mxu1 %v6558_v9  ;;  %v12140_v9 = vld [vmem:[#allocation4 + $0xe9] sm:$0xff] }
 0x56d   : > { %6460 = vmatmul.f32.gmra.mxu3 %v12110_v33 }
 0x56e   : > { %v5898_v45 = vadd.f32 %v5870_v47, %v5785_v26  ;;  %v12126_v47 = vld [vmem:[#allocation4 + $0xe1] sm:$0xff]  ;;  %6588 = vmatpush.msrb.mxu1 %v6557_v50  ;;  %6814 = vmatpush.msrb.mxu3 %v6783_v48  ;;  %v7137_v26 = vld [vmem:[#allocation10 + $0x3f8] sm:$0xff] }
 0x56f   : > { %v5763_v25 = vpop.f32.mrf.mxu2  ;;  %7138 = vmatpush.msra.mxu2 %v7137_v26  ;;  %v12156_v50 = vld [vmem:[#allocation4 + $0xf1] sm:$0xff] }
 0x570   : > { %v5873_v62 = vpop.f32.mrf.mxu3  ;;  %v5992_v51 = vpop.f32.mrf.mxu0  ;;  %v12116_v53 = vadd.f32 %v12075_v52, %v5898_v45 }
 0x571   : > { %v5647_v28 = vpop.f32.mrf.mxu1 }
 0x572   : > { %v5673_v59 = vadd.f32 %v5647_v28, %v11949_v41 }
 0x573   : > { %6098 = vmatmul.f32.gmra.mxu1 %v11959_v24  ;;  %6531 = vmatmul.f32.gmra.mxu0 %v12119_v38 }
 0x574   : > { %v5786_v14 = vadd.f32 %v5760_v7, %v5673_v59  ;;  %6217 = vmatmul.f32.gmra.mxu2 %v12122_v12 }
 0x575   : > { %6463 = vmatmul.f32.gmra.mxu3 %v12126_v47 }
 0x576   : > { %v5899_v41 = vadd.f32 %v5873_v62, %v5786_v14  ;;  %v12149_v14 = vld [vmem:[#allocation4 + $0xf8] sm:$0xff] }
 0x577   : > { %v5766_v52 = vpop.f32.mrf.mxu2 }
 0x578   : > { %v5876_v23 = vpop.f32.mrf.mxu3  ;;  %v5995_v18 = vpop.f32.mrf.mxu0  ;;  %v12130_v24 = vadd.f32 %v12088_v39, %v5899_v41  ;;  %v7024_v41 = vld [vmem:[#allocation10 + $0x378] sm:$0xff] }
 0x579   : > { %v5650_v22 = vpop.f32.mrf.mxu1  ;;  %7025 = vmatpush.msra.mxu1 %v7024_v41 }
 0x57a   : > { %v5674_v7 = vadd.f32 %v5650_v22, %v11963_v44 }
 0x57b   : > { %6101 = vmatmul.f32.gmra.mxu1 %v11972_v11  ;;  %6534 = vmatmul.f32.gmra.mxu0 %v12133_v55 }
 0x57c   : > { %v5787_v32 = vadd.f32 %v5763_v25, %v5674_v7  ;;  %6220 = vmatmul.f32.gmra.mxu2 %v12136_v27  ;;  %v12152_v25 = vld [vmem:[#allocation4 + $0xaa] sm:$0xff] }
 0x57d   : > { %6466 = vmatmul.f32.gmra.mxu3 %v12140_v9 }
 0x57e   : > { %v5900_v39 = vadd.f32 %v5876_v23, %v5787_v32  ;;  %v7136_v23 = vld [vmem:[#allocation10 + $0x3f0] sm:$0xff] }
 0x57f   : > { %v5769_v45 = vpop.f32.mrf.mxu2  ;;  %7139 = vmatpush.msra.mxu2 %v7136_v23  ;;  %v7135_v23 = vld [vmem:[#allocation10 + $0x3e8] sm:$0xff] }
 0x580   : > { %v5879_v62 = vpop.f32.mrf.mxu3  ;;  %v12143_v44 = vpop.f32.mrf.mxu0  ;;  %v12146_v28 = vadd.f32 %v12101_v8, %v5900_v39  ;;  %v7250_v8 = vld [vmem:[#allocation10 + $0x478] sm:$0xff] }
 0x581   : > { %v5653_v11 = vpop.f32.mrf.mxu1  ;;  %7251 = vmatpush.msra.mxu3 %v7250_v8  ;;  %v7023_v8 = vld [vmem:[#allocation10 + $0x370] sm:$0xff]  ;;  %7140 = vmatpush.msra.mxu2 %v7135_v23 }
 0x582   : > { %v5675_v59 = vadd.f32 %v5653_v11, %v11975_v46  ;;  %7026 = vmatpush.msra.mxu1 %v7023_v8 }
 0x583   : > { %6104 = vmatmul.f32.gmra.mxu1 %v12014_v58  ;;  %6537 = vmatmul.f32.gmra.mxu0 %v12149_v14 }
 0x584   : > { %v5788_v48 = vadd.f32 %v5766_v52, %v5675_v59  ;;  %6223 = vmatmul.f32.gmra.mxu2 %v12152_v25  ;;  %v12164_v59 = vld [vmem:[#allocation4 + $0xf9] sm:$0xff] }
 0x585   : > { %6469 = vmatmul.f32.gmra.mxu3 %v12156_v50 }
 0x586   : > { %v5901_v22 = vadd.f32 %v5879_v62, %v5788_v48  ;;  %v7249_v62 = vld [vmem:[#allocation10 + $0x470] sm:$0xff]  ;;  %v7499_v48 = vld [vmem:[#allocation10 + $0xf8] sm:$0xff] }
 0x587   : > { %v5772_v46 = vpop.f32.mrf.mxu2  ;;  %7252 = vmatpush.msra.mxu3 %v7249_v62  ;;  %7500 = vmatpush.msra.mxu0 %v7499_v48  ;;  %v7022_v62 = vld [vmem:[#allocation10 + $0x368] sm:$0xff] }
 0x588   : > { %v5882_v26 = vpop.f32.mrf.mxu3  ;;  %v6493_v7 = vpop.f32.mrf.mxu0  ;;  %v12159_v32 = vadd.f32 %v5992_v51, %v5901_v22  ;;  %7027 = vmatpush.msra.mxu1 %v7022_v62 }
 0x589   : > { %v5656_v39 = vpop.f32.mrf.mxu1 }
 0x58a   : > { %v5676_v52 = vadd.f32 %v5656_v39, %v11983_v3 }
 0x58b   : > { %6107 = vmatmul.f32.gmra.mxu1 %v12024_v1  ;;  %6928 = vmatmul.f32.vlgmr.msrb.gmra.mxu0 %v12122_v12 }
 0x58c   : > { %v5789_v11 = vadd.f32 %v5769_v45, %v5676_v52  ;;  %6702 = vmatmul.f32.vlgmr.msrb.gmra.mxu2 %v11942_v17 }
 0x58d   : > { %6472 = vmatmul.f32.gmra.mxu3 %v12164_v59 }
 0x58e   : > { %v5902_v41 = vadd.f32 %v5882_v26, %v5789_v11  ;;  %v7248_v26 = vld [vmem:[#allocation10 + $0x468] sm:$0xff]  ;;  %v7498_v11 = vld [vmem:[#allocation10 + $0xf0] sm:$0xff] }
 0x58f   : > { %v6179_v51 = vpop.f32.mrf.mxu2  ;;  %7253 = vmatpush.msra.mxu3 %v7248_v26  ;;  %7501 = vmatpush.msra.mxu0 %v7498_v11  ;;  %v6243_v26 = vld [vmem:[#allocation2 + $0x32] sm:$0xff] }
 0x590   : > { %v5885_v3 = vpop.f32.mrf.mxu3  ;;  %v6496_v22 = vpop.f32.mrf.mxu0  ;;  %v12168_v39 = vadd.f32 %v5995_v18, %v5902_v41  ;;  %v7134_v18 = vld [vmem:[#allocation10 + $0x3e0] sm:$0xff] }
 0x591   : > { %v5659_v45 = vpop.f32.mrf.mxu1  ;;  %7141 = vmatpush.msra.mxu2 %v7134_v18 }
 0x592   : > { %v5677_v52 = vadd.f32 %v5659_v45, %v11992_v15 }
 0x593   : > { %6110 = vmatmul.f32.gmra.mxu1 %v12036_v16  ;;  %6931 = vmatmul.f32.gmra.mxu0 %v12136_v27 }
 0x594   : > { %v5790_v17 = vadd.f32 %v5772_v46, %v5677_v52  ;;  %6705 = vmatmul.f32.gmra.mxu2 %v11956_v61  ;;  %v7497_v52 = vld [vmem:[#allocation10 + $0xe8] sm:$0xff] }
 0x595   : > { %6815 = vmatmul.f32.vlgmr.msrb.gmra.mxu3 %v12014_v58  ;;  %7502 = vmatpush.msra.mxu0 %v7497_v52  ;;  %v7020_v52 = vld [vmem:[#allocation10 + $0x358] sm:$0xff] }
 0x596   : > { %v5903_v48 = vadd.f32 %v5885_v3, %v5790_v17  ;;  %v12184_v3 = vld [vmem:[%s12990_s6] ss:$0 sm:$0xff]  ;;  %v7021_v17 = vld [vmem:[#allocation10 + $0x360] sm:$0xff] }
 0x597   : > { %v6182_v8 = vpop.f32.mrf.mxu2  ;;  %7028 = vmatpush.msra.mxu1 %v7021_v17  ;;  %v6244_v17 = vld [vmem:[#allocation2 + $0x3a] sm:$0xff] }
 0x598   : > { %v6428_v41 = vpop.f32.mrf.mxu3  ;;  %v6499_v23 = vpop.f32.mrf.mxu0  ;;  %v12176_v15 = vadd.f32 %v12143_v44, %v5903_v48  ;;  %v12191_v44 = vld [vmem:[%s12991_s7] ss:$0 sm:$0xff] }
 0x599   : > { %v12178_v46 = vadd.f32 %v6493_v7, %v6428_v41  ;;  %v6066_v61 = vpop.f32.mrf.mxu1  ;;  %v7247_v7 = vld [vmem:[#allocation10 + $0x460] sm:$0xff]  ;;  %7029 = vmatpush.msra.mxu1 %v7020_v52 }
 0x59a   : > { %v6114_v58 = vadd.f32 %v6066_v61, %v12002_v40  ;;  %7254 = vmatpush.msra.mxu3 %v7247_v7  ;;  %v12200_v61 = vld [vmem:[#allocation4 + $0xb2] sm:$0xff] }
 0x59b   : > { %6589 = vmatmul.f32.vlgmr.msrb.gmra.mxu1 %v11966_v21  ;;  %6934 = vmatmul.f32.gmra.mxu0 %v12152_v25  ;;  %v7133_v21 = vld [vmem:[#allocation10 + $0x3d8] sm:$0xff]  ;;  %v7496_v7 = vld [vmem:[#allocation10 + $0xe0] sm:$0xff] }
 0x59c   : > { %v6227_v45 = vadd.f32 %v6179_v51, %v6114_v58  ;;  %6708 = vmatmul.f32.gmra.mxu2 %v11969_v10  ;;  %7503 = vmatpush.msra.mxu0 %v7496_v7  ;;  %v7131_v7 = vld [vmem:[#allocation10 + $0x3c8] sm:$0xff] }
 0x59d   : > { %6818 = vmatmul.f32.gmra.mxu3 %v12024_v1  ;;  %7142 = vmatpush.msra.mxu2 %v7133_v21 }
 0x59e   : > { %v6263_v40 = vmul.f32 %v12184_v3, %v6227_v45 }
 0x59f   : > { %v6185_v11 = vpop.f32.mrf.mxu2 }
 0x5a0   : > { %v6283_v51 = vadd.f32 %v12191_v44, %v6263_v40  ;;  %v6431_v62 = vpop.f32.mrf.mxu3  ;;  %v6502_v48 = vpop.f32.mrf.mxu0  ;;  %v7246_v40 = vld [vmem:[#allocation10 + $0x458] sm:$0xff] }
 0x5a1   : > { %v12197_v10 = vadd.f32 %v6496_v22, %v6431_v62  ;;  %v6069_v1 = vpop.f32.mrf.mxu1  ;;  %7255 = vmatpush.msra.mxu3 %v7246_v40  ;;  %v6245_v40 = vld [vmem:[#allocation2 + $0x42] sm:$0xff] }
 0x5a2   : > { %v6299_v18 = vadd.f32 %v6283_v51, %v6243_v26  ;;  %v6115_v41 = vadd.f32 %v6069_v1, %v12010_v29  ;;  %v7132_v26 = vld [vmem:[#allocation10 + $0x3d0] sm:$0xff]  ;;  %v12212_v1 = vld [vmem:[#allocation4 + $0xba] sm:$0xff] }
 0x5a3   : > { %6592 = vmatmul.f32.gmra.mxu1 %v11978_v13  ;;  %6937 = vmatmul.f32.gmra.mxu0 %v12200_v61 }
 0x5a4   : > { %v6315_v58 = vmax.f32 %v6299_v18, 0.0  ;;  %v6228_v45 = vadd.f32 %v6182_v8, %v6115_v41  ;;  %6711 = vmatmul.f32.gmra.mxu2 %v12033_v20 }
 0x5a5   : > { %6821 = vmatmul.f32.gmra.mxu3 %v12036_v16  ;;  %7143 = vmatpush.msra.mxu2 %v7132_v26 }
 0x5a6   : > { %6331 = vst [vmem:[%s9213_s22] sm:$0xff] %v6315_v58  ;;  %v6264_v22 = vmul.f32 %v12184_v3, %v6228_v45  ;;  %v7245_v58 = vld [vmem:[#allocation10 + $0x450] sm:$0xff]  ;;  %v7495_v45 = vld [vmem:[#allocation10 + $0xd8] sm:$0xff] }
 0x5a7   : > { %v6188_v29 = vpop.f32.mrf.mxu2  ;;  %7256 = vmatpush.msra.mxu3 %v7245_v58  ;;  %7504 = vmatpush.msra.mxu0 %v7495_v45 }
 0x5a8   : > { %v6284_v13 = vadd.f32 %v12191_v44, %v6264_v22  ;;  %v6434_v21 = vpop.f32.mrf.mxu3  ;;  %v6505_v8 = vpop.f32.mrf.mxu0  ;;  %v7019_v22 = vld [vmem:[#allocation10 + $0x350] sm:$0xff]  ;;  %7144 = vmatpush.msra.mxu2 %v7131_v7 }
 0x5a9   : > { %v12209_v20 = vadd.f32 %v6499_v23, %v6434_v21  ;;  %v6072_v16 = vpop.f32.mrf.mxu1  ;;  %7030 = vmatpush.msra.mxu1 %v7019_v22 }
 0x5aa   : > { %v6300_v51 = vadd.f32 %v6284_v13, %v6244_v17  ;;  %v6116_v62 = vadd.f32 %v6072_v16, %v12020_v57  ;;  %v12224_v13 = vld [vmem:[#allocation4 + $0xc2] sm:$0xff] }
 0x5ab   : > { %6595 = vmatmul.f32.gmra.mxu1 %v11985_v56  ;;  %6940 = vmatmul.f32.gmra.mxu0 %v12212_v1 }
 0x5ac   : > { %v6316_v18 = vmax.f32 %v6300_v51, 0.0  ;;  %v6229_v41 = vadd.f32 %v6185_v11, %v6116_v62  ;;  %6714 = vmatmul.f32.gmra.mxu2 %v12045_v19  ;;  %v7244_v51 = vld [vmem:[#allocation10 + $0x448] sm:$0xff]  ;;  %v7494_v62 = vld [vmem:[#allocation10 + $0xd0] sm:$0xff] }
 0x5ad   : > { %6824 = vmatmul.f32.gmra.mxu3 %v12048_v60  ;;  %7505 = vmatpush.msra.mxu0 %v7494_v62  ;;  %v12248_v62 = vld [vmem:[#allocation4 + $0xd2] sm:$0xff] }
 0x5ae   : > { %6332 = vst [vmem:[%s9213_s22 + $0x8] sm:$0xff] %v6316_v18  ;;  %v6265_v23 = vmul.f32 %v12184_v3, %v6229_v41  ;;  %v7018_v18 = vld [vmem:[#allocation10 + $0x348] sm:$0xff]  ;;  %v6246_v41 = vld [vmem:[#allocation2 + $0x4a] sm:$0xff]  ;;  %7257 = vmatpush.msra.mxu3 %v7244_v51 }
 0x5af   : > { %v6191_v57 = vpop.f32.mrf.mxu2  ;;  %7031 = vmatpush.msra.mxu1 %v7018_v18 }
 0x5b0   : > { %v6285_v56 = vadd.f32 %v12191_v44, %v6265_v23  ;;  %v6437_v52 = vpop.f32.mrf.mxu3  ;;  %v6508_v11 = vpop.f32.mrf.mxu0  ;;  %v7130_v23 = vld [vmem:[#allocation10 + $0x3c0] sm:$0xff] }
 0x5b1   : > { %v12221_v19 = vadd.f32 %v6502_v48, %v6437_v52  ;;  %v6075_v60 = vpop.f32.mrf.mxu1  ;;  %7145 = vmatpush.msra.mxu2 %v7130_v23  ;;  %v7243_v52 = vld [vmem:[#allocation10 + $0x440] sm:$0xff]  ;;  %v7242_v23 = vld [vmem:[#allocation10 + $0x438] sm:$0xff] }
 0x5b2   : > { %v6301_v17 = vadd.f32 %v6285_v56, %v6245_v40  ;;  %v6117_v26 = vadd.f32 %v6075_v60, %v12030_v63  ;;  %v12236_v40 = vld [vmem:[#allocation4 + $0xca] sm:$0xff]  ;;  %v7493_v60 = vld [vmem:[#allocation10 + $0xc8] sm:$0xff]  ;;  %7258 = vmatpush.msra.mxu3 %v7243_v52 }
 0x5b3   : > { %6598 = vmatmul.f32.gmra.mxu1 %v12122_v12  ;;  %6943 = vmatmul.f32.gmra.mxu0 %v12224_v13 }
 0x5b4   : > { %v6317_v21 = vmax.f32 %v6301_v17, 0.0  ;;  %v6230_v16 = vadd.f32 %v6188_v29, %v6117_v26  ;;  %6717 = vmatmul.f32.gmra.mxu2 %v12057_v5  ;;  %v7017_v17 = vld [vmem:[#allocation10 + $0x340] sm:$0xff]  ;;  %7506 = vmatpush.msra.mxu0 %v7493_v60 }
 0x5b5   : > { %6827 = vmatmul.f32.gmra.mxu3 %v12060_v36  ;;  %v6247_v26 = vld [vmem:[#allocation2 + $0x52] sm:$0xff]  ;;  %7032 = vmatpush.msra.mxu1 %v7017_v17  ;;  %v7241_v17 = vld [vmem:[#allocation10 + $0x430] sm:$0xff] }
 0x5b6   : > { %6333 = vst [vmem:[%s9213_s22 + $0x10] sm:$0xff] %v6317_v21  ;;  %v6266_v48 = vmul.f32 %v12184_v3, %v6230_v16  ;;  %v7129_v21 = vld [vmem:[#allocation10 + $0x3b8] sm:$0xff]  ;;  %7259 = vmatpush.msra.mxu3 %v7242_v23 }
 0x5b7   : > { %v6194_v63 = vpop.f32.mrf.mxu2  ;;  %7146 = vmatpush.msra.mxu2 %v7129_v21  ;;  %v7015_v21 = vld [vmem:[#allocation10 + $0x330] sm:$0xff] }
 0x5b8   : > { %v6286_v12 = vadd.f32 %v12191_v44, %v6266_v48  ;;  %v6440_v58 = vpop.f32.mrf.mxu3  ;;  %v6511_v29 = vpop.f32.mrf.mxu0  ;;  %7260 = vmatpush.msra.mxu3 %v7241_v17  ;;  %v7239_v17 = vld [vmem:[#allocation10 + $0x420] sm:$0xff] }
 0x5b9   : > { %v12233_v5 = vadd.f32 %v6505_v8, %v6440_v58  ;;  %v6078_v36 = vpop.f32.mrf.mxu1  ;;  %v7016_v58 = vld [vmem:[#allocation10 + $0x338] sm:$0xff] }
 0x5ba   : > { %v6302_v45 = vadd.f32 %v6286_v12, %v6246_v41  ;;  %v6118_v22 = vadd.f32 %v6078_v36, %v12042_v6  ;;  %v7492_v12 = vld [vmem:[#allocation10 + $0xc0] sm:$0xff]  ;;  %7033 = vmatpush.msra.mxu1 %v7016_v58  ;;  %v7490_v58 = vld [vmem:[#allocation10 + $0xb0] sm:$0xff] }
 0x5bb   : > { %6601 = vmatmul.f32.gmra.mxu1 %v12136_v27  ;;  %6946 = vmatmul.f32.gmra.mxu0 %v12236_v40  ;;  %v6248_v36 = vld [vmem:[#allocation2 + $0x5a] sm:$0xff] }
 0x5bc   : > { %v6318_v7 = vmax.f32 %v6302_v45, 0.0  ;;  %v6231_v56 = vadd.f32 %v6191_v57, %v6118_v22  ;;  %6720 = vmatmul.f32.gmra.mxu2 %v12069_v2  ;;  %7507 = vmatpush.msra.mxu0 %v7492_v12  ;;  %v7128_v45 = vld [vmem:[#allocation10 + $0x3b0] sm:$0xff]  ;;  %v7240_v12 = vld [vmem:[#allocation10 + $0x428] sm:$0xff] }
 0x5bd   : > { %6830 = vmatmul.f32.gmra.mxu3 %v12072_v34  ;;  %7147 = vmatpush.msra.mxu2 %v7128_v45  ;;  %v6250_v45 = vld [vmem:[#allocation2 + $0x6a] sm:$0xff] }
 0x5be   : > { %6334 = vst [vmem:[%s9213_s22 + $0x18] sm:$0xff] %v6318_v7  ;;  %v6267_v8 = vmul.f32 %v12184_v3, %v6231_v56  ;;  %7034 = vmatpush.msra.mxu1 %v7015_v21  ;;  %7261 = vmatpush.msra.mxu3 %v7240_v12  ;;  %v7013_v21 = vld [vmem:[#allocation10 + $0x320] sm:$0xff]  ;;  %v7238_v12 = vld [vmem:[#allocation10 + $0x418] sm:$0xff] }
 0x5bf   : > { %v6197_v6 = vpop.f32.mrf.mxu2 }
 0x5c0   : > { %v6287_v27 = vadd.f32 %v12191_v44, %v6267_v8  ;;  %v6443_v16 = vpop.f32.mrf.mxu3  ;;  %v6514_v57 = vpop.f32.mrf.mxu0  ;;  %v12260_v8 = vld [vmem:[#allocation4 + $0xda] sm:$0xff]  ;;  %7262 = vmatpush.msra.mxu3 %v7239_v17 }
 0x5c1   : > { %v12245_v2 = vadd.f32 %v6508_v11, %v6443_v16  ;;  %v6081_v34 = vpop.f32.mrf.mxu1  ;;  %v7127_v16 = vld [vmem:[#allocation10 + $0x3a8] sm:$0xff] }
 0x5c2   : > { %v6303_v48 = vadd.f32 %v6287_v27, %v6247_v26  ;;  %v6119_v51 = vadd.f32 %v6081_v34, %v12054_v37  ;;  %v7491_v26 = vld [vmem:[#allocation10 + $0xb8] sm:$0xff]  ;;  %v6249_v27 = vld [vmem:[#allocation2 + $0x62] sm:$0xff]  ;;  %7148 = vmatpush.msra.mxu2 %v7127_v16  ;;  %7263 = vmatpush.msra.mxu3 %v7238_v12 }
 0x5c3   : > { %6604 = vmatmul.f32.gmra.mxu1 %v12152_v25  ;;  %6949 = vmatmul.f32.gmra.mxu0 %v12248_v62  ;;  %v7125_v16 = vld [vmem:[#allocation10 + $0x398] sm:$0xff] }
 0x5c4   : > { %v6319_v18 = vmax.f32 %v6303_v48, 0.0  ;;  %v6232_v41 = vadd.f32 %v6194_v63, %v6119_v51  ;;  %6723 = vmatmul.f32.gmra.mxu2 %v12081_v31  ;;  %7508 = vmatpush.msra.mxu0 %v7491_v26  ;;  %v7489_v26 = vld [vmem:[#allocation10 + $0xa8] sm:$0xff] }
 0x5c5   : > { %6833 = vmatmul.f32.gmra.mxu3 %v12085_v4 }
 0x5c6   : > { %6335 = vst [vmem:[%s9213_s22 + $0x20] sm:$0xff] %v6319_v18  ;;  %v6268_v11 = vmul.f32 %v12184_v3, %v6232_v41  ;;  %v12272_v41 = vld [vmem:[#allocation4 + $0xe2] sm:$0xff]  ;;  %7509 = vmatpush.msra.mxu0 %v7490_v58  ;;  %v7012_v58 = vld [vmem:[#allocation10 + $0x318] sm:$0xff] }
 0x5c7   : > { %v6200_v37 = vpop.f32.mrf.mxu2 }
 0x5c8   : > { %v6288_v25 = vadd.f32 %v12191_v44, %v6268_v11  ;;  %v6446_v22 = vpop.f32.mrf.mxu3  ;;  %v6517_v63 = vpop.f32.mrf.mxu0  ;;  %7510 = vmatpush.msra.mxu0 %v7489_v26 }
 0x5c9   : > { %v12257_v31 = vadd.f32 %v6511_v29, %v6446_v22  ;;  %v6084_v4 = vpop.f32.mrf.mxu1 }
 0x5ca   : > { %v6304_v7 = vadd.f32 %v6288_v25, %v6248_v36  ;;  %v6120_v56 = vadd.f32 %v6084_v4, %v12066_v54  ;;  %v7014_v36 = vld [vmem:[#allocation10 + $0x328] sm:$0xff]  ;;  %v7126_v25 = vld [vmem:[#allocation10 + $0x3a0] sm:$0xff] }
 0x5cb   : > { %6607 = vmatmul.f32.gmra.mxu1 %v12200_v61  ;;  %6952 = vmatmul.f32.gmra.mxu0 %v12260_v8 }
 0x5cc   : > { %v6320_v52 = vmax.f32 %v6304_v7, 0.0  ;;  %v6233_v60 = vadd.f32 %v6197_v6, %v6120_v56  ;;  %6726 = vmatmul.f32.gmra.mxu2 %v12094_v0  ;;  %7035 = vmatpush.msra.mxu1 %v7014_v36  ;;  %v6252_v36 = vld [vmem:[#allocation2 + $0x7a] sm:$0xff] }
 0x5cd   : > { %6836 = vmatmul.f32.gmra.mxu3 %v12098_v30  ;;  %7149 = vmatpush.msra.mxu2 %v7126_v25  ;;  %v7487_v25 = vld [vmem:[#allocation10 + $0x98] sm:$0xff] }
 0x5ce   : > { %6336 = vst [vmem:[%s9213_s22 + $0x28] sm:$0xff] %v6320_v52  ;;  %v6269_v29 = vmul.f32 %v12184_v3, %v6233_v60  ;;  %v12284_v52 = vld [vmem:[#allocation4 + $0xea] sm:$0xff]  ;;  %7036 = vmatpush.msra.mxu1 %v7013_v21  ;;  %v7484_v21 = vld [vmem:[#allocation10 + $0x80] sm:$0xff] }
 0x5cf   : > { %v6203_v54 = vpop.f32.mrf.mxu2  ;;  %7150 = vmatpush.msra.mxu2 %v7125_v16  ;;  %v7011_v16 = vld [vmem:[#allocation10 + $0x310] sm:$0xff] }
 0x5d0   : > { %v6289_v34 = vadd.f32 %v12191_v44, %v6269_v29  ;;  %v6449_v48 = vpop.f32.mrf.mxu3  ;;  %v6520_v6 = vpop.f32.mrf.mxu0  ;;  %7037 = vmatpush.msra.mxu1 %v7012_v58 }
 0x5d1   : > { %v12269_v0 = vadd.f32 %v6514_v57, %v6449_v48  ;;  %v6087_v30 = vpop.f32.mrf.mxu1 }
 0x5d2   : > { %v6305_v51 = vadd.f32 %v6289_v34, %v6249_v27  ;;  %v6121_v18 = vadd.f32 %v6087_v30, %v12078_v43  ;;  %v6251_v27 = vld [vmem:[#allocation2 + $0x72] sm:$0xff]  ;;  %7038 = vmatpush.msra.mxu1 %v7011_v16 }
 0x5d3   : > { %6610 = vmatmul.f32.gmra.mxu1 %v12212_v1  ;;  %6955 = vmatmul.f32.gmra.mxu0 %v12272_v41 }
 0x5d4   : > { %v6321_v11 = vmax.f32 %v6305_v51, 0.0  ;;  %v6234_v23 = vadd.f32 %v6200_v37, %v6121_v18  ;;  %6729 = vmatmul.f32.gmra.mxu2 %v12107_v42  ;;  %v12298_v18 = vld [vmem:[#allocation4 + $0xf2] sm:$0xff] }
 0x5d5   : > { %6839 = vmatmul.f32.gmra.mxu3 %v12110_v33 }
 0x5d6   : > { %6337 = vst [vmem:[%s9213_s22 + $0x30] sm:$0xff] %v6321_v11  ;;  %v6270_v57 = vmul.f32 %v12184_v3, %v6234_v23 }
 0x5d7   : > { %v6206_v43 = vpop.f32.mrf.mxu2 }
 0x5d8   : > { %v6290_v22 = vadd.f32 %v12191_v44, %v6270_v57  ;;  %v6452_v4 = vpop.f32.mrf.mxu3  ;;  %v6523_v37 = vpop.f32.mrf.mxu0  ;;  %v7488_v57 = vld [vmem:[#allocation10 + $0xa0] sm:$0xff] }
 0x5d9   : > { %v12281_v42 = vadd.f32 %v6517_v63, %v6452_v4  ;;  %v6090_v33 = vpop.f32.mrf.mxu1  ;;  %7511 = vmatpush.msra.mxu0 %v7488_v57  ;;  %v12326_v57 = vld [vmem:[#allocation4 + $0x100] sm:$0xff] }
 0x5da   : > { %v6306_v7 = vadd.f32 %v6290_v22, %v6250_v45  ;;  %v6122_v56 = vadd.f32 %v6090_v33, %v12091_v49  ;;  %v7486_v33 = vld [vmem:[#allocation10 + $0x90] sm:$0xff] }
 0x5db   : > { %6613 = vmatmul.f32.gmra.mxu1 %v12224_v13  ;;  %6958 = vmatmul.f32.gmra.mxu0 %v12284_v52 }
 0x5dc   : > { %v6322_v60 = vmax.f32 %v6306_v7, 0.0  ;;  %v6235_v29 = vadd.f32 %v6203_v54, %v6122_v56  ;;  %6732 = vmatmul.f32.gmra.mxu2 %v12119_v38  ;;  %7512 = vmatpush.msra.mxu0 %v7487_v25 }
 0x5dd   : > { %6842 = vmatmul.f32.gmra.mxu3 %v12126_v47 }
 0x5de   : > { %6338 = vst [vmem:[%s9213_s22 + $0x38] sm:$0xff] %v6322_v60  ;;  %v6271_v63 = vmul.f32 %v12184_v3, %v6235_v29  ;;  %v12310_v60 = vld [vmem:[#allocation4 + $0xfa] sm:$0xff]  ;;  %7513 = vmatpush.msra.mxu0 %v7486_v33 }
 0x5df   : > { %v6209_v49 = vpop.f32.mrf.mxu2  ;;  %v7123_v29 = vld [vmem:[#allocation10 + $0x388] sm:$0xff] }
 0x5e0   : > { %v6291_v34 = vadd.f32 %v12191_v44, %v6271_v63  ;;  %v6455_v48 = vpop.f32.mrf.mxu3  ;;  %v12293_v54 = vpop.f32.mrf.mxu0  ;;  %v7485_v63 = vld [vmem:[#allocation10 + $0x88] sm:$0xff] }
 0x5e1   : > { %v12295_v38 = vadd.f32 %v6520_v6, %v6455_v48  ;;  %v6093_v47 = vpop.f32.mrf.mxu1  ;;  %7514 = vmatpush.msra.mxu0 %v7485_v63 }
 0x5e2   : > { %v6307_v30 = vadd.f32 %v6291_v34, %v6251_v27  ;;  %v6123_v51 = vadd.f32 %v6093_v47, %v12104_v35  ;;  %v7124_v35 = vld [vmem:[#allocation10 + $0x390] sm:$0xff] }
 0x5e3   : > { %6616 = vmatmul.f32.gmra.mxu1 %v12236_v40  ;;  %6961 = vmatmul.f32.gmra.mxu0 %v12298_v18  ;;  %v7237_v27 = vld [vmem:[#allocation10 + $0x410] sm:$0xff] }
 0x5e4   : > { %v6323_v11 = vmax.f32 %v6307_v30, 0.0  ;;  %v6236_v23 = vadd.f32 %v6206_v43, %v6123_v51  ;;  %6735 = vmatmul.f32.gmra.mxu2 %v12133_v55  ;;  %7515 = vmatpush.msra.mxu0 %v7484_v21  ;;  %v6253_v34 = vld [vmem:[#allocation2 + $0x82] sm:$0xff]  ;;  %v7774_v21 = vld [vmem:[#allocation10 + $0x1f8] sm:$0xff] }
 0x5e5   : > { %6845 = vmatmul.f32.gmra.mxu3 %v12140_v9  ;;  %7151 = vmatpush.msra.mxu2 %v7124_v35  ;;  %v7010_v35 = vld [vmem:[#allocation10 + $0x308] sm:$0xff] }
 0x5e6   : > { %6339 = vst [vmem:[%s9213_s22 + $0x40] sm:$0xff] %v6323_v11  ;;  %v6272_v6 = vmul.f32 %v12184_v3, %v6236_v23  ;;  %7264 = vmatpush.msra.mxu3 %v7237_v27  ;;  %v12323_v23 = vld [vmem:[#allocation4 + $0x102] sm:$0xff]  ;;  %7039 = vmatpush.msra.mxu1 %v7010_v35  ;;  %v6255_v27 = vld [vmem:[#allocation2 + $0x92] sm:$0xff] }
 0x5e7   : > { %v6212_v45 = vpop.f32.mrf.mxu2  ;;  %7152 = vmatpush.msra.mxu2 %v7123_v29  ;;  %v12340_v29 = vld [vmem:[#allocation4 + $0x108] sm:$0xff] }
 0x5e8   : > { %v6292_v22 = vadd.f32 %v12191_v44, %v6272_v6  ;;  %v6458_v43 = vpop.f32.mrf.mxu3  ;;  %v6529_v4 = vpop.f32.mrf.mxu0  ;;  %v7236_v6 = vld [vmem:[#allocation10 + $0x408] sm:$0xff]  ;;  %v7773_v35 = vld [vmem:[#allocation10 + $0x1f0] sm:$0xff] }
 0x5e9   : > { %v12307_v55 = vadd.f32 %v6523_v37, %v6458_v43  ;;  %v6096_v9 = vpop.f32.mrf.mxu1  ;;  %v7122_v37 = vld [vmem:[#allocation10 + $0x380] sm:$0xff]  ;;  %7265 = vmatpush.msra.mxu3 %v7236_v6 }
 0x5ea   : > { %v6308_v7 = vadd.f32 %v6292_v22, %v6252_v36  ;;  %v6124_v56 = vadd.f32 %v6096_v9, %v12116_v53  ;;  %7153 = vmatpush.msra.mxu2 %v7122_v37  ;;  %v6254_v36 = vld [vmem:[#allocation2 + $0x8a] sm:$0xff] }
 0x5eb   : > { %6619 = vmatmul.f32.gmra.mxu1 %v12248_v62  ;;  %6964 = vmatmul.f32.gmra.mxu0 %v12310_v60  ;;  %v7661_v37 = vld [vmem:[#allocation10 + $0x178] sm:$0xff] }
 0x5ec   : > { %v6324_v17 = vmax.f32 %v6308_v7, 0.0  ;;  %v6237_v26 = vadd.f32 %v6209_v49, %v6124_v56  ;;  %6738 = vmatmul.f32.gmra.mxu2 %v12149_v14  ;;  %v12337_v56 = vld [vmem:[#allocation4 + $0x10a] sm:$0xff] }
 0x5ed   : > { %6848 = vmatmul.f32.gmra.mxu3 %v12156_v50  ;;  %7662 = vmatpush.msrb.mxu2 %v7661_v37 }
 0x5ee   : > { %6340 = vst [vmem:[%s9213_s22 + $0x48] sm:$0xff] %v6324_v17  ;;  %v6273_v53 = vmul.f32 %v12184_v3, %v6237_v26  ;;  %v12344_v26 = vld [vmem:[#allocation4 + $0x101] sm:$0xff] }
 0x5ef   : > { %v6215_v48 = vpop.f32.mrf.mxu2 }
 0x5f0   : > { %v6293_v49 = vadd.f32 %v12191_v44, %v6273_v53  ;;  %v6461_v47 = vpop.f32.mrf.mxu3  ;;  %v6532_v14 = vpop.f32.mrf.mxu0  ;;  %v7467_v53 = vld [vmem:[#allocation10 + $0x78] sm:$0xff] }
 0x5f1   : > { %v12320_v50 = vadd.f32 %v12293_v54, %v6461_v47  ;;  %v6099_v30 = vpop.f32.mrf.mxu1  ;;  %v7235_v54 = vld [vmem:[#allocation10 + $0x400] sm:$0xff]  ;;  %v7660_v47 = vld [vmem:[#allocation10 + $0x170] sm:$0xff] }
 0x5f2   : > { %v6309_v51 = vadd.f32 %v6293_v49, %v6253_v34  ;;  %v6125_v11 = vadd.f32 %v6099_v30, %v12130_v24  ;;  %7266 = vmatpush.msra.mxu3 %v7235_v54  ;;  %7663 = vmatpush.msrb.mxu2 %v7660_v47  ;;  %v7886_v47 = vld [vmem:[#allocation10 + $0x270] sm:$0xff] }
 0x5f3   : > { %6622 = vmatmul.f32.gmra.mxu1 %v12260_v8  ;;  %6967 = vmatmul.f32.gmra.mxu0 %v12323_v23 }
 0x5f4   : > { %v6325_v12 = vmax.f32 %v6309_v51, 0.0  ;;  %v6238_v58 = vadd.f32 %v6212_v45, %v6125_v11  ;;  %6741 = vmatmul.f32.gmra.mxu2 %v12326_v57  ;;  %7775 = vmatpush.msrb.mxu3 %v7774_v21 }
 0x5f5   : > { %6851 = vmatmul.f32.gmra.mxu3 %v12164_v59 }
 0x5f6   : > { %6341 = vst [vmem:[%s9213_s22 + $0x50] sm:$0xff] %v6325_v12  ;;  %v6274_v24 = vmul.f32 %v12184_v3, %v6238_v58  ;;  %v12353_v12 = vld [vmem:[#allocation4 + $0x112] sm:$0xff]  ;;  %7776 = vmatpush.msrb.mxu3 %v7773_v35 }
 0x5f7   : > { %v6218_v25 = vpop.f32.mrf.mxu2  ;;  %v12356_v58 = vld [vmem:[#allocation4 + $0x110] sm:$0xff] }
 0x5f8   : > { %v6294_v22 = vadd.f32 %v12191_v44, %v6274_v24  ;;  %v6464_v43 = vpop.f32.mrf.mxu3  ;;  %v6535_v9 = vpop.f32.mrf.mxu0 }
 0x5f9   : > { %v12334_v45 = vadd.f32 %v6529_v4, %v6464_v43  ;;  %v6102_v33 = vpop.f32.mrf.mxu1  ;;  %v7009_v4 = vld [vmem:[#allocation10 + $0x300] sm:$0xff] }
 0x5fa   : > { %v6310_v7 = vadd.f32 %v6294_v22, %v6254_v36  ;;  %v6126_v59 = vadd.f32 %v6102_v33, %v12146_v28  ;;  %7040 = vmatpush.msra.mxu1 %v7009_v4  ;;  %v7887_v36 = vld [vmem:[#allocation10 + $0x278] sm:$0xff]  ;;  %v6256_v43 = vld [vmem:[#allocation2 + $0x9a] sm:$0xff] }
 0x5fb   : > { %6625 = vmatmul.f32.gmra.mxu1 %v12272_v41  ;;  %6970 = vmatmul.f32.gmra.mxu0 %v12337_v56 }
 0x5fc   : > { %v6326_v63 = vmax.f32 %v6310_v7, 0.0  ;;  %v6239_v17 = vadd.f32 %v6215_v48, %v6126_v59  ;;  %6744 = vmatmul.f32.gmra.mxu2 %v12340_v29  ;;  %7565 = vmatpush.msrb.mxu1 %v7467_v53 }
 0x5fd   : > { %6854 = vmatmul.f32.gmra.mxu3 %v12344_v26  ;;  %7888 = vmatpush.msrb.mxu0 %v7887_v36 }
 0x5fe   : > { %6342 = vst [vmem:[%s9213_s22 + $0x58] sm:$0xff] %v6326_v63  ;;  %v6275_v28 = vmul.f32 %v12184_v3, %v6239_v17  ;;  %v7659_v63 = vld [vmem:[#allocation10 + $0x168] sm:$0xff] }
 0x5ff   : > { %v6221_v16 = vpop.f32.mrf.mxu2  ;;  %7664 = vmatpush.msrb.mxu2 %v7659_v63  ;;  %7889 = vmatpush.msrb.mxu0 %v7886_v47  ;;  %v7771_v63 = vld [vmem:[#allocation10 + $0x1e0] sm:$0xff] }
 0x600   : > { %v6295_v34 = vadd.f32 %v12191_v44, %v6275_v28  ;;  %v6467_v48 = vpop.f32.mrf.mxu3  ;;  %v6538_v49 = vpop.f32.mrf.mxu0 }
 0x601   : > { %v12350_v30 = vadd.f32 %v6532_v14, %v6467_v48  ;;  %v6105_v51 = vpop.f32.mrf.mxu1  ;;  %v12360_v14 = vld [vmem:[#allocation4 + $0x109] sm:$0xff]  ;;  %v7772_v48 = vld [vmem:[#allocation10 + $0x1e8] sm:$0xff] }
 0x602   : > { %v6311_v11 = vadd.f32 %v6295_v34, %v6255_v27  ;;  %v6127_v6 = vadd.f32 %v6105_v51, %v12159_v32  ;;  %v7466_v32 = vld [vmem:[#allocation10 + $0x70] sm:$0xff]  ;;  %v12373_v27 = vld [vmem:[#allocation4 + $0x111] sm:$0xff]  ;;  %7777 = vmatpush.msrb.mxu3 %v7772_v48 }
 0x603   : > { %6628 = vmatmul.f32.gmra.mxu1 %v12284_v52  ;;  %6973 = vmatmul.f32.gmra.mxu0 %v12353_v12  ;;  %v8858_v34 = vld [vmem:[#allocation4 + $0xb1] sm:$0xff] }
 0x604   : > { %v6327_v54 = vmax.f32 %v6311_v11, 0.0  ;;  %v6240_v24 = vadd.f32 %v6218_v25, %v6127_v6  ;;  %6747 = vmatmul.f32.gmra.mxu2 %v12356_v58  ;;  %7566 = vmatpush.msrb.mxu1 %v7466_v32 }
 0x605   : > { %6857 = vmatmul.f32.gmra.mxu3 %v12360_v14 }
 0x606   : > { %6343 = vst [vmem:[%s9213_s22 + $0x60] sm:$0xff] %v6327_v54  ;;  %v6276_v22 = vmul.f32 %v12184_v3, %v6240_v24  ;;  %v7658_v24 = vld [vmem:[#allocation10 + $0x160] sm:$0xff]  ;;  %7778 = vmatpush.msrb.mxu3 %v7771_v63 }
 0x607   : > { %v6224_v33 = vpop.f32.mrf.mxu2  ;;  %7665 = vmatpush.msrb.mxu2 %v7658_v24 }
 0x608   : > { %v6296_v7 = vadd.f32 %v12191_v44, %v6276_v22  ;;  %v6470_v25 = vpop.f32.mrf.mxu3  ;;  %v12366_v59 = vpop.f32.mrf.mxu0 }
 0x609   : > { %v12368_v17 = vadd.f32 %v6535_v9, %v6470_v25  ;;  %v6108_v4 = vpop.f32.mrf.mxu1  ;;  %v7465_v9 = vld [vmem:[#allocation10 + $0x68] sm:$0xff] }
 0x60a   : > { %v6312_v28 = vadd.f32 %v6296_v7, %v6256_v43  ;;  %v6128_v37 = vadd.f32 %v6108_v4, %v12168_v39  ;;  %7567 = vmatpush.msrb.mxu1 %v7465_v9  ;;  %v6257_v39 = vld [vmem:[#allocation2 + $0xa2] sm:$0xff]  ;;  %v8859_v25 = vld [vmem:[#allocation4 + $0xb9] sm:$0xff]  ;;  %v8860_v9 = vld [vmem:[#allocation4 + $0xb0] sm:$0xff] }
 0x60b   : > { %6631 = vmatmul.f32.gmra.mxu1 %v12298_v18  ;;  %7516 = vmatmul.f32.vlgmr.msra.gmra.mxu0 %v12344_v26  ;;  %v7885_v4 = vld [vmem:[#allocation10 + $0x268] sm:$0xff] }
 0x60c   : > { %v6328_v21 = vmax.f32 %v6312_v28, 0.0  ;;  %v6241_v53 = vadd.f32 %v6221_v16, %v6128_v37  ;;  %7154 = vmatmul.f32.vlgmr.msra.gmra.mxu2 %v8858_v34  ;;  %7890 = vmatpush.msrb.mxu0 %v7885_v4  ;;  %v8863_v4 = vld [vmem:[#allocation4 + $0xc9] sm:$0xff] }
 0x60d   : > { %6860 = vmatmul.f32.gmra.mxu3 %v12373_v27 }
 0x60e   : > { %6344 = vst [vmem:[%s9213_s22 + $0x68] sm:$0xff] %v6328_v21  ;;  %v6277_v51 = vmul.f32 %v12184_v3, %v6241_v53 }
 0x60f   : > { %v6703_v11 = vpop.f32.mrf.mxu2 }
 0x610   : > { %v6297_v6 = vadd.f32 %v12191_v44, %v6277_v51  ;;  %v6473_v16 = vpop.f32.mrf.mxu3  ;;  %v12379_v54 = vpop.f32.mrf.mxu0 }
 0x611   : > { %v12381_v35 = vadd.f32 %v6538_v49, %v6473_v16  ;;  %v6111_v36 = vpop.f32.mrf.mxu1  ;;  %v7464_v49 = vld [vmem:[#allocation10 + $0x60] sm:$0xff]  ;;  %v7463_v16 = vld [vmem:[#allocation10 + $0x58] sm:$0xff] }
 0x612   : > { %v6313_v32 = vadd.f32 %v6297_v6, %v6257_v39  ;;  %v6129_v22 = vadd.f32 %v6111_v36, %v12176_v15  ;;  %7568 = vmatpush.msrb.mxu1 %v7464_v49  ;;  %v6258_v15 = vld [vmem:[#allocation2 + $0xaa] sm:$0xff]  ;;  %v8861_v39 = vld [vmem:[#allocation4 + $0xc1] sm:$0xff] }
 0x613   : > { %6634 = vmatmul.f32.gmra.mxu1 %v12310_v60  ;;  %7519 = vmatmul.f32.gmra.mxu0 %v12360_v14  ;;  %v7770_v6 = vld [vmem:[#allocation10 + $0x1d8] sm:$0xff]  ;;  %v7769_v49 = vld [vmem:[#allocation10 + $0x1d0] sm:$0xff] }
 0x614   : > { %v6329_v43 = vmax.f32 %v6313_v32, 0.0  ;;  %v6242_v7 = vadd.f32 %v6224_v33, %v6129_v22  ;;  %7157 = vmatmul.f32.gmra.mxu2 %v8859_v25  ;;  %v7657_v33 = vld [vmem:[#allocation10 + $0x158] sm:$0xff]  ;;  %7779 = vmatpush.msrb.mxu3 %v7770_v6  ;;  %v7656_v22 = vld [vmem:[#allocation10 + $0x150] sm:$0xff]  ;;  %v12402_v25 = vld [vmem:[#allocation4 + $0x119] sm:$0xff] }
 0x615   : > { %7267 = vmatmul.f32.vlgmr.msra.gmra.mxu3 %v12200_v61  ;;  %7666 = vmatpush.msrb.mxu2 %v7657_v33  ;;  %v7655_v33 = vld [vmem:[#allocation10 + $0x148] sm:$0xff] }
 0x616   : > { %6345 = vst [vmem:[%s9213_s22 + $0x70] sm:$0xff] %v6329_v43  ;;  %v6278_v28 = vmul.f32 %v12184_v3, %v6242_v7  ;;  %7569 = vmatpush.msrb.mxu1 %v7463_v16  ;;  %7780 = vmatpush.msrb.mxu3 %v7769_v49 }
 0x617   : > { %v6706_v37 = vpop.f32.mrf.mxu2  ;;  %7667 = vmatpush.msrb.mxu2 %v7656_v22 }
 0x618   : > { %v6298_v21 = vadd.f32 %v12191_v44, %v6278_v28  ;;  %v6816_v53 = vpop.f32.mrf.mxu3  ;;  %v12390_v34 = vpop.f32.mrf.mxu0  ;;  %v7884_v44 = vld [vmem:[#allocation10 + $0x260] sm:$0xff]  ;;  %v7883_v28 = vld [vmem:[#allocation10 + $0x258] sm:$0xff] }
 0x619   : > { %v6590_v48 = vpop.f32.mrf.mxu1  ;;  %7891 = vmatpush.msrb.mxu0 %v7884_v44  ;;  %7668 = vmatpush.msrb.mxu2 %v7655_v33 }
 0x61a   : > { %v6314_v47 = vadd.f32 %v6298_v21, %v6258_v15  ;;  %v6638_v61 = vadd.f32 %v6590_v48, %v12178_v46 }
 0x61b   : > { %7041 = vmatmul.f32.vlgmr.msra.gmra.mxu1 %v8860_v9  ;;  %7522 = vmatmul.f32.gmra.mxu0 %v12373_v27 }
 0x61c   : > { %v6330_v3 = vmax.f32 %v6314_v47, 0.0  ;;  %v6751_v51 = vadd.f32 %v6703_v11, %v6638_v61  ;;  %7160 = vmatmul.f32.gmra.mxu2 %v8861_v39  ;;  %7892 = vmatpush.msrb.mxu0 %v7883_v28  ;;  %v12412_v61 = vld [vmem:[#allocation4 + $0x121] sm:$0xff] }
 0x61d   : > { %7270 = vmatmul.f32.gmra.mxu3 %v12212_v1  ;;  %v8862_v1 = vld [vmem:[#allocation4 + $0xb8] sm:$0xff]  ;;  %v7882_v39 = vld [vmem:[#allocation10 + $0x250] sm:$0xff] }
 0x61e   : > { %6346 = vst [vmem:[%s9213_s22 + $0x78] sm:$0xff] %v6330_v3  ;;  %v6864_v24 = vadd.f32 %v6816_v53, %v6751_v51  ;;  %v8865_v3 = vld [vmem:[#allocation4 + $0xd1] sm:$0xff]  ;;  %v7768_v51 = vld [vmem:[#allocation10 + $0x1c8] sm:$0xff]  ;;  %7893 = vmatpush.msrb.mxu0 %v7882_v39 }
 0x61f   : > { %v6709_v36 = vpop.f32.mrf.mxu2  ;;  %7781 = vmatpush.msrb.mxu3 %v7768_v51 }
 0x620   : > { %v6819_v46 = vpop.f32.mrf.mxu3  ;;  %v12396_v32 = vpop.f32.mrf.mxu0  ;;  %v12399_v43 = vadd.f32 %v12366_v59, %v6864_v24  ;;  %v7462_v59 = vld [vmem:[#allocation10 + $0x50] sm:$0xff]  ;;  %v7654_v24 = vld [vmem:[#allocation10 + $0x140] sm:$0xff] }
 0x621   : > { %v6593_v11 = vpop.f32.mrf.mxu1  ;;  %7570 = vmatpush.msrb.mxu1 %v7462_v59  ;;  %7669 = vmatpush.msrb.mxu2 %v7654_v24 }
 0x622   : > { %v6639_v7 = vadd.f32 %v6593_v11, %v12197_v10  ;;  %v12422_v11 = vld [vmem:[#allocation4 + $0x129] sm:$0xff] }
 0x623   : > { %7044 = vmatmul.f32.gmra.mxu1 %v8862_v1  ;;  %7525 = vmatmul.f32.gmra.mxu0 %v12402_v25  ;;  %v8867_v1 = vld [vmem:[#allocation4 + $0xd9] sm:$0xff] }
 0x624   : > { %v6752_v63 = vadd.f32 %v6706_v37, %v6639_v7  ;;  %7163 = vmatmul.f32.gmra.mxu2 %v8863_v4  ;;  %v7881_v4 = vld [vmem:[#allocation10 + $0x248] sm:$0xff] }
 0x625   : > { %7273 = vmatmul.f32.gmra.mxu3 %v12224_v13  ;;  %v8864_v13 = vld [vmem:[#allocation4 + $0xc0] sm:$0xff]  ;;  %7894 = vmatpush.msrb.mxu0 %v7881_v4 }
 0x626   : > { %v6865_v15 = vadd.f32 %v6819_v46, %v6752_v63  ;;  %v7767_v63 = vld [vmem:[#allocation10 + $0x1c0] sm:$0xff] }
 0x627   : > { %v6712_v21 = vpop.f32.mrf.mxu2  ;;  %7782 = vmatpush.msrb.mxu3 %v7767_v63 }
 0x628   : > { %v6822_v10 = vpop.f32.mrf.mxu3  ;;  %v12406_v53 = vpop.f32.mrf.mxu0  ;;  %v12409_v48 = vadd.f32 %v12379_v54, %v6865_v15  ;;  %v7461_v54 = vld [vmem:[#allocation10 + $0x48] sm:$0xff]  ;;  %v7653_v15 = vld [vmem:[#allocation10 + $0x138] sm:$0xff] }
 0x629   : > { %v6596_v37 = vpop.f32.mrf.mxu1  ;;  %7571 = vmatpush.msrb.mxu1 %v7461_v54  ;;  %7670 = vmatpush.msrb.mxu2 %v7653_v15 }
 0x62a   : > { %v6640_v47 = vadd.f32 %v6596_v37, %v12209_v20  ;;  %v12432_v37 = vld [vmem:[#allocation4 + $0x131] sm:$0xff] }
 0x62b   : > { %7047 = vmatmul.f32.gmra.mxu1 %v8864_v13  ;;  %7528 = vmatmul.f32.gmra.mxu0 %v12412_v61  ;;  %v8869_v13 = vld [vmem:[#allocation4 + $0xe1] sm:$0xff] }
 0x62c   : > { %v6753_v9 = vadd.f32 %v6709_v36, %v6640_v47  ;;  %7166 = vmatmul.f32.gmra.mxu2 %v8865_v3  ;;  %v7880_v3 = vld [vmem:[#allocation10 + $0x240] sm:$0xff] }
 0x62d   : > { %7276 = vmatmul.f32.gmra.mxu3 %v12236_v40  ;;  %v8866_v40 = vld [vmem:[#allocation4 + $0xc8] sm:$0xff]  ;;  %7895 = vmatpush.msrb.mxu0 %v7880_v3 }
 0x62e   : > { %v6866_v6 = vadd.f32 %v6822_v10, %v6753_v9  ;;  %v7766_v9 = vld [vmem:[#allocation10 + $0x1b8] sm:$0xff] }
 0x62f   : > { %v6715_v44 = vpop.f32.mrf.mxu2  ;;  %7783 = vmatpush.msrb.mxu3 %v7766_v9 }
 0x630   : > { %v6825_v20 = vpop.f32.mrf.mxu3  ;;  %v12416_v16 = vpop.f32.mrf.mxu0  ;;  %v12419_v46 = vadd.f32 %v12390_v34, %v6866_v6  ;;  %v7460_v34 = vld [vmem:[#allocation10 + $0x40] sm:$0xff]  ;;  %v7652_v6 = vld [vmem:[#allocation10 + $0x130] sm:$0xff] }
 0x631   : > { %v6599_v36 = vpop.f32.mrf.mxu1  ;;  %7572 = vmatpush.msrb.mxu1 %v7460_v34  ;;  %7671 = vmatpush.msrb.mxu2 %v7652_v6 }
 0x632   : > { %v6641_v22 = vadd.f32 %v6599_v36, %v12221_v19  ;;  %v12442_v36 = vld [vmem:[#allocation4 + $0x139] sm:$0xff] }
 0x633   : > { %7050 = vmatmul.f32.gmra.mxu1 %v8866_v40  ;;  %7531 = vmatmul.f32.gmra.mxu0 %v12422_v11  ;;  %v8871_v40 = vld [vmem:[#allocation4 + $0xe9] sm:$0xff] }
 0x634   : > { %v6754_v7 = vadd.f32 %v6712_v21, %v6641_v22  ;;  %7169 = vmatmul.f32.gmra.mxu2 %v8867_v1  ;;  %v7879_v1 = vld [vmem:[#allocation10 + $0x238] sm:$0xff] }
 0x635   : > { %7279 = vmatmul.f32.gmra.mxu3 %v12248_v62  ;;  %v8868_v62 = vld [vmem:[#allocation4 + $0xd0] sm:$0xff]  ;;  %7896 = vmatpush.msrb.mxu0 %v7879_v1 }
 0x636   : > { %v6867_v49 = vadd.f32 %v6825_v20, %v6754_v7  ;;  %v7765_v7 = vld [vmem:[#allocation10 + $0x1b0] sm:$0xff] }
 0x637   : > { %v6718_v28 = vpop.f32.mrf.mxu2  ;;  %7784 = vmatpush.msrb.mxu3 %v7765_v7 }
 0x638   : > { %v6828_v19 = vpop.f32.mrf.mxu3  ;;  %v12426_v59 = vpop.f32.mrf.mxu0  ;;  %v12429_v10 = vadd.f32 %v12396_v32, %v6867_v49  ;;  %v7459_v32 = vld [vmem:[#allocation10 + $0x38] sm:$0xff]  ;;  %v7651_v49 = vld [vmem:[#allocation10 + $0x128] sm:$0xff] }
 0x639   : > { %v6602_v21 = vpop.f32.mrf.mxu1  ;;  %7573 = vmatpush.msrb.mxu1 %v7459_v32  ;;  %7672 = vmatpush.msrb.mxu2 %v7651_v49 }
 0x63a   : > { %v6642_v33 = vadd.f32 %v6602_v21, %v12233_v5  ;;  %v12452_v21 = vld [vmem:[#allocation4 + $0x141] sm:$0xff] }
 0x63b   : > { %7053 = vmatmul.f32.gmra.mxu1 %v8868_v62  ;;  %7534 = vmatmul.f32.gmra.mxu0 %v12432_v37  ;;  %v8873_v62 = vld [vmem:[#allocation4 + $0xf1] sm:$0xff] }
 0x63c   : > { %v6755_v47 = vadd.f32 %v6715_v44, %v6642_v33  ;;  %7172 = vmatmul.f32.gmra.mxu2 %v8869_v13  ;;  %v7878_v13 = vld [vmem:[#allocation10 + $0x230] sm:$0xff] }
 0x63d   : > { %7282 = vmatmul.f32.gmra.mxu3 %v12260_v8  ;;  %v8870_v8 = vld [vmem:[#allocation4 + $0xd8] sm:$0xff]  ;;  %7897 = vmatpush.msrb.mxu0 %v7878_v13 }
 0x63e   : > { %v6868_v51 = vadd.f32 %v6828_v19, %v6755_v47  ;;  %v7764_v47 = vld [vmem:[#allocation10 + $0x1a8] sm:$0xff] }
 0x63f   : > { %v6721_v39 = vpop.f32.mrf.mxu2  ;;  %7785 = vmatpush.msrb.mxu3 %v7764_v47 }
 0x640   : > { %v6831_v5 = vpop.f32.mrf.mxu3  ;;  %v12436_v54 = vpop.f32.mrf.mxu0  ;;  %v12439_v20 = vadd.f32 %v12406_v53, %v6868_v51  ;;  %v7458_v53 = vld [vmem:[#allocation10 + $0x30] sm:$0xff]  ;;  %v7650_v51 = vld [vmem:[#allocation10 + $0x120] sm:$0xff] }
 0x641   : > { %v6605_v44 = vpop.f32.mrf.mxu1  ;;  %7574 = vmatpush.msrb.mxu1 %v7458_v53  ;;  %7673 = vmatpush.msrb.mxu2 %v7650_v51 }
 0x642   : > { %v6643_v24 = vadd.f32 %v6605_v44, %v12245_v2  ;;  %v12462_v44 = vld [vmem:[#allocation4 + $0x149] sm:$0xff] }
 0x643   : > { %7056 = vmatmul.f32.gmra.mxu1 %v8870_v8  ;;  %7537 = vmatmul.f32.gmra.mxu0 %v12442_v36  ;;  %v8875_v8 = vld [vmem:[#allocation4 + $0xf9] sm:$0xff] }
 0x644   : > { %v6756_v22 = vadd.f32 %v6718_v28, %v6643_v24  ;;  %7175 = vmatmul.f32.gmra.mxu2 %v8871_v40  ;;  %v7877_v40 = vld [vmem:[#allocation10 + $0x228] sm:$0xff] }
 0x645   : > { %7285 = vmatmul.f32.gmra.mxu3 %v12272_v41  ;;  %v8872_v41 = vld [vmem:[#allocation4 + $0xe0] sm:$0xff]  ;;  %7898 = vmatpush.msrb.mxu0 %v7877_v40 }
 0x646   : > { %v6869_v63 = vadd.f32 %v6831_v5, %v6756_v22  ;;  %v7763_v22 = vld [vmem:[#allocation10 + $0x1a0] sm:$0xff]  ;;  %v7647_v40 = vld [vmem:[#allocation10 + $0x108] sm:$0xff] }
 0x647   : > { %v6724_v4 = vpop.f32.mrf.mxu2  ;;  %7786 = vmatpush.msrb.mxu3 %v7763_v22  ;;  %v7874_v22 = vld [vmem:[#allocation10 + $0x210] sm:$0xff] }
 0x648   : > { %v6834_v2 = vpop.f32.mrf.mxu3  ;;  %v12446_v34 = vpop.f32.mrf.mxu0  ;;  %v12449_v19 = vadd.f32 %v12416_v16, %v6869_v63  ;;  %v7457_v16 = vld [vmem:[#allocation10 + $0x28] sm:$0xff]  ;;  %v7649_v63 = vld [vmem:[#allocation10 + $0x118] sm:$0xff] }
 0x649   : > { %v6608_v28 = vpop.f32.mrf.mxu1  ;;  %7575 = vmatpush.msrb.mxu1 %v7457_v16  ;;  %7674 = vmatpush.msrb.mxu2 %v7649_v63  ;;  %v7648_v16 = vld [vmem:[#allocation10 + $0x110] sm:$0xff] }
 0x64a   : > { %v6644_v15 = vadd.f32 %v6608_v28, %v12257_v31  ;;  %v12472_v28 = vld [vmem:[#allocation4 + $0x151] sm:$0xff] }
 0x64b   : > { %7059 = vmatmul.f32.gmra.mxu1 %v8872_v41  ;;  %7540 = vmatmul.f32.gmra.mxu0 %v12452_v21  ;;  %v7762_v41 = vld [vmem:[#allocation10 + $0x198] sm:$0xff] }
 0x64c   : > { %v6757_v33 = vadd.f32 %v6721_v39, %v6644_v15  ;;  %7178 = vmatmul.f32.gmra.mxu2 %v8873_v62  ;;  %7787 = vmatpush.msrb.mxu3 %v7762_v41 }
 0x64d   : > { %7288 = vmatmul.f32.gmra.mxu3 %v12284_v52  ;;  %v8874_v52 = vld [vmem:[#allocation4 + $0xe8] sm:$0xff]  ;;  %7675 = vmatpush.msrb.mxu2 %v7648_v16  ;;  %v7759_v16 = vld [vmem:[#allocation10 + $0x180] sm:$0xff] }
 0x64e   : > { %v6870_v9 = vadd.f32 %v6834_v2, %v6757_v33  ;;  %v7876_v33 = vld [vmem:[#allocation10 + $0x220] sm:$0xff] }
 0x64f   : > { %v6727_v3 = vpop.f32.mrf.mxu2  ;;  %7899 = vmatpush.msrb.mxu0 %v7876_v33  ;;  %7676 = vmatpush.msrb.mxu2 %v7647_v40 }
 0x650   : > { %v6837_v31 = vpop.f32.mrf.mxu3  ;;  %v12456_v32 = vpop.f32.mrf.mxu0  ;;  %v12459_v5 = vadd.f32 %v12426_v59, %v6870_v9  ;;  %v7456_v59 = vld [vmem:[#allocation10 + $0x20] sm:$0xff] }
 0x651   : > { %v6611_v39 = vpop.f32.mrf.mxu1  ;;  %7576 = vmatpush.msrb.mxu1 %v7456_v59 }
 0x652   : > { %v6645_v6 = vadd.f32 %v6611_v39, %v12269_v0  ;;  %v7761_v39 = vld [vmem:[#allocation10 + $0x190] sm:$0xff] }
 0x653   : > { %7062 = vmatmul.f32.gmra.mxu1 %v8874_v52  ;;  %7543 = vmatmul.f32.gmra.mxu0 %v12462_v44 }
 0x654   : > { %v6758_v24 = vadd.f32 %v6724_v4, %v6645_v6  ;;  %7181 = vmatmul.f32.gmra.mxu2 %v8875_v8  ;;  %v7875_v6 = vld [vmem:[#allocation10 + $0x218] sm:$0xff]  ;;  %7788 = vmatpush.msrb.mxu3 %v7761_v39 }
 0x655   : > { %7291 = vmatmul.f32.gmra.mxu3 %v12298_v18  ;;  %v8876_v18 = vld [vmem:[#allocation4 + $0xf0] sm:$0xff]  ;;  %7900 = vmatpush.msrb.mxu0 %v7875_v6 }
 0x656   : > { %v6871_v7 = vadd.f32 %v6837_v31, %v6758_v24  ;;  %v12483_v31 = vld [vmem:[#allocation4 + $0x159] sm:$0xff] }
 0x657   : > { %v6730_v1 = vpop.f32.mrf.mxu2  ;;  %7901 = vmatpush.msrb.mxu0 %v7874_v22 }
 0x658   : > { %v6840_v0 = vpop.f32.mrf.mxu3  ;;  %v12466_v53 = vpop.f32.mrf.mxu0  ;;  %v12469_v2 = vadd.f32 %v12436_v54, %v6871_v7  ;;  %v7455_v54 = vld [vmem:[#allocation10 + $0x18] sm:$0xff] }
 0x659   : > { %v6614_v4 = vpop.f32.mrf.mxu1  ;;  %7577 = vmatpush.msrb.mxu1 %v7455_v54 }
 0x65a   : > { %v6646_v49 = vadd.f32 %v6614_v4, %v12281_v42  ;;  %v7760_v4 = vld [vmem:[#allocation10 + $0x188] sm:$0xff] }
 0x65b   : > { %7065 = vmatmul.f32.gmra.mxu1 %v8876_v18  ;;  %7546 = vmatmul.f32.gmra.mxu0 %v12472_v28  ;;  %v7453_v18 = vld [vmem:[#allocation10 + $0x8] sm:$0xff] }
 0x65c   : > { %v6759_v15 = vadd.f32 %v6727_v3, %v6646_v49  ;;  %7184 = vmatmul.f32.gmra.mxu2 %v12344_v26  ;;  %v7646_v49 = vld [vmem:[#allocation10 + $0x100] sm:$0xff]  ;;  %7789 = vmatpush.msrb.mxu3 %v7760_v4 }
 0x65d   : > { %7294 = vmatmul.f32.gmra.mxu3 %v12310_v60  ;;  %v8877_v60 = vld [vmem:[#allocation4 + $0xf8] sm:$0xff]  ;;  %7677 = vmatpush.msrb.mxu2 %v7646_v49 }
 0x65e   : > { %v6872_v62 = vadd.f32 %v6840_v0, %v6759_v15  ;;  %v7873_v0 = vld [vmem:[#allocation10 + $0x208] sm:$0xff]  ;;  %7790 = vmatpush.msrb.mxu3 %v7759_v16 }
 0x65f   : > { %v6733_v47 = vpop.f32.mrf.mxu2  ;;  %7902 = vmatpush.msrb.mxu0 %v7873_v0  ;;  %v12525_v4 = vld [vmem:[#allocation4 + $0x179] sm:$0xff] }
 0x660   : > { %v6843_v42 = vpop.f32.mrf.mxu3  ;;  %v12477_v13 = vpop.f32.mrf.mxu0  ;;  %v12480_v9 = vadd.f32 %v12446_v34, %v6872_v62  ;;  %v7454_v34 = vld [vmem:[#allocation10 + $0x10] sm:$0xff] }
 0x661   : > { %v6617_v3 = vpop.f32.mrf.mxu1  ;;  %7578 = vmatpush.msrb.mxu1 %v7454_v34 }
 0x662   : > { %v6647_v26 = vadd.f32 %v6617_v3, %v12295_v38  ;;  %v7452_v3 = vld [vmem:[#allocation10] sm:$0xff] }
 0x663   : > { %7068 = vmatmul.f32.gmra.mxu1 %v8877_v60  ;;  %7549 = vmatmul.f32.gmra.mxu0 %v12483_v31 }
 0x664   : > { %v6760_v51 = vadd.f32 %v6730_v1, %v6647_v26  ;;  %7187 = vmatmul.f32.gmra.mxu2 %v12360_v14  ;;  %v12492_v1 = vld [vmem:[#allocation4 + $0x161] sm:$0xff]  ;;  %7579 = vmatpush.msrb.mxu1 %v7453_v18 }
 0x665   : > { %7297 = vmatmul.f32.gmra.mxu3 %v12323_v23 }
 0x666   : > { %v6873_v52 = vadd.f32 %v6843_v42, %v6760_v51  ;;  %7580 = vmatpush.msrb.mxu1 %v7452_v3  ;;  %v12538_v3 = vld [vmem:[#allocation4 + $0x120] sm:$0xff] }
 0x667   : > { %v6736_v24 = vpop.f32.mrf.mxu2 }
 0x668   : > { %v6846_v38 = vpop.f32.mrf.mxu3  ;;  %v6965_v8 = vpop.f32.mrf.mxu0  ;;  %v12489_v59 = vadd.f32 %v12456_v32, %v6873_v52  ;;  %v7872_v32 = vld [vmem:[#allocation10 + $0x200] sm:$0xff] }
 0x669   : > { %v6620_v7 = vpop.f32.mrf.mxu1  ;;  %7903 = vmatpush.msrb.mxu0 %v7872_v32  ;;  %v12512_v52 = vld [vmem:[#allocation4 + $0x171] sm:$0xff]  ;;  %v12530_v32 = vld [vmem:[#allocation4 + $0x122] sm:$0xff] }
 0x66a   : > { %v6648_v14 = vadd.f32 %v6620_v7, %v12307_v55 }
 0x66b   : > { %7071 = vmatmul.f32.gmra.mxu1 %v12326_v57  ;;  %7552 = vmatmul.f32.gmra.mxu0 %v12492_v1 }
 0x66c   : > { %v6761_v63 = vadd.f32 %v6733_v47, %v6648_v14  ;;  %7190 = vmatmul.f32.gmra.mxu2 %v12373_v27  ;;  %v12502_v47 = vld [vmem:[#allocation4 + $0x169] sm:$0xff] }
 0x66d   : > { %7300 = vmatmul.f32.gmra.mxu3 %v12337_v56 }
 0x66e   : > { %v6874_v55 = vadd.f32 %v6846_v38, %v6761_v63  ;;  %v12517_v38 = vld [vmem:[#allocation4 + $0x11a] sm:$0xff] }
 0x66f   : > { %v6739_v15 = vpop.f32.mrf.mxu2  ;;  %v12523_v63 = vld [vmem:[#allocation4 + $0x118] sm:$0xff] }
 0x670   : > { %v6849_v41 = vpop.f32.mrf.mxu3  ;;  %v6968_v33 = vpop.f32.mrf.mxu0  ;;  %v12499_v54 = vadd.f32 %v12466_v53, %v6874_v55 }
 0x671   : > { %v6623_v62 = vpop.f32.mrf.mxu1 }
 0x672   : > { %v6649_v27 = vadd.f32 %v6623_v62, %v12320_v50  ;;  %v8113_v50 = vld [vmem:[#allocation10 + $0x378] sm:$0xff]  ;;  %v8112_v62 = vld [vmem:[#allocation10 + $0x370] sm:$0xff] }
 0x673   : > { %7074 = vmatmul.f32.gmra.mxu1 %v12340_v29  ;;  %7555 = vmatmul.f32.gmra.mxu0 %v12502_v47 }
 0x674   : > { %v6762_v42 = vadd.f32 %v6736_v24, %v6649_v27  ;;  %7193 = vmatmul.f32.gmra.mxu2 %v12402_v25 }
 0x675   : > { %7303 = vmatmul.f32.gmra.mxu3 %v12353_v12  ;;  %8114 = vmatpush.msra.mxu2 %v8113_v50 }
 0x676   : > { %v6875_v53 = vadd.f32 %v6849_v41, %v6762_v42  ;;  %v8000_v41 = vld [vmem:[#allocation10 + $0x2f8] sm:$0xff] }
 0x677   : > { %v6742_v26 = vpop.f32.mrf.mxu2  ;;  %8001 = vmatpush.msra.mxu1 %v8000_v41  ;;  %8115 = vmatpush.msra.mxu2 %v8112_v62 }
 0x678   : > { %v6852_v60 = vpop.f32.mrf.mxu3  ;;  %v6971_v51 = vpop.f32.mrf.mxu0  ;;  %v12509_v39 = vadd.f32 %v12477_v13, %v6875_v53 }
 0x679   : > { %v6626_v6 = vpop.f32.mrf.mxu1 }
 0x67a   : > { %v6650_v34 = vadd.f32 %v6626_v6, %v12334_v45 }
 0x67b   : > { %7077 = vmatmul.f32.gmra.mxu1 %v12356_v58  ;;  %7558 = vmatmul.f32.gmra.mxu0 %v12512_v52 }
 0x67c   : > { %v6763_v24 = vadd.f32 %v6739_v15, %v6650_v34  ;;  %7196 = vmatmul.f32.gmra.mxu2 %v12412_v61  ;;  %v8339_v34 = vld [vmem:[#allocation10 + $0x478] sm:$0xff] }
 0x67d   : > { %7306 = vmatmul.f32.gmra.mxu3 %v12517_v38  ;;  %8340 = vmatpush.msra.mxu0 %v8339_v34 }
 0x67e   : > { %v6876_v22 = vadd.f32 %v6852_v60, %v6763_v24  ;;  %v7999_v24 = vld [vmem:[#allocation10 + $0x2f0] sm:$0xff] }
 0x67f   : > { %v6745_v13 = vpop.f32.mrf.mxu2  ;;  %8002 = vmatpush.msra.mxu1 %v7999_v24 }
 0x680   : > { %v6855_v40 = vpop.f32.mrf.mxu3  ;;  %v6974_v7 = vpop.f32.mrf.mxu0  ;;  %v12520_v14 = vadd.f32 %v6965_v8, %v6876_v22 }
 0x681   : > { %v6629_v45 = vpop.f32.mrf.mxu1 }
 0x682   : > { %v6651_v0 = vadd.f32 %v6629_v45, %v12350_v30  ;;  %v8226_v30 = vld [vmem:[#allocation10 + $0x3f8] sm:$0xff]  ;;  %v12551_v45 = vld [vmem:[#allocation4 + $0x128] sm:$0xff] }
 0x683   : > { %7080 = vmatmul.f32.gmra.mxu1 %v12523_v63  ;;  %7561 = vmatmul.f32.gmra.mxu0 %v12525_v4 }
 0x684   : > { %v6764_v49 = vadd.f32 %v6742_v26, %v6651_v0  ;;  %7199 = vmatmul.f32.gmra.mxu2 %v12422_v11  ;;  %8227 = vmatpush.msra.mxu3 %v8226_v30  ;;  %v12542_v26 = vld [vmem:[#allocation4 + $0x12a] sm:$0xff]  ;;  %v7998_v30 = vld [vmem:[#allocation10 + $0x2e8] sm:$0xff] }
 0x685   : > { %7309 = vmatmul.f32.gmra.mxu3 %v12530_v32  ;;  %8003 = vmatpush.msra.mxu1 %v7998_v30  ;;  %v8222_v30 = vld [vmem:[#allocation10 + $0x3d8] sm:$0xff] }
 0x686   : > { %v6877_v8 = vadd.f32 %v6855_v40, %v6764_v49 }
 0x687   : > { %v6748_v18 = vpop.f32.mrf.mxu2 }
 0x688   : > { %v6858_v55 = vpop.f32.mrf.mxu3  ;;  %v12533_v15 = vpop.f32.mrf.mxu0  ;;  %v12535_v27 = vadd.f32 %v6968_v33, %v6877_v8 }
 0x689   : > { %v6632_v42 = vpop.f32.mrf.mxu1 }
 0x68a   : > { %v6652_v16 = vadd.f32 %v6632_v42, %v12368_v17  ;;  %v8225_v17 = vld [vmem:[#allocation10 + $0x3f0] sm:$0xff]  ;;  %v8110_v42 = vld [vmem:[#allocation10 + $0x360] sm:$0xff] }
 0x68b   : > { %7083 = vmatmul.f32.gmra.mxu1 %v12538_v3  ;;  %7904 = vmatmul.f32.vlgmr.msrb.gmra.mxu0 %v12402_v25  ;;  %v8111_v25 = vld [vmem:[#allocation10 + $0x368] sm:$0xff] }
 0x68c   : > { %v6765_v53 = vadd.f32 %v6745_v13, %v6652_v16  ;;  %7678 = vmatmul.f32.vlgmr.msrb.gmra.mxu2 %v12323_v23  ;;  %8228 = vmatpush.msra.mxu3 %v8225_v17  ;;  %v7332_v17 = vld [vmem:[#allocation2 + $0xb2] sm:$0xff] }
 0x68d   : > { %7312 = vmatmul.f32.gmra.mxu3 %v12542_v26  ;;  %8116 = vmatpush.msra.mxu2 %v8111_v25 }
 0x68e   : > { %v6878_v33 = vadd.f32 %v6858_v55, %v6765_v53  ;;  %v8224_v55 = vld [vmem:[#allocation10 + $0x3e8] sm:$0xff] }
 0x68f   : > { %v7155_v60 = vpop.f32.mrf.mxu2  ;;  %8229 = vmatpush.msra.mxu3 %v8224_v55  ;;  %8117 = vmatpush.msra.mxu2 %v8110_v42  ;;  %v7333_v42 = vld [vmem:[#allocation2 + $0xba] sm:$0xff] }
 0x690   : > { %v6861_v50 = vpop.f32.mrf.mxu3  ;;  %v12546_v6 = vpop.f32.mrf.mxu0  ;;  %v12548_v22 = vadd.f32 %v6971_v51, %v6878_v33  ;;  %v8223_v33 = vld [vmem:[#allocation10 + $0x3e0] sm:$0xff] }
 0x691   : > { %v6635_v40 = vpop.f32.mrf.mxu1  ;;  %8230 = vmatpush.msra.mxu3 %v8223_v33 }
 0x692   : > { %v6653_v13 = vadd.f32 %v6635_v40, %v12381_v35  ;;  %v8338_v35 = vld [vmem:[#allocation10 + $0x470] sm:$0xff] }
 0x693   : > { %7086 = vmatmul.f32.gmra.mxu1 %v12551_v45  ;;  %7907 = vmatmul.f32.gmra.mxu0 %v12412_v61 }
 0x694   : > { %v6766_v23 = vadd.f32 %v6748_v18, %v6653_v13  ;;  %7681 = vmatmul.f32.gmra.mxu2 %v12337_v56  ;;  %8341 = vmatpush.msra.mxu0 %v8338_v35  ;;  %v12567_v18 = vld [vmem:[%s12990_s6] ss:$0 sm:$0xff] }
 0x695   : > { %7791 = vmatmul.f32.vlgmr.msrb.gmra.mxu3 %v12523_v63 }
 0x696   : > { %v6879_v51 = vadd.f32 %v6861_v50, %v6766_v23  ;;  %v7997_v50 = vld [vmem:[#allocation10 + $0x2e0] sm:$0xff]  ;;  %8231 = vmatpush.msra.mxu3 %v8222_v30 }
 0x697   : > { %v7158_v0 = vpop.f32.mrf.mxu2  ;;  %8004 = vmatpush.msra.mxu1 %v7997_v50 }
 0x698   : > { %v7268_v49 = vpop.f32.mrf.mxu3  ;;  %v12557_v8 = vpop.f32.mrf.mxu0  ;;  %v12559_v41 = vadd.f32 %v6974_v7, %v6879_v51 }
 0x699   : > { %v7042_v62 = vpop.f32.mrf.mxu1 }
 0x69a   : > { %v7090_v61 = vadd.f32 %v7042_v62, %v12399_v43  ;;  %v12574_v43 = vld [vmem:[%s12991_s7] ss:$0 sm:$0xff]  ;;  %v8336_v62 = vld [vmem:[#allocation10 + $0x460] sm:$0xff] }
 0x69b   : > { %7581 = vmatmul.f32.vlgmr.msrb.gmra.mxu1 %v12326_v57  ;;  %7910 = vmatmul.f32.gmra.mxu0 %v12422_v11 }
 0x69c   : > { %v7203_v56 = vadd.f32 %v7155_v60, %v7090_v61  ;;  %7684 = vmatmul.f32.gmra.mxu2 %v12353_v12  ;;  %v8337_v60 = vld [vmem:[#allocation10 + $0x468] sm:$0xff]  ;;  %v8109_v12 = vld [vmem:[#allocation10 + $0x358] sm:$0xff] }
 0x69d   : > { %7794 = vmatmul.f32.gmra.mxu3 %v12538_v3  ;;  %8342 = vmatpush.msra.mxu0 %v8337_v60 }
 0x69e   : > { %v7316_v7 = vadd.f32 %v7268_v49, %v7203_v56  ;;  %8118 = vmatpush.msra.mxu2 %v8109_v12  ;;  %v8335_v12 = vld [vmem:[#allocation10 + $0x458] sm:$0xff] }
 0x69f   : > { %v7161_v16 = vpop.f32.mrf.mxu2  ;;  %8343 = vmatpush.msra.mxu0 %v8336_v62 }
 0x6a0   : > { %v7352_v57 = vmul.f32 %v12567_v18, %v7316_v7  ;;  %v7271_v11 = vpop.f32.mrf.mxu3  ;;  %v12577_v53 = vpop.f32.mrf.mxu0 }
 0x6a1   : > { %v7045_v34 = vpop.f32.mrf.mxu1  ;;  %8344 = vmatpush.msra.mxu0 %v8335_v12 }
 0x6a2   : > { %v7372_v24 = vadd.f32 %v12574_v43, %v7352_v57  ;;  %v7091_v40 = vadd.f32 %v7045_v34, %v12409_v48 }
 0x6a3   : > { %7584 = vmatmul.f32.gmra.mxu1 %v12340_v29  ;;  %7913 = vmatmul.f32.gmra.mxu0 %v12432_v37  ;;  %v7996_v29 = vld [vmem:[#allocation10 + $0x2d8] sm:$0xff] }
 0x6a4   : > { %v7388_v25 = vadd.f32 %v7372_v24, %v7332_v17  ;;  %v7204_v13 = vadd.f32 %v7158_v0, %v7091_v40  ;;  %7687 = vmatmul.f32.gmra.mxu2 %v12517_v38  ;;  %v8108_v0 = vld [vmem:[#allocation10 + $0x350] sm:$0xff]  ;;  %8005 = vmatpush.msra.mxu1 %v7996_v29  ;;  %v8107_v40 = vld [vmem:[#allocation10 + $0x348] sm:$0xff] }
 0x6a5   : > { %7797 = vmatmul.f32.gmra.mxu3 %v12551_v45  ;;  %8119 = vmatpush.msra.mxu2 %v8108_v0  ;;  %v7334_v24 = vld [vmem:[#allocation2 + $0xc2] sm:$0xff]  ;;  %v7335_v0 = vld [vmem:[#allocation2 + $0xca] sm:$0xff] }
 0x6a6   : > { %v7404_v23 = vmax.f32 %v7388_v25, 0.0  ;;  %v7317_v51 = vadd.f32 %v7271_v11, %v7204_v13  ;;  %v12594_v11 = vld [vmem:[#allocation4 + $0x130] sm:$0xff] }
 0x6a7   : > { %v7164_v49 = vpop.f32.mrf.mxu2  ;;  %8120 = vmatpush.msra.mxu2 %v8107_v40  ;;  %v7336_v40 = vld [vmem:[#allocation2 + $0xd2] sm:$0xff] }
 0x6a8   : > { %7420 = vst [vmem:[%s9213_s22 + $0x80] sm:$0xff] %v7404_v23  ;;  %v7353_v55 = vmul.f32 %v12567_v18, %v7317_v51  ;;  %v7274_v35 = vpop.f32.mrf.mxu3  ;;  %v12587_v48 = vpop.f32.mrf.mxu0 }
 0x6a9   : > { %v7048_v37 = vpop.f32.mrf.mxu1 }
 0x6aa   : > { %v7373_v61 = vadd.f32 %v12574_v43, %v7353_v55  ;;  %v7092_v56 = vadd.f32 %v7048_v37, %v12419_v46  ;;  %v12606_v55 = vld [vmem:[#allocation4 + $0x138] sm:$0xff]  ;;  %v8334_v37 = vld [vmem:[#allocation10 + $0x450] sm:$0xff] }
 0x6ab   : > { %7587 = vmatmul.f32.gmra.mxu1 %v12356_v58  ;;  %7916 = vmatmul.f32.gmra.mxu0 %v12442_v36  ;;  %v8221_v58 = vld [vmem:[#allocation10 + $0x3d0] sm:$0xff] }
 0x6ac   : > { %v7389_v7 = vadd.f32 %v7373_v61, %v7333_v42  ;;  %v7205_v57 = vadd.f32 %v7161_v16, %v7092_v56  ;;  %7690 = vmatmul.f32.gmra.mxu2 %v12530_v32  ;;  %v7995_v36 = vld [vmem:[#allocation10 + $0x2d0] sm:$0xff]  ;;  %8232 = vmatpush.msra.mxu3 %v8221_v58  ;;  %v8106_v61 = vld [vmem:[#allocation10 + $0x340] sm:$0xff] }
 0x6ad   : > { %7800 = vmatmul.f32.gmra.mxu3 %v12594_v11  ;;  %8006 = vmatpush.msra.mxu1 %v7995_v36 }
 0x6ae   : > { %v7405_v33 = vmax.f32 %v7389_v7, 0.0  ;;  %v7318_v60 = vadd.f32 %v7274_v35, %v7205_v57  ;;  %8345 = vmatpush.msra.mxu0 %v8334_v37  ;;  %8121 = vmatpush.msra.mxu2 %v8106_v61  ;;  %v12616_v57 = vld [vmem:[#allocation4 + $0x132] sm:$0xff]  ;;  %v7337_v61 = vld [vmem:[#allocation2 + $0xda] sm:$0xff] }
 0x6af   : > { %v7167_v50 = vpop.f32.mrf.mxu2 }
 0x6b0   : > { %7421 = vst [vmem:[%s9213_s22 + $0x88] sm:$0xff] %v7405_v33  ;;  %v7354_v46 = vmul.f32 %v12567_v18, %v7318_v60  ;;  %v7277_v17 = vpop.f32.mrf.mxu3  ;;  %v12599_v34 = vpop.f32.mrf.mxu0 }
 0x6b1   : > { %v7051_v16 = vpop.f32.mrf.mxu1 }
 0x6b2   : > { %v7374_v25 = vadd.f32 %v12574_v43, %v7354_v46  ;;  %v7093_v13 = vadd.f32 %v7051_v16, %v12429_v10  ;;  %v12620_v46 = vld [vmem:[#allocation4 + $0x140] sm:$0xff] }
 0x6b3   : > { %7590 = vmatmul.f32.gmra.mxu1 %v12523_v63  ;;  %7919 = vmatmul.f32.gmra.mxu0 %v12452_v21  ;;  %v8220_v63 = vld [vmem:[#allocation10 + $0x3c8] sm:$0xff] }
 0x6b4   : > { %v7390_v23 = vadd.f32 %v7374_v25, %v7334_v24  ;;  %v7206_v51 = vadd.f32 %v7164_v49, %v7093_v13  ;;  %7693 = vmatmul.f32.gmra.mxu2 %v12542_v26  ;;  %v7994_v21 = vld [vmem:[#allocation10 + $0x2c8] sm:$0xff]  ;;  %8233 = vmatpush.msra.mxu3 %v8220_v63  ;;  %v8219_v24 = vld [vmem:[#allocation10 + $0x3c0] sm:$0xff]  ;;  %v8105_v25 = vld [vmem:[#allocation10 + $0x338] sm:$0xff] }
 0x6b5   : > { %7803 = vmatmul.f32.gmra.mxu3 %v12606_v55  ;;  %8007 = vmatpush.msra.mxu1 %v7994_v21  ;;  %v8333_v16 = vld [vmem:[#allocation10 + $0x448] sm:$0xff] }
 0x6b6   : > { %v7406_v35 = vmax.f32 %v7390_v23, 0.0  ;;  %v7319_v30 = vadd.f32 %v7277_v17, %v7206_v51  ;;  %8234 = vmatpush.msra.mxu3 %v8219_v24  ;;  %8346 = vmatpush.msra.mxu0 %v8333_v16  ;;  %v12630_v51 = vld [vmem:[#allocation4 + $0x13a] sm:$0xff] }
 0x6b7   : > { %v7170_v62 = vpop.f32.mrf.mxu2  ;;  %8122 = vmatpush.msra.mxu2 %v8105_v25  ;;  %v8331_v25 = vld [vmem:[#allocation10 + $0x438] sm:$0xff] }
 0x6b8   : > { %7422 = vst [vmem:[%s9213_s22 + $0x90] sm:$0xff] %v7406_v35  ;;  %v7355_v10 = vmul.f32 %v12567_v18, %v7319_v30  ;;  %v7280_v29 = vpop.f32.mrf.mxu3  ;;  %v12611_v42 = vpop.f32.mrf.mxu0 }
 0x6b9   : > { %v7054_v49 = vpop.f32.mrf.mxu1 }
 0x6ba   : > { %v7375_v56 = vadd.f32 %v12574_v43, %v7355_v10  ;;  %v7094_v7 = vadd.f32 %v7054_v49, %v12439_v20  ;;  %v12634_v10 = vld [vmem:[#allocation4 + $0x148] sm:$0xff]  ;;  %v8332_v49 = vld [vmem:[#allocation10 + $0x440] sm:$0xff] }
 0x6bb   : > { %7593 = vmatmul.f32.gmra.mxu1 %v12538_v3  ;;  %7922 = vmatmul.f32.gmra.mxu0 %v12462_v44  ;;  %v7993_v44 = vld [vmem:[#allocation10 + $0x2c0] sm:$0xff] }
 0x6bc   : > { %v7391_v33 = vadd.f32 %v7375_v56, %v7335_v0  ;;  %v7207_v60 = vadd.f32 %v7167_v50, %v7094_v7  ;;  %7696 = vmatmul.f32.gmra.mxu2 %v12616_v57  ;;  %8008 = vmatpush.msra.mxu1 %v7993_v44  ;;  %v8218_v0 = vld [vmem:[#allocation10 + $0x3b8] sm:$0xff]  ;;  %v8104_v56 = vld [vmem:[#allocation10 + $0x330] sm:$0xff] }
 0x6bd   : > { %7806 = vmatmul.f32.gmra.mxu3 %v12620_v46  ;;  %8347 = vmatpush.msra.mxu0 %v8332_v49 }
 0x6be   : > { %v7407_v17 = vmax.f32 %v7391_v33, 0.0  ;;  %v7320_v58 = vadd.f32 %v7280_v29, %v7207_v60  ;;  %8235 = vmatpush.msra.mxu3 %v8218_v0  ;;  %8123 = vmatpush.msra.mxu2 %v8104_v56  ;;  %v12644_v60 = vld [vmem:[#allocation4 + $0x142] sm:$0xff] }
 0x6bf   : > { %v7173_v12 = vpop.f32.mrf.mxu2  ;;  %8348 = vmatpush.msra.mxu0 %v8331_v25  ;;  %v8216_v56 = vld [vmem:[#allocation10 + $0x3a8] sm:$0xff] }
 0x6c0   : > { %7423 = vst [vmem:[%s9213_s22 + $0x98] sm:$0xff] %v7407_v17  ;;  %v7356_v20 = vmul.f32 %v12567_v18, %v7320_v58  ;;  %v7283_v36 = vpop.f32.mrf.mxu3  ;;  %v12625_v3 = vpop.f32.mrf.mxu0 }
 0x6c1   : > { %v7057_v50 = vpop.f32.mrf.mxu1 }
 0x6c2   : > { %v7376_v13 = vadd.f32 %v12574_v43, %v7356_v20  ;;  %v7095_v23 = vadd.f32 %v7057_v50, %v12449_v19  ;;  %v12648_v20 = vld [vmem:[#allocation4 + $0x150] sm:$0xff]  ;;  %v8217_v50 = vld [vmem:[#allocation10 + $0x3b0] sm:$0xff] }
 0x6c3   : > { %7596 = vmatmul.f32.gmra.mxu1 %v12551_v45  ;;  %7925 = vmatmul.f32.gmra.mxu0 %v12472_v28  ;;  %v7992_v28 = vld [vmem:[#allocation10 + $0x2b8] sm:$0xff] }
 0x6c4   : > { %v7392_v35 = vadd.f32 %v7376_v13, %v7336_v40  ;;  %v7208_v30 = vadd.f32 %v7170_v62, %v7095_v23  ;;  %7699 = vmatmul.f32.gmra.mxu2 %v12630_v51  ;;  %8009 = vmatpush.msra.mxu1 %v7992_v28  ;;  %v7338_v13 = vld [vmem:[#allocation2 + $0xe2] sm:$0xff] }
 0x6c5   : > { %7809 = vmatmul.f32.gmra.mxu3 %v12634_v10  ;;  %v8103_v23 = vld [vmem:[#allocation10 + $0x328] sm:$0xff] }
 0x6c6   : > { %v7408_v29 = vmax.f32 %v7392_v35, 0.0  ;;  %v7321_v63 = vadd.f32 %v7283_v36, %v7208_v30  ;;  %8236 = vmatpush.msra.mxu3 %v8217_v50  ;;  %8124 = vmatpush.msra.mxu2 %v8103_v23  ;;  %v12676_v50 = vld [vmem:[#allocation4 + $0x160] sm:$0xff] }
 0x6c7   : > { %v7176_v37 = vpop.f32.mrf.mxu2 }
 0x6c8   : > { %7424 = vst [vmem:[%s9213_s22 + $0xa0] sm:$0xff] %v7408_v29  ;;  %v7357_v19 = vmul.f32 %v12567_v18, %v7321_v63  ;;  %v7286_v21 = vpop.f32.mrf.mxu3  ;;  %v12639_v45 = vpop.f32.mrf.mxu0  ;;  %v12658_v29 = vld [vmem:[#allocation4 + $0x14a] sm:$0xff]  ;;  %8237 = vmatpush.msra.mxu3 %v8216_v56 }
 0x6c9   : > { %v7060_v62 = vpop.f32.mrf.mxu1 }
 0x6ca   : > { %v7377_v7 = vadd.f32 %v12574_v43, %v7357_v19  ;;  %v7096_v33 = vadd.f32 %v7060_v62, %v12459_v5 }
 0x6cb   : > { %7599 = vmatmul.f32.gmra.mxu1 %v12594_v11  ;;  %7928 = vmatmul.f32.gmra.mxu0 %v12483_v31  ;;  %v7991_v31 = vld [vmem:[#allocation10 + $0x2b0] sm:$0xff] }
 0x6cc   : > { %v7393_v17 = vadd.f32 %v7377_v7, %v7337_v61  ;;  %v7209_v58 = vadd.f32 %v7173_v12, %v7096_v33  ;;  %7702 = vmatmul.f32.gmra.mxu2 %v12644_v60  ;;  %8010 = vmatpush.msra.mxu1 %v7991_v31  ;;  %v8330_v7 = vld [vmem:[#allocation10 + $0x430] sm:$0xff] }
 0x6cd   : > { %7812 = vmatmul.f32.gmra.mxu3 %v12648_v20  ;;  %v7339_v33 = vld [vmem:[#allocation2 + $0xea] sm:$0xff]  ;;  %8349 = vmatpush.msra.mxu0 %v8330_v7 }
 0x6ce   : > { %v7409_v36 = vmax.f32 %v7393_v17, 0.0  ;;  %v7322_v24 = vadd.f32 %v7286_v21, %v7209_v58  ;;  %v12662_v21 = vld [vmem:[#allocation4 + $0x158] sm:$0xff]  ;;  %v12690_v7 = vld [vmem:[#allocation4 + $0x168] sm:$0xff] }
 0x6cf   : > { %v7179_v16 = vpop.f32.mrf.mxu2  ;;  %v8102_v17 = vld [vmem:[#allocation10 + $0x320] sm:$0xff] }
 0x6d0   : > { %7425 = vst [vmem:[%s9213_s22 + $0xa8] sm:$0xff] %v7409_v36  ;;  %v7358_v5 = vmul.f32 %v12567_v18, %v7322_v24  ;;  %v7289_v44 = vpop.f32.mrf.mxu3  ;;  %v12653_v40 = vpop.f32.mrf.mxu0  ;;  %8125 = vmatpush.msra.mxu2 %v8102_v17  ;;  %v12672_v24 = vld [vmem:[#allocation4 + $0x152] sm:$0xff] }
 0x6d1   : > { %v7063_v12 = vpop.f32.mrf.mxu1  ;;  %v8327_v17 = vld [vmem:[#allocation10 + $0x418] sm:$0xff] }
 0x6d2   : > { %v7378_v35 = vadd.f32 %v12574_v43, %v7358_v5  ;;  %v7097_v30 = vadd.f32 %v7063_v12, %v12469_v2 }
 0x6d3   : > { %7602 = vmatmul.f32.gmra.mxu1 %v12606_v55  ;;  %7931 = vmatmul.f32.gmra.mxu0 %v12492_v1  ;;  %v7990_v1 = vld [vmem:[#allocation10 + $0x2a8] sm:$0xff] }
 0x6d4   : > { %v7394_v63 = vadd.f32 %v7378_v35, %v7338_v13  ;;  %v7210_v19 = vadd.f32 %v7176_v37, %v7097_v30  ;;  %7705 = vmatmul.f32.gmra.mxu2 %v12658_v29  ;;  %8011 = vmatpush.msra.mxu1 %v7990_v1  ;;  %v8215_v35 = vld [vmem:[#allocation10 + $0x3a0] sm:$0xff]  ;;  %v8329_v30 = vld [vmem:[#allocation10 + $0x428] sm:$0xff] }
 0x6d5   : > { %7815 = vmatmul.f32.gmra.mxu3 %v12662_v21  ;;  %8350 = vmatpush.msra.mxu0 %v8329_v30  ;;  %v8328_v1 = vld [vmem:[#allocation10 + $0x420] sm:$0xff]  ;;  %v12700_v30 = vld [vmem:[#allocation4 + $0x162] sm:$0xff] }
 0x6d6   : > { %v7410_v0 = vmax.f32 %v7394_v63, 0.0  ;;  %v7323_v49 = vadd.f32 %v7289_v44, %v7210_v19  ;;  %v7340_v63 = vld [vmem:[#allocation2 + $0xf2] sm:$0xff]  ;;  %8238 = vmatpush.msra.mxu3 %v8215_v35 }
 0x6d7   : > { %v7182_v28 = vpop.f32.mrf.mxu2  ;;  %v8101_v19 = vld [vmem:[#allocation10 + $0x318] sm:$0xff]  ;;  %8351 = vmatpush.msra.mxu0 %v8328_v1 }
 0x6d8   : > { %7426 = vst [vmem:[%s9213_s22 + $0xb0] sm:$0xff] %v7410_v0  ;;  %v7359_v2 = vmul.f32 %v12567_v18, %v7323_v49  ;;  %v7292_v61 = vpop.f32.mrf.mxu3  ;;  %v12667_v62 = vpop.f32.mrf.mxu0  ;;  %8126 = vmatpush.msra.mxu2 %v8101_v19 }
 0x6d9   : > { %v7066_v37 = vpop.f32.mrf.mxu1  ;;  %8352 = vmatpush.msra.mxu0 %v8327_v17  ;;  %v7987_v17 = vld [vmem:[#allocation10 + $0x290] sm:$0xff] }
 0x6da   : > { %v7379_v58 = vadd.f32 %v12574_v43, %v7359_v2  ;;  %v7098_v36 = vadd.f32 %v7066_v37, %v12480_v9  ;;  %v12686_v2 = vld [vmem:[#allocation4 + $0x15a] sm:$0xff] }
 0x6db   : > { %7605 = vmatmul.f32.gmra.mxu1 %v12620_v46  ;;  %7934 = vmatmul.f32.gmra.mxu0 %v12502_v47  ;;  %v7989_v47 = vld [vmem:[#allocation10 + $0x2a0] sm:$0xff] }
 0x6dc   : > { %v7395_v5 = vadd.f32 %v7379_v58, %v7339_v33  ;;  %v7211_v44 = vadd.f32 %v7179_v16, %v7098_v36  ;;  %7708 = vmatmul.f32.gmra.mxu2 %v12672_v24  ;;  %8012 = vmatpush.msra.mxu1 %v7989_v47  ;;  %v8099_v47 = vld [vmem:[#allocation10 + $0x308] sm:$0xff] }
 0x6dd   : > { %7818 = vmatmul.f32.gmra.mxu3 %v12676_v50 }
 0x6de   : > { %v7411_v25 = vmax.f32 %v7395_v5, 0.0  ;;  %v7324_v31 = vadd.f32 %v7292_v61, %v7211_v44  ;;  %v8100_v44 = vld [vmem:[#allocation10 + $0x310] sm:$0xff] }
 0x6df   : > { %v7185_v13 = vpop.f32.mrf.mxu2  ;;  %8127 = vmatpush.msra.mxu2 %v8100_v44 }
 0x6e0   : > { %7427 = vst [vmem:[%s9213_s22 + $0xb8] sm:$0xff] %v7411_v25  ;;  %v7360_v9 = vmul.f32 %v12567_v18, %v7324_v31  ;;  %v7295_v12 = vpop.f32.mrf.mxu3  ;;  %v12681_v23 = vpop.f32.mrf.mxu0  ;;  %v7341_v25 = vld [vmem:[#allocation2 + $0xfa] sm:$0xff] }
 0x6e1   : > { %v7069_v16 = vpop.f32.mrf.mxu1  ;;  %8128 = vmatpush.msra.mxu2 %v8099_v47 }
 0x6e2   : > { %v7380_v0 = vadd.f32 %v12574_v43, %v7360_v9  ;;  %v7099_v49 = vadd.f32 %v7069_v16, %v12489_v59  ;;  %v8326_v9 = vld [vmem:[#allocation10 + $0x410] sm:$0xff] }
 0x6e3   : > { %7608 = vmatmul.f32.gmra.mxu1 %v12634_v10  ;;  %7937 = vmatmul.f32.gmra.mxu0 %v12512_v52  ;;  %v8214_v52 = vld [vmem:[#allocation10 + $0x398] sm:$0xff] }
 0x6e4   : > { %v7396_v61 = vadd.f32 %v7380_v0, %v7340_v63  ;;  %v7212_v56 = vadd.f32 %v7182_v28, %v7099_v49  ;;  %7711 = vmatmul.f32.gmra.mxu2 %v12686_v2  ;;  %v7988_v28 = vld [vmem:[#allocation10 + $0x298] sm:$0xff]  ;;  %8239 = vmatpush.msra.mxu3 %v8214_v52  ;;  %v8325_v63 = vld [vmem:[#allocation10 + $0x408] sm:$0xff]  ;;  %v8324_v49 = vld [vmem:[#allocation10 + $0x400] sm:$0xff] }
 0x6e5   : > { %7821 = vmatmul.f32.gmra.mxu3 %v12690_v7  ;;  %8013 = vmatpush.msra.mxu1 %v7988_v28  ;;  %v12704_v0 = vld [vmem:[#allocation4 + $0x170] sm:$0xff] }
 0x6e6   : > { %v7412_v33 = vmax.f32 %v7396_v61, 0.0  ;;  %v7325_v59 = vadd.f32 %v7295_v12, %v7212_v56  ;;  %8353 = vmatpush.msra.mxu0 %v8326_v9 }
 0x6e7   : > { %v7188_v37 = vpop.f32.mrf.mxu2  ;;  %8014 = vmatpush.msra.mxu1 %v7987_v17  ;;  %v12729_v17 = vld [vmem:[#allocation4 + $0x189] sm:$0xff] }
 0x6e8   : > { %7428 = vst [vmem:[%s9213_s22 + $0xc0] sm:$0xff] %v7412_v33  ;;  %v7361_v58 = vmul.f32 %v12567_v18, %v7325_v59  ;;  %v7298_v36 = vpop.f32.mrf.mxu3  ;;  %v12695_v5 = vpop.f32.mrf.mxu0  ;;  %8354 = vmatpush.msra.mxu0 %v8325_v63  ;;  %v8213_v59 = vld [vmem:[#allocation10 + $0x390] sm:$0xff] }
 0x6e9   : > { %v7072_v31 = vpop.f32.mrf.mxu1  ;;  %8240 = vmatpush.msra.mxu3 %v8213_v59 }
 0x6ea   : > { %v7381_v12 = vadd.f32 %v12574_v43, %v7361_v58  ;;  %v7100_v35 = vadd.f32 %v7072_v31, %v12499_v54  ;;  %v8098_v54 = vld [vmem:[#allocation10 + $0x300] sm:$0xff]  ;;  %8355 = vmatpush.msra.mxu0 %v8324_v49  ;;  %v7342_v58 = vld [vmem:[#allocation2 + $0x102] sm:$0xff] }
 0x6eb   : > { %7611 = vmatmul.f32.gmra.mxu1 %v12648_v20  ;;  %7940 = vmatmul.f32.gmra.mxu0 %v12525_v4  ;;  %v8212_v31 = vld [vmem:[#allocation10 + $0x388] sm:$0xff] }
 0x6ec   : > { %v7397_v16 = vadd.f32 %v7381_v12, %v7341_v25  ;;  %v7213_v19 = vadd.f32 %v7185_v13, %v7100_v35  ;;  %7714 = vmatmul.f32.gmra.mxu2 %v12700_v30  ;;  %v12716_v25 = vld [vmem:[#allocation4 + $0x16a] sm:$0xff]  ;;  %v12720_v35 = vld [vmem:[#allocation4 + $0x178] sm:$0xff]  ;;  %8241 = vmatpush.msra.mxu3 %v8212_v31 }
 0x6ed   : > { %7824 = vmatmul.f32.gmra.mxu3 %v12704_v0  ;;  %8129 = vmatpush.msra.mxu2 %v8098_v54 }
 0x6ee   : > { %v7413_v61 = vmax.f32 %v7397_v16, 0.0  ;;  %v7326_v56 = vadd.f32 %v7298_v36, %v7213_v19  ;;  %v12713_v36 = vld [vmem:[#allocation4 + $0x181] sm:$0xff] }
 0x6ef   : > { %v7191_v1 = vpop.f32.mrf.mxu2 }
 0x6f0   : > { %7429 = vst [vmem:[%s9213_s22 + $0xc8] sm:$0xff] %v7413_v61  ;;  %v7362_v4 = vmul.f32 %v12567_v18, %v7326_v56  ;;  %v7301_v33 = vpop.f32.mrf.mxu3  ;;  %v12709_v13 = vpop.f32.mrf.mxu0  ;;  %v7986_v61 = vld [vmem:[#allocation10 + $0x288] sm:$0xff] }
 0x6f1   : > { %v7075_v52 = vpop.f32.mrf.mxu1  ;;  %8015 = vmatpush.msra.mxu1 %v7986_v61 }
 0x6f2   : > { %v7382_v28 = vadd.f32 %v12574_v43, %v7362_v4  ;;  %v7101_v44 = vadd.f32 %v7075_v52, %v12509_v39  ;;  %v8211_v39 = vld [vmem:[#allocation10 + $0x380] sm:$0xff] }
 0x6f3   : > { %7614 = vmatmul.f32.gmra.mxu1 %v12662_v21  ;;  %7943 = vmatmul.f32.gmra.mxu0 %v12713_v36 }
 0x6f4   : > { %v7398_v9 = vadd.f32 %v7382_v28, %v7342_v58  ;;  %v7214_v12 = vadd.f32 %v7188_v37, %v7101_v44  ;;  %7717 = vmatmul.f32.gmra.mxu2 %v12716_v25  ;;  %8242 = vmatpush.msra.mxu3 %v8211_v39  ;;  %v7343_v37 = vld [vmem:[#allocation2 + $0x10a] sm:$0xff]  ;;  %v12736_v28 = vld [vmem:[#allocation4 + $0x180] sm:$0xff]  ;;  %v7985_v44 = vld [vmem:[#allocation10 + $0x280] sm:$0xff] }
 0x6f5   : > { %7827 = vmatmul.f32.gmra.mxu3 %v12720_v35  ;;  %8016 = vmatpush.msra.mxu1 %v7985_v44 }
 0x6f6   : > { %v7414_v47 = vmax.f32 %v7398_v9, 0.0  ;;  %v7327_v63 = vadd.f32 %v7301_v33, %v7214_v12  ;;  %v12732_v33 = vld [vmem:[#allocation4 + $0x172] sm:$0xff] }
 0x6f7   : > { %v7194_v16 = vpop.f32.mrf.mxu2 }
 0x6f8   : > { %7430 = vst [vmem:[%s9213_s22 + $0xd0] sm:$0xff] %v7414_v47  ;;  %v7363_v19 = vmul.f32 %v12567_v18, %v7327_v63  ;;  %v7304_v54 = vpop.f32.mrf.mxu3  ;;  %v12725_v49 = vpop.f32.mrf.mxu0  ;;  %v7344_v63 = vld [vmem:[#allocation2 + $0x112] sm:$0xff] }
 0x6f9   : > { %13117 = vst [vmem:[#allocation33_spill] sm:$0xff] %v12725_v49  ;;  %v7078_v56 = vpop.f32.mrf.mxu1 }
 0x6fa   : > { %v7383_v4 = vadd.f32 %v12574_v43, %v7363_v19  ;;  %v7102_v59 = vadd.f32 %v7078_v56, %v12520_v14 }
 0x6fb   : > { %7617 = vmatmul.f32.gmra.mxu1 %v12676_v50  ;;  %7946 = vmatmul.f32.gmra.mxu0 %v12729_v17 }
 0x6fc   : > { %v7399_v58 = vadd.f32 %v7383_v4, %v7343_v37  ;;  %v7215_v52 = vadd.f32 %v7191_v1, %v7102_v59  ;;  %7720 = vmatmul.f32.gmra.mxu2 %v12732_v33  ;;  %v12745_v37 = vld [vmem:[#allocation4 + $0x191] sm:$0xff]  ;;  %v12752_v59 = vld [vmem:[#allocation4 + $0x188] sm:$0xff] }
 0x6fd   : > { %7830 = vmatmul.f32.gmra.mxu3 %v12736_v28 }
 0x6fe   : > { %v7415_v31 = vmax.f32 %v7399_v58, 0.0  ;;  %v7328_v9 = vadd.f32 %v7304_v54, %v7215_v52  ;;  %v12748_v54 = vld [vmem:[#allocation4 + $0x17a] sm:$0xff] }
 0x6ff   : > { %v7197_v14 = vpop.f32.mrf.mxu2 }
 0x700   : > { %7431 = vst [vmem:[%s9213_s22 + $0xd8] sm:$0xff] %v7415_v31  ;;  %v7364_v12 = vmul.f32 %v12567_v18, %v7328_v9  ;;  %v7307_v39 = vpop.f32.mrf.mxu3  ;;  %v12741_v47 = vpop.f32.mrf.mxu0 }
 0x701   : > { %13118 = vst [vmem:[#allocation36_spill] sm:$0xff] %v12741_v47  ;;  %v7081_v1 = vpop.f32.mrf.mxu1 }
 0x702   : > { %v7384_v19 = vadd.f32 %v12574_v43, %v7364_v12  ;;  %v7103_v61 = vadd.f32 %v7081_v1, %v12535_v27  ;;  %v7345_v12 = vld [vmem:[#allocation2 + $0x11a] sm:$0xff] }
 0x703   : > { %7620 = vmatmul.f32.gmra.mxu1 %v12690_v7  ;;  %7949 = vmatmul.f32.gmra.mxu0 %v12745_v37 }
 0x704   : > { %v7400_v56 = vadd.f32 %v7384_v19, %v7344_v63  ;;  %v7216_v4 = vadd.f32 %v7194_v16, %v7103_v61  ;;  %7723 = vmatmul.f32.gmra.mxu2 %v12748_v54 }
 0x705   : > { %7833 = vmatmul.f32.gmra.mxu3 %v12752_v59 }
 0x706   : > { %v7416_v58 = vmax.f32 %v7400_v56, 0.0  ;;  %v7329_v52 = vadd.f32 %v7307_v39, %v7216_v4  ;;  %v12761_v39 = vld [vmem:[#allocation4 + $0x190] sm:$0xff] }
 0x707   : > { %v7200_v44 = vpop.f32.mrf.mxu2 }
 0x708   : > { %7432 = vst [vmem:[%s9213_s22 + $0xe0] sm:$0xff] %v7416_v58  ;;  %v7365_v27 = vmul.f32 %v12567_v18, %v7329_v52  ;;  %v7310_v31 = vpop.f32.mrf.mxu3  ;;  %v7905_v9 = vpop.f32.mrf.mxu0 }
 0x709   : > { %v7084_v1 = vpop.f32.mrf.mxu1 }
 0x70a   : > { %v7385_v63 = vadd.f32 %v12574_v43, %v7365_v27  ;;  %v7104_v16 = vadd.f32 %v7084_v1, %v12548_v22  ;;  %v7346_v1 = vld [vmem:[#allocation2 + $0x122] sm:$0xff] }
 0x70b   : > { %7623 = vmatmul.f32.gmra.mxu1 %v12704_v0  ;;  %8356 = vmatmul.f32.vlgmr.msra.gmra.mxu0 %v12616_v57 }
 0x70c   : > { %v7401_v19 = vadd.f32 %v7385_v63, %v7345_v12  ;;  %v7217_v61 = vadd.f32 %v7197_v14, %v7104_v16  ;;  %8130 = vmatmul.f32.vlgmr.msra.gmra.mxu2 %v12594_v11 }
 0x70d   : > { %7836 = vmatmul.f32.gmra.mxu3 %v12761_v39 }
 0x70e   : > { %v7417_v56 = vmax.f32 %v7401_v19, 0.0  ;;  %v7330_v4 = vadd.f32 %v7310_v31, %v7217_v61  ;;  %v8878_v31 = vld [vmem:[#allocation4 + $0x131] sm:$0xff] }
 0x70f   : > { %v7679_v58 = vpop.f32.mrf.mxu2 }
 0x710   : > { %7433 = vst [vmem:[%s9213_s22 + $0xe8] sm:$0xff] %v7417_v56  ;;  %v7366_v52 = vmul.f32 %v12567_v18, %v7330_v4  ;;  %v7313_v27 = vpop.f32.mrf.mxu3  ;;  %v7908_v22 = vpop.f32.mrf.mxu0 }
 0x711   : > { %v7087_v47 = vpop.f32.mrf.mxu1 }
 0x712   : > { %v7386_v12 = vadd.f32 %v12574_v43, %v7366_v52  ;;  %v7105_v14 = vadd.f32 %v7087_v47, %v12559_v41  ;;  %v7347_v41 = vld [vmem:[#allocation2 + $0x12a] sm:$0xff] }
 0x713   : > { %7626 = vmatmul.f32.gmra.mxu1 %v12720_v35  ;;  %8359 = vmatmul.f32.gmra.mxu0 %v12630_v51 }
 0x714   : > { %v7402_v11 = vadd.f32 %v7386_v12, %v7346_v1  ;;  %v7218_v63 = vadd.f32 %v7200_v44, %v7105_v14  ;;  %8133 = vmatmul.f32.gmra.mxu2 %v12606_v55 }
 0x715   : > { %8243 = vmatmul.f32.vlgmr.msra.gmra.mxu3 %v8878_v31 }
 0x716   : > { %v7418_v16 = vmax.f32 %v7402_v11, 0.0  ;;  %v7331_v19 = vadd.f32 %v7313_v27, %v7218_v63  ;;  %v8879_v27 = vld [vmem:[#allocation4 + $0x139] sm:$0xff] }
 0x717   : > { %v7682_v61 = vpop.f32.mrf.mxu2 }
 0x718   : > { %7434 = vst [vmem:[%s9213_s22 + $0xf0] sm:$0xff] %v7418_v16  ;;  %v7367_v56 = vmul.f32 %v12567_v18, %v7331_v19  ;;  %v7792_v4 = vpop.f32.mrf.mxu3  ;;  %v7911_v52 = vpop.f32.mrf.mxu0 }
 0x719   : > { %v7582_v47 = vpop.f32.mrf.mxu1 }
 0x71a   : > { %v7387_v49 = vadd.f32 %v12574_v43, %v7367_v56  ;;  %v7583_v1 = vadd.f32 %v7582_v47, %v12533_v15 }
 0x71b   : > { %8017 = vmatmul.f32.vlgmr.msra.gmra.mxu1 %v12517_v38  ;;  %8362 = vmatmul.f32.gmra.mxu0 %v12644_v60 }
 0x71c   : > { %v7403_v55 = vadd.f32 %v7387_v49, %v7347_v41  ;;  %v7727_v44 = vadd.f32 %v7679_v58, %v7583_v1  ;;  %8136 = vmatmul.f32.gmra.mxu2 %v12620_v46  ;;  %v8880_v46 = vld [vmem:[#allocation4 + $0x141] sm:$0xff] }
 0x71d   : > { %8246 = vmatmul.f32.gmra.mxu3 %v8879_v27 }
 0x71e   : > { %v7419_v18 = vmax.f32 %v7403_v55, 0.0  ;;  %v7840_v12 = vadd.f32 %v7792_v4, %v7727_v44 }
 0x71f   : > { %v7685_v14 = vpop.f32.mrf.mxu2 }
 0x720   : > { %7435 = vst [vmem:[%s9213_s22 + $0xf8] sm:$0xff] %v7419_v18  ;;  %v7795_v11 = vpop.f32.mrf.mxu3  ;;  %v7914_v63 = vpop.f32.mrf.mxu0  ;;  %v12780_v31 = vadd.f32 %v7905_v9, %v7840_v12 }
 0x721   : > { %v7585_v43 = vpop.f32.mrf.mxu1 }
 0x722   : > { %v7586_v15 = vadd.f32 %v7585_v43, %v12546_v6  ;;  %v8881_v6 = vld [vmem:[#allocation4 + $0x149] sm:$0xff] }
 0x723   : > { %8020 = vmatmul.f32.gmra.mxu1 %v12530_v32  ;;  %8365 = vmatmul.f32.gmra.mxu0 %v12658_v29 }
 0x724   : > { %v7728_v38 = vadd.f32 %v7682_v61, %v7586_v15  ;;  %8139 = vmatmul.f32.gmra.mxu2 %v12634_v10 }
 0x725   : > { %8249 = vmatmul.f32.gmra.mxu3 %v8880_v46 }
 0x726   : > { %v7841_v49 = vadd.f32 %v7795_v11, %v7728_v38 }
 0x727   : > { %v7688_v58 = vpop.f32.mrf.mxu2 }
 0x728   : > { %v7798_v16 = vpop.f32.mrf.mxu3  ;;  %v7917_v19 = vpop.f32.mrf.mxu0  ;;  %v12786_v56 = vadd.f32 %v7908_v22, %v7841_v49 }
 0x729   : > { %v7588_v9 = vpop.f32.mrf.mxu1 }
 0x72a   : > { %v7589_v4 = vadd.f32 %v7588_v9, %v12557_v8  ;;  %v8882_v8 = vld [vmem:[#allocation4 + $0x151] sm:$0xff] }
 0x72b   : > { %8023 = vmatmul.f32.gmra.mxu1 %v12542_v26  ;;  %8368 = vmatmul.f32.gmra.mxu0 %v12672_v24 }
 0x72c   : > { %v7729_v32 = vadd.f32 %v7685_v14, %v7589_v4  ;;  %8142 = vmatmul.f32.gmra.mxu2 %v12648_v20 }
 0x72d   : > { %8252 = vmatmul.f32.gmra.mxu3 %v8881_v6 }
 0x72e   : > { %v7842_v10 = vadd.f32 %v7798_v16, %v7729_v32 }
 0x72f   : > { %v7691_v61 = vpop.f32.mrf.mxu2 }
 0x730   : > { %v7801_v41 = vpop.f32.mrf.mxu3  ;;  %v7920_v47 = vpop.f32.mrf.mxu0  ;;  %v12792_v1 = vadd.f32 %v7911_v52, %v7842_v10 }
 0x731   : > { %v7591_v22 = vpop.f32.mrf.mxu1 }
 0x732   : > { %v7592_v55 = vadd.f32 %v7591_v22, %v12577_v53 }
 0x733   : > { %8026 = vmatmul.f32.gmra.mxu1 %v12616_v57  ;;  %8371 = vmatmul.f32.gmra.mxu0 %v12686_v2  ;;  %v8883_v57 = vld [vmem:[#allocation4 + $0x159] sm:$0xff] }
 0x734   : > { %v7730_v26 = vadd.f32 %v7688_v58, %v7592_v55  ;;  %8145 = vmatmul.f32.gmra.mxu2 %v12662_v21 }
 0x735   : > { %8255 = vmatmul.f32.gmra.mxu3 %v8882_v8 }
 0x736   : > { %v7843_v20 = vadd.f32 %v7801_v41, %v7730_v26 }
 0x737   : > { %v7694_v44 = vpop.f32.mrf.mxu2 }
 0x738   : > { %v7804_v27 = vpop.f32.mrf.mxu3  ;;  %v7923_v18 = vpop.f32.mrf.mxu0  ;;  %v12798_v12 = vadd.f32 %v7914_v63, %v7843_v20 }
 0x739   : > { %v7594_v52 = vpop.f32.mrf.mxu1 }
 0x73a   : > { %v7595_v14 = vadd.f32 %v7594_v52, %v12587_v48 }
 0x73b   : > { %8029 = vmatmul.f32.gmra.mxu1 %v12630_v51  ;;  %8374 = vmatmul.f32.gmra.mxu0 %v12700_v30  ;;  %v8884_v51 = vld [vmem:[#allocation4 + $0x161] sm:$0xff] }
 0x73c   : > { %v7731_v53 = vadd.f32 %v7691_v61, %v7595_v14  ;;  %8148 = vmatmul.f32.gmra.mxu2 %v12676_v50 }
 0x73d   : > { %8258 = vmatmul.f32.gmra.mxu3 %v8883_v57 }
 0x73e   : > { %v7844_v21 = vadd.f32 %v7804_v27, %v7731_v53  ;;  %v12825_v27 = vld [vmem:[#allocation4 + $0x182] sm:$0xff] }
 0x73f   : > { %v7697_v11 = vpop.f32.mrf.mxu2 }
 0x740   : > { %v7807_v43 = vpop.f32.mrf.mxu3  ;;  %v7926_v15 = vpop.f32.mrf.mxu0  ;;  %v12804_v38 = vadd.f32 %v7917_v19, %v7844_v21  ;;  %v12833_v21 = vld [vmem:[#allocation4 + $0x18a] sm:$0xff] }
 0x741   : > { %v7597_v63 = vpop.f32.mrf.mxu1 }
 0x742   : > { %v7598_v46 = vadd.f32 %v7597_v63, %v12599_v34 }
 0x743   : > { %8032 = vmatmul.f32.gmra.mxu1 %v12644_v60  ;;  %8377 = vmatmul.f32.gmra.mxu0 %v12716_v25  ;;  %v8885_v60 = vld [vmem:[#allocation4 + $0x169] sm:$0xff] }
 0x744   : > { %v7732_v48 = vadd.f32 %v7694_v44, %v7598_v46  ;;  %8151 = vmatmul.f32.gmra.mxu2 %v12690_v7 }
 0x745   : > { %8261 = vmatmul.f32.gmra.mxu3 %v8884_v51 }
 0x746   : > { %v7845_v50 = vadd.f32 %v7807_v43, %v7732_v48  ;;  %v12842_v48 = vld [vmem:[#allocation4 + $0x192] sm:$0xff] }
 0x747   : > { %v7700_v49 = vpop.f32.mrf.mxu2 }
 0x748   : > { %v7810_v58 = vpop.f32.mrf.mxu3  ;;  %v7929_v16 = vpop.f32.mrf.mxu0  ;;  %v12810_v9 = vadd.f32 %v7920_v47, %v7845_v50 }
 0x749   : > { %v7600_v19 = vpop.f32.mrf.mxu1 }
 0x74a   : > { %v7601_v4 = vadd.f32 %v7600_v19, %v12611_v42  ;;  %v8888_v19 = vld [vmem:[#allocation4] sm:$0xff] }
 0x74b   : > { %8035 = vmatmul.f32.gmra.mxu1 %v12658_v29  ;;  %8380 = vmatmul.f32.gmra.mxu0 %v12732_v33  ;;  %v8886_v29 = vld [vmem:[#allocation4 + $0x171] sm:$0xff] }
 0x74c   : > { %v7733_v34 = vadd.f32 %v7697_v11, %v7601_v4  ;;  %8154 = vmatmul.f32.gmra.mxu2 %v12704_v0 }
 0x74d   : > { %8264 = vmatmul.f32.gmra.mxu3 %v8885_v60  ;;  %v5202_v60 = vld [vmem:[#allocation4 + $0x1a2] sm:$0xff] }
 0x74e   : > { %v7846_v7 = vadd.f32 %v7810_v58, %v7733_v34 }
 0x74f   : > { %v7703_v32 = vpop.f32.mrf.mxu2 }
 0x750   : > { %v7813_v6 = vpop.f32.mrf.mxu3  ;;  %v7932_v10 = vpop.f32.mrf.mxu0  ;;  %v12816_v61 = vadd.f32 %v7923_v18, %v7846_v7 }
 0x751   : > { %v7603_v41 = vpop.f32.mrf.mxu1 }
 0x752   : > { %v7604_v47 = vadd.f32 %v7603_v41, %v12625_v3 }
 0x753   : > { %8038 = vmatmul.f32.gmra.mxu1 %v12672_v24  ;;  %8383 = vmatmul.f32.gmra.mxu0 %v12748_v54  ;;  %v8887_v24 = vld [vmem:[#allocation4 + $0x179] sm:$0xff] }
 0x754   : > { %v7734_v42 = vadd.f32 %v7700_v49, %v7604_v47  ;;  %8157 = vmatmul.f32.gmra.mxu2 %v12720_v35  ;;  %v5201_v49 = vld [vmem:[#allocation4 + $0x19a] sm:$0xff] }
 0x755   : > { %8267 = vmatmul.f32.gmra.mxu3 %v8886_v29 }
 0x756   : > { %v7847_v0 = vadd.f32 %v7813_v6, %v7734_v42  ;;  %v5203_v42 = vld [vmem:[#allocation4 + $0x1aa] sm:$0xff] }
 0x757   : > { %v7706_v22 = vpop.f32.mrf.mxu2 }
 0x758   : > { %v7816_v55 = vpop.f32.mrf.mxu3  ;;  %v7935_v26 = vpop.f32.mrf.mxu0  ;;  %v12822_v8 = vadd.f32 %v7926_v15, %v7847_v0 }
 0x759   : > { %v7606_v20 = vpop.f32.mrf.mxu1 }
 0x75a   : > { %v7607_v44 = vadd.f32 %v7606_v20, %v12639_v45 }
 0x75b   : > { %8041 = vmatmul.f32.gmra.mxu1 %v12686_v2  ;;  %8386 = vmatmul.f32.gmra.mxu0 %v12825_v27 }
 0x75c   : > { %v7735_v3 = vadd.f32 %v7703_v32, %v7607_v44  ;;  %8160 = vmatmul.f32.gmra.mxu2 %v12736_v28 }
 0x75d   : > { %8270 = vmatmul.f32.gmra.mxu3 %v8887_v24 }
 0x75e   : > { %v7848_v35 = vadd.f32 %v7816_v55, %v7735_v3  ;;  %v5094_v55 = vld [vmem:[#allocation4 + $0x1a1] sm:$0xff] }
 0x75f   : > { %v7709_v18 = vpop.f32.mrf.mxu2 }
 0x760   : > { %v7819_v52 = vpop.f32.mrf.mxu3  ;;  %v7938_v14 = vpop.f32.mrf.mxu0  ;;  %v12830_v53 = vadd.f32 %v7929_v16, %v7848_v35  ;;  %v13119_v35 = vld [vmem:[#allocation33_spill] sm:$0xff] }
 0x761   : > { %v7609_v57 = vpop.f32.mrf.mxu1 }
 0x762   : > { %v7610_v45 = vadd.f32 %v7609_v57, %v12653_v40 }
 0x763   : > { %8044 = vmatmul.f32.gmra.mxu1 %v12700_v30  ;;  %8389 = vmatmul.f32.gmra.mxu0 %v12833_v21 }
 0x764   : > { %v7736_v2 = vadd.f32 %v7706_v22, %v7610_v45  ;;  %8163 = vmatmul.f32.gmra.mxu2 %v12752_v59 }
 0x765   : > { %8273 = vmatmul.f32.gmra.mxu3 %v12713_v36 }
 0x766   : > { %v7849_v28 = vadd.f32 %v7819_v52, %v7736_v2  ;;  %v5095_v52 = vld [vmem:[#allocation4 + $0x1a9] sm:$0xff] }
 0x767   : > { %v7712_v11 = vpop.f32.mrf.mxu2 }
 0x768   : > { %v7822_v43 = vpop.f32.mrf.mxu3  ;;  %v7941_v15 = vpop.f32.mrf.mxu0  ;;  %v12839_v63 = vadd.f32 %v7932_v10, %v7849_v28  ;;  %v5093_v10 = vld [vmem:[#allocation4 + $0x199] sm:$0xff] }
 0x769   : > { %v7612_v46 = vpop.f32.mrf.mxu1 }
 0x76a   : > { %v7613_v40 = vadd.f32 %v7612_v46, %v12667_v62 }
 0x76b   : > { %8047 = vmatmul.f32.gmra.mxu1 %v12716_v25  ;;  %8392 = vmatmul.f32.gmra.mxu0 %v12842_v48 }
 0x76c   : > { %v7737_v30 = vadd.f32 %v7709_v18, %v7613_v40  ;;  %8166 = vmatmul.f32.gmra.mxu2 %v12761_v39 }
 0x76d   : > { %8276 = vmatmul.f32.gmra.mxu3 %v12729_v17 }
 0x76e   : > { %v7850_v36 = vadd.f32 %v7822_v43, %v7737_v30 }
 0x76f   : > { %v7715_v59 = vpop.f32.mrf.mxu2 }
 0x770   : > { %v7825_v51 = vpop.f32.mrf.mxu3  ;;  %v7944_v50 = vpop.f32.mrf.mxu0  ;;  %v12848_v58 = vadd.f32 %v7935_v26, %v7850_v36 }
 0x771   : > { %v7615_v16 = vpop.f32.mrf.mxu1 }
 0x772   : > { %v7616_v62 = vadd.f32 %v7615_v16, %v12681_v23  ;;  %v12875_v16 = vld [vmem:[%s12990_s6] ss:$0 sm:$0xff] }
 0x773   : > { %8050 = vmatmul.f32.gmra.mxu1 %v12732_v33  ;;  %8395 = vmatmul.f32.gmra.mxu0 %v5201_v49 }
 0x774   : > { %v7738_v25 = vadd.f32 %v7712_v11, %v7616_v62  ;;  %8169 = vmatmul.f32.gmra.mxu2 %v8888_v19  ;;  %v13120_v11 = vld [vmem:[#allocation36_spill] sm:$0xff] }
 0x775   : > { %8279 = vmatmul.f32.gmra.mxu3 %v12745_v37 }
 0x776   : > { %v7851_v39 = vadd.f32 %v7825_v51, %v7738_v25 }
 0x777   : > { %v7718_v17 = vpop.f32.mrf.mxu2 }
 0x778   : > { %v7828_v4 = vpop.f32.mrf.mxu3  ;;  %v7947_v34 = vpop.f32.mrf.mxu0  ;;  %v12853_v7 = vadd.f32 %v7938_v14, %v7851_v39 }
 0x779   : > { %v7618_v32 = vpop.f32.mrf.mxu1 }
 0x77a   : > { %v7619_v6 = vadd.f32 %v7618_v32, %v12695_v5 }
 0x77b   : > { %8053 = vmatmul.f32.gmra.mxu1 %v12748_v54  ;;  %8398 = vmatmul.f32.gmra.mxu0 %v5202_v60 }
 0x77c   : > { %v7739_v23 = vadd.f32 %v7715_v59, %v7619_v6  ;;  %8172 = vmatmul.f32.gmra.mxu2 %v8888_v19 }
 0x77d   : > { %8282 = vmatmul.f32.gmra.mxu3 %v5093_v10 }
 0x77e   : > { %v7852_v33 = vadd.f32 %v7828_v4, %v7739_v23 }
 0x77f   : > { %v7721_v41 = vpop.f32.mrf.mxu2 }
 0x780   : > { %v7831_v37 = vpop.f32.mrf.mxu3  ;;  %v7950_v47 = vpop.f32.mrf.mxu0  ;;  %v12857_v29 = vadd.f32 %v7941_v15, %v7852_v33 }
 0x781   : > { %v7621_v0 = vpop.f32.mrf.mxu1 }
 0x782   : > { %v7622_v22 = vadd.f32 %v7621_v0, %v12709_v13 }
 0x783   : > { %8056 = vmatmul.f32.gmra.mxu1 %v12825_v27  ;;  %8401 = vmatmul.f32.gmra.mxu0 %v5203_v42 }
 0x784   : > { %v7740_v5 = vadd.f32 %v7718_v17, %v7622_v22  ;;  %8175 = vmatmul.f32.gmra.mxu2 %v8888_v19 }
 0x785   : > { %8285 = vmatmul.f32.gmra.mxu3 %v5094_v55  ;;  %v8422_v55 = vld [vmem:[#allocation2 + $0x13a] sm:$0xff] }
 0x786   : > { %v7853_v54 = vadd.f32 %v7831_v37, %v7740_v5 }
 0x787   : > { %v7724_v26 = vpop.f32.mrf.mxu2 }
 0x788   : > { %v7834_v20 = vpop.f32.mrf.mxu3  ;;  %v8357_v44 = vpop.f32.mrf.mxu0  ;;  %v12861_v3 = vadd.f32 %v7944_v50, %v7853_v54 }
 0x789   : > { %v7624_v24 = vpop.f32.mrf.mxu1 }
 0x78a   : > { %v7625_v18 = vadd.f32 %v7624_v24, %v13119_v35 }
 0x78b   : > { %8059 = vmatmul.f32.gmra.mxu1 %v12833_v21 }
 0x78c   : > { %v7741_v13 = vadd.f32 %v7721_v41, %v7625_v18 }
 0x78d   : > { %8288 = vmatmul.f32.gmra.mxu3 %v5095_v52 }
 0x78e   : > { %v7854_v14 = vadd.f32 %v7834_v20, %v7741_v13 }
 0x78f   : > { %v8131_v27 = vpop.f32.mrf.mxu2 }
 0x790   : > { %v7837_v57 = vpop.f32.mrf.mxu3  ;;  %v8360_v45 = vpop.f32.mrf.mxu0  ;;  %v12865_v2 = vadd.f32 %v7947_v34, %v7854_v14  ;;  %v8421_v34 = vld [vmem:[#allocation2 + $0x132] sm:$0xff]  ;;  %v8423_v14 = vld [vmem:[#allocation2 + $0x142] sm:$0xff] }
 0x791   : > { %v7627_v28 = vpop.f32.mrf.mxu1 }
 0x792   : > { %v7628_v43 = vadd.f32 %v7627_v28, %v13120_v11 }
 0x793   : > { %8062 = vmatmul.f32.gmra.mxu1 %v12842_v48  ;;  %v12880_v48 = vld [vmem:[%s12991_s7] ss:$0 sm:$0xff] }
 0x794   : > { %v7742_v15 = vadd.f32 %v7724_v26, %v7628_v43 }
 0x796   : > { %v7855_v46 = vadd.f32 %v7837_v57, %v7742_v15 }
 0x797   : > { %v8134_v40 = vpop.f32.mrf.mxu2 }
 0x798   : > { %v8244_v30 = vpop.f32.mrf.mxu3  ;;  %v8363_v36 = vpop.f32.mrf.mxu0  ;;  %v12869_v59 = vadd.f32 %v7950_v47, %v7855_v46 }
 0x799   : > { %v8018_v21 = vpop.f32.mrf.mxu1 }
 0x79a   : > { %v8066_v51 = vadd.f32 %v8018_v21, %v12780_v31  ;;  %v8424_v21 = vld [vmem:[#allocation2 + $0x14a] sm:$0xff] }
 0x79c   : > { %v8179_v50 = vadd.f32 %v8131_v27, %v8066_v51 }
 0x79e   : > { %v8292_v49 = vadd.f32 %v8244_v30, %v8179_v50 }
 0x79f   : > { %v8137_v62 = vpop.f32.mrf.mxu2 }
 0x7a0   : > { %v8405_v25 = vadd.f32 %v8357_v44, %v8292_v49  ;;  %v8247_v19 = vpop.f32.mrf.mxu3  ;;  %v8366_v39 = vpop.f32.mrf.mxu0 }
 0x7a1   : > { %v8021_v17 = vpop.f32.mrf.mxu1 }
 0x7a2   : > { %v8441_v31 = vmul.f32 %v12875_v16, %v8405_v25  ;;  %v8067_v4 = vadd.f32 %v8021_v17, %v12786_v56 }
 0x7a4   : > { %v8461_v60 = vadd.f32 %v12880_v48, %v8441_v31  ;;  %v8180_v32 = vadd.f32 %v8134_v40, %v8067_v4 }
 0x7a6   : > { %v8477_v6 = vadd.f32 %v8461_v60, %v8421_v34  ;;  %v8293_v10 = vadd.f32 %v8247_v19, %v8180_v32  ;;  %v8425_v60 = vld [vmem:[#allocation2 + $0x152] sm:$0xff] }
 0x7a7   : > { %v8140_v23 = vpop.f32.mrf.mxu2 }
 0x7a8   : > { %v8493_v33 = vmax.f32 %v8477_v6, 0.0  ;;  %v8406_v41 = vadd.f32 %v8360_v45, %v8293_v10  ;;  %v8250_v37 = vpop.f32.mrf.mxu3  ;;  %v8369_v42 = vpop.f32.mrf.mxu0 }
 0x7a9   : > { %v8024_v47 = vpop.f32.mrf.mxu1 }
 0x7aa   : > { %8509 = vst [vmem:[%s9213_s22 + $0x100] sm:$0xff] %v8493_v33  ;;  %v8442_v0 = vmul.f32 %v12875_v16, %v8406_v41  ;;  %v8068_v22 = vadd.f32 %v8024_v47, %v12792_v1 }
 0x7ac   : > { %v8462_v56 = vadd.f32 %v12880_v48, %v8442_v0  ;;  %v8181_v5 = vadd.f32 %v8137_v62, %v8068_v22 }
 0x7ae   : > { %v8478_v54 = vadd.f32 %v8462_v56, %v8422_v55  ;;  %v8294_v26 = vadd.f32 %v8250_v37, %v8181_v5  ;;  %v8426_v55 = vld [vmem:[#allocation2 + $0x15a] sm:$0xff] }
 0x7af   : > { %v8143_v20 = vpop.f32.mrf.mxu2 }
 0x7b0   : > { %v8494_v44 = vmax.f32 %v8478_v54, 0.0  ;;  %v8407_v24 = vadd.f32 %v8363_v36, %v8294_v26  ;;  %v8253_v35 = vpop.f32.mrf.mxu3  ;;  %v8372_v27 = vpop.f32.mrf.mxu0 }
 0x7b1   : > { %v8027_v18 = vpop.f32.mrf.mxu1 }
 0x7b2   : > { %8510 = vst [vmem:[%s9213_s22 + $0x108] sm:$0xff] %v8494_v44  ;;  %v8443_v52 = vmul.f32 %v12875_v16, %v8407_v24  ;;  %v8069_v13 = vadd.f32 %v8027_v18, %v12798_v12 }
 0x7b4   : > { %v8463_v1 = vadd.f32 %v12880_v48, %v8443_v52  ;;  %v8182_v57 = vadd.f32 %v8140_v23, %v8069_v13 }
 0x7b6   : > { %v8479_v45 = vadd.f32 %v8463_v1, %v8423_v14  ;;  %v8295_v28 = vadd.f32 %v8253_v35, %v8182_v57  ;;  %v8427_v14 = vld [vmem:[#allocation2 + $0x162] sm:$0xff] }
 0x7b7   : > { %v8146_v11 = vpop.f32.mrf.mxu2 }
 0x7b8   : > { %v8495_v43 = vmax.f32 %v8479_v45, 0.0  ;;  %v8408_v15 = vadd.f32 %v8366_v39, %v8295_v28  ;;  %v8256_v46 = vpop.f32.mrf.mxu3  ;;  %v8375_v50 = vpop.f32.mrf.mxu0 }
 0x7b9   : > { %v8030_v40 = vpop.f32.mrf.mxu1 }
 0x7ba   : > { %8511 = vst [vmem:[%s9213_s22 + $0x110] sm:$0xff] %v8495_v43  ;;  %v8444_v30 = vmul.f32 %v12875_v16, %v8408_v15  ;;  %v8070_v36 = vadd.f32 %v8030_v40, %v12804_v38 }
 0x7bc   : > { %v8464_v12 = vadd.f32 %v12880_v48, %v8444_v30  ;;  %v8183_v51 = vadd.f32 %v8143_v20, %v8070_v36  ;;  %v8428_v30 = vld [vmem:[#allocation2 + $0x16a] sm:$0xff] }
 0x7be   : > { %v8480_v49 = vadd.f32 %v8464_v12, %v8424_v21  ;;  %v8296_v62 = vadd.f32 %v8256_v46, %v8183_v51 }
 0x7bf   : > { %v8149_v25 = vpop.f32.mrf.mxu2 }
 0x7c0   : > { %v8496_v19 = vmax.f32 %v8480_v49, 0.0  ;;  %v8409_v17 = vadd.f32 %v8369_v42, %v8296_v62  ;;  %v8259_v31 = vpop.f32.mrf.mxu3  ;;  %v8378_v23 = vpop.f32.mrf.mxu0 }
 0x7c1   : > { %v8033_v39 = vpop.f32.mrf.mxu1 }
 0x7c2   : > { %8512 = vst [vmem:[%s9213_s22 + $0x118] sm:$0xff] %v8496_v19  ;;  %v8445_v4 = vmul.f32 %v12875_v16, %v8409_v17  ;;  %v8071_v34 = vadd.f32 %v8033_v39, %v12810_v9  ;;  %v8429_v39 = vld [vmem:[#allocation2 + $0x172] sm:$0xff] }
 0x7c4   : > { %v8465_v38 = vadd.f32 %v12880_v48, %v8445_v4  ;;  %v8184_v32 = vadd.f32 %v8146_v11, %v8071_v34 }
 0x7c6   : > { %v8481_v6 = vadd.f32 %v8465_v38, %v8425_v60  ;;  %v8297_v10 = vadd.f32 %v8259_v31, %v8184_v32 }
 0x7c7   : > { %v8152_v33 = vpop.f32.mrf.mxu2 }
 0x7c8   : > { %v8497_v41 = vmax.f32 %v8481_v6, 0.0  ;;  %v8410_v37 = vadd.f32 %v8372_v27, %v8297_v10  ;;  %v8262_v47 = vpop.f32.mrf.mxu3  ;;  %v8381_v35 = vpop.f32.mrf.mxu0 }
 0x7c9   : > { %v8036_v42 = vpop.f32.mrf.mxu1 }
 0x7ca   : > { %8513 = vst [vmem:[%s9213_s22 + $0x120] sm:$0xff] %v8497_v41  ;;  %v8446_v0 = vmul.f32 %v12875_v16, %v8410_v37  ;;  %v8072_v22 = vadd.f32 %v8036_v42, %v12816_v61  ;;  %v8430_v37 = vld [vmem:[#allocation2 + $0x17a] sm:$0xff] }
 0x7cc   : > { %v8466_v9 = vadd.f32 %v12880_v48, %v8446_v0  ;;  %v8185_v56 = vadd.f32 %v8149_v25, %v8072_v22 }
 0x7ce   : > { %v8482_v5 = vadd.f32 %v8466_v9, %v8426_v55  ;;  %v8298_v54 = vadd.f32 %v8262_v47, %v8185_v56 }
 0x7cf   : > { %v8155_v26 = vpop.f32.mrf.mxu2 }
 0x7d0   : > { %v8498_v20 = vmax.f32 %v8482_v5, 0.0  ;;  %v8411_v44 = vadd.f32 %v8375_v50, %v8298_v54  ;;  %v8265_v24 = vpop.f32.mrf.mxu3  ;;  %v8384_v36 = vpop.f32.mrf.mxu0 }
 0x7d1   : > { %v8039_v18 = vpop.f32.mrf.mxu1 }
 0x7d2   : > { %8514 = vst [vmem:[%s9213_s22 + $0x128] sm:$0xff] %v8498_v20  ;;  %v8447_v52 = vmul.f32 %v12875_v16, %v8411_v44  ;;  %v8073_v13 = vadd.f32 %v8039_v18, %v12822_v8  ;;  %v8431_v44 = vld [vmem:[#allocation2 + $0x182] sm:$0xff] }
 0x7d4   : > { %v8467_v61 = vadd.f32 %v12880_v48, %v8447_v52  ;;  %v8186_v27 = vadd.f32 %v8152_v33, %v8073_v13 }
 0x7d6   : > { %v8483_v1 = vadd.f32 %v8467_v61, %v8427_v14  ;;  %v8299_v57 = vadd.f32 %v8265_v24, %v8186_v27 }
 0x7d7   : > { %v8158_v45 = vpop.f32.mrf.mxu2 }
 0x7d8   : > { %v8499_v28 = vmax.f32 %v8483_v1, 0.0  ;;  %v8412_v11 = vadd.f32 %v8378_v23, %v8299_v57  ;;  %v8268_v43 = vpop.f32.mrf.mxu3  ;;  %v8387_v34 = vpop.f32.mrf.mxu0 }
 0x7d9   : > { %v8042_v15 = vpop.f32.mrf.mxu1 }
 0x7da   : > { %8515 = vst [vmem:[%s9213_s22 + $0x130] sm:$0xff] %v8499_v28  ;;  %v8448_v46 = vmul.f32 %v12875_v16, %v8412_v11  ;;  %v8074_v40 = vadd.f32 %v8042_v15, %v12830_v53  ;;  %v8432_v28 = vld [vmem:[#allocation2 + $0x18a] sm:$0xff] }
 0x7dc   : > { %v8468_v8 = vadd.f32 %v12880_v48, %v8448_v46  ;;  %v8187_v21 = vadd.f32 %v8155_v26, %v8074_v40 }
 0x7de   : > { %v8484_v12 = vadd.f32 %v8468_v8, %v8428_v30  ;;  %v8300_v51 = vadd.f32 %v8268_v43, %v8187_v21 }
 0x7df   : > { %v8161_v25 = vpop.f32.mrf.mxu2 }
 0x7e0   : > { %v8500_v50 = vmax.f32 %v8484_v12, 0.0  ;;  %v8413_v49 = vadd.f32 %v8381_v35, %v8300_v51  ;;  %v8271_v62 = vpop.f32.mrf.mxu3  ;;  %v8390_v55 = vpop.f32.mrf.mxu0 }
 0x7e1   : > { %v8045_v19 = vpop.f32.mrf.mxu1 }
 0x7e2   : > { %8516 = vst [vmem:[%s9213_s22 + $0x138] sm:$0xff] %v8500_v50  ;;  %v8449_v17 = vmul.f32 %v12875_v16, %v8413_v49  ;;  %v8075_v31 = vadd.f32 %v8045_v19, %v12839_v63  ;;  %v8433_v50 = vld [vmem:[#allocation2 + $0x192] sm:$0xff] }
 0x7e4   : > { %v8469_v53 = vadd.f32 %v12880_v48, %v8449_v17  ;;  %v8188_v4 = vadd.f32 %v8158_v45, %v8075_v31 }
 0x7e6   : > { %v8485_v60 = vadd.f32 %v8469_v53, %v8429_v39  ;;  %v8301_v38 = vadd.f32 %v8271_v62, %v8188_v4 }
 0x7e7   : > { %v8164_v47 = vpop.f32.mrf.mxu2 }
 0x7e8   : > { %v8501_v32 = vmax.f32 %v8485_v60, 0.0  ;;  %v8414_v6 = vadd.f32 %v8384_v36, %v8301_v38  ;;  %v8274_v10 = vpop.f32.mrf.mxu3  ;;  %v8393_v27 = vpop.f32.mrf.mxu0  ;;  %v8434_v60 = vld [vmem:[#allocation2 + $0x19a] sm:$0xff] }
 0x7e9   : > { %v8048_v23 = vpop.f32.mrf.mxu1 }
 0x7ea   : > { %8517 = vst [vmem:[%s9213_s22 + $0x140] sm:$0xff] %v8501_v32  ;;  %v8450_v33 = vmul.f32 %v12875_v16, %v8414_v6  ;;  %v8076_v41 = vadd.f32 %v8048_v23, %v12848_v58 }
 0x7ec   : > { %v8470_v63 = vadd.f32 %v12880_v48, %v8450_v33  ;;  %v8189_v42 = vadd.f32 %v8161_v25, %v8076_v41 }
 0x7ee   : > { %v8486_v0 = vadd.f32 %v8470_v63, %v8430_v37  ;;  %v8302_v22 = vadd.f32 %v8274_v10, %v8189_v42 }
 0x7ef   : > { %v8167_v35 = vpop.f32.mrf.mxu2 }
 0x7f0   : > { %v8502_v9 = vmax.f32 %v8486_v0, 0.0  ;;  %v8415_v56 = vadd.f32 %v8387_v34, %v8302_v22  ;;  %v8277_v5 = vpop.f32.mrf.mxu3  ;;  %v8396_v21 = vpop.f32.mrf.mxu0 }
 0x7f1   : > { %v8051_v54 = vpop.f32.mrf.mxu1 }
 0x7f2   : > { %8518 = vst [vmem:[%s9213_s22 + $0x148] sm:$0xff] %v8502_v9  ;;  %v8451_v26 = vmul.f32 %v12875_v16, %v8415_v56  ;;  %v8077_v20 = vadd.f32 %v8051_v54, %v12853_v7 }
 0x7f4   : > { %v8471_v58 = vadd.f32 %v12880_v48, %v8451_v26  ;;  %v8190_v24 = vadd.f32 %v8164_v47, %v8077_v20 }
 0x7f6   : > { %v8487_v18 = vadd.f32 %v8471_v58, %v8431_v44  ;;  %v8303_v52 = vadd.f32 %v8277_v5, %v8190_v24 }
 0x7f7   : > { %v8170_v43 = vpop.f32.mrf.mxu2 }
 0x7f8   : > { %v8503_v13 = vmax.f32 %v8487_v18, 0.0  ;;  %v8416_v14 = vadd.f32 %v8390_v55, %v8303_v52  ;;  %v8280_v61 = vpop.f32.mrf.mxu3  ;;  %v8399_v38 = vpop.f32.mrf.mxu0 }
 0x7f9   : > { %v8054_v1 = vpop.f32.mrf.mxu1 }
 0x7fa   : > { %8519 = vst [vmem:[%s9213_s22 + $0x150] sm:$0xff] %v8503_v13  ;;  %v8452_v57 = vmul.f32 %v12875_v16, %v8416_v14  ;;  %v8078_v45 = vadd.f32 %v8054_v1, %v12857_v29 }
 0x7fc   : > { %v8472_v7 = vadd.f32 %v12880_v48, %v8452_v57  ;;  %v8191_v11 = vadd.f32 %v8167_v35, %v8078_v45 }
 0x7fe   : > { %v8488_v15 = vadd.f32 %v8472_v7, %v8432_v28  ;;  %v8304_v46 = vadd.f32 %v8280_v61, %v8191_v11 }
 0x7ff   : > { %v8173_v19 = vpop.f32.mrf.mxu2 }
 0x800   : > { %v8504_v40 = vmax.f32 %v8488_v15, 0.0  ;;  %v8417_v30 = vadd.f32 %v8393_v27, %v8304_v46  ;;  %v8283_v36 = vpop.f32.mrf.mxu3  ;;  %v8402_v55 = vpop.f32.mrf.mxu0 }
 0x801   : > { %v8057_v8 = vpop.f32.mrf.mxu1 }
 0x802   : > { %8520 = vst [vmem:[%s9213_s22 + $0x158] sm:$0xff] %v8504_v40  ;;  %v8453_v12 = vmul.f32 %v12875_v16, %v8417_v30  ;;  %v8079_v51 = vadd.f32 %v8057_v8, %v12861_v3 }
 0x804   : > { %v8473_v29 = vadd.f32 %v12880_v48, %v8453_v12  ;;  %v8192_v49 = vadd.f32 %v8170_v43, %v8079_v51 }
 0x806   : > { %v8489_v62 = vadd.f32 %v8473_v29, %v8433_v50  ;;  %v8305_v25 = vadd.f32 %v8283_v36, %v8192_v49 }
 0x807   : > { %v8176_v37 = vpop.f32.mrf.mxu2 }
 0x808   : > { %v8505_v17 = vmax.f32 %v8489_v62, 0.0  ;;  %v8418_v31 = vadd.f32 %v8396_v21, %v8305_v25  ;;  %v8286_v53 = vpop.f32.mrf.mxu3 }
 0x809   : > { %v8060_v39 = vpop.f32.mrf.mxu1 }
 0x80a   : > { %8521 = vst [vmem:[%s9213_s22 + $0x160] sm:$0xff] %v8505_v17  ;;  %v8454_v4 = vmul.f32 %v12875_v16, %v8418_v31  ;;  %v8080_v34 = vadd.f32 %v8060_v39, %v12865_v2  ;;  %v8435_v2 = vld [vmem:[#allocation2 + $0x1a2] sm:$0xff] }
 0x80c   : > { %v8474_v3 = vadd.f32 %v12880_v48, %v8454_v4  ;;  %v8193_v32 = vadd.f32 %v8173_v19, %v8080_v34 }
 0x80e   : > { %v8490_v6 = vadd.f32 %v8474_v3, %v8434_v60  ;;  %v8306_v10 = vadd.f32 %v8286_v53, %v8193_v32 }
 0x810   : > { %v8506_v23 = vmax.f32 %v8490_v6, 0.0  ;;  %v8419_v33 = vadd.f32 %v8399_v38, %v8306_v10  ;;  %v8289_v42 = vpop.f32.mrf.mxu3 }
 0x811   : > { %v8063_v41 = vpop.f32.mrf.mxu1 }
 0x812   : > { %8522 = vst [vmem:[%s9213_s22 + $0x168] sm:$0xff] %v8506_v23  ;;  %v8455_v47 = vmul.f32 %v12875_v16, %v8419_v33  ;;  %v8081_v63 = vadd.f32 %v8063_v41, %v12869_v59  ;;  %v8436_v59 = vld [vmem:[#allocation2 + $0x1aa] sm:$0xff] }
 0x814   : > { %v8475_v0 = vadd.f32 %v12880_v48, %v8455_v47  ;;  %v8194_v22 = vadd.f32 %v8176_v37, %v8081_v63 }
 0x816   : > { %v8491_v9 = vadd.f32 %v8475_v0, %v8435_v2  ;;  %v8307_v56 = vadd.f32 %v8289_v42, %v8194_v22 }
 0x818   : > { %v8507_v5 = vmax.f32 %v8491_v9, 0.0  ;;  %v8420_v54 = vadd.f32 %v8402_v55, %v8307_v56 }
 0x81a   : > { %8523 = vst [vmem:[%s9213_s22 + $0x170] sm:$0xff] %v8507_v5  ;;  %v8456_v26 = vmul.f32 %v12875_v16, %v8420_v54 }
 0x81c   : > { %v8476_v20 = vadd.f32 %v12880_v48, %v8456_v26 }
 0x81e   : > { %v8492_v44 = vadd.f32 %v8476_v20, %v8436_v59 }
 0x820   : > { %v8508_v58 = vmax.f32 %v8492_v44, 0.0 }
 0x822   : > { %8524 = vst [vmem:[%s9213_s22 + $0x178] sm:$0xff] %v8508_v58 }
 0x823   : > { %9000 = shalt.err (!%p8997_p13)
}
 0x824   : > { %s9070_s13 = smov 128   ;;  %s9071_s22 = smov 8  }
 0x825   : > { %8693 = dma.vmem_to_hbm [thread:$0]  (%p9157_p4), %s8541_s9, 6144, %s8543_s19, %s8526_s30, %s9070_s13, %s9070_s13, %s9071_s22  }
 0x826 PF: > { %p8710_p0 = scmp.ge.s32.totalorder %s9061_s10, 2  ;;  %s8557_s20 = sand.u32 1, %s9041_s27  }
 0x827   : > { %s8558_s16 = scalar_lea.sflag [#allocation9], %s8557_s20 }
 0x828   : > { %p8703_p1 = pnand %p8710_p0, %p9164_p8 }
 0x82a   : > { %p8704_p2 = pneg %p8703_p1 }
 0x82c   : > { %9036 = dma.done.wait (%p8704_p2), %s8558_s16, 6144  }
 0x82d   : > { %9038 = vsyncadd (%p8704_p2), %s8558_s16, 4294961152  ;;  %s23_s10 = sadd.s32 1, %s9061_s10   ;;  %s13121_s30 = sld [smem:[#allocation23_spill]] }
 0x82e   : > { %p20_p3 = scmp.ge.s32.totalorder %s23_s10, 4   ;;  %s13122_s9 = sld [smem:[#allocation24_spill]] }
 0x82f   : > { %s13123_s27 = smov %s9045_s28  ;;  %s13124_s28 = smov %s9049_s29 }
 0x830   : > { %s13125_s29 = smov %s9170_s18  ;;  %22 = sbr.rel (!%p20_p3) target bundleno = 9 (0x9), region = 116 }
 0x835   :  { %8564 = vsyncpa [#allocation8], 1 }
 0x836   :  { %8566 = vsyncpa [#allocation8 + $0x1], 1 }
 0x837   :  { %8567 = vsyncpa [#allocation11], 1 }
 0x838   :  { %8568 = vsyncpa [#allocation9], 1 }
 0x839   :  { %8570 = vsyncpa [#allocation9 + $0x1], 1 }
 0x83a   :  { %8571 = vsyncmov [#allocation6] }
 0x83d   :  { %s8572_s15 = vpop.sfrf %8571 }
 0x83e   :  { %p8665_p4 = scmp.ne.s32.totalorder %s8572_s15, 0 }
 0x840   :  { %8576 = shalt.err (%p8665_p4)  }
 0x841   :  { %8578 = vsyncmov [#allocation6 + $0x1] }
 0x844   :  { %s8579_s17 = vpop.sfrf %8578 }
 0x845   :  { %p8666_p8 = scmp.ne.s32.totalorder %s8579_s17, 0 }
 0x847   :  { %8583 = shalt.err (%p8666_p8)  }

</bundles_post_ra>
